<compile_context>
chip_gen: v6e
topology: v6e:2x2x1
jax: 0.10.0
libtpu: 0.0.40
codegen_flags: <defaults>
</compile_context>

<pallas_src>
import numpy as np

import jax
import jax.numpy as jnp
from jax import lax
from jax.experimental import pallas as pl
from jax.experimental.pallas import tpu as pltpu

# ----------------------------------------------------------------------------
# Network geometry (fixed by the PyTorch module; MNIST 1x28x28 input).
# ----------------------------------------------------------------------------
IN_H = IN_W = 28
C1_OUT, K1 = 6, 5
C1_H = C1_W = IN_H - K1 + 1           # 24
P1_H = P1_W = C1_H // 2               # 12
C2_OUT, K2 = 16, 5
C2_H = C2_W = P1_H - K2 + 1           # 8
P2_H = P2_W = C2_H // 2               # 4
FC_DIMS = [(16 * 4 * 4, 120), (120, 240), (240, 480), (480, 240),
           (240, 120), (120, 100), (100, 10)]

SUB = 8                               # sublane granularity for the batch dim
LANE = 128                            # lane granularity for feature dims

X_FEAT = IN_H * IN_W                  # 784  (lane order: h*28 + w)
POOL1_FEAT = C1_OUT * P1_H * P1_W     # 864  (lane order: c*144 + y*12 + x)
POOL1_PAD = 896                       # 864 padded up to a multiple of 128
POOL2_FEAT = C2_OUT * P2_H * P2_W     # 256  (== torch flatten order; 2*128)

# Max batch rows per grid step.  256 saturates the v6e/v7x MXU M dimension;
# v5e (4x 128x128 MXU) saturates at 128 -- 256 still works there, it just
# carries a larger live-activation footprint.
MAX_TILE = 256


def _round_up(v, m):
    return ((v + m - 1) // m) * m


# ----------------------------------------------------------------------------
# Host-side (one-time) weight preprocessing: conv+pool -> structured matmuls.
# ----------------------------------------------------------------------------
def _conv_pool_matrix(w, in_h, in_w, k, out_h, out_w):
    """Dense structured matrix T of shape (4, cin*in_h*in_w, cout*out_h*out_w).

    T[q] maps a flattened (cin, in_h, in_w) input (lane order ci*HW + y*W + x) to
    the VALID-conv outputs at positions (2*yo + dy, 2*xo + dx) -- i.e. quadrant
    q = (dy, dx) of every 2x2 max-pool window -- in flattened (cout, out_h, out_w)
    lane order.  Hence  max_q(x_flat @ T[q])  ==  maxpool2x2(conv2d(x, w)).
    """
    cout, cin, _, _ = w.shape
    t = np.zeros((4, cin * in_h * in_w, cout * out_h * out_w), np.float32)
    yo = np.arange(out_h)
    xo = np.arange(out_w)
    out_sp = (yo[:, None] * out_w + xo[None, :]).reshape(-1)        # (out_h*out_w,)
    for q in range(4):
        dy, dx = q // 2, q % 2
        for ki in range(k):
            for kj in range(k):
                yi = 2 * yo[:, None] + dy + ki                      # (out_h, 1)
                xi = 2 * xo[None, :] + dx + kj                      # (1, out_w)
                in_sp = (yi * in_w + xi).reshape(-1)                # (out_h*out_w,)
                for co in range(cout):
                    cols = co * out_h * out_w + out_sp
                    for ci in range(cin):
                        rows = ci * in_h * in_w + in_sp
                        t[q, rows, cols] = w[co, ci, ki, kj]
    return t


def prepare_params(params):
    """One-time host-side prep: build the fused conv+pool matrices (quadrants
    concatenated along N, conv1 output padded 864->896), replicate conv biases
    per lane, and zero-pad FC weights to (8, 128)-friendly shapes."""
    w1, b1 = params["conv1"]
    w2, b2 = params["conv2"]
    t1 = _conv_pool_matrix(np.asarray(w1), IN_H, IN_W, K1, P1_H, P1_W)   # (4, 784, 864)
    t2 = _conv_pool_matrix(np.asarray(w2), P1_H, P1_W, K2, P2_H, P2_W)   # (4, 864, 256)

    pad1 = POOL1_PAD - POOL1_FEAT                                        # 32
    # Pad conv1 output columns to 896 (lane-aligned), then concatenate the four
    # quadrant matrices along N -> one wide MXU pass per conv stage.
    t1 = np.pad(t1, ((0, 0), (0, 0), (0, pad1)))                         # (4, 784, 896)
    t1_wide = np.concatenate([t1[q] for q in range(4)], axis=1)          # (784, 4*896)
    # conv2 consumes the padded 896-wide pool1 output -> add 32 zero rows.
    t2 = np.pad(t2, ((0, 0), (0, pad1), (0, 0)))                         # (4, 896, 256)
    t2_wide = np.concatenate([t2[q] for q in range(4)], axis=1)          # (896, 4*256)

    b1r = np.zeros((1, POOL1_PAD), np.float32)
    b1r[0, :POOL1_FEAT] = np.repeat(np.asarray(b1), P1_H * P1_W)
    b2r = np.repeat(np.asarray(b2), P2_H * P2_W)[None, :].astype(np.float32)

    prep = {
        "t1": jnp.asarray(t1_wide, jnp.bfloat16),                        # (784, 3584)
        "b1": jnp.asarray(b1r, jnp.float32),                             # (1, 896)
        "t2": jnp.asarray(t2_wide, jnp.bfloat16),                        # (896, 1024)
        "b2": jnp.asarray(b2r, jnp.float32),                             # (1, 256)
    }
    fc = []
    for w, b in params["fc"]:                                            # torch layout (out, in)
        fout, fin = w.shape
        fin_p, fout_p = _round_up(fin, LANE), _round_up(fout, LANE)
        wp = jnp.zeros((fin_p, fout_p), jnp.float32).at[:fin, :fout].set(w.T)
        bp = jnp.zeros((1, fout_p), jnp.float32).at[0, :fout].set(b)
        fc.append((wp.astype(jnp.bfloat16), bp))
    prep["fc"] = fc
    return prep


# ----------------------------------------------------------------------------
# The fused Pallas kernel: whole forward for one batch tile, VMEM-resident.
# ----------------------------------------------------------------------------
def _fused_forward_kernel(x_ref, t1_ref, b1_ref, t2_ref, b2_ref, *refs):
    o_ref = refs[-1]
    fc_refs = refs[:-1]

    x = x_ref[...]                                                  # (tile, 784) bf16

    # conv1 + ReLU + 2x2 maxpool: ONE wide MXU pass over the 4 concatenated
    # quadrant matrices, then VPU max over statically 128-aligned column slices.
    wide = jnp.dot(x, t1_ref[...], preferred_element_type=jnp.float32)   # (tile, 4*896)
    acc = wide[:, 0:POOL1_PAD]
    for q in range(1, 4):
        acc = jnp.maximum(acc, wide[:, q * POOL1_PAD:(q + 1) * POOL1_PAD])
    h = jnp.maximum(acc + b1_ref[...], 0.0)                         # (tile, 896) f32

    # conv2 + ReLU + 2x2 maxpool (output already in torch x.view(-1, 256) order).
    wide = jnp.dot(h.astype(jnp.bfloat16), t2_ref[...],
                   preferred_element_type=jnp.float32)              # (tile, 4*256)
    acc = wide[:, 0:POOL2_FEAT]
    for q in range(1, 4):
        acc = jnp.maximum(acc, wide[:, q * POOL2_FEAT:(q + 1) * POOL2_FEAT])
    h = jnp.maximum(acc + b2_ref[...], 0.0)                         # (tile, 256) f32

    # fc1..fc7 (ReLU on all but the last); feature dims zero-padded to 128s.
    n_fc = len(fc_refs) // 2
    for i in range(n_fc):
        w = fc_refs[2 * i][...]
        b = fc_refs[2 * i + 1][...]
        h = jnp.dot(h.astype(jnp.bfloat16), w, preferred_element_type=jnp.float32) + b
        if i < n_fc - 1:
            h = jnp.maximum(h, 0.0)

    o_ref[...] = h                                                  # (tile, 128) f32


def _pick_tile(n):
    """Batch rows per grid step: as large as possible (MXU M utilization, fewer
    grid steps), but keep >= 2 grid steps for moderate batches so both v7x
    TensorCores get work under dimension_semantics=("parallel",)."""
    if n <= SUB:
        return SUB
    if n <= 2 * MAX_TILE:
        return _round_up((n + 1) // 2, SUB)   # split in two tiles
    return MAX_TILE


def image_classifier_forward(x, prep):
    """x: (N, 1, 28, 28) float32 -> logits (N, 10) float32."""
    n = x.shape[0]
    tile = _pick_tile(n)
    b = _round_up(n, tile)
    xf = x.reshape(n, X_FEAT)
    xf = jnp.pad(xf, ((0, b - n), (0, 0))).astype(jnp.bfloat16)     # (b, 784)

    fc_flat = []
    for w, bias in prep["fc"]:
        fc_flat += [w, bias]
    out_cols = prep["fc"][-1][0].shape[1]                           # 128

    def _resident_spec(a):
        # Whole-array block with a constant index -> resident across all batch
        # tiles; single-buffered (default double-buffering would burn ~8 MiB of
        # VMEM on weights for no benefit).
        return pl.BlockSpec(a.shape, lambda i: (0,) * a.ndim,
                            pipeline_mode=pl.Buffered(1))

    weight_args = [prep["t1"], prep["b1"], prep["t2"], prep["b2"]] + fc_flat
    in_specs = ([pl.BlockSpec((tile, X_FEAT), lambda i: (i, 0))]
                + [_resident_spec(a) for a in weight_args])

    out = pl.pallas_call(
        _fused_forward_kernel,
        out_shape=jax.ShapeDtypeStruct((b, out_cols), jnp.float32),
        grid=(b // tile,),
        in_specs=in_specs,
        out_specs=pl.BlockSpec((tile, out_cols), lambda i: (i, 0)),
        compiler_params=pltpu.CompilerParams(
            # batch tiles are independent -> sharded across v7x TensorCores
            dimension_semantics=("parallel",),
            # budget: ~8 MiB single-buffered weights + 2x input tile + f32
            # activation temps for a 256-row tile ≈ 16 MiB; 40 MiB leaves
            # headroom and stays under v7x's 64 MiB/TC.
            vmem_limit_bytes=40 * 1024 * 1024,
        ),
    )(xf, *weight_args)
    return out[:n, :10]


# ----------------------------------------------------------------------------
# Parameters (deterministic, PyTorch-style uniform(-1/sqrt(fan_in), +...)).
# ----------------------------------------------------------------------------
def _uniform(key, shape, fan_in):
    bound = 1.0 / (fan_in ** 0.5)
    return jax.random.uniform(key, shape, jnp.float32, -bound, bound)


def init_params(key):
    keys = iter(jax.random.split(key, 64))

    def conv(cout, cin, k):
        fan_in = cin * k * k
        return (_uniform(next(keys), (cout, cin, k, k), fan_in),
                _uniform(next(keys), (cout,), fan_in))

    def linear(fin, fout):
        return (_uniform(next(keys), (fout, fin), fin),   # torch nn.Linear layout (out, in)
                _uniform(next(keys), (fout,), fin))

    return {
        "conv1": conv(6, 1, 5),
        "conv2": conv(16, 6, 5),
        "conv3": conv(32, 16, 3),   # defined in __init__ but unused in forward()
        "conv4": conv(64, 32, 3),   # unused in forward()
        "conv5": conv(128, 64, 3),  # unused in forward()
        "fc": [linear(i, o) for i, o in FC_DIMS],
    }


# ----------------------------------------------------------------------------
# Pure-JAX reference (same bf16-operand / f32-accumulate precision policy).
# ----------------------------------------------------------------------------
def reference_forward(x, params):
    def conv_relu(inp, w, b):
        y = lax.conv_general_dilated(
            inp.astype(jnp.bfloat16), w.astype(jnp.bfloat16),
            window_strides=(1, 1), padding="VALID",
            dimension_numbers=("NCHW", "OIHW", "NCHW"),
            preferred_element_type=jnp.float32)
        return jnp.maximum(y + b.reshape(1, -1, 1, 1), 0.0)

    def pool(y):
        return lax.reduce_window(y, -jnp.inf, lax.max,
                                 (1, 1, 2, 2), (1, 1, 2, 2), "VALID")

    y = pool(conv_relu(x, *params["conv1"]))
    y = pool(conv_relu(y, *params["conv2"]))
    h = y.reshape(y.shape[0], -1)                                   # (N, 256), channel-major
    n_fc = len(params["fc"])
    for i, (w, b) in enumerate(params["fc"]):
        h = jnp.dot(h.astype(jnp.bfloat16), w.T.astype(jnp.bfloat16),
                    preferred_element_type=jnp.float32) + b
        if i < n_fc - 1:
            h = jnp.maximum(h, 0.0)
    return h                                                        # (N, 10)


if __name__ == "__main__":
    key = jax.random.PRNGKey(0)
    k_params, k_x, k_x2 = jax.random.split(key, 3)
    params = init_params(k_params)
    prep = prepare_params(params)

    fwd = jax.jit(image_classifier_forward)
    ref = jax.jit(reference_forward)

    # Small MNIST-shaped input: (batch=2, channels=1, 28, 28)  -> single 8-row tile.
    x = jax.random.normal(k_x, (2, 1, 28, 28), dtype=jnp.float32)
    logits = jax.block_until_ready(fwd(x, prep))
    assert logits.shape == (2, 10), logits.shape
    assert bool(jnp.all(jnp.isfinite(logits)))
    err = float(jnp.max(jnp.abs(logits - jax.block_until_ready(ref(x, params)))))
    assert err < 2e-2, f"mismatch vs pure-JAX reference (batch=2): max abs err = {err}"

    # Larger batch exercises the multi-tile / "parallel" grid path (2 grid steps).
    x2 = jax.random.normal(k_x2, (32, 1, 28, 28), dtype=jnp.float32)
    logits2 = jax.block_until_ready(fwd(x2, prep))
    assert logits2.shape == (32, 10), logits2.shape
    err2 = float(jnp.max(jnp.abs(logits2 - jax.block_until_ready(ref(x2, params)))))
    assert err2 < 2e-2, f"mismatch vs pure-JAX reference (batch=32): max abs err = {err2}"

    print("KERNEL_OK")
</pallas_src>

<mosaic_0001>
module attributes {stable_mosaic.version = 11 : i64} {
  func.func @_fused_forward_kernel(%arg0: i32, %arg1: memref<8x784xbf16, #tpu.memory_space<vmem>>, %arg2: memref<784x3584xbf16, #tpu.memory_space<vmem>>, %arg3: memref<1x896xf32, #tpu.memory_space<vmem>>, %arg4: memref<896x1024xbf16, #tpu.memory_space<vmem>>, %arg5: memref<1x256xf32, #tpu.memory_space<vmem>>, %arg6: memref<256x128xbf16, #tpu.memory_space<vmem>>, %arg7: memref<1x128xf32, #tpu.memory_space<vmem>>, %arg8: memref<128x256xbf16, #tpu.memory_space<vmem>>, %arg9: memref<1x256xf32, #tpu.memory_space<vmem>>, %arg10: memref<256x512xbf16, #tpu.memory_space<vmem>>, %arg11: memref<1x512xf32, #tpu.memory_space<vmem>>, %arg12: memref<512x256xbf16, #tpu.memory_space<vmem>>, %arg13: memref<1x256xf32, #tpu.memory_space<vmem>>, %arg14: memref<256x128xbf16, #tpu.memory_space<vmem>>, %arg15: memref<1x128xf32, #tpu.memory_space<vmem>>, %arg16: memref<128x128xbf16, #tpu.memory_space<vmem>>, %arg17: memref<1x128xf32, #tpu.memory_space<vmem>>, %arg18: memref<128x128xbf16, #tpu.memory_space<vmem>>, %arg19: memref<1x128xf32, #tpu.memory_space<vmem>>, %arg20: memref<8x128xf32, #tpu.memory_space<vmem>>) attributes {dimension_semantics = [#tpu.dimension_semantics<parallel>], iteration_bounds = array<i64: 1>, scalar_prefetch = 0 : i64, scratch_operands = 0 : i64, tpu.core_type = #tpu.core_type<tc>, window_params = [{transform_indices = @transform_0, window_bounds = array<i64: 8, 784>}, {pipeline_mode = #tpu.pipeline_mode<synchronous>, transform_indices = @transform_1, window_bounds = array<i64: 784, 3584>}, {pipeline_mode = #tpu.pipeline_mode<synchronous>, transform_indices = @transform_2, window_bounds = array<i64: 1, 896>}, {pipeline_mode = #tpu.pipeline_mode<synchronous>, transform_indices = @transform_3, window_bounds = array<i64: 896, 1024>}, {pipeline_mode = #tpu.pipeline_mode<synchronous>, transform_indices = @transform_4, window_bounds = array<i64: 1, 256>}, {pipeline_mode = #tpu.pipeline_mode<synchronous>, transform_indices = @transform_5, window_bounds = array<i64: 256, 128>}, {pipeline_mode = #tpu.pipeline_mode<synchronous>, transform_indices = @transform_6, window_bounds = array<i64: 1, 128>}, {pipeline_mode = #tpu.pipeline_mode<synchronous>, transform_indices = @transform_7, window_bounds = array<i64: 128, 256>}, {pipeline_mode = #tpu.pipeline_mode<synchronous>, transform_indices = @transform_8, window_bounds = array<i64: 1, 256>}, {pipeline_mode = #tpu.pipeline_mode<synchronous>, transform_indices = @transform_9, window_bounds = array<i64: 256, 512>}, {pipeline_mode = #tpu.pipeline_mode<synchronous>, transform_indices = @transform_10, window_bounds = array<i64: 1, 512>}, {pipeline_mode = #tpu.pipeline_mode<synchronous>, transform_indices = @transform_11, window_bounds = array<i64: 512, 256>}, {pipeline_mode = #tpu.pipeline_mode<synchronous>, transform_indices = @transform_12, window_bounds = array<i64: 1, 256>}, {pipeline_mode = #tpu.pipeline_mode<synchronous>, transform_indices = @transform_13, window_bounds = array<i64: 256, 128>}, {pipeline_mode = #tpu.pipeline_mode<synchronous>, transform_indices = @transform_14, window_bounds = array<i64: 1, 128>}, {pipeline_mode = #tpu.pipeline_mode<synchronous>, transform_indices = @transform_15, window_bounds = array<i64: 128, 128>}, {pipeline_mode = #tpu.pipeline_mode<synchronous>, transform_indices = @transform_16, window_bounds = array<i64: 1, 128>}, {pipeline_mode = #tpu.pipeline_mode<synchronous>, transform_indices = @transform_17, window_bounds = array<i64: 128, 128>}, {pipeline_mode = #tpu.pipeline_mode<synchronous>, transform_indices = @transform_18, window_bounds = array<i64: 1, 128>}, {transform_indices = @transform_19, window_bounds = array<i64: 8, 128>}]} {
    %c0 = arith.constant 0 : index
    %c0_0 = arith.constant 0 : index
    %0 = vector.load %arg1[%c0, %c0_0] : memref<8x784xbf16, #tpu.memory_space<vmem>>, vector<8x784xbf16>
    %c0_1 = arith.constant 0 : index
    %c0_2 = arith.constant 0 : index
    %1 = vector.load %arg2[%c0_1, %c0_2] : memref<784x3584xbf16, #tpu.memory_space<vmem>>, vector<784x3584xbf16>
    %cst = arith.constant dense<0.000000e+00> : vector<8x3584xf32>
    %2 = tpu.matmul %0, %1, %cst {dimension_numbers = #tpu.dot_dimension_numbers<[1], [0], [0], [1], [0, 0, 1, 1], [], []>} : vector<8x784xbf16>, vector<784x3584xbf16>, vector<8x3584xf32> -> vector<8x3584xf32>
    %3 = vector.extract_strided_slice %2 {offsets = [0, 0], sizes = [8, 896], strides = [1, 1]} : vector<8x3584xf32> to vector<8x896xf32>
    %4 = vector.extract_strided_slice %2 {offsets = [0, 896], sizes = [8, 896], strides = [1, 1]} : vector<8x3584xf32> to vector<8x896xf32>
    %5 = arith.maximumf %3, %4 : vector<8x896xf32>
    %6 = vector.extract_strided_slice %2 {offsets = [0, 1792], sizes = [8, 896], strides = [1, 1]} : vector<8x3584xf32> to vector<8x896xf32>
    %7 = arith.maximumf %5, %6 : vector<8x896xf32>
    %8 = vector.extract_strided_slice %2 {offsets = [0, 2688], sizes = [8, 896], strides = [1, 1]} : vector<8x3584xf32> to vector<8x896xf32>
    %9 = arith.maximumf %7, %8 : vector<8x896xf32>
    %c0_3 = arith.constant 0 : index
    %c0_4 = arith.constant 0 : index
    %10 = vector.load %arg3[%c0_3, %c0_4] : memref<1x896xf32, #tpu.memory_space<vmem>>, vector<1x896xf32>
    %11 = vector.broadcast %10 : vector<1x896xf32> to vector<8x896xf32>
    %12 = arith.addf %9, %11 : vector<8x896xf32>
    %cst_5 = arith.constant 0.000000e+00 : f32
    %13 = vector.broadcast %cst_5 : f32 to vector<8x896xf32>
    %14 = arith.maximumf %12, %13 : vector<8x896xf32>
    %15 = arith.truncf %14 : vector<8x896xf32> to vector<8x896xbf16>
    %c0_6 = arith.constant 0 : index
    %c0_7 = arith.constant 0 : index
    %16 = vector.load %arg4[%c0_6, %c0_7] : memref<896x1024xbf16, #tpu.memory_space<vmem>>, vector<896x1024xbf16>
    %cst_8 = arith.constant dense<0.000000e+00> : vector<8x1024xf32>
    %17 = tpu.matmul %15, %16, %cst_8 {dimension_numbers = #tpu.dot_dimension_numbers<[1], [0], [0], [1], [0, 0, 1, 1], [], []>} : vector<8x896xbf16>, vector<896x1024xbf16>, vector<8x1024xf32> -> vector<8x1024xf32>
    %18 = vector.extract_strided_slice %17 {offsets = [0, 0], sizes = [8, 256], strides = [1, 1]} : vector<8x1024xf32> to vector<8x256xf32>
    %19 = vector.extract_strided_slice %17 {offsets = [0, 256], sizes = [8, 256], strides = [1, 1]} : vector<8x1024xf32> to vector<8x256xf32>
    %20 = arith.maximumf %18, %19 : vector<8x256xf32>
    %21 = vector.extract_strided_slice %17 {offsets = [0, 512], sizes = [8, 256], strides = [1, 1]} : vector<8x1024xf32> to vector<8x256xf32>
    %22 = arith.maximumf %20, %21 : vector<8x256xf32>
    %23 = vector.extract_strided_slice %17 {offsets = [0, 768], sizes = [8, 256], strides = [1, 1]} : vector<8x1024xf32> to vector<8x256xf32>
    %24 = arith.maximumf %22, %23 : vector<8x256xf32>
    %c0_9 = arith.constant 0 : index
    %c0_10 = arith.constant 0 : index
    %25 = vector.load %arg5[%c0_9, %c0_10] : memref<1x256xf32, #tpu.memory_space<vmem>>, vector<1x256xf32>
    %26 = vector.broadcast %25 : vector<1x256xf32> to vector<8x256xf32>
    %27 = arith.addf %24, %26 : vector<8x256xf32>
    %cst_11 = arith.constant 0.000000e+00 : f32
    %28 = vector.broadcast %cst_11 : f32 to vector<8x256xf32>
    %29 = arith.maximumf %27, %28 : vector<8x256xf32>
    %c0_12 = arith.constant 0 : index
    %c0_13 = arith.constant 0 : index
    %30 = vector.load %arg6[%c0_12, %c0_13] : memref<256x128xbf16, #tpu.memory_space<vmem>>, vector<256x128xbf16>
    %c0_14 = arith.constant 0 : index
    %c0_15 = arith.constant 0 : index
    %31 = vector.load %arg7[%c0_14, %c0_15] : memref<1x128xf32, #tpu.memory_space<vmem>>, vector<1x128xf32>
    %32 = arith.truncf %29 : vector<8x256xf32> to vector<8x256xbf16>
    %cst_16 = arith.constant dense<0.000000e+00> : vector<8x128xf32>
    %33 = tpu.matmul %32, %30, %cst_16 {dimension_numbers = #tpu.dot_dimension_numbers<[1], [0], [0], [1], [0, 0, 1, 1], [], []>} : vector<8x256xbf16>, vector<256x128xbf16>, vector<8x128xf32> -> vector<8x128xf32>
    %34 = vector.broadcast %31 : vector<1x128xf32> to vector<8x128xf32>
    %35 = arith.addf %33, %34 : vector<8x128xf32>
    %cst_17 = arith.constant 0.000000e+00 : f32
    %36 = vector.broadcast %cst_17 : f32 to vector<8x128xf32>
    %37 = arith.maximumf %35, %36 : vector<8x128xf32>
    %c0_18 = arith.constant 0 : index
    %c0_19 = arith.constant 0 : index
    %38 = vector.load %arg8[%c0_18, %c0_19] : memref<128x256xbf16, #tpu.memory_space<vmem>>, vector<128x256xbf16>
    %c0_20 = arith.constant 0 : index
    %c0_21 = arith.constant 0 : index
    %39 = vector.load %arg9[%c0_20, %c0_21] : memref<1x256xf32, #tpu.memory_space<vmem>>, vector<1x256xf32>
    %40 = arith.truncf %37 : vector<8x128xf32> to vector<8x128xbf16>
    %cst_22 = arith.constant dense<0.000000e+00> : vector<8x256xf32>
    %41 = tpu.matmul %40, %38, %cst_22 {dimension_numbers = #tpu.dot_dimension_numbers<[1], [0], [0], [1], [0, 0, 1, 1], [], []>} : vector<8x128xbf16>, vector<128x256xbf16>, vector<8x256xf32> -> vector<8x256xf32>
    %42 = vector.broadcast %39 : vector<1x256xf32> to vector<8x256xf32>
    %43 = arith.addf %41, %42 : vector<8x256xf32>
    %cst_23 = arith.constant 0.000000e+00 : f32
    %44 = vector.broadcast %cst_23 : f32 to vector<8x256xf32>
    %45 = arith.maximumf %43, %44 : vector<8x256xf32>
    %c0_24 = arith.constant 0 : index
    %c0_25 = arith.constant 0 : index
    %46 = vector.load %arg10[%c0_24, %c0_25] : memref<256x512xbf16, #tpu.memory_space<vmem>>, vector<256x512xbf16>
    %c0_26 = arith.constant 0 : index
    %c0_27 = arith.constant 0 : index
    %47 = vector.load %arg11[%c0_26, %c0_27] : memref<1x512xf32, #tpu.memory_space<vmem>>, vector<1x512xf32>
    %48 = arith.truncf %45 : vector<8x256xf32> to vector<8x256xbf16>
    %cst_28 = arith.constant dense<0.000000e+00> : vector<8x512xf32>
    %49 = tpu.matmul %48, %46, %cst_28 {dimension_numbers = #tpu.dot_dimension_numbers<[1], [0], [0], [1], [0, 0, 1, 1], [], []>} : vector<8x256xbf16>, vector<256x512xbf16>, vector<8x512xf32> -> vector<8x512xf32>
    %50 = vector.broadcast %47 : vector<1x512xf32> to vector<8x512xf32>
    %51 = arith.addf %49, %50 : vector<8x512xf32>
    %cst_29 = arith.constant 0.000000e+00 : f32
    %52 = vector.broadcast %cst_29 : f32 to vector<8x512xf32>
    %53 = arith.maximumf %51, %52 : vector<8x512xf32>
    %c0_30 = arith.constant 0 : index
    %c0_31 = arith.constant 0 : index
    %54 = vector.load %arg12[%c0_30, %c0_31] : memref<512x256xbf16, #tpu.memory_space<vmem>>, vector<512x256xbf16>
    %c0_32 = arith.constant 0 : index
    %c0_33 = arith.constant 0 : index
    %55 = vector.load %arg13[%c0_32, %c0_33] : memref<1x256xf32, #tpu.memory_space<vmem>>, vector<1x256xf32>
    %56 = arith.truncf %53 : vector<8x512xf32> to vector<8x512xbf16>
    %cst_34 = arith.constant dense<0.000000e+00> : vector<8x256xf32>
    %57 = tpu.matmul %56, %54, %cst_34 {dimension_numbers = #tpu.dot_dimension_numbers<[1], [0], [0], [1], [0, 0, 1, 1], [], []>} : vector<8x512xbf16>, vector<512x256xbf16>, vector<8x256xf32> -> vector<8x256xf32>
    %58 = vector.broadcast %55 : vector<1x256xf32> to vector<8x256xf32>
    %59 = arith.addf %57, %58 : vector<8x256xf32>
    %cst_35 = arith.constant 0.000000e+00 : f32
    %60 = vector.broadcast %cst_35 : f32 to vector<8x256xf32>
    %61 = arith.maximumf %59, %60 : vector<8x256xf32>
    %c0_36 = arith.constant 0 : index
    %c0_37 = arith.constant 0 : index
    %62 = vector.load %arg14[%c0_36, %c0_37] : memref<256x128xbf16, #tpu.memory_space<vmem>>, vector<256x128xbf16>
    %c0_38 = arith.constant 0 : index
    %c0_39 = arith.constant 0 : index
    %63 = vector.load %arg15[%c0_38, %c0_39] : memref<1x128xf32, #tpu.memory_space<vmem>>, vector<1x128xf32>
    %64 = arith.truncf %61 : vector<8x256xf32> to vector<8x256xbf16>
    %cst_40 = arith.constant dense<0.000000e+00> : vector<8x128xf32>
    %65 = tpu.matmul %64, %62, %cst_40 {dimension_numbers = #tpu.dot_dimension_numbers<[1], [0], [0], [1], [0, 0, 1, 1], [], []>} : vector<8x256xbf16>, vector<256x128xbf16>, vector<8x128xf32> -> vector<8x128xf32>
    %66 = vector.broadcast %63 : vector<1x128xf32> to vector<8x128xf32>
    %67 = arith.addf %65, %66 : vector<8x128xf32>
    %cst_41 = arith.constant 0.000000e+00 : f32
    %68 = vector.broadcast %cst_41 : f32 to vector<8x128xf32>
    %69 = arith.maximumf %67, %68 : vector<8x128xf32>
    %c0_42 = arith.constant 0 : index
    %c0_43 = arith.constant 0 : index
    %70 = vector.load %arg16[%c0_42, %c0_43] : memref<128x128xbf16, #tpu.memory_space<vmem>>, vector<128x128xbf16>
    %c0_44 = arith.constant 0 : index
    %c0_45 = arith.constant 0 : index
    %71 = vector.load %arg17[%c0_44, %c0_45] : memref<1x128xf32, #tpu.memory_space<vmem>>, vector<1x128xf32>
    %72 = arith.truncf %69 : vector<8x128xf32> to vector<8x128xbf16>
    %cst_46 = arith.constant dense<0.000000e+00> : vector<8x128xf32>
    %73 = tpu.matmul %72, %70, %cst_46 {dimension_numbers = #tpu.dot_dimension_numbers<[1], [0], [0], [1], [0, 0, 1, 1], [], []>} : vector<8x128xbf16>, vector<128x128xbf16>, vector<8x128xf32> -> vector<8x128xf32>
    %74 = vector.broadcast %71 : vector<1x128xf32> to vector<8x128xf32>
    %75 = arith.addf %73, %74 : vector<8x128xf32>
    %cst_47 = arith.constant 0.000000e+00 : f32
    %76 = vector.broadcast %cst_47 : f32 to vector<8x128xf32>
    %77 = arith.maximumf %75, %76 : vector<8x128xf32>
    %c0_48 = arith.constant 0 : index
    %c0_49 = arith.constant 0 : index
    %78 = vector.load %arg18[%c0_48, %c0_49] : memref<128x128xbf16, #tpu.memory_space<vmem>>, vector<128x128xbf16>
    %c0_50 = arith.constant 0 : index
    %c0_51 = arith.constant 0 : index
    %79 = vector.load %arg19[%c0_50, %c0_51] : memref<1x128xf32, #tpu.memory_space<vmem>>, vector<1x128xf32>
    %80 = arith.truncf %77 : vector<8x128xf32> to vector<8x128xbf16>
    %cst_52 = arith.constant dense<0.000000e+00> : vector<8x128xf32>
    %81 = tpu.matmul %80, %78, %cst_52 {dimension_numbers = #tpu.dot_dimension_numbers<[1], [0], [0], [1], [0, 0, 1, 1], [], []>} : vector<8x128xbf16>, vector<128x128xbf16>, vector<8x128xf32> -> vector<8x128xf32>
    %82 = vector.broadcast %79 : vector<1x128xf32> to vector<8x128xf32>
    %83 = arith.addf %81, %82 : vector<8x128xf32>
    %c0_53 = arith.constant 0 : index
    %c0_54 = arith.constant 0 : index
    %84 = vector.load %arg20[%c0_53, %c0_54] : memref<8x128xf32, #tpu.memory_space<vmem>>, vector<8x128xf32>
    tpu.vector_store %arg20[%c0_53, %c0_54], %83 {strides = array<i32>} : memref<8x128xf32, #tpu.memory_space<vmem>>, vector<8x128xf32>,
    return
  }
  func.func @transform_0(%arg0: i32) -> (i32, i32) {
    %c0_i32 = arith.constant 0 : i32
    %c0_i32_0 = arith.constant 0 : i32
    return %arg0, %c0_i32 : i32, i32
  }
  func.func @transform_1(%arg0: i32) -> (i32, i32) {
    %c0_i32 = arith.constant 0 : i32
    %c0_i32_0 = arith.constant 0 : i32
    %c0_i32_1 = arith.constant 0 : i32
    return %c0_i32, %c0_i32_0 : i32, i32
  }
  func.func @transform_2(%arg0: i32) -> (i32, i32) {
    %c0_i32 = arith.constant 0 : i32
    %c0_i32_0 = arith.constant 0 : i32
    %c0_i32_1 = arith.constant 0 : i32
    return %c0_i32, %c0_i32_0 : i32, i32
  }
  func.func @transform_3(%arg0: i32) -> (i32, i32) {
    %c0_i32 = arith.constant 0 : i32
    %c0_i32_0 = arith.constant 0 : i32
    %c0_i32_1 = arith.constant 0 : i32
    return %c0_i32, %c0_i32_0 : i32, i32
  }
  func.func @transform_4(%arg0: i32) -> (i32, i32) {
    %c0_i32 = arith.constant 0 : i32
    %c0_i32_0 = arith.constant 0 : i32
    %c0_i32_1 = arith.constant 0 : i32
    return %c0_i32, %c0_i32_0 : i32, i32
  }
  func.func @transform_5(%arg0: i32) -> (i32, i32) {
    %c0_i32 = arith.constant 0 : i32
    %c0_i32_0 = arith.constant 0 : i32
    %c0_i32_1 = arith.constant 0 : i32
    return %c0_i32, %c0_i32_0 : i32, i32
  }
  func.func @transform_6(%arg0: i32) -> (i32, i32) {
    %c0_i32 = arith.constant 0 : i32
    %c0_i32_0 = arith.constant 0 : i32
    %c0_i32_1 = arith.constant 0 : i32
    return %c0_i32, %c0_i32_0 : i32, i32
  }
  func.func @transform_7(%arg0: i32) -> (i32, i32) {
    %c0_i32 = arith.constant 0 : i32
    %c0_i32_0 = arith.constant 0 : i32
    %c0_i32_1 = arith.constant 0 : i32
    return %c0_i32, %c0_i32_0 : i32, i32
  }
  func.func @transform_8(%arg0: i32) -> (i32, i32) {
    %c0_i32 = arith.constant 0 : i32
    %c0_i32_0 = arith.constant 0 : i32
    %c0_i32_1 = arith.constant 0 : i32
    return %c0_i32, %c0_i32_0 : i32, i32
  }
  func.func @transform_9(%arg0: i32) -> (i32, i32) {
    %c0_i32 = arith.constant 0 : i32
    %c0_i32_0 = arith.constant 0 : i32
    %c0_i32_1 = arith.constant 0 : i32
    return %c0_i32, %c0_i32_0 : i32, i32
  }
  func.func @transform_10(%arg0: i32) -> (i32, i32) {
    %c0_i32 = arith.constant 0 : i32
    %c0_i32_0 = arith.constant 0 : i32
    %c0_i32_1 = arith.constant 0 : i32
    return %c0_i32, %c0_i32_0 : i32, i32
  }
  func.func @transform_11(%arg0: i32) -> (i32, i32) {
    %c0_i32 = arith.constant 0 : i32
    %c0_i32_0 = arith.constant 0 : i32
    %c0_i32_1 = arith.constant 0 : i32
    return %c0_i32, %c0_i32_0 : i32, i32
  }
  func.func @transform_12(%arg0: i32) -> (i32, i32) {
    %c0_i32 = arith.constant 0 : i32
    %c0_i32_0 = arith.constant 0 : i32
    %c0_i32_1 = arith.constant 0 : i32
    return %c0_i32, %c0_i32_0 : i32, i32
  }
  func.func @transform_13(%arg0: i32) -> (i32, i32) {
    %c0_i32 = arith.constant 0 : i32
    %c0_i32_0 = arith.constant 0 : i32
    %c0_i32_1 = arith.constant 0 : i32
    return %c0_i32, %c0_i32_0 : i32, i32
  }
  func.func @transform_14(%arg0: i32) -> (i32, i32) {
    %c0_i32 = arith.constant 0 : i32
    %c0_i32_0 = arith.constant 0 : i32
    %c0_i32_1 = arith.constant 0 : i32
    return %c0_i32, %c0_i32_0 : i32, i32
  }
  func.func @transform_15(%arg0: i32) -> (i32, i32) {
    %c0_i32 = arith.constant 0 : i32
    %c0_i32_0 = arith.constant 0 : i32
    %c0_i32_1 = arith.constant 0 : i32
    return %c0_i32, %c0_i32_0 : i32, i32
  }
  func.func @transform_16(%arg0: i32) -> (i32, i32) {
    %c0_i32 = arith.constant 0 : i32
    %c0_i32_0 = arith.constant 0 : i32
    %c0_i32_1 = arith.constant 0 : i32
    return %c0_i32, %c0_i32_0 : i32, i32
  }
  func.func @transform_17(%arg0: i32) -> (i32, i32) {
    %c0_i32 = arith.constant 0 : i32
    %c0_i32_0 = arith.constant 0 : i32
    %c0_i32_1 = arith.constant 0 : i32
    return %c0_i32, %c0_i32_0 : i32, i32
  }
  func.func @transform_18(%arg0: i32) -> (i32, i32) {
    %c0_i32 = arith.constant 0 : i32
    %c0_i32_0 = arith.constant 0 : i32
    %c0_i32_1 = arith.constant 0 : i32
    return %c0_i32, %c0_i32_0 : i32, i32
  }
  func.func @transform_19(%arg0: i32) -> (i32, i32) {
    %c0_i32 = arith.constant 0 : i32
    %c0_i32_0 = arith.constant 0 : i32
    return %arg0, %c0_i32 : i32, i32
  }
}

</mosaic_0001>

<bundles_post_ra>
// kernel: image_classifier_forward.1
= control target key start
LH: loop header
LB: loop body
LE: loop exit
PB: predicated region body
PF: predicated region fallthrough
CT: control target
= control target key end

     0   :  { %s21743_s0 = inlined_call_operand.vmem [shape: bf16[8,784], index: 0, kind: input, shape index: {}]   ;;  %s21744_s1 = inlined_call_operand.hbm [shape: bf16[784,3584], index: 1, kind: input, shape index: {}]   ;;  %s21745_s2 = inlined_call_operand.hbm [shape: f32[1,896], index: 2, kind: input, shape index: {}]   ;;  %s21746_s3 = inlined_call_operand.hbm [shape: bf16[896,1024], index: 3, kind: input, shape index: {}]   ;;  %s21747_s4 = inlined_call_operand.hbm [shape: f32[1,256], index: 4, kind: input, shape index: {}]   ;;  %s21748_s5 = inlined_call_operand.hbm [shape: bf16[256,128], index: 5, kind: input, shape index: {}]   ;;  %s21749_s6 = inlined_call_operand.hbm [shape: f32[1,128], index: 6, kind: input, shape index: {}]   ;;  %s21750_s7 = inlined_call_operand.hbm [shape: bf16[128,256], index: 7, kind: input, shape index: {}]   ;;  %s21751_s8 = inlined_call_operand.hbm [shape: f32[1,256], index: 8, kind: input, shape index: {}]   ;;  %s21752_s9 = inlined_call_operand.hbm [shape: bf16[256,512], index: 9, kind: input, shape index: {}]   ;;  %s21753_s10 = inlined_call_operand.hbm [shape: f32[1,512], index: 10, kind: input, shape index: {}]   ;;  %s21754_s11 = inlined_call_operand.hbm [shape: bf16[512,256], index: 11, kind: input, shape index: {}]   ;;  %s21755_s12 = inlined_call_operand.hbm [shape: f32[1,256], index: 12, kind: input, shape index: {}]   ;;  %s21756_s13 = inlined_call_operand.hbm [shape: bf16[256,128], index: 13, kind: input, shape index: {}]   ;;  %s21757_s14 = inlined_call_operand.hbm [shape: f32[1,128], index: 14, kind: input, shape index: {}]   ;;  %s21758_s15 = inlined_call_operand.hbm [shape: bf16[128,128], index: 15, kind: input, shape index: {}]   ;;  %s21759_s16 = inlined_call_operand.hbm [shape: f32[1,128], index: 16, kind: input, shape index: {}]   ;;  %s21760_s17 = inlined_call_operand.hbm [shape: bf16[128,128], index: 17, kind: input, shape index: {}]   ;;  %s21761_s18 = inlined_call_operand.hbm [shape: f32[1,128], index: 18, kind: input, shape index: {}]   ;;  %s21762_s19 = inlined_call_operand.vmem [shape: f32[8,128], index: 19, kind: output, shape index: {}]  }
   0x1   :  { %21764 = sst [smem:[#allocation40_spill]] %s21743_s0 }
   0x2   :  { %21765 = sst [smem:[#allocation41_spill]] %s21744_s1 }
   0x3   :  { %21766 = sst [smem:[#allocation42_spill]] %s21745_s2 }
   0x4   :  { %21767 = sst [smem:[#allocation43_spill]] %s21746_s3 }
   0x5   :  { %24 = vsyncpa [#allocation3], 0 }
   0x6   :  { %25 = vsyncpa [#allocation5], 0 }
   0x7   :  { %26 = vsyncpa [#allocation8], 0 }
   0x8   :  { %27 = vsyncpa [#allocation11], 0 }
   0x9   :  { %28 = vsyncpa [#allocation14], 0 }
   0xa   :  { %29 = vsyncpa [#allocation17], 0 }
   0xb   :  { %30 = vsyncpa [#allocation20], 0 }
   0xc   :  { %31 = vsyncpa [#allocation23], 0 }
   0xd   :  { %32 = vsyncpa [#allocation26], 0 }
   0xe   :  { %33 = vsyncpa [#allocation29], 0  ;;  %s20905_s0 = smov [#allocation4]   ;;  %s20906_s20 = smov [#allocation7]  }
   0xf   :  { %s54_s30 = sshll.u32 %s20905_s0, 4  ;;  %s76_s21 = sshll.u32 %s20906_s20, 4  ;;  %s55_s30 = int_to_ptr.vmem [resolvable:$true] %s54_s30  ;;  %s77_s21 = int_to_ptr.vmem [resolvable:$true] %s76_s21 }
  0x10   :  { %s20533_s1 = scalar_lea.vmem %s55_s30, 112  ;;  %s20537_s22 = scalar_lea.vmem %s55_s30, 128 }
  0x11   :  { %p20534_p0 = scmp.ne.s32.totalorder %s55_s30, %s20533_s1  ;;  %p20538_p1 = scmp.lt.s32.totalorder %s55_s30, %s55_s30 }
  0x12   :  { %p20539_p2 = scmp.lt.s32.totalorder %s20537_s22, %s20533_s1 }
  0x14   :  { %p20540_p3 = por %p20539_p2, %p20538_p1 }
  0x16   :  { %p20541_p4 = pnand %p20540_p3, %p20534_p0 }
  0x18   :  { %20544 = shalt.err (!%p20541_p4)
}
  0x19   :  { %s21768_s24 = sld [smem:[#allocation42_spill]]  ;;  %s20553_s25 = scalar_lea.vmem %s77_s21, 32 }
  0x1a   :  { %p20554_p5 = scmp.ne.s32.totalorder %s77_s21, %s20553_s25  ;;  %p20558_p6 = scmp.lt.s32.totalorder %s77_s21, %s77_s21 }
  0x1b   :  { %p20559_p7 = scmp.lt.s32.totalorder %s20553_s25, %s20553_s25 }
  0x1d   :  { %p20560_p8 = por %p20559_p7, %p20558_p6 }
  0x1f   :  { %57 = dma.hbm_to_vmem [thread:$0]  %s21768_s24, 112, %s55_s30, [#allocation5]  }
  0x20   :  { %p20561_p9 = pnand %p20560_p8, %p20554_p5 }
  0x22   :  { %20564 = shalt.err (!%p20561_p9)
}
  0x23   :  { %79 = dma.hbm_to_vmem [thread:$0]  %s21747_s4, 32, %s77_s21, [#allocation8]  }
  0x24   :  { %s20907_s27 = smov [#allocation10]   ;;  %s20908_s29 = smov [#allocation13]  }
  0x25   :  { %s98_s28 = sshll.u32 %s20907_s27, 4  ;;  %s120_s0 = sshll.u32 %s20908_s29, 4  ;;  %s99_s28 = int_to_ptr.vmem [resolvable:$true] %s98_s28  ;;  %s121_s0 = int_to_ptr.vmem [resolvable:$true] %s120_s0 }
  0x26   :  { %s20573_s20 = scalar_lea.vmem %s99_s28, 16  ;;  %s20577_s30 = scalar_lea.vmem %s99_s28, 32 }
  0x27   :  { %p20574_p10 = scmp.ne.s32.totalorder %s99_s28, %s20573_s20  ;;  %p20578_p11 = scmp.lt.s32.totalorder %s99_s28, %s99_s28 }
  0x28   :  { %p20579_p12 = scmp.lt.s32.totalorder %s20577_s30, %s20573_s20 }
  0x2a   :  { %p20580_p13 = por %p20579_p12, %p20578_p11 }
  0x2c   :  { %p20581_p0 = pnand %p20580_p13, %p20574_p10 }
  0x2e   :  { %20584 = shalt.err (!%p20581_p0)
}
  0x2f   :  { %101 = dma.hbm_to_vmem [thread:$0]  %s21749_s6, 16, %s99_s28, [#allocation11]  }
  0x30   :  { %s20593_s2 = scalar_lea.vmem %s121_s0, 32  ;;  %p20598_p2 = scmp.lt.s32.totalorder %s121_s0, %s121_s0 }
  0x31   :  { %p20594_p1 = scmp.ne.s32.totalorder %s121_s0, %s20593_s2  ;;  %p20599_p3 = scmp.lt.s32.totalorder %s20593_s2, %s20593_s2 }
  0x33   :  { %p20600_p4 = por %p20599_p3, %p20598_p2 }
  0x35   :  { %p20601_p5 = pnand %p20600_p4, %p20594_p1 }
  0x37   :  { %20604 = shalt.err (!%p20601_p5)
}
  0x38   :  { %123 = dma.hbm_to_vmem [thread:$0]  %s21751_s8, 32, %s121_s0, [#allocation14]  }
  0x39   :  { %s20909_s23 = smov [#allocation16]   ;;  %s20910_s25 = smov [#allocation19]  }
  0x3a   :  { %s142_s24 = sshll.u32 %s20909_s23, 4  ;;  %s164_s3 = sshll.u32 %s20910_s25, 4  ;;  %s143_s24 = int_to_ptr.vmem [resolvable:$true] %s142_s24  ;;  %s165_s3 = int_to_ptr.vmem [resolvable:$true] %s164_s3 }
  0x3b   :  { %s20613_s26 = scalar_lea.vmem %s143_s24, 64  ;;  %p20618_p7 = scmp.lt.s32.totalorder %s143_s24, %s143_s24 }
  0x3c   :  { %p20614_p6 = scmp.ne.s32.totalorder %s143_s24, %s20613_s26  ;;  %p20619_p8 = scmp.lt.s32.totalorder %s20613_s26, %s20613_s26 }
  0x3e   :  { %p20620_p9 = por %p20619_p8, %p20618_p7 }
  0x40   :  { %p20621_p10 = pnand %p20620_p9, %p20614_p6 }
  0x42   :  { %20624 = shalt.err (!%p20621_p10)
}
  0x43   :  { %145 = dma.hbm_to_vmem [thread:$0]  %s21753_s10, 64, %s143_s24, [#allocation17]  }
  0x44   :  { %s20633_s28 = scalar_lea.vmem %s165_s3, 32  ;;  %p20638_p12 = scmp.lt.s32.totalorder %s165_s3, %s165_s3 }
  0x45   :  { %p20634_p11 = scmp.ne.s32.totalorder %s165_s3, %s20633_s28  ;;  %p20639_p13 = scmp.lt.s32.totalorder %s20633_s28, %s20633_s28 }
  0x47   :  { %p20640_p0 = por %p20639_p13, %p20638_p12 }
  0x49   :  { %p20641_p1 = pnand %p20640_p0, %p20634_p11 }
  0x4b   :  { %20644 = shalt.err (!%p20641_p1)
}
  0x4c   :  { %167 = dma.hbm_to_vmem [thread:$0]  %s21755_s12, 32, %s165_s3, [#allocation20]  }
  0x4d   :  { %s20911_s0 = smov [#allocation22]   ;;  %s20912_s30 = smov [#allocation25]  }
  0x4e   :  { %s186_s20 = sshll.u32 %s20911_s0, 4  ;;  %s208_s1 = sshll.u32 %s20912_s30, 4  ;;  %s187_s20 = int_to_ptr.vmem [resolvable:$true] %s186_s20  ;;  %s209_s1 = int_to_ptr.vmem [resolvable:$true] %s208_s1 }
  0x4f   :  { %s20653_s22 = scalar_lea.vmem %s187_s20, 16  ;;  %s20657_s10 = scalar_lea.vmem %s187_s20, 32 }
  0x50   :  { %p20654_p2 = scmp.ne.s32.totalorder %s187_s20, %s20653_s22  ;;  %p20658_p3 = scmp.lt.s32.totalorder %s187_s20, %s187_s20 }
  0x51   :  { %p20659_p4 = scmp.lt.s32.totalorder %s20657_s10, %s20653_s22 }
  0x53   :  { %p20660_p5 = por %p20659_p4, %p20658_p3 }
  0x55   :  { %p20661_p6 = pnand %p20660_p5, %p20654_p2 }
  0x57   :  { %20664 = shalt.err (!%p20661_p6)
}
  0x58   :  { %189 = dma.hbm_to_vmem [thread:$0]  %s21757_s14, 16, %s187_s20, [#allocation23]  }
  0x59   :  { %s20673_s21 = scalar_lea.vmem %s209_s1, 16  ;;  %s20677_s12 = scalar_lea.vmem %s209_s1, 32 }
  0x5a   :  { %p20674_p7 = scmp.ne.s32.totalorder %s209_s1, %s20673_s21  ;;  %p20678_p8 = scmp.lt.s32.totalorder %s209_s1, %s209_s1 }
  0x5b   :  { %p20679_p9 = scmp.lt.s32.totalorder %s20677_s12, %s20673_s21 }
  0x5d   :  { %p20680_p10 = por %p20679_p9, %p20678_p8 }
  0x5f   :  { %p20681_p11 = pnand %p20680_p10, %p20674_p7 }
  0x61   :  { %20684 = shalt.err (!%p20681_p11)
}
  0x62   :  { %211 = dma.hbm_to_vmem [thread:$0]  %s21759_s16, 16, %s209_s1, [#allocation26]  }
  0x63   :  { %s20913_s25 = smov [#allocation2]  }
  0x64   :  { %s41_s3 = sshll.u32 %s20913_s25, 4  ;;  %s42_s3 = int_to_ptr.vmem [resolvable:$true] %s41_s3 }
  0x65   :  { %s20693_s26 = scalar_lea.vmem %s42_s3, 175616  ;;  %p20698_p13 = scmp.lt.s32.totalorder %s42_s3, %s42_s3 }
  0x66   :  { %p20694_p12 = scmp.ne.s32.totalorder %s42_s3, %s20693_s26  ;;  %p20699_p0 = scmp.lt.s32.totalorder %s20693_s26, %s20693_s26 }
  0x68   :  { %p20700_p1 = por %p20699_p0, %p20698_p13 }
  0x6a   :  { %p20701_p2 = pnand %p20700_p1, %p20694_p12 }
  0x6c   :  { %20704 = shalt.err (!%p20701_p2)
}
  0x6d   :  { %s20914_s14 = smov 1792   ;;  %s20915_s6 = smov 112  }
  0x6e   :  { %s21769_s8 = sld [smem:[#allocation41_spill]]  ;;  %s20916_s29 = smov [#allocation6]  }
  0x6f   :  { %s63_s0 = sshll.u32 %s20916_s29, 4  ;;  %s64_s0 = int_to_ptr.vmem [resolvable:$true] %s63_s0 }
  0x70   :  { %s20713_s16 = scalar_lea.vmem %s64_s0, 57344  ;;  %p20718_p4 = scmp.lt.s32.totalorder %s64_s0, %s64_s0 }
  0x71   :  { %p20714_p3 = scmp.ne.s32.totalorder %s64_s0, %s20713_s16  ;;  %p20719_p5 = scmp.lt.s32.totalorder %s20713_s16, %s20713_s16 }
  0x73   :  { %p20720_p6 = por %p20719_p5, %p20718_p4 }
  0x74   :  { %47 = dma.hbm_to_vmem [thread:$0]  %s21769_s8, 175616, %s42_s3, [#allocation3], %s20914_s14, %s20914_s14, %s20915_s6  }
  0x75   :  { %p20721_p7 = pnand %p20720_p6, %p20714_p3 }
  0x77   :  { %20724 = shalt.err (!%p20721_p7)
}
  0x78   :  { %s20917_s20 = smov 512   ;;  %s20918_s30 = smov 32  }
  0x79   :  { %s21770_s10 = sld [smem:[#allocation43_spill]]  ;;  %s20919_s2 = smov [#allocation9]  }
  0x7a   :  { %s85_s4 = sshll.u32 %s20919_s2, 4  ;;  %s86_s4 = int_to_ptr.vmem [resolvable:$true] %s85_s4 }
  0x7b   :  { %s20733_s21 = scalar_lea.vmem %s86_s4, 2048  ;;  %p20738_p9 = scmp.lt.s32.totalorder %s86_s4, %s86_s4 }
  0x7c   :  { %p20734_p8 = scmp.ne.s32.totalorder %s86_s4, %s20733_s21  ;;  %p20739_p10 = scmp.lt.s32.totalorder %s20733_s21, %s20733_s21 }
  0x7e   :  { %p20740_p11 = por %p20739_p10, %p20738_p9 }
  0x7f   :  { %69 = dma.hbm_to_vmem [thread:$0]  %s21770_s10, 57344, %s64_s0, [#allocation5], %s20917_s20, %s20917_s20, %s20918_s30  }
  0x80   :  { %p20741_p12 = pnand %p20740_p11, %p20734_p8 }
  0x82   :  { %20744 = shalt.err (!%p20741_p12)
}
  0x83   :  { %s20920_s12 = smov 64   ;;  %s20921_s23 = smov 4  }
  0x84   :  { %91 = dma.hbm_to_vmem [thread:$0]  %s21748_s5, 2048, %s86_s4, [#allocation8], %s20920_s12, %s20920_s12, %s20921_s23  }
  0x85   :  { %s20922_s3 = smov [#allocation12]  }
  0x86   :  { %s107_s26 = sshll.u32 %s20922_s3, 4  ;;  %s108_s26 = int_to_ptr.vmem [resolvable:$true] %s107_s26 }
  0x87   :  { %s20753_s14 = scalar_lea.vmem %s108_s26, 2048  ;;  %p20758_p0 = scmp.lt.s32.totalorder %s108_s26, %s108_s26 }
  0x88   :  { %p20754_p13 = scmp.ne.s32.totalorder %s108_s26, %s20753_s14  ;;  %p20759_p1 = scmp.lt.s32.totalorder %s20753_s14, %s20753_s14 }
  0x8a   :  { %p20760_p2 = por %p20759_p1, %p20758_p0 }
  0x8c   :  { %p20761_p3 = pnand %p20760_p2, %p20754_p13 }
  0x8e   :  { %20764 = shalt.err (!%p20761_p3)
}
  0x8f   :  { %s20923_s6 = smov 128   ;;  %s20924_s27 = smov 8  }
  0x90   :  { %113 = dma.hbm_to_vmem [thread:$0]  %s21750_s7, 2048, %s108_s26, [#allocation11], %s20923_s6, %s20923_s6, %s20924_s27  }
  0x91   :  { %s20925_s5 = smov [#allocation15]  }
  0x92   :  { %s129_s29 = sshll.u32 %s20925_s5, 4  ;;  %s130_s29 = int_to_ptr.vmem [resolvable:$true] %s129_s29 }
  0x93   :  { %s20773_s0 = scalar_lea.vmem %s130_s29, 8192  ;;  %p20778_p5 = scmp.lt.s32.totalorder %s130_s29, %s130_s29 }
  0x94   :  { %p20774_p4 = scmp.ne.s32.totalorder %s130_s29, %s20773_s0  ;;  %p20779_p6 = scmp.lt.s32.totalorder %s20773_s0, %s20773_s0 }
  0x96   :  { %p20780_p7 = por %p20779_p6, %p20778_p5 }
  0x98   :  { %p20781_p8 = pnand %p20780_p7, %p20774_p4 }
  0x9a   :  { %20784 = shalt.err (!%p20781_p8)
}
  0x9b   :  { %s20926_s16 = smov 256   ;;  %s20927_s20 = smov 16  }
  0x9c   :  { %135 = dma.hbm_to_vmem [thread:$0]  %s21752_s9, 8192, %s130_s29, [#allocation14], %s20926_s16, %s20926_s16, %s20927_s20  }
  0x9d   :  { %s20928_s22 = smov [#allocation18]   ;;  %s20929_s7 = smov [#allocation21]  }
  0x9e   :  { %s151_s10 = sshll.u32 %s20928_s22, 4  ;;  %s173_s2 = sshll.u32 %s20929_s7, 4  ;;  %s152_s10 = int_to_ptr.vmem [resolvable:$true] %s151_s10  ;;  %s174_s2 = int_to_ptr.vmem [resolvable:$true] %s173_s2 }
  0x9f   :  { %s20793_s4 = scalar_lea.vmem %s152_s10, 8192  ;;  %p20798_p10 = scmp.lt.s32.totalorder %s152_s10, %s152_s10 }
  0xa0   :  { %p20794_p9 = scmp.ne.s32.totalorder %s152_s10, %s20793_s4  ;;  %p20799_p11 = scmp.lt.s32.totalorder %s20793_s4, %s20793_s4 }
  0xa2   :  { %p20800_p12 = por %p20799_p11, %p20798_p10 }
  0xa4   :  { %p20801_p13 = pnand %p20800_p12, %p20794_p9 }
  0xa6   :  { %20804 = shalt.err (!%p20801_p13)
}
  0xa7   :  { %157 = dma.hbm_to_vmem [thread:$0]  %s21754_s11, 8192, %s152_s10, [#allocation17], %s20923_s6, %s20923_s6, %s20924_s27  }
  0xa8   :  { %s20813_s9 = scalar_lea.vmem %s174_s2, 2048  ;;  %p20818_p1 = scmp.lt.s32.totalorder %s174_s2, %s174_s2 }
  0xa9   :  { %p20814_p0 = scmp.ne.s32.totalorder %s174_s2, %s20813_s9  ;;  %p20819_p2 = scmp.lt.s32.totalorder %s20813_s9, %s20813_s9 }
  0xab   :  { %p20820_p3 = por %p20819_p2, %p20818_p1 }
  0xad   :  { %p20821_p4 = pnand %p20820_p3, %p20814_p0 }
  0xaf   :  { %20824 = shalt.err (!%p20821_p4)
}
  0xb0   :  { %179 = dma.hbm_to_vmem [thread:$0]  %s21756_s13, 2048, %s174_s2, [#allocation20], %s20920_s12, %s20920_s12, %s20921_s23  }
  0xb1   :  { %s20930_s26 = smov [#allocation24]   ;;  %s20931_s28 = smov [#allocation27]  }
  0xb2   :  { %s195_s14 = sshll.u32 %s20930_s26, 4  ;;  %s217_s11 = sshll.u32 %s20931_s28, 4  ;;  %s196_s14 = int_to_ptr.vmem [resolvable:$true] %s195_s14  ;;  %s218_s11 = int_to_ptr.vmem [resolvable:$true] %s217_s11 }
  0xb3   :  { %s20833_s6 = scalar_lea.vmem %s196_s14, 1024  ;;  %p20838_p6 = scmp.lt.s32.totalorder %s196_s14, %s196_s14 }
  0xb4   :  { %p20834_p5 = scmp.ne.s32.totalorder %s196_s14, %s20833_s6  ;;  %p20839_p7 = scmp.lt.s32.totalorder %s20833_s6, %s20833_s6 }
  0xb6   :  { %p20840_p8 = por %p20839_p7, %p20838_p6 }
  0xb8   :  { %p20841_p9 = pnand %p20840_p8, %p20834_p5 }
  0xba   :  { %20844 = shalt.err (!%p20841_p9)
}
  0xbb   :  { %201 = dma.hbm_to_vmem [thread:$0]  %s21758_s15, 1024, %s196_s14, [#allocation23], %s20920_s12, %s20920_s12, %s20921_s23  }
  0xbc   :  { %s20853_s13 = scalar_lea.vmem %s218_s11, 1024  ;;  %p20858_p11 = scmp.lt.s32.totalorder %s218_s11, %s218_s11 }
  0xbd   :  { %p20854_p10 = scmp.ne.s32.totalorder %s218_s11, %s20853_s13  ;;  %p20859_p12 = scmp.lt.s32.totalorder %s20853_s13, %s20853_s13 }
  0xbf   :  { %p20860_p13 = por %p20859_p12, %p20858_p11 }
  0xc1   :  { %p20861_p0 = pnand %p20860_p13, %p20854_p10 }
  0xc3   :  { %20864 = shalt.err (!%p20861_p0)
}
  0xc4   :  { %223 = dma.hbm_to_vmem [thread:$0]  %s21760_s17, 1024, %s218_s11, [#allocation26], %s20920_s12, %s20920_s12, %s20921_s23  }
  0xc5   :  { %s20932_s0 = smov [#allocation28]  }
  0xc6   :  { %s230_s16 = sshll.u32 %s20932_s0, 4  ;;  %s231_s16 = int_to_ptr.vmem [resolvable:$true] %s230_s16 }
  0xc7   :  { %s20873_s20 = scalar_lea.vmem %s231_s16, 16  ;;  %s20877_s15 = scalar_lea.vmem %s231_s16, 32 }
  0xc8   :  { %p20874_p1 = scmp.ne.s32.totalorder %s231_s16, %s20873_s20  ;;  %p20878_p2 = scmp.lt.s32.totalorder %s231_s16, %s231_s16 }
  0xc9   :  { %p20879_p3 = scmp.lt.s32.totalorder %s20877_s15, %s20873_s20 }
  0xcb   :  { %p20880_p4 = por %p20879_p3, %p20878_p2 }
  0xcd   :  { %p20881_p5 = pnand %p20880_p4, %p20874_p1 }
  0xcf   :  { %20884 = shalt.err (!%p20881_p5)
}
  0xd0   :  { %233 = dma.hbm_to_vmem [thread:$0]  %s21761_s18, 16, %s231_s16, [#allocation29]  }
  0xd1   :  { %20885 = dma.done.wait [#allocation3], 175616  }
  0xd2   :  { %20886 = vsyncadd [#allocation3], 4294791680 }
  0xd3   :  { %20887 = dma.done.wait [#allocation5], 57456  }
  0xd4   :  { %20888 = vsyncadd [#allocation5], 4294909840 }
  0xd5   :  { %20889 = dma.done.wait [#allocation8], 2080  }
  0xd6   :  { %20890 = vsyncadd [#allocation8], 4294965216 }
  0xd7   :  { %20891 = dma.done.wait [#allocation11], 2064  }
  0xd8   :  { %20892 = vsyncadd [#allocation11], 4294965232 }
  0xd9   :  { %20893 = dma.done.wait [#allocation14], 8224  }
  0xda   :  { %20894 = vsyncadd [#allocation14], 4294959072 }
  0xdb   :  { %20895 = dma.done.wait [#allocation17], 8256  }
  0xdc   :  { %20896 = vsyncadd [#allocation17], 4294959040 }
  0xdd   :  { %20897 = dma.done.wait [#allocation20], 2080  }
  0xde   :  { %20898 = vsyncadd [#allocation20], 4294965216 }
  0xdf   :  { %20899 = dma.done.wait [#allocation23], 1040  }
  0xe0   :  { %20900 = vsyncadd [#allocation23], 4294966256 }
  0xe1   :  { %20901 = dma.done.wait [#allocation26], 1040  }
  0xe2   :  { %20902 = vsyncadd [#allocation26], 4294966256 }
  0xe3   :  { %20903 = dma.done.wait [#allocation29], 16  }
  0xe4   :  { %20904 = vsyncadd [#allocation29], 4294967280  ;;  %v18190_v0 = vld [vmem:[#allocation2 + $0x624] ss:$112 sps:$4 sm:$0xff]   ;;  %v18194_v2 = vld [vmem:[#allocation2 + $0x620] ss:$112 sps:$4 sm:$0xff]  }
  0xe5   :  { %v18192_v1 = vld [vmem:[#allocation2 + $0x1424] ss:$112 sps:$4 sm:$0xff]   ;;  %8553 = vmatprep.subr.bf16.mxu0 %v18190_v0  ;;  %v18195_v3 = vld [vmem:[#allocation2 + $0x1420] ss:$112 sps:$4 sm:$0xff]   ;;  %s21771_s12 = sld [smem:[#allocation40_spill]]  ;;  %vm8549_vm0 = vcmask 130048  }
  0xe6   :  { %8594 = vmatprep.subr.bf16.mxu1 %v18192_v1  ;;  %v18196_v4 = vld [vmem:[#allocation2 + $0x544] ss:$112 sps:$4 sm:$0xff]   ;;  %8554 = vmatpush1.bf16.msra.mxu0 %v18194_v2  ;;  %v18200_v6 = vld [vmem:[#allocation2 + $0x540] ss:$112 sps:$4 sm:$0xff]   ;;  %vm20935_vm1 = vmmov 0  }
  0xe7   :  { %8595 = vmatpush1.bf16.msra.mxu1 %v18195_v3  ;;  %v18198_v5 = vld [vmem:[#allocation2 + $0x1344] ss:$112 sps:$4 sm:$0xff]   ;;  %8555 = vmatprep.subr.bf16.mxu0 %v18196_v4  ;;  %v18201_v7 = vld [vmem:[#allocation2 + $0x1340] ss:$112 sps:$4 sm:$0xff]  }
  0xe8   :  { %8596 = vmatprep.subr.bf16.mxu1 %v18198_v5  ;;  %v18202_v8 = vld [vmem:[#allocation2 + $0x464] ss:$112 sps:$4 sm:$0xff]   ;;  %v18206_v10 = vld [vmem:[#allocation2 + $0x460] ss:$112 sps:$4 sm:$0xff]  }
  0xe9   :  { %v18204_v9 = vld [vmem:[#allocation2 + $0x1264] ss:$112 sps:$4 sm:$0xff]   ;;  %v18207_v11 = vld [vmem:[#allocation2 + $0x1260] ss:$112 sps:$4 sm:$0xff]  }
  0xea   :  { %8556 = vmatpush1.bf16.msra.mxu0 %v18200_v6  ;;  %v18208_v12 = vld [vmem:[#allocation2 + $0x384] ss:$112 sps:$4 sm:$0xff]   ;;  %v18212_v14 = vld [vmem:[#allocation2 + $0x380] ss:$112 sps:$4 sm:$0xff]  }
  0xeb   :  { %8597 = vmatpush1.bf16.msra.mxu1 %v18201_v7  ;;  %8557 = vmatprep.subr.bf16.mxu0 %v18202_v8  ;;  %v18210_v13 = vld [vmem:[#allocation2 + $0x1184] ss:$112 sps:$4 sm:$0xff]   ;;  %v18213_v15 = vld [vmem:[#allocation2 + $0x1180] ss:$112 sps:$4 sm:$0xff]   ;;  %v290_v48 = vld [vmem:[%s21771_s12 + $0x8] sm:$0xff] }
  0xec   :  { %8598 = vmatprep.subr.bf16.mxu1 %v18204_v9  ;;  %v18214_v16 = vld [vmem:[#allocation2 + $0x2a4] ss:$112 sps:$4 sm:$0xff]   ;;  %v18218_v18 = vld [vmem:[#allocation2 + $0x2a0] ss:$112 sps:$4 sm:$0xff]   ;;  %v21116_v51 = vcombine.high %v290_v48, %v290_v48  ;;  %v21122_v7 = vcombine.low %v290_v48, %v290_v48 }
  0xed   :  { %v18216_v17 = vld [vmem:[#allocation2 + $0x10a4] ss:$112 sps:$4 sm:$0xff]   ;;  %v18219_v19 = vld [vmem:[#allocation2 + $0x10a0] ss:$112 sps:$4 sm:$0xff]  }
  0xee   :  { %8558 = vmatpush1.bf16.msra.mxu0 %v18206_v10  ;;  %v18220_v20 = vld [vmem:[#allocation2 + $0x1c4] ss:$112 sps:$4 sm:$0xff]   ;;  %v18224_v22 = vld [vmem:[#allocation2 + $0x1c0] ss:$112 sps:$4 sm:$0xff]   ;;  %8626 = vmatprep.mubr.bf16.mxu1 %v21116_v51 }
  0xef   :  { %8599 = vmatpush1.bf16.msra.mxu1 %v18207_v11  ;;  %8559 = vmatprep.subr.bf16.mxu0 %v18208_v12  ;;  %v18222_v21 = vld [vmem:[#allocation2 + $0xfc4] ss:$112 sps:$4 sm:$0xff]   ;;  %v18225_v23 = vld [vmem:[#allocation2 + $0xfc0] ss:$112 sps:$4 sm:$0xff]   ;;  %v18301_v11 = vld [vmem:[#allocation2 + $0x62c] ss:$112 sps:$4 sm:$0xff]  }
  0xf0   :  { %8600 = vmatprep.subr.bf16.mxu1 %v18210_v13  ;;  %v18226_v24 = vld [vmem:[#allocation2 + $0xe4] ss:$112 sps:$4 sm:$0xff]   ;;  %v18230_v26 = vld [vmem:[#allocation2 + $0xe0] ss:$112 sps:$4 sm:$0xff]   ;;  %v20933_v13 = vmov 0  }
  0xf1   :  { %v18228_v25 = vld [vmem:[#allocation2 + $0xee4] ss:$112 sps:$4 sm:$0xff]   ;;  %v18231_v27 = vld [vmem:[#allocation2 + $0xee0] ss:$112 sps:$4 sm:$0xff]  }
  0xf2   :  { %8560 = vmatpush1.bf16.msra.mxu0 %v18212_v14  ;;  %v18232_v28 = vld [vmem:[#allocation2 + $0x4] ss:$112 sps:$4 sm:$0xff]   ;;  %v18236_v30 = vld [vmem:[#allocation2] ss:$112 sps:$4 sm:$0xff]  }
  0xf3   :  { %8601 = vmatpush1.bf16.msra.mxu1 %v18213_v15  ;;  %8561 = vmatprep.subr.bf16.mxu0 %v18214_v16  ;;  %v18234_v29 = vld [vmem:[#allocation2 + $0xe04] ss:$112 sps:$4 sm:$0xff]   ;;  %v18237_v31 = vld [vmem:[#allocation2 + $0xe00] ss:$112 sps:$4 sm:$0xff]   ;;  %v18299_v15 = vld [vmem:[#allocation2 + $0x628] ss:$112 sps:$4 sm:$0xff]  }
  0xf4   :  { %8602 = vmatprep.subr.bf16.mxu1 %v18216_v17  ;;  %v18238_v32 = vld [vmem:[#allocation2 + $0xd24] ss:$112 sps:$4 sm:$0xff]   ;;  %v18242_v34 = vld [vmem:[#allocation2 + $0xd20] ss:$112 sps:$4 sm:$0xff]   ;;  %v21130_v17 = vld [vmem:[%s21771_s12 + $0x18] ss:$0 sps:$4 sm:$0xff]  }
  0xf5   :  { %v18240_v33 = vld [vmem:[#allocation2 + $0x1b24] ss:$112 sps:$4 sm:$0xff]   ;;  %v18243_v35 = vld [vmem:[#allocation2 + $0x1b20] ss:$112 sps:$4 sm:$0xff]  }
  0xf6   :  { %8562 = vmatpush1.bf16.msra.mxu0 %v18218_v18  ;;  %v18244_v36 = vld [vmem:[#allocation2 + $0xc44] ss:$112 sps:$4 sm:$0xff]   ;;  %v18248_v38 = vld [vmem:[#allocation2 + $0xc40] ss:$112 sps:$4 sm:$0xff]   ;;  %v18308_v18 = vld [vmem:[#allocation2 + $0x54c] ss:$112 sps:$4 sm:$0xff]  }
  0xf7   :  { %8603 = vmatpush1.bf16.msra.mxu1 %v18219_v19  ;;  %8563 = vmatprep.subr.bf16.mxu0 %v18220_v20  ;;  %v18246_v37 = vld [vmem:[#allocation2 + $0x1a44] ss:$112 sps:$4 sm:$0xff]   ;;  %v18249_v39 = vld [vmem:[#allocation2 + $0x1a40] ss:$112 sps:$4 sm:$0xff]   ;;  %v18306_v20 = vld [vmem:[#allocation2 + $0x548] ss:$112 sps:$4 sm:$0xff]  }
  0xf8   :  { %8604 = vmatprep.subr.bf16.mxu1 %v18222_v21  ;;  %v18250_v40 = vld [vmem:[#allocation2 + $0xb64] ss:$112 sps:$4 sm:$0xff]   ;;  %v18254_v42 = vld [vmem:[#allocation2 + $0xb60] ss:$112 sps:$4 sm:$0xff]  }
  0xf9   :  { %v18252_v41 = vld [vmem:[#allocation2 + $0x1964] ss:$112 sps:$4 sm:$0xff]   ;;  %v18255_v43 = vld [vmem:[#allocation2 + $0x1960] ss:$112 sps:$4 sm:$0xff]  }
  0xfa   :  { %8564 = vmatpush1.bf16.msra.mxu0 %v18224_v22  ;;  %v18256_v44 = vld [vmem:[#allocation2 + $0xa84] ss:$112 sps:$4 sm:$0xff]   ;;  %v18260_v49 = vld [vmem:[#allocation2 + $0xa80] ss:$112 sps:$4 sm:$0xff]   ;;  %v18314_v22 = vld [vmem:[#allocation2 + $0x46c] ss:$112 sps:$4 sm:$0xff]  }
  0xfb   :  { %8605 = vmatpush1.bf16.msra.mxu1 %v18225_v23  ;;  %8565 = vmatprep.subr.bf16.mxu0 %v18226_v24  ;;  %v18258_v45 = vld [vmem:[#allocation2 + $0x1884] ss:$112 sps:$4 sm:$0xff]   ;;  %v18261_v50 = vld [vmem:[#allocation2 + $0x1880] ss:$112 sps:$4 sm:$0xff]   ;;  %v18312_v24 = vld [vmem:[#allocation2 + $0x468] ss:$112 sps:$4 sm:$0xff]  }
  0xfc   :  { %8606 = vmatprep.subr.bf16.mxu1 %v18228_v25  ;;  %v289_v46 = vld [vmem:[%s21771_s12] sm:$0xff] }
  0xfd   :  { %v21111_v47 = vcombine.high %v289_v46, %v289_v46  ;;  %v18262_v52 = vld [vmem:[#allocation2 + $0x9a4] ss:$112 sps:$4 sm:$0xff]   ;;  %v18266_v54 = vld [vmem:[#allocation2 + $0x9a0] ss:$112 sps:$4 sm:$0xff]   ;;  %v21120_v6 = vcombine.low %v289_v46, %v289_v46  ;;  %v18342_v46 = vld [vmem:[#allocation2 + $0x8] ss:$112 sps:$4 sm:$0xff]  }
  0xfe   :  { %8566 = vmatpush1.bf16.msra.mxu0 %v18230_v26  ;;  %v18264_v53 = vld [vmem:[#allocation2 + $0x17a4] ss:$112 sps:$4 sm:$0xff]   ;;  %v18267_v55 = vld [vmem:[#allocation2 + $0x17a0] ss:$112 sps:$4 sm:$0xff]   ;;  %v18320_v26 = vld [vmem:[#allocation2 + $0x38c] ss:$112 sps:$4 sm:$0xff]  }
  0xff   :  { %8607 = vmatpush1.bf16.msra.mxu1 %v18231_v27  ;;  %8567 = vmatprep.subr.bf16.mxu0 %v18232_v28  ;;  %v18268_v56 = vld [vmem:[#allocation2 + $0x8c4] ss:$112 sps:$4 sm:$0xff]   ;;  %v18272_v58 = vld [vmem:[#allocation2 + $0x8c0] ss:$112 sps:$4 sm:$0xff]   ;;  %v18318_v28 = vld [vmem:[#allocation2 + $0x388] ss:$112 sps:$4 sm:$0xff]  }
 0x100   :  { %8608 = vmatprep.subr.bf16.mxu1 %v18234_v29  ;;  %8585 = vmatprep.mubr.bf16.mxu0 %v21111_v47  ;;  %v18270_v57 = vld [vmem:[#allocation2 + $0x16c4] ss:$112 sps:$4 sm:$0xff]   ;;  %v18273_v59 = vld [vmem:[#allocation2 + $0x16c0] ss:$112 sps:$4 sm:$0xff]  }
 0x101   :  { %v18274_v60 = vld [vmem:[#allocation2 + $0x7e4] ss:$112 sps:$4 sm:$0xff]   ;;  %v18278_v62 = vld [vmem:[#allocation2 + $0x7e0] ss:$112 sps:$4 sm:$0xff]  }
 0x102   :  { %8568 = vmatpush1.bf16.msra.mxu0 %v18236_v30  ;;  %v18276_v61 = vld [vmem:[#allocation2 + $0x15e4] ss:$112 sps:$4 sm:$0xff]   ;;  %v18279_v63 = vld [vmem:[#allocation2 + $0x15e0] ss:$112 sps:$4 sm:$0xff]   ;;  %v18326_v30 = vld [vmem:[#allocation2 + $0x2ac] ss:$112 sps:$4 sm:$0xff]  }
 0x103   :  { %8609 = vmatpush1.bf16.msra.mxu1 %v18237_v31  ;;  %8569 = vmatprep.subr.bf16.mxu0 %v18238_v32  ;;  %v18280_v0 = vld [vmem:[#allocation2 + $0x704] ss:$112 sps:$4 sm:$0xff]   ;;  %v18284_v2 = vld [vmem:[#allocation2 + $0x700] ss:$112 sps:$4 sm:$0xff]  }
 0x104   :  { %8610 = vmatprep.subr.bf16.mxu1 %v18240_v33  ;;  %v18282_v1 = vld [vmem:[#allocation2 + $0x1504] ss:$112 sps:$4 sm:$0xff]   ;;  %v18285_v3 = vld [vmem:[#allocation2 + $0x1500] ss:$112 sps:$4 sm:$0xff]  }
 0x105   :  { %v18292_v4 = vld [vmem:[#allocation2 + $0x2224] ss:$112 sps:$4 sm:$0xff]   ;;  %v18290_v8 = vld [vmem:[#allocation2 + $0x2220] ss:$112 sps:$4 sm:$0xff]  }
 0x106   :  { %8570 = vmatpush2.bf16.msra.mxu0 %v18242_v34  ;;  %v18295_v5 = vld [vmem:[#allocation2 + $0x2a04] ss:$112 sps:$4 sm:$0xff]   ;;  %v18293_v9 = vld [vmem:[#allocation2 + $0x2a00] ss:$112 sps:$4 sm:$0xff]   ;;  %v18324_v34 = vld [vmem:[#allocation2 + $0x2a8] ss:$112 sps:$4 sm:$0xff]  }
 0x107   :  { %8611 = vmatpush2.bf16.msra.mxu1 %v18243_v35  ;;  %8571 = vmatprep.subr.bf16.mxu0 %v18244_v36  ;;  %v18298_v10 = vld [vmem:[#allocation2 + $0x2144] ss:$112 sps:$4 sm:$0xff]   ;;  %v18296_v12 = vld [vmem:[#allocation2 + $0x2140] ss:$112 sps:$4 sm:$0xff]   ;;  %v18332_v36 = vld [vmem:[#allocation2 + $0x1cc] ss:$112 sps:$4 sm:$0xff]  }
 0x108   :  { %8612 = vmatprep.subr.bf16.mxu1 %v18246_v37  ;;  %v18304_v14 = vld [vmem:[#allocation2 + $0x2064] ss:$112 sps:$4 sm:$0xff]   ;;  %v18302_v16 = vld [vmem:[#allocation2 + $0x2060] ss:$112 sps:$4 sm:$0xff]  }
 0x109   :  { %v18311_v19 = vld [vmem:[#allocation2 + $0x1f84] ss:$112 sps:$4 sm:$0xff]   ;;  %v18309_v21 = vld [vmem:[#allocation2 + $0x1f80] ss:$112 sps:$4 sm:$0xff]  }
 0x10a   :  { %8572 = vmatpush2.bf16.msra.mxu0 %v18248_v38  ;;  %v18317_v23 = vld [vmem:[#allocation2 + $0x1ea4] ss:$112 sps:$4 sm:$0xff]   ;;  %v18315_v25 = vld [vmem:[#allocation2 + $0x1ea0] ss:$112 sps:$4 sm:$0xff]   ;;  %v18330_v38 = vld [vmem:[#allocation2 + $0x1c8] ss:$112 sps:$4 sm:$0xff]  }
 0x10b   :  { %8613 = vmatpush2.bf16.msra.mxu1 %v18249_v39  ;;  %8573 = vmatprep.subr.bf16.mxu0 %v18250_v40  ;;  %v18323_v27 = vld [vmem:[#allocation2 + $0x1dc4] ss:$112 sps:$4 sm:$0xff]   ;;  %v18321_v29 = vld [vmem:[#allocation2 + $0x1dc0] ss:$112 sps:$4 sm:$0xff]   ;;  %v18338_v40 = vld [vmem:[#allocation2 + $0xec] ss:$112 sps:$4 sm:$0xff]  }
 0x10c   :  { %8614 = vmatprep.subr.bf16.mxu1 %v18252_v41  ;;  %v18329_v31 = vld [vmem:[#allocation2 + $0x1ce4] ss:$112 sps:$4 sm:$0xff]   ;;  %v18327_v35 = vld [vmem:[#allocation2 + $0x1ce0] ss:$112 sps:$4 sm:$0xff]  }
 0x10d   :  { %v21138_v32 = vld [vmem:[%s21771_s12 + $0x10] sm:$0xff] }
 0x10e   :  { %8574 = vmatpush2.bf16.msra.mxu0 %v18254_v42  ;;  %v21142_v33 = vcombine.high %v21138_v32, %v21138_v32  ;;  %v18335_v37 = vld [vmem:[#allocation2 + $0x1c04] ss:$112 sps:$4 sm:$0xff]   ;;  %v18333_v39 = vld [vmem:[#allocation2 + $0x1c00] ss:$112 sps:$4 sm:$0xff]   ;;  %v18336_v42 = vld [vmem:[#allocation2 + $0xe8] ss:$112 sps:$4 sm:$0xff]  }
 0x10f   :  { %8615 = vmatpush2.bf16.msra.mxu1 %v18255_v43  ;;  %8575 = vmatprep.subr.bf16.mxu0 %v18256_v44  ;;  %v18341_v41 = vld [vmem:[#allocation2 + $0x2924] ss:$112 sps:$4 sm:$0xff]   ;;  %v18339_v43 = vld [vmem:[#allocation2 + $0x2920] ss:$112 sps:$4 sm:$0xff]   ;;  %v18344_v44 = vld [vmem:[#allocation2 + $0xc] ss:$112 sps:$4 sm:$0xff]  }
 0x110   :  { %8616 = vmatprep.subr.bf16.mxu1 %v18258_v45  ;;  %v18347_v45 = vld [vmem:[#allocation2 + $0x2844] ss:$112 sps:$4 sm:$0xff]   ;;  %v18345_v48 = vld [vmem:[#allocation2 + $0x2840] ss:$112 sps:$4 sm:$0xff]  }
 0x112   :  { %8576 = vmatpush2.bf16.msra.mxu0 %v18260_v49  ;;  %v18350_v49 = vld [vmem:[#allocation2 + $0xd2c] ss:$112 sps:$4 sm:$0xff]  }
 0x113   :  { %8617 = vmatpush2.bf16.msra.mxu1 %v18261_v50  ;;  %8577 = vmatprep.subr.bf16.mxu0 %v18262_v52  ;;  %v18353_v50 = vld [vmem:[#allocation2 + $0x2764] ss:$112 sps:$4 sm:$0xff]   ;;  %v18348_v52 = vld [vmem:[#allocation2 + $0xd28] ss:$112 sps:$4 sm:$0xff]  }
 0x114   :  { %8618 = vmatprep.subr.bf16.mxu1 %v18264_v53  ;;  %v18351_v53 = vld [vmem:[#allocation2 + $0x2760] ss:$112 sps:$4 sm:$0xff]  }
 0x116   :  { %8578 = vmatpush2.bf16.msra.mxu0 %v18266_v54  ;;  %v18356_v54 = vld [vmem:[#allocation2 + $0xc4c] ss:$112 sps:$4 sm:$0xff]  }
 0x117   :  { %8619 = vmatpush2.bf16.msra.mxu1 %v18267_v55  ;;  %8579 = vmatprep.subr.bf16.mxu0 %v18268_v56  ;;  %v18359_v55 = vld [vmem:[#allocation2 + $0x2684] ss:$112 sps:$4 sm:$0xff]   ;;  %v18354_v56 = vld [vmem:[#allocation2 + $0xc48] ss:$112 sps:$4 sm:$0xff]  }
 0x118   :  { %8620 = vmatprep.subr.bf16.mxu1 %v18270_v57  ;;  %v18357_v57 = vld [vmem:[#allocation2 + $0x2680] ss:$112 sps:$4 sm:$0xff]  }
 0x11a   :  { %8580 = vmatpush2.bf16.msra.mxu0 %v18272_v58  ;;  %v18362_v58 = vld [vmem:[#allocation2 + $0xb6c] ss:$112 sps:$4 sm:$0xff]  }
 0x11b   :  { %8621 = vmatpush2.bf16.msra.mxu1 %v18273_v59  ;;  %8581 = vmatprep.subr.bf16.mxu0 %v18274_v60  ;;  %v18365_v59 = vld [vmem:[#allocation2 + $0x25a4] ss:$112 sps:$4 sm:$0xff]   ;;  %v18360_v60 = vld [vmem:[#allocation2 + $0xb68] ss:$112 sps:$4 sm:$0xff]  }
 0x11c   :  { %8622 = vmatprep.subr.bf16.mxu1 %v18276_v61  ;;  %v18363_v61 = vld [vmem:[#allocation2 + $0x25a0] ss:$112 sps:$4 sm:$0xff]  }
 0x11e   :  { %8582 = vmatpush2.bf16.msra.mxu0 %v18278_v62  ;;  %v18368_v62 = vld [vmem:[#allocation2 + $0xa8c] ss:$112 sps:$4 sm:$0xff]  }
 0x11f   :  { %8623 = vmatpush2.bf16.msra.mxu1 %v18279_v63  ;;  %8583 = vmatprep.subr.bf16.mxu0 %v18280_v0  ;;  %v18371_v63 = vld [vmem:[#allocation2 + $0x24c4] ss:$112 sps:$4 sm:$0xff]   ;;  %v18366_v0 = vld [vmem:[#allocation2 + $0xa88] ss:$112 sps:$4 sm:$0xff]  }
 0x120   :  { %8624 = vmatprep.subr.bf16.mxu1 %v18282_v1  ;;  %v18369_v1 = vld [vmem:[#allocation2 + $0x24c0] ss:$112 sps:$4 sm:$0xff]  }
 0x122   :  { %8584 = vmatpush2.bf16.msra.mxu0 %v18284_v2  ;;  %v18374_v2 = vld [vmem:[#allocation2 + $0x9ac] ss:$112 sps:$4 sm:$0xff]  }
 0x123   :  { %8625 = vmatpush2.bf16.msra.mxu1 %v18285_v3  ;;  %8635 = vmatprep.subr.bf16.mxu0 %v18292_v4  ;;  %v18377_v3 = vld [vmem:[#allocation2 + $0x23e4] ss:$112 sps:$4 sm:$0xff]   ;;  %v18372_v4 = vld [vmem:[#allocation2 + $0x9a8] ss:$112 sps:$4 sm:$0xff]  }
 0x124   :  { %8690 = vmatprep.subr.bf16.mxu1 %v18295_v5  ;;  %v18375_v5 = vld [vmem:[#allocation2 + $0x23e0] ss:$112 sps:$4 sm:$0xff]  }
 0x125   :  { %8586 = vmatmul.mubr.bf16.vlgmr.msra.gmra.mxu0 %v21120_v6 }
 0x126   :  { %8627 = vmatmul.mubr.bf16.vlgmr.msra.gmra.mxu1 %v21122_v7  ;;  %8636 = vmatpush1.bf16.msra.mxu0 %v18290_v8  ;;  %v18380_v8 = vld [vmem:[#allocation2 + $0x8cc] ss:$112 sps:$4 sm:$0xff]  }
 0x127   :  { %8691 = vmatpush1.bf16.msra.mxu1 %v18293_v9  ;;  %8637 = vmatprep.subr.bf16.mxu0 %v18298_v10  ;;  %v18383_v9 = vld [vmem:[#allocation2 + $0x2304] ss:$112 sps:$4 sm:$0xff]   ;;  %v18378_v10 = vld [vmem:[#allocation2 + $0x8c8] ss:$112 sps:$4 sm:$0xff]  }
 0x128   :  { %8708 = vmatprep.mubr.bf16.mxu1 %v20933_v13  ;;  %8717 = vmatprep.subr.bf16.mxu1 %v18301_v11  ;;  %v18381_v11 = vld [vmem:[#allocation2 + $0x2300] ss:$112 sps:$4 sm:$0xff]  }
 0x129   :  { %8667 = vmatprep.mubr.bf16.mxu0 %v21142_v33 }
 0x12a   :  { %8638 = vmatpush1.bf16.msra.mxu0 %v18296_v12  ;;  %v18387_v12 = vld [vmem:[#allocation2 + $0x7ec] ss:$112 sps:$4 sm:$0xff]  }
 0x12b   :  { %8639 = vmatprep.subr.bf16.mxu0 %v18304_v14  ;;  %v18391_v14 = vld [vmem:[#allocation2 + $0x142c] ss:$112 sps:$4 sm:$0xff]  }
 0x12e   :  { %17399 = vmatmul.mubr.msk.bf16.vlgmr.msra.gmra.mxu1 %vm8549_vm0, %v21130_v17  ;;  %8640 = vmatpush1.bf16.msra.mxu0 %v18302_v16  ;;  %v21147_v16 = vcombine.low %v21138_v32, %v21138_v32  ;;  %v18415_v32 = vld [vmem:[#allocation2 + $0x10ac] ss:$112 sps:$4 sm:$0xff]  }
 0x12f   :  { %8718 = vmatpush1.bf16.msra.mxu1 %v18299_v15  ;;  %8641 = vmatprep.subr.bf16.mxu0 %v18311_v19  ;;  %v18385_v15 = vld [vmem:[#allocation2 + $0x7e8] ss:$112 sps:$4 sm:$0xff]   ;;  %v18394_v19 = vld [vmem:[#allocation2 + $0x70c] ss:$112 sps:$4 sm:$0xff]  }
 0x130   :  { %8719 = vmatprep.subr.bf16.mxu1 %v18308_v18  ;;  %8749 = vmatprep.mubr.bf16.mxu1 %v21111_v47  ;;  %v18389_v18 = vld [vmem:[#allocation2 + $0x1428] ss:$112 sps:$4 sm:$0xff]  }
 0x132   :  { %8642 = vmatpush1.bf16.msra.mxu0 %v18309_v21  ;;  %v18392_v21 = vld [vmem:[#allocation2 + $0x708] ss:$112 sps:$4 sm:$0xff]  }
 0x133   :  { %8720 = vmatpush1.bf16.msra.mxu1 %v18306_v20  ;;  %8643 = vmatprep.subr.bf16.mxu0 %v18317_v23  ;;  %v18397_v20 = vld [vmem:[#allocation2 + $0x134c] ss:$112 sps:$4 sm:$0xff]  }
 0x134   :  { %8721 = vmatprep.subr.bf16.mxu1 %v18314_v22  ;;  %v18395_v22 = vld [vmem:[#allocation2 + $0x1348] ss:$112 sps:$4 sm:$0xff]   ;;  %v18400_v23 = vld [vmem:[#allocation2 + $0x222c] ss:$112 sps:$4 sm:$0xff]  }
 0x136   :  { %8644 = vmatpush1.bf16.msra.mxu0 %v18315_v25  ;;  %v18398_v25 = vld [vmem:[#allocation2 + $0x2228] ss:$112 sps:$4 sm:$0xff]  }
 0x137   :  { %8722 = vmatpush1.bf16.msra.mxu1 %v18312_v24  ;;  %8645 = vmatprep.subr.bf16.mxu0 %v18323_v27  ;;  %v18403_v24 = vld [vmem:[#allocation2 + $0x126c] ss:$112 sps:$4 sm:$0xff]  }
 0x138   :  { %8723 = vmatprep.subr.bf16.mxu1 %v18320_v26  ;;  %v18401_v26 = vld [vmem:[#allocation2 + $0x1268] ss:$112 sps:$4 sm:$0xff]   ;;  %v18406_v27 = vld [vmem:[#allocation2 + $0x214c] ss:$112 sps:$4 sm:$0xff]  }
 0x13a   :  { %8646 = vmatpush1.bf16.msra.mxu0 %v18321_v29  ;;  %v18404_v29 = vld [vmem:[#allocation2 + $0x2148] ss:$112 sps:$4 sm:$0xff]  }
 0x13b   :  { %8724 = vmatpush1.bf16.msra.mxu1 %v18318_v28  ;;  %8647 = vmatprep.subr.bf16.mxu0 %v18329_v31  ;;  %v18409_v28 = vld [vmem:[#allocation2 + $0x118c] ss:$112 sps:$4 sm:$0xff]  }
 0x13c   :  { %8725 = vmatprep.subr.bf16.mxu1 %v18326_v30  ;;  %v18407_v30 = vld [vmem:[#allocation2 + $0x1188] ss:$112 sps:$4 sm:$0xff]   ;;  %v18412_v31 = vld [vmem:[#allocation2 + $0x206c] ss:$112 sps:$4 sm:$0xff]  }
 0x13e   :  { %8648 = vmatpush1.bf16.msra.mxu0 %v18327_v35  ;;  %v18413_v35 = vld [vmem:[#allocation2 + $0x10a8] ss:$112 sps:$4 sm:$0xff]  }
 0x13f   :  { %8726 = vmatpush1.bf16.msra.mxu1 %v18324_v34  ;;  %8649 = vmatprep.subr.bf16.mxu0 %v18335_v37  ;;  %v18410_v34 = vld [vmem:[#allocation2 + $0x2068] ss:$112 sps:$4 sm:$0xff]   ;;  %v18421_v37 = vld [vmem:[#allocation2 + $0xfcc] ss:$112 sps:$4 sm:$0xff]  }
 0x140   :  { %8727 = vmatprep.subr.bf16.mxu1 %v18332_v36  ;;  %v18418_v36 = vld [vmem:[#allocation2 + $0x1f8c] ss:$112 sps:$4 sm:$0xff]  }
 0x142   :  { %8650 = vmatpush1.bf16.msra.mxu0 %v18333_v39  ;;  %v18419_v39 = vld [vmem:[#allocation2 + $0xfc8] ss:$112 sps:$4 sm:$0xff]  }
 0x143   :  { %8728 = vmatpush1.bf16.msra.mxu1 %v18330_v38  ;;  %8651 = vmatprep.subr.bf16.mxu0 %v18341_v41  ;;  %v18416_v38 = vld [vmem:[#allocation2 + $0x1f88] ss:$112 sps:$4 sm:$0xff]   ;;  %v18427_v41 = vld [vmem:[#allocation2 + $0xeec] ss:$112 sps:$4 sm:$0xff]  }
 0x144   :  { %8729 = vmatprep.subr.bf16.mxu1 %v18338_v40  ;;  %v18424_v40 = vld [vmem:[#allocation2 + $0x1eac] ss:$112 sps:$4 sm:$0xff]  }
 0x146   :  { %8652 = vmatpush2.bf16.msra.mxu0 %v18339_v43  ;;  %v18425_v43 = vld [vmem:[#allocation2 + $0xee8] ss:$112 sps:$4 sm:$0xff]  }
 0x147   :  { %8730 = vmatpush1.bf16.msra.mxu1 %v18336_v42  ;;  %8653 = vmatprep.subr.bf16.mxu0 %v18347_v45  ;;  %v18422_v42 = vld [vmem:[#allocation2 + $0x1ea8] ss:$112 sps:$4 sm:$0xff]   ;;  %v18433_v45 = vld [vmem:[#allocation2 + $0xe0c] ss:$112 sps:$4 sm:$0xff]  }
 0x148   :  { %8731 = vmatprep.subr.bf16.mxu1 %v18344_v44  ;;  %v18430_v44 = vld [vmem:[#allocation2 + $0x1dcc] ss:$112 sps:$4 sm:$0xff]  }
 0x14a   :  { %8654 = vmatpush2.bf16.msra.mxu0 %v18345_v48  ;;  %v18431_v48 = vld [vmem:[#allocation2 + $0xe08] ss:$112 sps:$4 sm:$0xff]  }
 0x14b   :  { %8732 = vmatpush1.bf16.msra.mxu1 %v18342_v46  ;;  %8655 = vmatprep.subr.bf16.mxu0 %v18353_v50  ;;  %v18428_v46 = vld [vmem:[#allocation2 + $0x1dc8] ss:$112 sps:$4 sm:$0xff]   ;;  %v18439_v50 = vld [vmem:[#allocation2 + $0x1b2c] ss:$112 sps:$4 sm:$0xff]  }
 0x14c   :  { %8733 = vmatprep.subr.bf16.mxu1 %v18350_v49  ;;  %v18436_v49 = vld [vmem:[#allocation2 + $0x1cec] ss:$112 sps:$4 sm:$0xff]  }
 0x14e   :  { %8656 = vmatpush2.bf16.msra.mxu0 %v18351_v53  ;;  %v18437_v53 = vld [vmem:[#allocation2 + $0x1b28] ss:$112 sps:$4 sm:$0xff]  }
 0x14f   :  { %8734 = vmatpush2.bf16.msra.mxu1 %v18348_v52  ;;  %8657 = vmatprep.subr.bf16.mxu0 %v18359_v55  ;;  %v18434_v52 = vld [vmem:[#allocation2 + $0x1ce8] ss:$112 sps:$4 sm:$0xff]   ;;  %v18445_v55 = vld [vmem:[#allocation2 + $0x1a4c] ss:$112 sps:$4 sm:$0xff]  }
 0x150   :  { %8735 = vmatprep.subr.bf16.mxu1 %v18356_v54  ;;  %v18442_v54 = vld [vmem:[#allocation2 + $0x1c0c] ss:$112 sps:$4 sm:$0xff]  }
 0x152   :  { %8658 = vmatpush2.bf16.msra.mxu0 %v18357_v57  ;;  %v18443_v57 = vld [vmem:[#allocation2 + $0x1a48] ss:$112 sps:$4 sm:$0xff]  }
 0x153   :  { %8736 = vmatpush2.bf16.msra.mxu1 %v18354_v56  ;;  %8659 = vmatprep.subr.bf16.mxu0 %v18365_v59  ;;  %v18440_v56 = vld [vmem:[#allocation2 + $0x1c08] ss:$112 sps:$4 sm:$0xff]   ;;  %v18451_v59 = vld [vmem:[#allocation2 + $0x196c] ss:$112 sps:$4 sm:$0xff]  }
 0x154   :  { %8737 = vmatprep.subr.bf16.mxu1 %v18362_v58  ;;  %v18448_v58 = vld [vmem:[#allocation2 + $0x292c] ss:$112 sps:$4 sm:$0xff]  }
 0x156   :  { %8660 = vmatpush2.bf16.msra.mxu0 %v18363_v61  ;;  %v18449_v61 = vld [vmem:[#allocation2 + $0x1968] ss:$112 sps:$4 sm:$0xff]  }
 0x157   :  { %8738 = vmatpush2.bf16.msra.mxu1 %v18360_v60  ;;  %8661 = vmatprep.subr.bf16.mxu0 %v18371_v63  ;;  %v18446_v60 = vld [vmem:[#allocation2 + $0x2928] ss:$112 sps:$4 sm:$0xff]   ;;  %v18457_v63 = vld [vmem:[#allocation2 + $0x188c] ss:$112 sps:$4 sm:$0xff]  }
 0x158   :  { %8739 = vmatprep.subr.bf16.mxu1 %v18368_v62  ;;  %v18454_v62 = vld [vmem:[#allocation2 + $0x284c] ss:$112 sps:$4 sm:$0xff]  }
 0x15a   :  { %8662 = vmatpush2.bf16.msra.mxu0 %v18369_v1  ;;  %v18455_v1 = vld [vmem:[#allocation2 + $0x1888] ss:$112 sps:$4 sm:$0xff]  }
 0x15b   :  { %8740 = vmatpush2.bf16.msra.mxu1 %v18366_v0  ;;  %8663 = vmatprep.subr.bf16.mxu0 %v18377_v3  ;;  %v18452_v0 = vld [vmem:[#allocation2 + $0x2848] ss:$112 sps:$4 sm:$0xff]   ;;  %v18463_v3 = vld [vmem:[#allocation2 + $0x17ac] ss:$112 sps:$4 sm:$0xff]  }
 0x15c   :  { %8741 = vmatprep.subr.bf16.mxu1 %v18374_v2  ;;  %v18460_v2 = vld [vmem:[#allocation2 + $0x276c] ss:$112 sps:$4 sm:$0xff]  }
 0x15e   :  { %8664 = vmatpush2.bf16.msra.mxu0 %v18375_v5  ;;  %v18461_v5 = vld [vmem:[#allocation2 + $0x17a8] ss:$112 sps:$4 sm:$0xff]  }
 0x15f   :  { %8742 = vmatpush2.bf16.msra.mxu1 %v18372_v4  ;;  %8665 = vmatprep.subr.bf16.mxu0 %v18383_v9  ;;  %v18458_v4 = vld [vmem:[#allocation2 + $0x2768] ss:$112 sps:$4 sm:$0xff]   ;;  %v18469_v9 = vld [vmem:[#allocation2 + $0x16cc] ss:$112 sps:$4 sm:$0xff]  }
 0x160   :  { %8743 = vmatprep.subr.bf16.mxu1 %v18380_v8  ;;  %v18466_v8 = vld [vmem:[#allocation2 + $0x268c] ss:$112 sps:$4 sm:$0xff]  }
 0x162   :  { %8666 = vmatpush2.bf16.msra.mxu0 %v18381_v11  ;;  %v18467_v11 = vld [vmem:[#allocation2 + $0x16c8] ss:$112 sps:$4 sm:$0xff]  }
 0x163   :  { %8744 = vmatpush2.bf16.msra.mxu1 %v18378_v10  ;;  %8758 = vmatprep.subr.bf16.mxu0 %v18391_v14  ;;  %v18464_v10 = vld [vmem:[#allocation2 + $0x2688] ss:$112 sps:$4 sm:$0xff]   ;;  %v18475_v14 = vld [vmem:[#allocation2 + $0x15ec] ss:$112 sps:$4 sm:$0xff]  }
 0x164   :  { %8745 = vmatprep.subr.bf16.mxu1 %v18387_v12  ;;  %v18472_v12 = vld [vmem:[#allocation2 + $0x25ac] ss:$112 sps:$4 sm:$0xff]  }
 0x165   :  { %8668 = vmatmul.mubr.bf16.vlgmr.msra.gmra.mxu0 %v21147_v16 }
 0x166   :  { %8759 = vmatpush1.bf16.msra.mxu0 %v18389_v18  ;;  %8790 = vmatprep.mubr.bf16.mxu0 %v21116_v51  ;;  %v18473_v18 = vld [vmem:[#allocation2 + $0x15e8] ss:$112 sps:$4 sm:$0xff]  }
 0x167   :  { %8746 = vmatpush2.bf16.msra.mxu1 %v18385_v15  ;;  %8760 = vmatprep.subr.bf16.mxu0 %v18397_v20  ;;  %v18470_v15 = vld [vmem:[#allocation2 + $0x25a8] ss:$112 sps:$4 sm:$0xff]   ;;  %v18481_v20 = vld [vmem:[#allocation2 + $0x150c] ss:$112 sps:$4 sm:$0xff]  }
 0x168   :  { %8747 = vmatprep.subr.bf16.mxu1 %v18394_v19  ;;  %v18478_v19 = vld [vmem:[#allocation2 + $0x24cc] ss:$112 sps:$4 sm:$0xff]  }
 0x16a   :  { %8761 = vmatpush1.bf16.msra.mxu0 %v18395_v22  ;;  %v18479_v22 = vld [vmem:[#allocation2 + $0x1508] ss:$112 sps:$4 sm:$0xff]  }
 0x16b   :  { %8748 = vmatpush2.bf16.msra.mxu1 %v18392_v21  ;;  %8762 = vmatprep.subr.bf16.mxu0 %v18403_v24  ;;  %v18476_v21 = vld [vmem:[#allocation2 + $0x24c8] ss:$112 sps:$4 sm:$0xff]   ;;  %v18487_v24 = vld [vmem:[#allocation2 + $0x634] ss:$112 sps:$4 sm:$0xff]  }
 0x16c   :  { %8799 = vmatprep.subr.bf16.mxu1 %v18400_v23  ;;  %v18484_v23 = vld [vmem:[#allocation2 + $0x23ec] ss:$112 sps:$4 sm:$0xff]  }
 0x16e   :  { %8750 = vmatmul.mubr.bf16.vlgmr.msra.gmra.mxu1 %v21120_v6  ;;  %8763 = vmatpush1.bf16.msra.mxu0 %v18401_v26  ;;  %v18485_v26 = vld [vmem:[#allocation2 + $0x630] ss:$112 sps:$4 sm:$0xff]  }
 0x16f   :  { %8800 = vmatpush1.bf16.msra.mxu1 %v18398_v25  ;;  %8764 = vmatprep.subr.bf16.mxu0 %v18409_v28  ;;  %v18482_v25 = vld [vmem:[#allocation2 + $0x23e8] ss:$112 sps:$4 sm:$0xff]   ;;  %v18493_v28 = vld [vmem:[#allocation2 + $0x554] ss:$112 sps:$4 sm:$0xff]  }
 0x170   :  { %8801 = vmatprep.subr.bf16.mxu1 %v18406_v27  ;;  %8831 = vmatprep.mubr.bf16.mxu1 %v21142_v33  ;;  %v18490_v27 = vld [vmem:[#allocation2 + $0x230c] ss:$112 sps:$4 sm:$0xff]  }
 0x172   :  { %8765 = vmatpush1.bf16.msra.mxu0 %v18407_v30  ;;  %v18491_v30 = vld [vmem:[#allocation2 + $0x550] ss:$112 sps:$4 sm:$0xff]  }
 0x173   :  { %8802 = vmatpush1.bf16.msra.mxu1 %v18404_v29  ;;  %8766 = vmatprep.subr.bf16.mxu0 %v18415_v32  ;;  %v18488_v29 = vld [vmem:[#allocation2 + $0x2308] ss:$112 sps:$4 sm:$0xff]   ;;  %v18499_v32 = vld [vmem:[#allocation2 + $0x474] ss:$112 sps:$4 sm:$0xff]  }
 0x174   :  { %8803 = vmatprep.subr.bf16.mxu1 %v18412_v31  ;;  %v18496_v31 = vld [vmem:[#allocation2 + $0x2a0c] ss:$112 sps:$4 sm:$0xff]  }
 0x176   :  { %8767 = vmatpush1.bf16.msra.mxu0 %v18413_v35  ;;  %v18497_v35 = vld [vmem:[#allocation2 + $0x470] ss:$112 sps:$4 sm:$0xff]  }
 0x177   :  { %8804 = vmatpush1.bf16.msra.mxu1 %v18410_v34  ;;  %8768 = vmatprep.subr.bf16.mxu0 %v18421_v37  ;;  %v18494_v34 = vld [vmem:[#allocation2 + $0x2a08] ss:$112 sps:$4 sm:$0xff]   ;;  %v18505_v37 = vld [vmem:[#allocation2 + $0x1434] ss:$112 sps:$4 sm:$0xff]  }
 0x178   :  { %8805 = vmatprep.subr.bf16.mxu1 %v18418_v36  ;;  %v18502_v36 = vld [vmem:[#allocation2 + $0x394] ss:$112 sps:$4 sm:$0xff]  }
 0x17a   :  { %8769 = vmatpush1.bf16.msra.mxu0 %v18419_v39  ;;  %v18508_v39 = vld [vmem:[#allocation2 + $0x2b4] ss:$112 sps:$4 sm:$0xff]  }
 0x17b   :  { %8806 = vmatpush1.bf16.msra.mxu1 %v18416_v38  ;;  %8770 = vmatprep.subr.bf16.mxu0 %v18427_v41  ;;  %v18500_v38 = vld [vmem:[#allocation2 + $0x390] ss:$112 sps:$4 sm:$0xff]  }
 0x17c   :  { %8807 = vmatprep.subr.bf16.mxu1 %v18424_v40  ;;  %v18503_v40 = vld [vmem:[#allocation2 + $0x1430] ss:$112 sps:$4 sm:$0xff]  }
 0x17d   :  { %v18506_v41 = vld [vmem:[#allocation2 + $0x2b0] ss:$112 sps:$4 sm:$0xff]  }
 0x17e   :  { %8771 = vmatpush1.bf16.msra.mxu0 %v18425_v43  ;;  %v18514_v43 = vld [vmem:[#allocation2 + $0x1d4] ss:$112 sps:$4 sm:$0xff]  }
 0x17f   :  { %8808 = vmatpush1.bf16.msra.mxu1 %v18422_v42  ;;  %8772 = vmatprep.subr.bf16.mxu0 %v18433_v45  ;;  %v18511_v42 = vld [vmem:[#allocation2 + $0x1354] ss:$112 sps:$4 sm:$0xff]   ;;  %v18512_v45 = vld [vmem:[#allocation2 + $0x1d0] ss:$112 sps:$4 sm:$0xff]  }
 0x180   :  { %8809 = vmatprep.subr.bf16.mxu1 %v18430_v44  ;;  %v18509_v44 = vld [vmem:[#allocation2 + $0x1350] ss:$112 sps:$4 sm:$0xff]  }
 0x182   :  { %8773 = vmatpush1.bf16.msra.mxu0 %v18431_v48  ;;  %v18520_v48 = vld [vmem:[#allocation2 + $0xf4] ss:$112 sps:$4 sm:$0xff]  }
 0x183   :  { %8810 = vmatpush1.bf16.msra.mxu1 %v18428_v46  ;;  %8774 = vmatprep.subr.bf16.mxu0 %v18439_v50  ;;  %v18517_v46 = vld [vmem:[#allocation2 + $0x1274] ss:$112 sps:$4 sm:$0xff]   ;;  %v18518_v50 = vld [vmem:[#allocation2 + $0xf0] ss:$112 sps:$4 sm:$0xff]  }
 0x184   :  { %8811 = vmatprep.subr.bf16.mxu1 %v18436_v49  ;;  %v18515_v49 = vld [vmem:[#allocation2 + $0x1270] ss:$112 sps:$4 sm:$0xff]  }
 0x186   :  { %8775 = vmatpush2.bf16.msra.mxu0 %v18437_v53  ;;  %v18526_v53 = vld [vmem:[#allocation2 + $0x14] ss:$112 sps:$4 sm:$0xff]  }
 0x187   :  { %8812 = vmatpush1.bf16.msra.mxu1 %v18434_v52  ;;  %8776 = vmatprep.subr.bf16.mxu0 %v18445_v55  ;;  %v18523_v52 = vld [vmem:[#allocation2 + $0x1194] ss:$112 sps:$4 sm:$0xff]  }
 0x188   :  { %8813 = vmatprep.subr.bf16.mxu1 %v18442_v54  ;;  %v18521_v54 = vld [vmem:[#allocation2 + $0x1190] ss:$112 sps:$4 sm:$0xff]   ;;  %v18529_v55 = vld [vmem:[#allocation2 + $0x10b4] ss:$112 sps:$4 sm:$0xff]  }
 0x18a   :  { %8777 = vmatpush2.bf16.msra.mxu0 %v18443_v57  ;;  %v18527_v57 = vld [vmem:[#allocation2 + $0x10b0] ss:$112 sps:$4 sm:$0xff]  }
 0x18b   :  { %8814 = vmatpush1.bf16.msra.mxu1 %v18440_v56  ;;  %8778 = vmatprep.subr.bf16.mxu0 %v18451_v59  ;;  %v18532_v56 = vld [vmem:[#allocation2 + $0xd34] ss:$112 sps:$4 sm:$0xff]  }
 0x18c   :  { %8815 = vmatprep.subr.bf16.mxu1 %v18448_v58  ;;  %v18530_v58 = vld [vmem:[#allocation2 + $0xd30] ss:$112 sps:$4 sm:$0xff]   ;;  %v18535_v59 = vld [vmem:[#allocation2 + $0xfd4] ss:$112 sps:$4 sm:$0xff]  }
 0x18e   :  { %8779 = vmatpush2.bf16.msra.mxu0 %v18449_v61  ;;  %v18533_v61 = vld [vmem:[#allocation2 + $0xfd0] ss:$112 sps:$4 sm:$0xff]  }
 0x18f   :  { %8816 = vmatpush2.bf16.msra.mxu1 %v18446_v60  ;;  %8780 = vmatprep.subr.bf16.mxu0 %v18457_v63  ;;  %v18538_v60 = vld [vmem:[#allocation2 + $0xc54] ss:$112 sps:$4 sm:$0xff]  }
 0x190   :  { %8817 = vmatprep.subr.bf16.mxu1 %v18454_v62  ;;  %v18536_v62 = vld [vmem:[#allocation2 + $0xc50] ss:$112 sps:$4 sm:$0xff]   ;;  %v18541_v63 = vld [vmem:[#allocation2 + $0xef4] ss:$112 sps:$4 sm:$0xff]  }
 0x192   :  { %8781 = vmatpush2.bf16.msra.mxu0 %v18455_v1  ;;  %v18539_v1 = vld [vmem:[#allocation2 + $0xef0] ss:$112 sps:$4 sm:$0xff]  }
 0x193   :  { %8818 = vmatpush2.bf16.msra.mxu1 %v18452_v0  ;;  %8782 = vmatprep.subr.bf16.mxu0 %v18463_v3  ;;  %v18544_v0 = vld [vmem:[#allocation2 + $0xb74] ss:$112 sps:$4 sm:$0xff]  }
 0x194   :  { %8819 = vmatprep.subr.bf16.mxu1 %v18460_v2  ;;  %v18542_v2 = vld [vmem:[#allocation2 + $0xb70] ss:$112 sps:$4 sm:$0xff]   ;;  %v18547_v3 = vld [vmem:[#allocation2 + $0xe14] ss:$112 sps:$4 sm:$0xff]  }
 0x196   :  { %8783 = vmatpush2.bf16.msra.mxu0 %v18461_v5  ;;  %v18545_v5 = vld [vmem:[#allocation2 + $0xe10] ss:$112 sps:$4 sm:$0xff]  }
 0x197   :  { %8820 = vmatpush2.bf16.msra.mxu1 %v18458_v4  ;;  %8784 = vmatprep.subr.bf16.mxu0 %v18469_v9  ;;  %v18550_v4 = vld [vmem:[#allocation2 + $0xa94] ss:$112 sps:$4 sm:$0xff]  }
 0x198   :  { %8821 = vmatprep.subr.bf16.mxu1 %v18466_v8  ;;  %v18548_v8 = vld [vmem:[#allocation2 + $0xa90] ss:$112 sps:$4 sm:$0xff]   ;;  %v18553_v9 = vld [vmem:[#allocation2 + $0x1b34] ss:$112 sps:$4 sm:$0xff]  }
 0x19a   :  { %8785 = vmatpush2.bf16.msra.mxu0 %v18467_v11  ;;  %v18551_v11 = vld [vmem:[#allocation2 + $0x1b30] ss:$112 sps:$4 sm:$0xff]  }
 0x19b   :  { %8822 = vmatpush2.bf16.msra.mxu1 %v18464_v10  ;;  %8786 = vmatprep.subr.bf16.mxu0 %v18475_v14  ;;  %v18556_v10 = vld [vmem:[#allocation2 + $0x9b4] ss:$112 sps:$4 sm:$0xff]  }
 0x19c   :  { %8823 = vmatprep.subr.bf16.mxu1 %v18472_v12  ;;  %v18554_v12 = vld [vmem:[#allocation2 + $0x9b0] ss:$112 sps:$4 sm:$0xff]   ;;  %v18559_v14 = vld [vmem:[#allocation2 + $0x1a54] ss:$112 sps:$4 sm:$0xff]  }
 0x19e   :  { %8787 = vmatpush2.bf16.msra.mxu0 %v18473_v18  ;;  %v18557_v18 = vld [vmem:[#allocation2 + $0x1a50] ss:$112 sps:$4 sm:$0xff]  }
 0x19f   :  { %8824 = vmatpush2.bf16.msra.mxu1 %v18470_v15  ;;  %8788 = vmatprep.subr.bf16.mxu0 %v18481_v20  ;;  %v18562_v15 = vld [vmem:[#allocation2 + $0x8d4] ss:$112 sps:$4 sm:$0xff]  }
 0x1a0   :  { %8825 = vmatprep.subr.bf16.mxu1 %v18478_v19  ;;  %v18560_v19 = vld [vmem:[#allocation2 + $0x8d0] ss:$112 sps:$4 sm:$0xff]   ;;  %v18565_v20 = vld [vmem:[#allocation2 + $0x1974] ss:$112 sps:$4 sm:$0xff]  }
 0x1a2   :  { %8789 = vmatpush2.bf16.msra.mxu0 %v18479_v22  ;;  %v18563_v22 = vld [vmem:[#allocation2 + $0x1970] ss:$112 sps:$4 sm:$0xff]  }
 0x1a3   :  { %8826 = vmatpush2.bf16.msra.mxu1 %v18476_v21  ;;  %8881 = vmatprep.subr.bf16.mxu0 %v18487_v24  ;;  %v18568_v21 = vld [vmem:[#allocation2 + $0x7f4] ss:$112 sps:$4 sm:$0xff]  }
 0x1a4   :  { %8827 = vmatprep.subr.bf16.mxu1 %v18484_v23  ;;  %v18566_v23 = vld [vmem:[#allocation2 + $0x7f0] ss:$112 sps:$4 sm:$0xff]   ;;  %v18571_v24 = vld [vmem:[#allocation2 + $0x1894] ss:$112 sps:$4 sm:$0xff]  }
 0x1a5   :  { %8791 = vmatmul.mubr.bf16.vlgmr.msra.gmra.mxu0 %v21122_v7 }
 0x1a6   :  { %8882 = vmatpush1.bf16.msra.mxu0 %v18485_v26  ;;  %8913 = vmatprep.mubr.bf16.mxu0 %v21111_v47  ;;  %v18569_v26 = vld [vmem:[#allocation2 + $0x1890] ss:$112 sps:$4 sm:$0xff]  }
 0x1a7   :  { %8828 = vmatpush2.bf16.msra.mxu1 %v18482_v25  ;;  %8883 = vmatprep.subr.bf16.mxu0 %v18493_v28  ;;  %v18574_v25 = vld [vmem:[#allocation2 + $0x714] ss:$112 sps:$4 sm:$0xff]  }
 0x1a8   :  { %8829 = vmatprep.subr.bf16.mxu1 %v18490_v27  ;;  %v18572_v27 = vld [vmem:[#allocation2 + $0x710] ss:$112 sps:$4 sm:$0xff]   ;;  %v18577_v28 = vld [vmem:[#allocation2 + $0x17b4] ss:$112 sps:$4 sm:$0xff]  }
 0x1aa   :  { %8884 = vmatpush1.bf16.msra.mxu0 %v18491_v30  ;;  %v18575_v30 = vld [vmem:[#allocation2 + $0x17b0] ss:$112 sps:$4 sm:$0xff]  }
 0x1ab   :  { %8830 = vmatpush2.bf16.msra.mxu1 %v18488_v29  ;;  %8885 = vmatprep.subr.bf16.mxu0 %v18499_v32  ;;  %v18580_v29 = vld [vmem:[#allocation2 + $0x2234] ss:$112 sps:$4 sm:$0xff]  }
 0x1ac   :  { %8854 = vmatprep.subr.bf16.mxu1 %v18496_v31  ;;  %v18578_v31 = vld [vmem:[#allocation2 + $0x2230] ss:$112 sps:$4 sm:$0xff]   ;;  %v18583_v32 = vld [vmem:[#allocation2 + $0x16d4] ss:$112 sps:$4 sm:$0xff]  }
 0x1ae   :  { %8832 = vmatmul.mubr.bf16.vlgmr.msra.gmra.mxu1 %v21147_v16  ;;  %8886 = vmatpush1.bf16.msra.mxu0 %v18497_v35 }
 0x1af   :  { %8855 = vmatpush1.bf16.msra.mxu1 %v18494_v34  ;;  %8887 = vmatprep.subr.bf16.mxu0 %v18502_v36  ;;  %v18586_v34 = vld [vmem:[#allocation2 + $0x2154] ss:$112 sps:$4 sm:$0xff]  }
 0x1b0   :  { %8872 = vmatprep.mubr.bf16.mxu1 %v20933_v13  ;;  %8922 = vmatprep.subr.bf16.mxu1 %v18505_v37 }
 0x1b2   :  { %8888 = vmatpush1.bf16.msra.mxu0 %v18500_v38  ;;  %v18581_v38 = vld [vmem:[#allocation2 + $0x16d0] ss:$112 sps:$4 sm:$0xff]  }
 0x1b3   :  { %8889 = vmatprep.subr.bf16.mxu0 %v18508_v39  ;;  %v18584_v39 = vld [vmem:[#allocation2 + $0x2150] ss:$112 sps:$4 sm:$0xff]  }
 0x1b6   :  { %17400 = vmatmul.mubr.msk.bf16.vlgmr.msra.gmra.mxu1 %vm8549_vm0, %v21130_v17  ;;  %8890 = vmatpush1.bf16.msra.mxu0 %v18506_v41  ;;  %v18524_v17 = vld [vmem:[#allocation2 + $0x10] ss:$112 sps:$4 sm:$0xff]  }
 0x1b7   :  { %8923 = vmatpush1.bf16.msra.mxu1 %v18503_v40  ;;  %8891 = vmatprep.subr.bf16.mxu0 %v18514_v43  ;;  %v18589_v40 = vld [vmem:[#allocation2 + $0x15f4] ss:$112 sps:$4 sm:$0xff]  }
 0x1b8   :  { %8924 = vmatprep.subr.bf16.mxu1 %v18511_v42  ;;  %8954 = vmatprep.mubr.bf16.mxu1 %v21116_v51  ;;  %v18592_v43 = vld [vmem:[#allocation2 + $0x2074] ss:$112 sps:$4 sm:$0xff]  }
 0x1ba   :  { %8892 = vmatpush1.bf16.msra.mxu0 %v18512_v45 }
 0x1bb   :  { %8925 = vmatpush1.bf16.msra.mxu1 %v18509_v44  ;;  %8893 = vmatprep.subr.bf16.mxu0 %v18520_v48  ;;  %v18587_v48 = vld [vmem:[#allocation2 + $0x15f0] ss:$112 sps:$4 sm:$0xff]  }
 0x1bc   :  { %8926 = vmatprep.subr.bf16.mxu1 %v18517_v46 }
 0x1be   :  { %8894 = vmatpush1.bf16.msra.mxu0 %v18518_v50  ;;  %v18595_v50 = vld [vmem:[#allocation2 + $0x1514] ss:$112 sps:$4 sm:$0xff]  }
 0x1bf   :  { %8927 = vmatpush1.bf16.msra.mxu1 %v18515_v49  ;;  %8895 = vmatprep.subr.bf16.mxu0 %v18526_v53  ;;  %v18590_v49 = vld [vmem:[#allocation2 + $0x2070] ss:$112 sps:$4 sm:$0xff]   ;;  %v18598_v53 = vld [vmem:[#allocation2 + $0x1f94] ss:$112 sps:$4 sm:$0xff]  }
 0x1c0   :  { %8928 = vmatprep.subr.bf16.mxu1 %v18523_v52 }
 0x1c2   :  { %8896 = vmatpush1.bf16.msra.mxu0 %v18524_v17  ;;  %v18593_v17 = vld [vmem:[#allocation2 + $0x1510] ss:$112 sps:$4 sm:$0xff]  }
 0x1c3   :  { %8929 = vmatpush1.bf16.msra.mxu1 %v18521_v54  ;;  %8897 = vmatprep.subr.bf16.mxu0 %v18532_v56  ;;  %v18596_v56 = vld [vmem:[#allocation2 + $0x1f90] ss:$112 sps:$4 sm:$0xff]  }
 0x1c4   :  { %8930 = vmatprep.subr.bf16.mxu1 %v18529_v55 }
 0x1c6   :  { %8898 = vmatpush2.bf16.msra.mxu0 %v18530_v58 }
 0x1c7   :  { %8931 = vmatpush1.bf16.msra.mxu1 %v18527_v57  ;;  %8899 = vmatprep.subr.bf16.mxu0 %v18538_v60  ;;  %v18601_v57 = vld [vmem:[#allocation2 + $0x2a14] ss:$112 sps:$4 sm:$0xff]  }
 0x1c8   :  { %8932 = vmatprep.subr.bf16.mxu1 %v18535_v59  ;;  %v18604_v59 = vld [vmem:[#allocation2 + $0x1eb4] ss:$112 sps:$4 sm:$0xff]  }
 0x1ca   :  { %8900 = vmatpush2.bf16.msra.mxu0 %v18536_v62  ;;  %v18602_v62 = vld [vmem:[#allocation2 + $0x1eb0] ss:$112 sps:$4 sm:$0xff]  }
 0x1cb   :  { %8933 = vmatpush1.bf16.msra.mxu1 %v18533_v61  ;;  %8901 = vmatprep.subr.bf16.mxu0 %v18544_v0  ;;  %v18599_v61 = vld [vmem:[#allocation2 + $0x2a10] ss:$112 sps:$4 sm:$0xff]   ;;  %v18607_v0 = vld [vmem:[#allocation2 + $0x1dd4] ss:$112 sps:$4 sm:$0xff]  }
 0x1cc   :  { %8934 = vmatprep.subr.bf16.mxu1 %v18541_v63 }
 0x1ce   :  { %8902 = vmatpush2.bf16.msra.mxu0 %v18542_v2  ;;  %v18605_v2 = vld [vmem:[#allocation2 + $0x1dd0] ss:$112 sps:$4 sm:$0xff]  }
 0x1cf   :  { %8935 = vmatpush1.bf16.msra.mxu1 %v18539_v1  ;;  %8903 = vmatprep.subr.bf16.mxu0 %v18550_v4  ;;  %v18610_v1 = vld [vmem:[#allocation2 + $0x63c] ss:$112 sps:$4 sm:$0xff]   ;;  %v18608_v4 = vld [vmem:[#allocation2 + $0x638] ss:$112 sps:$4 sm:$0xff]  }
 0x1d0   :  { %8936 = vmatprep.subr.bf16.mxu1 %v18547_v3  ;;  %v18613_v3 = vld [vmem:[#allocation2 + $0x1cf4] ss:$112 sps:$4 sm:$0xff]  }
 0x1d2   :  { %8904 = vmatpush2.bf16.msra.mxu0 %v18548_v8  ;;  %v18616_v8 = vld [vmem:[#allocation2 + $0x55c] ss:$112 sps:$4 sm:$0xff]  }
 0x1d3   :  { %8937 = vmatpush1.bf16.msra.mxu1 %v18545_v5  ;;  %8905 = vmatprep.subr.bf16.mxu0 %v18556_v10  ;;  %v18611_v5 = vld [vmem:[#allocation2 + $0x1cf0] ss:$112 sps:$4 sm:$0xff]   ;;  %v20519_v10 = vld [vmem:[%s21771_s12 + $0x18] ss:$0 sps:$4 sm:$0xff]  }
 0x1d4   :  { %8938 = vmatprep.subr.bf16.mxu1 %v18553_v9  ;;  %v18619_v9 = vld [vmem:[#allocation2 + $0x1c14] ss:$112 sps:$4 sm:$0xff]  }
 0x1d6   :  { %8906 = vmatpush2.bf16.msra.mxu0 %v18554_v12  ;;  %v18617_v12 = vld [vmem:[#allocation2 + $0x1c10] ss:$112 sps:$4 sm:$0xff]  }
 0x1d7   :  { %8939 = vmatpush2.bf16.msra.mxu1 %v18551_v11  ;;  %8907 = vmatprep.subr.bf16.mxu0 %v18562_v15  ;;  %v18614_v11 = vld [vmem:[#allocation2 + $0x558] ss:$112 sps:$4 sm:$0xff]   ;;  %v18625_v15 = vld [vmem:[#allocation2 + $0x2934] ss:$112 sps:$4 sm:$0xff]  }
 0x1d8   :  { %8940 = vmatprep.subr.bf16.mxu1 %v18559_v14  ;;  %v18622_v14 = vld [vmem:[#allocation2 + $0x47c] ss:$112 sps:$4 sm:$0xff]  }
 0x1da   :  { %8908 = vmatpush2.bf16.msra.mxu0 %v18560_v19  ;;  %v18623_v19 = vld [vmem:[#allocation2 + $0x2930] ss:$112 sps:$4 sm:$0xff]  }
 0x1db   :  { %8941 = vmatpush2.bf16.msra.mxu1 %v18557_v18  ;;  %8909 = vmatprep.subr.bf16.mxu0 %v18568_v21  ;;  %v18620_v18 = vld [vmem:[#allocation2 + $0x478] ss:$112 sps:$4 sm:$0xff]   ;;  %v18631_v21 = vld [vmem:[#allocation2 + $0x2854] ss:$112 sps:$4 sm:$0xff]  }
 0x1dc   :  { %8942 = vmatprep.subr.bf16.mxu1 %v18565_v20  ;;  %v18628_v20 = vld [vmem:[#allocation2 + $0x39c] ss:$112 sps:$4 sm:$0xff]  }
 0x1de   :  { %8910 = vmatpush2.bf16.msra.mxu0 %v18566_v23  ;;  %v18629_v23 = vld [vmem:[#allocation2 + $0x2850] ss:$112 sps:$4 sm:$0xff]  }
 0x1df   :  { %8943 = vmatpush2.bf16.msra.mxu1 %v18563_v22  ;;  %8911 = vmatprep.subr.bf16.mxu0 %v18574_v25  ;;  %v18626_v22 = vld [vmem:[#allocation2 + $0x398] ss:$112 sps:$4 sm:$0xff]   ;;  %v18637_v25 = vld [vmem:[#allocation2 + $0x2774] ss:$112 sps:$4 sm:$0xff]  }
 0x1e0   :  { %8944 = vmatprep.subr.bf16.mxu1 %v18571_v24  ;;  %v18634_v24 = vld [vmem:[#allocation2 + $0x2bc] ss:$112 sps:$4 sm:$0xff]  }
 0x1e2   :  { %8912 = vmatpush2.bf16.msra.mxu0 %v18572_v27  ;;  %v18635_v27 = vld [vmem:[#allocation2 + $0x2770] ss:$112 sps:$4 sm:$0xff]  }
 0x1e3   :  { %8945 = vmatpush2.bf16.msra.mxu1 %v18569_v26  ;;  %8963 = vmatprep.subr.bf16.mxu0 %v18580_v29  ;;  %v18632_v26 = vld [vmem:[#allocation2 + $0x2b8] ss:$112 sps:$4 sm:$0xff]   ;;  %v18643_v29 = vld [vmem:[#allocation2 + $0x2694] ss:$112 sps:$4 sm:$0xff]  }
 0x1e4   :  { %8946 = vmatprep.subr.bf16.mxu1 %v18577_v28  ;;  %v18640_v28 = vld [vmem:[#allocation2 + $0x1dc] ss:$112 sps:$4 sm:$0xff]  }
 0x1e5   :  { %v8587_v35 = vpop.f32.mrf.mxu0  ;;  %8914 = vmatmul.mubr.bf16.vlgmr.msra.gmra.mxu0 %v21120_v6 }
 0x1e6   :  { %v8628_v36 = vpop.f32.mrf.mxu1  ;;  %8964 = vmatpush1.bf16.msra.mxu0 %v18578_v31  ;;  %8995 = vmatprep.mubr.bf16.mxu0 %v21142_v33  ;;  %v18641_v31 = vld [vmem:[#allocation2 + $0x2690] ss:$112 sps:$4 sm:$0xff]  }
 0x1e7   :  { %8947 = vmatpush2.bf16.msra.mxu1 %v18575_v30  ;;  %v21161_v37 = vadd.f32 %v8628_v36, %v8587_v35  ;;  %v8589_v41 = vpop.f32.mrf.mxu0  ;;  %8965 = vmatprep.subr.bf16.mxu0 %v18586_v34  ;;  %v18638_v30 = vld [vmem:[#allocation2 + $0x1d8] ss:$112 sps:$4 sm:$0xff]   ;;  %v18649_v34 = vld [vmem:[#allocation2 + $0x25b4] ss:$112 sps:$4 sm:$0xff]   ;;  %v18647_v36 = vld [vmem:[#allocation2 + $0x25b0] ss:$112 sps:$4 sm:$0xff]  }
 0x1e8   :  { %v8630_v42 = vpop.f32.mrf.mxu1  ;;  %8948 = vmatprep.subr.bf16.mxu1 %v18583_v32  ;;  %v18646_v32 = vld [vmem:[#allocation2 + $0xfc] ss:$112 sps:$4 sm:$0xff]   ;;  %v18644_v35 = vld [vmem:[#allocation2 + $0xf8] ss:$112 sps:$4 sm:$0xff]  }
 0x1e9   :  { %v21163_v44 = vadd.f32 %v8630_v42, %v8589_v41  ;;  %v8591_v46 = vpop.f32.mrf.mxu0  ;;  %v18653_v41 = vld [vmem:[#allocation2 + $0x24d0] ss:$112 sps:$4 sm:$0xff]   ;;  %v18658_v42 = vld [vmem:[#allocation2 + $0xd3c] ss:$112 sps:$4 sm:$0xff]  }
 0x1ea   :  { %v8632_v45 = vpop.f32.mrf.mxu1  ;;  %8966 = vmatpush1.bf16.msra.mxu0 %v18584_v39  ;;  %v18655_v39 = vld [vmem:[#allocation2 + $0x24d4] ss:$112 sps:$4 sm:$0xff]   ;;  %v18659_v46 = vld [vmem:[#allocation2 + $0x23f0] ss:$112 sps:$4 sm:$0xff]  }
 0x1eb   :  { %8949 = vmatpush2.bf16.msra.mxu1 %v18581_v38  ;;  %8967 = vmatprep.subr.bf16.mxu0 %v18592_v43  ;;  %v8592_v54 = vpop.f32.mrf.mxu0  ;;  %v18652_v38 = vld [vmem:[#allocation2 + $0x1c] ss:$112 sps:$4 sm:$0xff]   ;;  %v18661_v43 = vld [vmem:[#allocation2 + $0x23f4] ss:$112 sps:$4 sm:$0xff]   ;;  %v18656_v45 = vld [vmem:[#allocation2 + $0xd38] ss:$112 sps:$4 sm:$0xff]  }
 0x1ec   :  { %v8633_v52 = vpop.f32.mrf.mxu1  ;;  %8950 = vmatprep.subr.bf16.mxu1 %v18589_v40  ;;  %v18650_v40 = vld [vmem:[#allocation2 + $0x18] ss:$112 sps:$4 sm:$0xff]   ;;  %v18673_v54 = vld [vmem:[#allocation2 + $0x143c] ss:$112 sps:$4 sm:$0xff]  }
 0x1ed   :  { %v18665_v52 = vld [vmem:[#allocation2 + $0x2310] ss:$112 sps:$4 sm:$0xff]  }
 0x1ee   :  { %v21166_v55 = vpop.f32.mrf.mxu1  ;;  %8968 = vmatpush1.bf16.msra.mxu0 %v18590_v49  ;;  %v18667_v49 = vld [vmem:[#allocation2 + $0x2314] ss:$112 sps:$4 sm:$0xff]  }
 0x1ef   :  { %8951 = vmatpush2.bf16.msra.mxu1 %v18587_v48  ;;  %8969 = vmatprep.subr.bf16.mxu0 %v18598_v53  ;;  %v18664_v48 = vld [vmem:[#allocation2 + $0xc5c] ss:$112 sps:$4 sm:$0xff]  }
 0x1f0   :  { %v21168_v58 = vpop.f32.mrf.mxu1  ;;  %8952 = vmatprep.subr.bf16.mxu1 %v18595_v50  ;;  %v18662_v50 = vld [vmem:[#allocation2 + $0xc58] ss:$112 sps:$4 sm:$0xff]   ;;  %v18670_v53 = vld [vmem:[#allocation2 + $0xb7c] ss:$112 sps:$4 sm:$0xff]  }
 0x1f2   :  { %v8714_v60 = vpop.f32.mrf.mxu1  ;;  %8970 = vmatpush1.bf16.msra.mxu0 %v18596_v56  ;;  %v18671_v56 = vld [vmem:[#allocation2 + $0x1438] ss:$112 sps:$4 sm:$0xff]  }
 0x1f3   :  { %8953 = vmatpush2.bf16.msra.mxu1 %v18593_v17  ;;  %8971 = vmatprep.subr.bf16.mxu0 %v18604_v59  ;;  %v18668_v17 = vld [vmem:[#allocation2 + $0xb78] ss:$112 sps:$4 sm:$0xff]   ;;  %v18679_v59 = vld [vmem:[#allocation2 + $0x135c] ss:$112 sps:$4 sm:$0xff]  }
 0x1f4   :  { %v8715_v63 = vpop.f32.mrf.mxu1  ;;  %9018 = vmatprep.subr.bf16.mxu1 %v18601_v57  ;;  %v18676_v57 = vld [vmem:[#allocation2 + $0xa9c] ss:$112 sps:$4 sm:$0xff]  }
 0x1f5   :  { %v18677_v63 = vld [vmem:[#allocation2 + $0x1358] ss:$112 sps:$4 sm:$0xff]  }
 0x1f6   :  { %8955 = vmatmul.mubr.bf16.vlgmr.msra.gmra.mxu1 %v21122_v7  ;;  %8972 = vmatpush1.bf16.msra.mxu0 %v18602_v62  ;;  %v18674_v62 = vld [vmem:[#allocation2 + $0xa98] ss:$112 sps:$4 sm:$0xff]  }
 0x1f7   :  { %9019 = vmatpush1.bf16.msra.mxu1 %v18599_v61  ;;  %8973 = vmatprep.subr.bf16.mxu0 %v18607_v0 }
 0x1f8   :  { %9036 = vmatprep.mubr.bf16.mxu1 %v20933_v13  ;;  %9045 = vmatprep.subr.bf16.mxu1 %v18610_v1  ;;  %v18682_v1 = vld [vmem:[#allocation2 + $0x9bc] ss:$112 sps:$4 sm:$0xff]  }
 0x1fa   :  { %8974 = vmatpush1.bf16.msra.mxu0 %v18605_v2  ;;  %v18685_v2 = vld [vmem:[#allocation2 + $0x127c] ss:$112 sps:$4 sm:$0xff]  }
 0x1fb   :  { %8975 = vmatprep.subr.bf16.mxu0 %v18613_v3 }
 0x1fe   :  { %17401 = vmatmul.mubr.msk.bf16.vlgmr.msra.gmra.mxu1 %vm8549_vm0, %v20519_v10  ;;  %8976 = vmatpush1.bf16.msra.mxu0 %v18611_v5  ;;  %v18688_v10 = vld [vmem:[#allocation2 + $0x8dc] ss:$112 sps:$4 sm:$0xff]  }
 0x1ff   :  { %9046 = vmatpush1.bf16.msra.mxu1 %v18608_v4  ;;  %8977 = vmatprep.subr.bf16.mxu0 %v18619_v9  ;;  %v18683_v9 = vld [vmem:[#allocation2 + $0x1278] ss:$112 sps:$4 sm:$0xff]  }
 0x200   :  { %9047 = vmatprep.subr.bf16.mxu1 %v18616_v8  ;;  %9077 = vmatprep.mubr.bf16.mxu1 %v21111_v47 }
 0x202   :  { %8978 = vmatpush1.bf16.msra.mxu0 %v18617_v12 }
 0x203   :  { %9048 = vmatpush1.bf16.msra.mxu1 %v18614_v11  ;;  %8979 = vmatprep.subr.bf16.mxu0 %v18625_v15  ;;  %v18691_v11 = vld [vmem:[#allocation2 + $0x119c] ss:$112 sps:$4 sm:$0xff]  }
 0x204   :  { %9049 = vmatprep.subr.bf16.mxu1 %v18622_v14 }
 0x206   :  { %8980 = vmatpush2.bf16.msra.mxu0 %v18623_v19 }
 0x207   :  { %9050 = vmatpush1.bf16.msra.mxu1 %v18620_v18  ;;  %8981 = vmatprep.subr.bf16.mxu0 %v18631_v21  ;;  %v18697_v18 = vld [vmem:[#allocation2 + $0x10bc] ss:$112 sps:$4 sm:$0xff]   ;;  %v18695_v21 = vld [vmem:[#allocation2 + $0x10b8] ss:$112 sps:$4 sm:$0xff]  }
 0x208   :  { %9051 = vmatprep.subr.bf16.mxu1 %v18628_v20  ;;  %v18692_v20 = vld [vmem:[#allocation2 + $0x7f8] ss:$112 sps:$4 sm:$0xff]  }
 0x20a   :  { %8982 = vmatpush2.bf16.msra.mxu0 %v18629_v23  ;;  %v18700_v23 = vld [vmem:[#allocation2 + $0x71c] ss:$112 sps:$4 sm:$0xff]  }
 0x20b   :  { %9052 = vmatpush1.bf16.msra.mxu1 %v18626_v22  ;;  %8983 = vmatprep.subr.bf16.mxu0 %v18637_v25  ;;  %v18698_v25 = vld [vmem:[#allocation2 + $0x718] ss:$112 sps:$4 sm:$0xff]  }
 0x20c   :  { %9053 = vmatprep.subr.bf16.mxu1 %v18634_v24  ;;  %v18703_v24 = vld [vmem:[#allocation2 + $0xfdc] ss:$112 sps:$4 sm:$0xff]  }
 0x20e   :  { %8984 = vmatpush2.bf16.msra.mxu0 %v18635_v27  ;;  %v18706_v27 = vld [vmem:[#allocation2 + $0x223c] ss:$112 sps:$4 sm:$0xff]  }
 0x20f   :  { %9054 = vmatpush1.bf16.msra.mxu1 %v18632_v26  ;;  %8985 = vmatprep.subr.bf16.mxu0 %v18643_v29  ;;  %v18701_v26 = vld [vmem:[#allocation2 + $0xfd8] ss:$112 sps:$4 sm:$0xff]  }
 0x210   :  { %9055 = vmatprep.subr.bf16.mxu1 %v18640_v28  ;;  %v18709_v28 = vld [vmem:[#allocation2 + $0xefc] ss:$112 sps:$4 sm:$0xff]   ;;  %v18704_v29 = vld [vmem:[#allocation2 + $0x2238] ss:$112 sps:$4 sm:$0xff]  }
 0x212   :  { %8986 = vmatpush2.bf16.msra.mxu0 %v18641_v31  ;;  %v18712_v31 = vld [vmem:[#allocation2 + $0x215c] ss:$112 sps:$4 sm:$0xff]  }
 0x213   :  { %9056 = vmatpush1.bf16.msra.mxu1 %v18638_v30  ;;  %8987 = vmatprep.subr.bf16.mxu0 %v18649_v34  ;;  %v18707_v30 = vld [vmem:[#allocation2 + $0xef8] ss:$112 sps:$4 sm:$0xff]  }
 0x214   :  { %9057 = vmatprep.subr.bf16.mxu1 %v18646_v32  ;;  %v18715_v32 = vld [vmem:[#allocation2 + $0xe1c] ss:$112 sps:$4 sm:$0xff]   ;;  %v18710_v34 = vld [vmem:[#allocation2 + $0x2158] ss:$112 sps:$4 sm:$0xff]  }
 0x216   :  { %8988 = vmatpush2.bf16.msra.mxu0 %v18647_v36  ;;  %v18718_v36 = vld [vmem:[#allocation2 + $0x207c] ss:$112 sps:$4 sm:$0xff]  }
 0x217   :  { %9058 = vmatpush1.bf16.msra.mxu1 %v18644_v35  ;;  %8989 = vmatprep.subr.bf16.mxu0 %v18655_v39  ;;  %v18713_v35 = vld [vmem:[#allocation2 + $0xe18] ss:$112 sps:$4 sm:$0xff]  }
 0x218   :  { %9059 = vmatprep.subr.bf16.mxu1 %v18652_v38  ;;  %v18721_v38 = vld [vmem:[#allocation2 + $0x1b3c] ss:$112 sps:$4 sm:$0xff]   ;;  %v18716_v39 = vld [vmem:[#allocation2 + $0x2078] ss:$112 sps:$4 sm:$0xff]  }
 0x21a   :  { %8990 = vmatpush2.bf16.msra.mxu0 %v18653_v41  ;;  %v18724_v41 = vld [vmem:[#allocation2 + $0x1f9c] ss:$112 sps:$4 sm:$0xff]  }
 0x21b   :  { %9060 = vmatpush1.bf16.msra.mxu1 %v18650_v40  ;;  %8991 = vmatprep.subr.bf16.mxu0 %v18661_v43  ;;  %v18719_v40 = vld [vmem:[#allocation2 + $0x1b38] ss:$112 sps:$4 sm:$0xff]  }
 0x21c   :  { %9061 = vmatprep.subr.bf16.mxu1 %v18658_v42  ;;  %v18727_v42 = vld [vmem:[#allocation2 + $0x1a5c] ss:$112 sps:$4 sm:$0xff]   ;;  %v18722_v43 = vld [vmem:[#allocation2 + $0x1f98] ss:$112 sps:$4 sm:$0xff]  }
 0x21e   :  { %8992 = vmatpush2.bf16.msra.mxu0 %v18659_v46  ;;  %v18730_v46 = vld [vmem:[#allocation2 + $0x1ebc] ss:$112 sps:$4 sm:$0xff]  }
 0x21f   :  { %9062 = vmatpush2.bf16.msra.mxu1 %v18656_v45  ;;  %8993 = vmatprep.subr.bf16.mxu0 %v18667_v49  ;;  %v18725_v45 = vld [vmem:[#allocation2 + $0x1a58] ss:$112 sps:$4 sm:$0xff]  }
 0x220   :  { %9063 = vmatprep.subr.bf16.mxu1 %v18664_v48  ;;  %v18733_v48 = vld [vmem:[#allocation2 + $0x197c] ss:$112 sps:$4 sm:$0xff]   ;;  %v18728_v49 = vld [vmem:[#allocation2 + $0x1eb8] ss:$112 sps:$4 sm:$0xff]  }
 0x222   :  { %8994 = vmatpush2.bf16.msra.mxu0 %v18665_v52  ;;  %v18736_v52 = vld [vmem:[#allocation2 + $0x1ddc] ss:$112 sps:$4 sm:$0xff]  }
 0x223   :  { %9064 = vmatpush2.bf16.msra.mxu1 %v18662_v50  ;;  %9086 = vmatprep.subr.bf16.mxu0 %v18673_v54  ;;  %v18731_v50 = vld [vmem:[#allocation2 + $0x1978] ss:$112 sps:$4 sm:$0xff]  }
 0x224   :  { %9065 = vmatprep.subr.bf16.mxu1 %v18670_v53  ;;  %v18739_v53 = vld [vmem:[#allocation2 + $0x189c] ss:$112 sps:$4 sm:$0xff]   ;;  %v18734_v54 = vld [vmem:[#allocation2 + $0x1dd8] ss:$112 sps:$4 sm:$0xff]  }
 0x225   :  { %v8669_v60 = vpop.f32.mrf.mxu0  ;;  %8996 = vmatmul.mubr.bf16.vlgmr.msra.gmra.mxu0 %v21147_v16 }
 0x226   :  { %v8670_v61 = vadd.f32 %v8669_v60, %v21161_v37  ;;  %9087 = vmatpush1.bf16.msra.mxu0 %v18671_v56  ;;  %9118 = vmatprep.mubr.bf16.mxu0 %v21116_v51  ;;  %v18680_v37 = vld [vmem:[#allocation2 + $0x9b8] ss:$112 sps:$4 sm:$0xff]   ;;  %v18742_v56 = vld [vmem:[#allocation2 + $0x1cfc] ss:$112 sps:$4 sm:$0xff]  }
 0x227   :  { %9066 = vmatpush2.bf16.msra.mxu1 %v18668_v17  ;;  %v8671_v0 = vpop.f32.mrf.mxu0  ;;  %9088 = vmatprep.subr.bf16.mxu0 %v18679_v59  ;;  %v18737_v17 = vld [vmem:[#allocation2 + $0x1898] ss:$112 sps:$4 sm:$0xff]  }
 0x228   :  { %9067 = vmatprep.subr.bf16.mxu1 %v18676_v57  ;;  %v21180_v3 = vadd.f32 %v21166_v55, %v8670_v61  ;;  %v8672_v4 = vadd.f32 %v8671_v0, %v21163_v44  ;;  %v18686_v55 = vld [vmem:[#allocation2 + $0x8d8] ss:$112 sps:$4 sm:$0xff]   ;;  %v18745_v57 = vld [vmem:[#allocation2 + $0x17bc] ss:$112 sps:$4 sm:$0xff]  }
 0x229   :  { %v8673_v5 = vpop.f32.mrf.mxu0  ;;  %v18689_v44 = vld [vmem:[#allocation2 + $0x1198] ss:$112 sps:$4 sm:$0xff]   ;;  %v18748_v61 = vld [vmem:[#allocation2 + $0x1c1c] ss:$112 sps:$4 sm:$0xff]  }
 0x22a   :  { %v21185_v8 = vadd.f32 %v21168_v58, %v8672_v4  ;;  %9089 = vmatpush1.bf16.msra.mxu0 %v18677_v63  ;;  %v18694_v58 = vld [vmem:[#allocation2 + $0x7fc] ss:$112 sps:$4 sm:$0xff]   ;;  %v18740_v59 = vld [vmem:[#allocation2 + $0x1cf8] ss:$112 sps:$4 sm:$0xff]  }
 0x22b   :  { %9068 = vmatpush2.bf16.msra.mxu1 %v18674_v62  ;;  %9090 = vmatprep.subr.bf16.mxu0 %v18685_v2  ;;  %v8674_v12 = vpop.f32.mrf.mxu0  ;;  %v18743_v60 = vld [vmem:[#allocation2 + $0x17b8] ss:$112 sps:$4 sm:$0xff]   ;;  %v18751_v62 = vld [vmem:[#allocation2 + $0x16dc] ss:$112 sps:$4 sm:$0xff]  }
 0x22c   :  { %9069 = vmatprep.subr.bf16.mxu1 %v18682_v1  ;;  %v18746_v63 = vld [vmem:[#allocation2 + $0x1c18] ss:$112 sps:$4 sm:$0xff]   ;;  %v18754_v1 = vld [vmem:[#allocation2 + $0x293c] ss:$112 sps:$4 sm:$0xff]  }
 0x22d   :  { %v18749_v0 = vld [vmem:[#allocation2 + $0x16d8] ss:$112 sps:$4 sm:$0xff]   ;;  %v18757_v2 = vld [vmem:[#allocation2 + $0x15fc] ss:$112 sps:$4 sm:$0xff]  }
 0x22e   :  { %v21187_v14 = vpop.f32.mrf.mxu1  ;;  %9091 = vmatpush1.bf16.msra.mxu0 %v18683_v9  ;;  %v18752_v4 = vld [vmem:[#allocation2 + $0x2938] ss:$112 sps:$4 sm:$0xff]   ;;  %v18763_v9 = vld [vmem:[#allocation2 + $0x151c] ss:$112 sps:$4 sm:$0xff]  }
 0x22f   :  { %9070 = vmatpush2.bf16.msra.mxu1 %v18680_v37  ;;  %9092 = vmatprep.subr.bf16.mxu0 %v18691_v11  ;;  %v18755_v5 = vld [vmem:[#allocation2 + $0x15f8] ss:$112 sps:$4 sm:$0xff]   ;;  %v18760_v37 = vld [vmem:[#allocation2 + $0x285c] ss:$112 sps:$4 sm:$0xff]  }
 0x230   :  { %v21189_v15 = vpop.f32.mrf.mxu1  ;;  %9071 = vmatprep.subr.bf16.mxu1 %v18688_v10  ;;  %v18758_v10 = vld [vmem:[#allocation2 + $0x2858] ss:$112 sps:$4 sm:$0xff]   ;;  %v18766_v12 = vld [vmem:[#allocation2 + $0x277c] ss:$112 sps:$4 sm:$0xff]  }
 0x231   :  { %v18761_v11 = vld [vmem:[#allocation2 + $0x1518] ss:$112 sps:$4 sm:$0xff]  }
 0x232   :  { %v8755_v19 = vpop.f32.mrf.mxu1  ;;  %9093 = vmatpush1.bf16.msra.mxu0 %v18689_v44  ;;  %v18764_v44 = vld [vmem:[#allocation2 + $0x2778] ss:$112 sps:$4 sm:$0xff]  }
 0x233   :  { %9072 = vmatpush2.bf16.msra.mxu1 %v18686_v55  ;;  %9094 = vmatprep.subr.bf16.mxu0 %v18697_v18  ;;  %v18769_v55 = vld [vmem:[#allocation2 + $0x644] ss:$112 sps:$4 sm:$0xff]   ;;  %v18772_v18 = vld [vmem:[#allocation2 + $0x269c] ss:$112 sps:$4 sm:$0xff]  }
 0x234   :  { %v8756_v22 = vpop.f32.mrf.mxu1  ;;  %9073 = vmatprep.subr.bf16.mxu1 %v18694_v58  ;;  %v18767_v58 = vld [vmem:[#allocation2 + $0x640] ss:$112 sps:$4 sm:$0xff]   ;;  %v18775_v19 = vld [vmem:[#allocation2 + $0x564] ss:$112 sps:$4 sm:$0xff]  }
 0x236   :  { %9095 = vmatpush1.bf16.msra.mxu0 %v18695_v21  ;;  %v18773_v21 = vld [vmem:[#allocation2 + $0x560] ss:$112 sps:$4 sm:$0xff]  }
 0x237   :  { %9074 = vmatpush2.bf16.msra.mxu1 %v18692_v20  ;;  %9096 = vmatprep.subr.bf16.mxu0 %v18703_v24  ;;  %v18770_v20 = vld [vmem:[#allocation2 + $0x2698] ss:$112 sps:$4 sm:$0xff]   ;;  %v18778_v24 = vld [vmem:[#allocation2 + $0x25bc] ss:$112 sps:$4 sm:$0xff]  }
 0x238   :  { %9075 = vmatprep.subr.bf16.mxu1 %v18700_v23 }
 0x23a   :  { %9097 = vmatpush1.bf16.msra.mxu0 %v18701_v26 }
 0x23b   :  { %9076 = vmatpush2.bf16.msra.mxu1 %v18698_v25  ;;  %9098 = vmatprep.subr.bf16.mxu0 %v18709_v28  ;;  %v18781_v25 = vld [vmem:[#allocation2 + $0x484] ss:$112 sps:$4 sm:$0xff]   ;;  %v18776_v28 = vld [vmem:[#allocation2 + $0x25b8] ss:$112 sps:$4 sm:$0xff]  }
 0x23c   :  { %9127 = vmatprep.subr.bf16.mxu1 %v18706_v27 }
 0x23e   :  { %9078 = vmatmul.mubr.bf16.vlgmr.msra.gmra.mxu1 %v21120_v6  ;;  %9099 = vmatpush1.bf16.msra.mxu0 %v18707_v30 }
 0x23f   :  { %9128 = vmatpush1.bf16.msra.mxu1 %v18704_v29  ;;  %9100 = vmatprep.subr.bf16.mxu0 %v18715_v32  ;;  %v18779_v29 = vld [vmem:[#allocation2 + $0x480] ss:$112 sps:$4 sm:$0xff]   ;;  %v18787_v32 = vld [vmem:[#allocation2 + $0x3a4] ss:$112 sps:$4 sm:$0xff]  }
 0x240   :  { %9129 = vmatprep.subr.bf16.mxu1 %v18712_v31  ;;  %9159 = vmatprep.mubr.bf16.mxu1 %v21142_v33  ;;  %v18784_v31 = vld [vmem:[#allocation2 + $0x24dc] ss:$112 sps:$4 sm:$0xff]  }
 0x242   :  { %9101 = vmatpush1.bf16.msra.mxu0 %v18713_v35 }
 0x243   :  { %9130 = vmatpush1.bf16.msra.mxu1 %v18710_v34  ;;  %9102 = vmatprep.subr.bf16.mxu0 %v18721_v38  ;;  %v18782_v34 = vld [vmem:[#allocation2 + $0x24d8] ss:$112 sps:$4 sm:$0xff]  }
 0x244   :  { %9131 = vmatprep.subr.bf16.mxu1 %v18718_v36  ;;  %v18785_v36 = vld [vmem:[#allocation2 + $0x3a0] ss:$112 sps:$4 sm:$0xff]  }
 0x246   :  { %9103 = vmatpush2.bf16.msra.mxu0 %v18719_v40 }
 0x247   :  { %9132 = vmatpush1.bf16.msra.mxu1 %v18716_v39  ;;  %9104 = vmatprep.subr.bf16.mxu0 %v18727_v42  ;;  %v18790_v39 = vld [vmem:[#allocation2 + $0x23fc] ss:$112 sps:$4 sm:$0xff]   ;;  %v18788_v42 = vld [vmem:[#allocation2 + $0x23f8] ss:$112 sps:$4 sm:$0xff]  }
 0x248   :  { %9133 = vmatprep.subr.bf16.mxu1 %v18724_v41 }
 0x24a   :  { %9105 = vmatpush2.bf16.msra.mxu0 %v18725_v45  ;;  %v18791_v45 = vld [vmem:[#allocation2 + $0x2c0] ss:$112 sps:$4 sm:$0xff]  }
 0x24b   :  { %9134 = vmatpush1.bf16.msra.mxu1 %v18722_v43  ;;  %9106 = vmatprep.subr.bf16.mxu0 %v18733_v48  ;;  %v18799_v48 = vld [vmem:[#allocation2 + $0x1e4] ss:$112 sps:$4 sm:$0xff]  }
 0x24c   :  { %9135 = vmatprep.subr.bf16.mxu1 %v18730_v46  ;;  %v18796_v46 = vld [vmem:[#allocation2 + $0x231c] ss:$112 sps:$4 sm:$0xff]  }
 0x24e   :  { %9107 = vmatpush2.bf16.msra.mxu0 %v18731_v50  ;;  %v18794_v50 = vld [vmem:[#allocation2 + $0x2318] ss:$112 sps:$4 sm:$0xff]  }
 0x24f   :  { %9136 = vmatpush1.bf16.msra.mxu1 %v18728_v49  ;;  %9108 = vmatprep.subr.bf16.mxu0 %v18739_v53  ;;  %v18797_v53 = vld [vmem:[#allocation2 + $0x1e0] ss:$112 sps:$4 sm:$0xff]  }
 0x250   :  { %9137 = vmatprep.subr.bf16.mxu1 %v18736_v52 }
 0x252   :  { %9109 = vmatpush2.bf16.msra.mxu0 %v18737_v17  ;;  %v18802_v17 = vld [vmem:[#allocation2 + $0x2a1c] ss:$112 sps:$4 sm:$0xff]  }
 0x253   :  { %9138 = vmatpush1.bf16.msra.mxu1 %v18734_v54  ;;  %9110 = vmatprep.subr.bf16.mxu0 %v18745_v57 }
 0x254   :  { %9139 = vmatprep.subr.bf16.mxu1 %v18742_v56  ;;  %v18805_v56 = vld [vmem:[#allocation2 + $0x104] ss:$112 sps:$4 sm:$0xff]  }
 0x256   :  { %9111 = vmatpush2.bf16.msra.mxu0 %v18743_v60 }
 0x257   :  { %9140 = vmatpush1.bf16.msra.mxu1 %v18740_v59  ;;  %9112 = vmatprep.subr.bf16.mxu0 %v18751_v62  ;;  %v18803_v62 = vld [vmem:[#allocation2 + $0x100] ss:$112 sps:$4 sm:$0xff]  }
 0x258   :  { %9141 = vmatprep.subr.bf16.mxu1 %v18748_v61  ;;  %v18800_v61 = vld [vmem:[#allocation2 + $0x2a18] ss:$112 sps:$4 sm:$0xff]  }
 0x25a   :  { %9113 = vmatpush2.bf16.msra.mxu0 %v18749_v0 }
 0x25b   :  { %9142 = vmatpush1.bf16.msra.mxu1 %v18746_v63  ;;  %9114 = vmatprep.subr.bf16.mxu0 %v18757_v2  ;;  %v18808_v63 = vld [vmem:[#allocation2 + $0x24] ss:$112 sps:$4 sm:$0xff]   ;;  %v18806_v2 = vld [vmem:[#allocation2 + $0x20] ss:$112 sps:$4 sm:$0xff]  }
 0x25c   :  { %9143 = vmatprep.subr.bf16.mxu1 %v18754_v1  ;;  %v18811_v1 = vld [vmem:[#allocation2 + $0x1444] ss:$112 sps:$4 sm:$0xff]  }
 0x25e   :  { %9115 = vmatpush2.bf16.msra.mxu0 %v18755_v5  ;;  %v18809_v5 = vld [vmem:[#allocation2 + $0x1440] ss:$112 sps:$4 sm:$0xff]  }
 0x25f   :  { %9144 = vmatpush2.bf16.msra.mxu1 %v18752_v4  ;;  %9116 = vmatprep.subr.bf16.mxu0 %v18763_v9  ;;  %v18814_v4 = vld [vmem:[#allocation2 + $0xd44] ss:$112 sps:$4 sm:$0xff]  }
 0x260   :  { %9145 = vmatprep.subr.bf16.mxu1 %v18760_v37  ;;  %v18812_v37 = vld [vmem:[#allocation2 + $0xd40] ss:$112 sps:$4 sm:$0xff]   ;;  %v18817_v9 = vld [vmem:[#allocation2 + $0x1364] ss:$112 sps:$4 sm:$0xff]  }
 0x262   :  { %9117 = vmatpush2.bf16.msra.mxu0 %v18761_v11  ;;  %v18815_v11 = vld [vmem:[#allocation2 + $0x1360] ss:$112 sps:$4 sm:$0xff]  }
 0x263   :  { %9146 = vmatpush2.bf16.msra.mxu1 %v18758_v10  ;;  %9209 = vmatprep.subr.bf16.mxu0 %v18769_v55  ;;  %v18820_v10 = vld [vmem:[#allocation2 + $0xc64] ss:$112 sps:$4 sm:$0xff]   ;;  %v18818_v55 = vld [vmem:[#allocation2 + $0xc60] ss:$112 sps:$4 sm:$0xff]  }
 0x264   :  { %9147 = vmatprep.subr.bf16.mxu1 %v18766_v12  ;;  %v21206_v12 = vld [vmem:[%s21771_s12 + $0x18] ss:$0 sps:$4 sm:$0xff]  }
 0x265   :  { %v8792_v22 = vpop.f32.mrf.mxu0  ;;  %9119 = vmatmul.mubr.bf16.vlgmr.msra.gmra.mxu0 %v21122_v7 }
 0x266   :  { %v8793_v23 = vadd.f32 %v8792_v22, %v21187_v14  ;;  %9210 = vmatpush1.bf16.msra.mxu0 %v18767_v58  ;;  %9241 = vmatprep.mubr.bf16.mxu0 %v21111_v47  ;;  %v18826_v58 = vld [vmem:[#allocation2 + $0xb84] ss:$112 sps:$4 sm:$0xff]   ;;  %v18827_v22 = vld [vmem:[#allocation2 + $0x11a0] ss:$112 sps:$4 sm:$0xff]  }
 0x267   :  { %9148 = vmatpush2.bf16.msra.mxu1 %v18764_v44  ;;  %v8794_v26 = vpop.f32.mrf.mxu0  ;;  %9211 = vmatprep.subr.bf16.mxu0 %v18775_v19  ;;  %v18823_v44 = vld [vmem:[#allocation2 + $0x1284] ss:$112 sps:$4 sm:$0xff]   ;;  %v18824_v19 = vld [vmem:[#allocation2 + $0xb80] ss:$112 sps:$4 sm:$0xff]  }
 0x268   :  { %9149 = vmatprep.subr.bf16.mxu1 %v18772_v18  ;;  %v8795_v27 = vadd.f32 %v8794_v26, %v21189_v15  ;;  %v18793_v15 = vld [vmem:[#allocation2 + $0x2c4] ss:$112 sps:$4 sm:$0xff]   ;;  %v18821_v18 = vld [vmem:[#allocation2 + $0x1280] ss:$112 sps:$4 sm:$0xff]  }
 0x269   :  { %v8796_v30 = vpop.f32.mrf.mxu0  ;;  %v18833_v26 = vld [vmem:[#allocation2 + $0x10c0] ss:$112 sps:$4 sm:$0xff]  }
 0x26a   :  { %9212 = vmatpush1.bf16.msra.mxu0 %v18773_v21  ;;  %v18832_v21 = vld [vmem:[#allocation2 + $0xaa4] ss:$112 sps:$4 sm:$0xff]   ;;  %v18839_v30 = vld [vmem:[#allocation2 + $0xfe0] ss:$112 sps:$4 sm:$0xff]  }
 0x26b   :  { %9150 = vmatpush2.bf16.msra.mxu1 %v18770_v20  ;;  %9213 = vmatprep.subr.bf16.mxu0 %v18781_v25  ;;  %v8797_v14 = vpop.f32.mrf.mxu0  ;;  %v18829_v20 = vld [vmem:[#allocation2 + $0x11a4] ss:$112 sps:$4 sm:$0xff]  }
 0x26c   :  { %9151 = vmatprep.subr.bf16.mxu1 %v18778_v24  ;;  %v18835_v24 = vld [vmem:[#allocation2 + $0x10c4] ss:$112 sps:$4 sm:$0xff]  }
 0x26d   :  { %v18838_v25 = vld [vmem:[#allocation2 + $0x9c4] ss:$112 sps:$4 sm:$0xff]  }
 0x26e   :  { %v8833_v35 = vpop.f32.mrf.mxu1  ;;  %9214 = vmatpush1.bf16.msra.mxu0 %v18779_v29  ;;  %v18844_v29 = vld [vmem:[#allocation2 + $0x8e4] ss:$112 sps:$4 sm:$0xff]  }
 0x26f   :  { %9152 = vmatpush2.bf16.msra.mxu1 %v18776_v28  ;;  %v8834_v38 = vadd.f32 %v8833_v35, %v8793_v23  ;;  %9215 = vmatprep.subr.bf16.mxu0 %v18787_v32  ;;  %v18830_v23 = vld [vmem:[#allocation2 + $0xaa0] ss:$112 sps:$4 sm:$0xff]   ;;  %v18841_v28 = vld [vmem:[#allocation2 + $0xfe4] ss:$112 sps:$4 sm:$0xff]  }
 0x270   :  { %v8835_v40 = vpop.f32.mrf.mxu1  ;;  %9153 = vmatprep.subr.bf16.mxu1 %v18784_v31  ;;  %v18842_v31 = vld [vmem:[#allocation2 + $0x8e0] ss:$112 sps:$4 sm:$0xff]   ;;  %v18847_v32 = vld [vmem:[#allocation2 + $0xf04] ss:$112 sps:$4 sm:$0xff]  }
 0x271   :  { %v8836_v41 = vadd.f32 %v8835_v40, %v8795_v27  ;;  %v18836_v27 = vld [vmem:[#allocation2 + $0x9c0] ss:$112 sps:$4 sm:$0xff]   ;;  %v18850_v14 = vld [vmem:[#allocation2 + $0x804] ss:$112 sps:$4 sm:$0xff]  }
 0x272   :  { %v8837_v43 = vpop.f32.mrf.mxu1  ;;  %9216 = vmatpush1.bf16.msra.mxu0 %v18785_v36  ;;  %v18848_v35 = vld [vmem:[#allocation2 + $0x800] ss:$112 sps:$4 sm:$0xff]   ;;  %v18853_v36 = vld [vmem:[#allocation2 + $0xe24] ss:$112 sps:$4 sm:$0xff]  }
 0x273   :  { %9154 = vmatpush2.bf16.msra.mxu1 %v18782_v34  ;;  %9217 = vmatprep.subr.bf16.mxu0 %v18793_v15  ;;  %v18845_v34 = vld [vmem:[#allocation2 + $0xf00] ss:$112 sps:$4 sm:$0xff]   ;;  %v18859_v40 = vld [vmem:[#allocation2 + $0x1b44] ss:$112 sps:$4 sm:$0xff]  }
 0x274   :  { %v8838_v49 = vpop.f32.mrf.mxu1  ;;  %9155 = vmatprep.subr.bf16.mxu1 %v18790_v39  ;;  %v18851_v39 = vld [vmem:[#allocation2 + $0xe20] ss:$112 sps:$4 sm:$0xff]  }
 0x275   :  { %v18854_v15 = vld [vmem:[#allocation2 + $0x720] ss:$112 sps:$4 sm:$0xff]   ;;  %v18868_v49 = vld [vmem:[#allocation2 + $0x1984] ss:$112 sps:$4 sm:$0xff]  }
 0x276   :  { %v8874_v52 = vpop.f32.mrf.mxu1  ;;  %9218 = vmatpush1.bf16.msra.mxu0 %v18791_v45  ;;  %v18863_v43 = vld [vmem:[#allocation2 + $0x2240] ss:$112 sps:$4 sm:$0xff]   ;;  %v18862_v45 = vld [vmem:[#allocation2 + $0x1a64] ss:$112 sps:$4 sm:$0xff]  }
 0x277   :  { %9156 = vmatpush2.bf16.msra.mxu1 %v18788_v42  ;;  %v21197_v54 = vadd.f32 %v8874_v52, %v8834_v38  ;;  %9219 = vmatprep.subr.bf16.mxu0 %v18799_v48  ;;  %v18856_v38 = vld [vmem:[#allocation2 + $0x724] ss:$112 sps:$4 sm:$0xff]   ;;  %v18857_v42 = vld [vmem:[#allocation2 + $0x1b40] ss:$112 sps:$4 sm:$0xff]  }
 0x278   :  { %v8876_v57 = vpop.f32.mrf.mxu1  ;;  %9157 = vmatprep.subr.bf16.mxu1 %v18796_v46  ;;  %v18871_v46 = vld [vmem:[#allocation2 + $0x2164] ss:$112 sps:$4 sm:$0xff]   ;;  %v18860_v48 = vld [vmem:[#allocation2 + $0x1a60] ss:$112 sps:$4 sm:$0xff]  }
 0x279   :  { %v21199_v59 = vadd.f32 %v8876_v57, %v8836_v41  ;;  %v18865_v41 = vld [vmem:[#allocation2 + $0x2244] ss:$112 sps:$4 sm:$0xff]   ;;  %v18869_v52 = vld [vmem:[#allocation2 + $0x2160] ss:$112 sps:$4 sm:$0xff]  }
 0x27a   :  { %v8878_v60 = vpop.f32.mrf.mxu1  ;;  %9220 = vmatpush1.bf16.msra.mxu0 %v18797_v53  ;;  %v18877_v53 = vld [vmem:[#allocation2 + $0x2084] ss:$112 sps:$4 sm:$0xff]   ;;  %v18866_v57 = vld [vmem:[#allocation2 + $0x1980] ss:$112 sps:$4 sm:$0xff]  }
 0x27b   :  { %9158 = vmatpush2.bf16.msra.mxu1 %v18794_v50  ;;  %9221 = vmatprep.subr.bf16.mxu0 %v18805_v56  ;;  %v18875_v60 = vld [vmem:[#allocation2 + $0x2080] ss:$112 sps:$4 sm:$0xff]  }
 0x27c   :  { %v8879_v0 = vpop.f32.mrf.mxu1  ;;  %9182 = vmatprep.subr.bf16.mxu1 %v18802_v17 }
 0x27d   :  { %v18872_v0 = vld [vmem:[#allocation2 + $0x18a0] ss:$112 sps:$4 sm:$0xff]  }
 0x27e   :  { %9160 = vmatmul.mubr.bf16.vlgmr.msra.gmra.mxu1 %v21147_v16  ;;  %9222 = vmatpush1.bf16.msra.mxu0 %v18803_v62  ;;  %v18883_v62 = vld [vmem:[#allocation2 + $0x1fa4] ss:$112 sps:$4 sm:$0xff]  }
 0x27f   :  { %9183 = vmatpush1.bf16.msra.mxu1 %v18800_v61  ;;  %9200 = vmatprep.mubr.bf16.mxu1 %v20933_v13  ;;  %v18874_v61 = vld [vmem:[#allocation2 + $0x18a4] ss:$112 sps:$4 sm:$0xff]  }
 0x280   :  { %9223 = vmatprep.subr.bf16.mxu0 %v18808_v63  ;;  %9250 = vmatprep.subr.bf16.mxu1 %v18811_v1  ;;  %v18881_v1 = vld [vmem:[#allocation2 + $0x1fa0] ss:$112 sps:$4 sm:$0xff]  }
 0x282   :  { %9224 = vmatpush1.bf16.msra.mxu0 %v18806_v2  ;;  %v18880_v2 = vld [vmem:[#allocation2 + $0x17c4] ss:$112 sps:$4 sm:$0xff]  }
 0x283   :  { %9225 = vmatprep.subr.bf16.mxu0 %v18814_v4  ;;  %v18889_v4 = vld [vmem:[#allocation2 + $0x1ec4] ss:$112 sps:$4 sm:$0xff]  }
 0x286   :  { %17402 = vmatmul.mubr.msk.bf16.vlgmr.msra.gmra.mxu1 %vm8549_vm0, %v21206_v12  ;;  %9226 = vmatpush2.bf16.msra.mxu0 %v18812_v37  ;;  %v18887_v37 = vld [vmem:[#allocation2 + $0x1ec0] ss:$112 sps:$4 sm:$0xff]  }
 0x287   :  { %9251 = vmatpush1.bf16.msra.mxu1 %v18809_v5  ;;  %9227 = vmatprep.subr.bf16.mxu0 %v18820_v10  ;;  %v18878_v5 = vld [vmem:[#allocation2 + $0x17c0] ss:$112 sps:$4 sm:$0xff]   ;;  %v18895_v10 = vld [vmem:[#allocation2 + $0x1de4] ss:$112 sps:$4 sm:$0xff]  }
 0x288   :  { %9252 = vmatprep.subr.bf16.mxu1 %v18817_v9  ;;  %9282 = vmatprep.mubr.bf16.mxu1 %v21116_v51  ;;  %v18886_v9 = vld [vmem:[#allocation2 + $0x16e4] ss:$112 sps:$4 sm:$0xff]  }
 0x28a   :  { %9228 = vmatpush2.bf16.msra.mxu0 %v18818_v55 }
 0x28b   :  { %9253 = vmatpush1.bf16.msra.mxu1 %v18815_v11  ;;  %9229 = vmatprep.subr.bf16.mxu0 %v18826_v58  ;;  %v18893_v58 = vld [vmem:[#allocation2 + $0x1de0] ss:$112 sps:$4 sm:$0xff]  }
 0x28c   :  { %9254 = vmatprep.subr.bf16.mxu1 %v18823_v44  ;;  %v18884_v44 = vld [vmem:[#allocation2 + $0x16e0] ss:$112 sps:$4 sm:$0xff]  }
 0x28e   :  { %9230 = vmatpush2.bf16.msra.mxu0 %v18824_v19  ;;  %v18892_v19 = vld [vmem:[#allocation2 + $0x1604] ss:$112 sps:$4 sm:$0xff]  }
 0x28f   :  { %9255 = vmatpush1.bf16.msra.mxu1 %v18821_v18  ;;  %9231 = vmatprep.subr.bf16.mxu0 %v18832_v21 }
 0x290   :  { %9256 = vmatprep.subr.bf16.mxu1 %v18829_v20  ;;  %v18901_v20 = vld [vmem:[#allocation2 + $0x1d04] ss:$112 sps:$4 sm:$0xff]  }
 0x292   :  { %9232 = vmatpush2.bf16.msra.mxu0 %v18830_v23  ;;  %v18890_v23 = vld [vmem:[#allocation2 + $0x1600] ss:$112 sps:$4 sm:$0xff]  }
 0x293   :  { %9257 = vmatpush1.bf16.msra.mxu1 %v18827_v22  ;;  %9233 = vmatprep.subr.bf16.mxu0 %v18838_v25 }
 0x294   :  { %9258 = vmatprep.subr.bf16.mxu1 %v18835_v24  ;;  %v18899_v24 = vld [vmem:[#allocation2 + $0x1d00] ss:$112 sps:$4 sm:$0xff]  }
 0x296   :  { %9234 = vmatpush2.bf16.msra.mxu0 %v18836_v27  ;;  %v18904_v27 = vld [vmem:[#allocation2 + $0x1c24] ss:$112 sps:$4 sm:$0xff]  }
 0x297   :  { %9259 = vmatpush1.bf16.msra.mxu1 %v18833_v26  ;;  %9235 = vmatprep.subr.bf16.mxu0 %v18844_v29  ;;  %v18898_v26 = vld [vmem:[#allocation2 + $0x1524] ss:$112 sps:$4 sm:$0xff]   ;;  %v18902_v29 = vld [vmem:[#allocation2 + $0x1c20] ss:$112 sps:$4 sm:$0xff]  }
 0x298   :  { %9260 = vmatprep.subr.bf16.mxu1 %v18841_v28  ;;  %v18896_v28 = vld [vmem:[#allocation2 + $0x1520] ss:$112 sps:$4 sm:$0xff]  }
 0x29a   :  { %9236 = vmatpush2.bf16.msra.mxu0 %v18842_v31 }
 0x29b   :  { %9261 = vmatpush1.bf16.msra.mxu1 %v18839_v30  ;;  %9237 = vmatprep.subr.bf16.mxu0 %v18850_v14  ;;  %v18910_v14 = vld [vmem:[#allocation2 + $0x2944] ss:$112 sps:$4 sm:$0xff]  }
 0x29c   :  { %9262 = vmatprep.subr.bf16.mxu1 %v18847_v32  ;;  %v18907_v32 = vld [vmem:[#allocation2 + $0x2a24] ss:$112 sps:$4 sm:$0xff]  }
 0x29e   :  { %9238 = vmatpush2.bf16.msra.mxu0 %v18848_v35  ;;  %v18908_v35 = vld [vmem:[#allocation2 + $0x2940] ss:$112 sps:$4 sm:$0xff]  }
 0x29f   :  { %9263 = vmatpush1.bf16.msra.mxu1 %v18845_v34  ;;  %9239 = vmatprep.subr.bf16.mxu0 %v18856_v38  ;;  %v18905_v34 = vld [vmem:[#allocation2 + $0x2a20] ss:$112 sps:$4 sm:$0xff]  }
 0x2a0   :  { %9264 = vmatprep.subr.bf16.mxu1 %v18853_v36 }
 0x2a2   :  { %9240 = vmatpush2.bf16.msra.mxu0 %v18854_v15  ;;  %v18914_v15 = vld [vmem:[#allocation2 + $0x2860] ss:$112 sps:$4 sm:$0xff]  }
 0x2a3   :  { %9265 = vmatpush1.bf16.msra.mxu1 %v18851_v39  ;;  %9291 = vmatprep.subr.bf16.mxu0 %v18865_v41  ;;  %v18913_v39 = vld [vmem:[#allocation2 + $0x64c] ss:$112 sps:$4 sm:$0xff]   ;;  %v18922_v41 = vld [vmem:[#allocation2 + $0x2784] ss:$112 sps:$4 sm:$0xff]  }
 0x2a4   :  { %9266 = vmatprep.subr.bf16.mxu1 %v18859_v40  ;;  %v18916_v40 = vld [vmem:[#allocation2 + $0x2864] ss:$112 sps:$4 sm:$0xff]  }
 0x2a5   :  { %9242 = vmatmul.mubr.bf16.vlgmr.msra.gmra.mxu0 %v21120_v6  ;;  %v8915_v50 = vpop.f32.mrf.mxu0 }
 0x2a6   :  { %9292 = vmatpush1.bf16.msra.mxu0 %v18863_v43  ;;  %9323 = vmatprep.mubr.bf16.mxu0 %v21142_v33  ;;  %v18920_v43 = vld [vmem:[#allocation2 + $0x2780] ss:$112 sps:$4 sm:$0xff]  }
 0x2a7   :  { %9267 = vmatpush2.bf16.msra.mxu1 %v18857_v42  ;;  %9293 = vmatprep.subr.bf16.mxu0 %v18871_v46  ;;  %v8917_v17 = vpop.f32.mrf.mxu0  ;;  %v18911_v42 = vld [vmem:[#allocation2 + $0x648] ss:$112 sps:$4 sm:$0xff]   ;;  %v18928_v46 = vld [vmem:[#allocation2 + $0x26a4] ss:$112 sps:$4 sm:$0xff]  }
 0x2a8   :  { %9268 = vmatprep.subr.bf16.mxu1 %v18862_v45  ;;  %v18919_v45 = vld [vmem:[#allocation2 + $0x56c] ss:$112 sps:$4 sm:$0xff]  }
 0x2a9   :  { %v8919_v56 = vpop.f32.mrf.mxu0 }
 0x2aa   :  { %9294 = vmatpush1.bf16.msra.mxu0 %v18869_v52  ;;  %v18934_v52 = vld [vmem:[#allocation2 + $0x25c4] ss:$112 sps:$4 sm:$0xff]   ;;  %v18932_v56 = vld [vmem:[#allocation2 + $0x25c0] ss:$112 sps:$4 sm:$0xff]  }
 0x2ab   :  { %9269 = vmatpush2.bf16.msra.mxu1 %v18860_v48  ;;  %9295 = vmatprep.subr.bf16.mxu0 %v18877_v53  ;;  %v8920_v63 = vpop.f32.mrf.mxu0  ;;  %v18917_v48 = vld [vmem:[#allocation2 + $0x568] ss:$112 sps:$4 sm:$0xff]  }
 0x2ac   :  { %9270 = vmatprep.subr.bf16.mxu1 %v18868_v49  ;;  %v18925_v49 = vld [vmem:[#allocation2 + $0x48c] ss:$112 sps:$4 sm:$0xff]   ;;  %v18923_v53 = vld [vmem:[#allocation2 + $0x488] ss:$112 sps:$4 sm:$0xff]  }
 0x2ad   :  { %v18935_v63 = vld [vmem:[#allocation2 + $0x2c8] ss:$112 sps:$4 sm:$0xff]  }
 0x2ae   :  { %9296 = vmatpush1.bf16.msra.mxu0 %v18875_v60  ;;  %v18937_v60 = vld [vmem:[#allocation2 + $0x2cc] ss:$112 sps:$4 sm:$0xff]  }
 0x2af   :  { %9271 = vmatpush2.bf16.msra.mxu1 %v18866_v57  ;;  %9297 = vmatprep.subr.bf16.mxu0 %v18883_v62  ;;  %v18940_v57 = vld [vmem:[#allocation2 + $0x24e4] ss:$112 sps:$4 sm:$0xff]  }
 0x2b0   :  { %9272 = vmatprep.subr.bf16.mxu1 %v18874_v61  ;;  %v18938_v61 = vld [vmem:[#allocation2 + $0x24e0] ss:$112 sps:$4 sm:$0xff]   ;;  %v18946_v62 = vld [vmem:[#allocation2 + $0x2404] ss:$112 sps:$4 sm:$0xff]  }
 0x2b2   :  { %9298 = vmatpush1.bf16.msra.mxu0 %v18881_v1  ;;  %v18944_v1 = vld [vmem:[#allocation2 + $0x2400] ss:$112 sps:$4 sm:$0xff]  }
 0x2b3   :  { %9273 = vmatpush2.bf16.msra.mxu1 %v18872_v0  ;;  %9299 = vmatprep.subr.bf16.mxu0 %v18889_v4  ;;  %v18943_v0 = vld [vmem:[#allocation2 + $0x1ec] ss:$112 sps:$4 sm:$0xff]   ;;  %v18941_v4 = vld [vmem:[#allocation2 + $0x1e8] ss:$112 sps:$4 sm:$0xff]  }
 0x2b4   :  { %9274 = vmatprep.subr.bf16.mxu1 %v18880_v2  ;;  %v18952_v2 = vld [vmem:[#allocation2 + $0x2324] ss:$112 sps:$4 sm:$0xff]  }
 0x2b6   :  { %v8956_v11 = vpop.f32.mrf.mxu1  ;;  %9300 = vmatpush1.bf16.msra.mxu0 %v18887_v37  ;;  %v18950_v37 = vld [vmem:[#allocation2 + $0x2320] ss:$112 sps:$4 sm:$0xff]  }
 0x2b7   :  { %9275 = vmatpush2.bf16.msra.mxu1 %v18878_v5  ;;  %v21213_v55 = vadd.f32 %v8956_v11, %v8915_v50  ;;  %9301 = vmatprep.subr.bf16.mxu0 %v18895_v10  ;;  %v18926_v50 = vld [vmem:[#allocation2 + $0x26a0] ss:$112 sps:$4 sm:$0xff]   ;;  %v18949_v5 = vld [vmem:[#allocation2 + $0x10c] ss:$112 sps:$4 sm:$0xff]   ;;  %v18947_v10 = vld [vmem:[#allocation2 + $0x108] ss:$112 sps:$4 sm:$0xff]  }
 0x2b8   :  { %v8958_v18 = vpop.f32.mrf.mxu1  ;;  %9276 = vmatprep.subr.bf16.mxu1 %v18886_v9  ;;  %v18958_v9 = vld [vmem:[#allocation2 + $0x144c] ss:$112 sps:$4 sm:$0xff]  }
 0x2b9   :  { %v21215_v21 = vadd.f32 %v8958_v18, %v8917_v17  ;;  %v18931_v17 = vld [vmem:[#allocation2 + $0x3ac] ss:$112 sps:$4 sm:$0xff]  }
 0x2ba   :  { %v8960_v22 = vpop.f32.mrf.mxu1  ;;  %9302 = vmatpush1.bf16.msra.mxu0 %v18893_v58  ;;  %v18955_v11 = vld [vmem:[#allocation2 + $0x2c] ss:$112 sps:$4 sm:$0xff]  }
 0x2bb   :  { %9277 = vmatpush2.bf16.msra.mxu1 %v18884_v44  ;;  %9303 = vmatprep.subr.bf16.mxu0 %v18901_v20  ;;  %v18956_v44 = vld [vmem:[#allocation2 + $0x1448] ss:$112 sps:$4 sm:$0xff]   ;;  %v18964_v58 = vld [vmem:[#allocation2 + $0x136c] ss:$112 sps:$4 sm:$0xff]  }
 0x2bc   :  { %v8961_v25 = vpop.f32.mrf.mxu1  ;;  %9278 = vmatprep.subr.bf16.mxu1 %v18892_v19  ;;  %v18953_v19 = vld [vmem:[#allocation2 + $0x28] ss:$112 sps:$4 sm:$0xff]   ;;  %v18961_v22 = vld [vmem:[#allocation2 + $0xd4c] ss:$112 sps:$4 sm:$0xff]  }
 0x2bd   :  { %v18970_v25 = vld [vmem:[#allocation2 + $0x128c] ss:$112 sps:$4 sm:$0xff]  }
 0x2be   :  { %v21217_v30 = vpop.f32.mrf.mxu1  ;;  %9304 = vmatpush1.bf16.msra.mxu0 %v18899_v24 }
 0x2bf   :  { %9279 = vmatpush2.bf16.msra.mxu1 %v18890_v23  ;;  %9305 = vmatprep.subr.bf16.mxu0 %v18904_v27  ;;  %v18962_v23 = vld [vmem:[#allocation2 + $0x1368] ss:$112 sps:$4 sm:$0xff]  }
 0x2c0   :  { %v21219_v31 = vpop.f32.mrf.mxu1  ;;  %9280 = vmatprep.subr.bf16.mxu1 %v18898_v26 }
 0x2c2   :  { %v9042_v36 = vpop.f32.mrf.mxu1  ;;  %9306 = vmatpush1.bf16.msra.mxu0 %v18902_v29 }
 0x2c3   :  { %9281 = vmatpush2.bf16.msra.mxu1 %v18896_v28  ;;  %9307 = vmatprep.subr.bf16.mxu0 %v18910_v14  ;;  %v18968_v14 = vld [vmem:[#allocation2 + $0x1288] ss:$112 sps:$4 sm:$0xff]  }
 0x2c4   :  { %v9043_v38 = vpop.f32.mrf.mxu1  ;;  %9346 = vmatprep.subr.bf16.mxu1 %v18907_v32  ;;  %v18967_v32 = vld [vmem:[#allocation2 + $0xc6c] ss:$112 sps:$4 sm:$0xff]   ;;  %v18974_v36 = vld [vmem:[#allocation2 + $0x11a8] ss:$112 sps:$4 sm:$0xff]  }
 0x2c5   :  { %v18982_v38 = vld [vmem:[#allocation2 + $0x10cc] ss:$112 sps:$4 sm:$0xff]  }
 0x2c6   :  { %9283 = vmatmul.mubr.bf16.vlgmr.msra.gmra.mxu1 %v21122_v7  ;;  %9308 = vmatpush2.bf16.msra.mxu0 %v18908_v35 }
 0x2c7   :  { %9347 = vmatpush1.bf16.msra.mxu1 %v18905_v34  ;;  %9364 = vmatprep.mubr.bf16.mxu1 %v20933_v13  ;;  %v18976_v34 = vld [vmem:[#allocation2 + $0x11ac] ss:$112 sps:$4 sm:$0xff]  }
 0x2c8   :  { %9373 = vmatprep.subr.bf16.mxu1 %v18913_v39  ;;  %9309 = vmatprep.subr.bf16.mxu0 %v18916_v40  ;;  %v18971_v39 = vld [vmem:[#allocation2 + $0xb88] ss:$112 sps:$4 sm:$0xff]   ;;  %v18988_v40 = vld [vmem:[#allocation2 + $0xfec] ss:$112 sps:$4 sm:$0xff]  }
 0x2ca   :  { %9310 = vmatpush2.bf16.msra.mxu0 %v18914_v15  ;;  %v18979_v15 = vld [vmem:[#allocation2 + $0xaac] ss:$112 sps:$4 sm:$0xff]  }
 0x2cb   :  { %9311 = vmatprep.subr.bf16.mxu0 %v18922_v41  ;;  %v18977_v41 = vld [vmem:[#allocation2 + $0xaa8] ss:$112 sps:$4 sm:$0xff]  }
 0x2ce   :  { %17403 = vmatmul.mubr.msk.bf16.vlgmr.msra.gmra.mxu1 %vm8549_vm0, %v21206_v12  ;;  %9312 = vmatpush2.bf16.msra.mxu0 %v18920_v43  ;;  %v18929_v12 = vld [vmem:[#allocation2 + $0x3a8] ss:$112 sps:$4 sm:$0xff]   ;;  %v18985_v43 = vld [vmem:[#allocation2 + $0x9cc] ss:$112 sps:$4 sm:$0xff]  }
 0x2cf   :  { %9374 = vmatpush1.bf16.msra.mxu1 %v18911_v42  ;;  %9313 = vmatprep.subr.bf16.mxu0 %v18928_v46  ;;  %v18986_v42 = vld [vmem:[#allocation2 + $0xfe8] ss:$112 sps:$4 sm:$0xff]  }
 0x2d0   :  { %9375 = vmatprep.subr.bf16.mxu1 %v18919_v45  ;;  %9405 = vmatprep.mubr.bf16.mxu1 %v21111_v47  ;;  %v18994_v45 = vld [vmem:[#allocation2 + $0xf0c] ss:$112 sps:$4 sm:$0xff]   ;;  %v18983_v46 = vld [vmem:[#allocation2 + $0x9c8] ss:$112 sps:$4 sm:$0xff]  }
 0x2d2   :  { %9314 = vmatpush2.bf16.msra.mxu0 %v18926_v50  ;;  %v19000_v50 = vld [vmem:[#allocation2 + $0xe2c] ss:$112 sps:$4 sm:$0xff]  }
 0x2d3   :  { %9376 = vmatpush1.bf16.msra.mxu1 %v18917_v48  ;;  %9315 = vmatprep.subr.bf16.mxu0 %v18934_v52  ;;  %v18992_v48 = vld [vmem:[#allocation2 + $0xf08] ss:$112 sps:$4 sm:$0xff]  }
 0x2d4   :  { %9377 = vmatprep.subr.bf16.mxu1 %v18925_v49  ;;  %v18991_v49 = vld [vmem:[#allocation2 + $0x8ec] ss:$112 sps:$4 sm:$0xff]  }
 0x2d6   :  { %9316 = vmatpush2.bf16.msra.mxu0 %v18932_v56 }
 0x2d7   :  { %9378 = vmatpush1.bf16.msra.mxu1 %v18923_v53  ;;  %9317 = vmatprep.subr.bf16.mxu0 %v18940_v57  ;;  %v18989_v53 = vld [vmem:[#allocation2 + $0x8e8] ss:$112 sps:$4 sm:$0xff]   ;;  %v18997_v57 = vld [vmem:[#allocation2 + $0x80c] ss:$112 sps:$4 sm:$0xff]  }
 0x2d8   :  { %9379 = vmatprep.subr.bf16.mxu1 %v18931_v17  ;;  %v18998_v17 = vld [vmem:[#allocation2 + $0xe28] ss:$112 sps:$4 sm:$0xff]  }
 0x2da   :  { %9318 = vmatpush2.bf16.msra.mxu0 %v18938_v61  ;;  %v18995_v61 = vld [vmem:[#allocation2 + $0x808] ss:$112 sps:$4 sm:$0xff]  }
 0x2db   :  { %9380 = vmatpush1.bf16.msra.mxu1 %v18929_v12  ;;  %9319 = vmatprep.subr.bf16.mxu0 %v18946_v62  ;;  %v19006_v12 = vld [vmem:[#allocation2 + $0x1b4c] ss:$112 sps:$4 sm:$0xff]   ;;  %v19004_v62 = vld [vmem:[#allocation2 + $0x1b48] ss:$112 sps:$4 sm:$0xff]  }
 0x2dc   :  { %9381 = vmatprep.subr.bf16.mxu1 %v18937_v60 }
 0x2de   :  { %9320 = vmatpush2.bf16.msra.mxu0 %v18944_v1  ;;  %v19012_v1 = vld [vmem:[#allocation2 + $0x1a6c] ss:$112 sps:$4 sm:$0xff]  }
 0x2df   :  { %9382 = vmatpush1.bf16.msra.mxu1 %v18935_v63  ;;  %9321 = vmatprep.subr.bf16.mxu0 %v18952_v2  ;;  %v19001_v2 = vld [vmem:[#allocation2 + $0x728] ss:$112 sps:$4 sm:$0xff]  }
 0x2e0   :  { %9383 = vmatprep.subr.bf16.mxu1 %v18943_v0  ;;  %v19003_v0 = vld [vmem:[#allocation2 + $0x72c] ss:$112 sps:$4 sm:$0xff]  }
 0x2e2   :  { %9322 = vmatpush2.bf16.msra.mxu0 %v18950_v37  ;;  %v19018_v37 = vld [vmem:[#allocation2 + $0x198c] ss:$112 sps:$4 sm:$0xff]  }
 0x2e3   :  { %9384 = vmatpush1.bf16.msra.mxu1 %v18941_v4  ;;  %9414 = vmatprep.subr.bf16.mxu0 %v18958_v9  ;;  %v19010_v4 = vld [vmem:[#allocation2 + $0x1a68] ss:$112 sps:$4 sm:$0xff]  }
 0x2e4   :  { %9385 = vmatprep.subr.bf16.mxu1 %v18949_v5  ;;  %v19009_v5 = vld [vmem:[#allocation2 + $0x224c] ss:$112 sps:$4 sm:$0xff]   ;;  %v19007_v9 = vld [vmem:[#allocation2 + $0x2248] ss:$112 sps:$4 sm:$0xff]  }
 0x2e5   :  { %v8997_v18 = vpop.f32.mrf.mxu0  ;;  %9324 = vmatmul.mubr.bf16.vlgmr.msra.gmra.mxu0 %v21147_v16 }
 0x2e6   :  { %v8998_v20 = vadd.f32 %v8997_v18, %v21213_v55  ;;  %9415 = vmatpush1.bf16.msra.mxu0 %v18956_v44  ;;  %9446 = vmatprep.mubr.bf16.mxu0 %v21116_v51  ;;  %v18959_v55 = vld [vmem:[#allocation2 + $0xd48] ss:$112 sps:$4 sm:$0xff]   ;;  %v19024_v44 = vld [vmem:[#allocation2 + $0x18ac] ss:$112 sps:$4 sm:$0xff]  }
 0x2e7   :  { %9386 = vmatpush1.bf16.msra.mxu1 %v18947_v10  ;;  %v8999_v24 = vpop.f32.mrf.mxu0  ;;  %9416 = vmatprep.subr.bf16.mxu0 %v18964_v58  ;;  %v19016_v10 = vld [vmem:[#allocation2 + $0x1988] ss:$112 sps:$4 sm:$0xff]  }
 0x2e8   :  { %9387 = vmatprep.subr.bf16.mxu1 %v18955_v11  ;;  %v21229_v26 = vadd.f32 %v21217_v30, %v8998_v20  ;;  %v9000_v27 = vadd.f32 %v8999_v24, %v21215_v21  ;;  %v18965_v30 = vld [vmem:[#allocation2 + $0xc68] ss:$112 sps:$4 sm:$0xff]   ;;  %v18973_v21 = vld [vmem:[#allocation2 + $0xb8c] ss:$112 sps:$4 sm:$0xff]  }
 0x2e9   :  { %v9001_v28 = vpop.f32.mrf.mxu0  ;;  %v19015_v11 = vld [vmem:[#allocation2 + $0x216c] ss:$112 sps:$4 sm:$0xff]   ;;  %v19013_v58 = vld [vmem:[#allocation2 + $0x2168] ss:$112 sps:$4 sm:$0xff]  }
 0x2ea   :  { %v21234_v29 = vadd.f32 %v21219_v31, %v9000_v27  ;;  %9417 = vmatpush1.bf16.msra.mxu0 %v18962_v23  ;;  %v18980_v31 = vld [vmem:[#allocation2 + $0x10c8] ss:$112 sps:$4 sm:$0xff]   ;;  %v19030_v20 = vld [vmem:[#allocation2 + $0x17cc] ss:$112 sps:$4 sm:$0xff]  }
 0x2eb   :  { %9388 = vmatpush1.bf16.msra.mxu1 %v18953_v19  ;;  %9418 = vmatprep.subr.bf16.mxu0 %v18970_v25  ;;  %v9002_v35 = vpop.f32.mrf.mxu0  ;;  %v19022_v18 = vld [vmem:[#allocation2 + $0x18a8] ss:$112 sps:$4 sm:$0xff]   ;;  %v19021_v19 = vld [vmem:[#allocation2 + $0x208c] ss:$112 sps:$4 sm:$0xff]  }
 0x2ec   :  { %9389 = vmatprep.subr.bf16.mxu1 %v18961_v22  ;;  %v19019_v22 = vld [vmem:[#allocation2 + $0x2088] ss:$112 sps:$4 sm:$0xff]   ;;  %v19027_v24 = vld [vmem:[#allocation2 + $0x1fac] ss:$112 sps:$4 sm:$0xff]  }
 0x2ed   :  { %v19028_v23 = vld [vmem:[#allocation2 + $0x17c8] ss:$112 sps:$4 sm:$0xff]   ;;  %v19036_v25 = vld [vmem:[#allocation2 + $0x16ec] ss:$112 sps:$4 sm:$0xff]  }
 0x2ee   :  { %9419 = vmatpush1.bf16.msra.mxu0 %v18968_v14  ;;  %v19025_v27 = vld [vmem:[#allocation2 + $0x1fa8] ss:$112 sps:$4 sm:$0xff]   ;;  %v19039_v35 = vld [vmem:[#allocation2 + $0x1dec] ss:$112 sps:$4 sm:$0xff]  }
 0x2ef   :  { %9390 = vmatpush2.bf16.msra.mxu1 %v18959_v55  ;;  %9420 = vmatprep.subr.bf16.mxu0 %v18976_v34  ;;  %v19034_v28 = vld [vmem:[#allocation2 + $0x16e8] ss:$112 sps:$4 sm:$0xff]   ;;  %v19033_v55 = vld [vmem:[#allocation2 + $0x1ecc] ss:$112 sps:$4 sm:$0xff]  }
 0x2f0   :  { %9391 = vmatprep.subr.bf16.mxu1 %v18967_v32  ;;  %v19042_v32 = vld [vmem:[#allocation2 + $0x160c] ss:$112 sps:$4 sm:$0xff]   ;;  %v19031_v14 = vld [vmem:[#allocation2 + $0x1ec8] ss:$112 sps:$4 sm:$0xff]  }
 0x2f1   :  { %v19040_v34 = vld [vmem:[#allocation2 + $0x1608] ss:$112 sps:$4 sm:$0xff]  }
 0x2f2   :  { %9421 = vmatpush1.bf16.msra.mxu0 %v18974_v36  ;;  %v19037_v36 = vld [vmem:[#allocation2 + $0x1de8] ss:$112 sps:$4 sm:$0xff]  }
 0x2f3   :  { %9392 = vmatpush2.bf16.msra.mxu1 %v18965_v30  ;;  %9422 = vmatprep.subr.bf16.mxu0 %v18982_v38  ;;  %v19048_v30 = vld [vmem:[#allocation2 + $0x152c] ss:$112 sps:$4 sm:$0xff]  }
 0x2f4   :  { %9393 = vmatprep.subr.bf16.mxu1 %v18973_v21  ;;  %v19046_v21 = vld [vmem:[#allocation2 + $0x1528] ss:$112 sps:$4 sm:$0xff]   ;;  %v19045_v38 = vld [vmem:[#allocation2 + $0x1d0c] ss:$112 sps:$4 sm:$0xff]  }
 0x2f6   :  { %9423 = vmatpush1.bf16.msra.mxu0 %v18980_v31  ;;  %v19043_v31 = vld [vmem:[#allocation2 + $0x1d08] ss:$112 sps:$4 sm:$0xff]  }
 0x2f7   :  { %9394 = vmatpush2.bf16.msra.mxu1 %v18971_v39  ;;  %9424 = vmatprep.subr.bf16.mxu0 %v18988_v40  ;;  %v19057_v39 = vld [vmem:[#allocation2 + $0x2a2c] ss:$112 sps:$4 sm:$0xff]  }
 0x2f8   :  { %9395 = vmatprep.subr.bf16.mxu1 %v18979_v15  ;;  %v19055_v15 = vld [vmem:[#allocation2 + $0x2a28] ss:$112 sps:$4 sm:$0xff]   ;;  %v19051_v40 = vld [vmem:[#allocation2 + $0x1c2c] ss:$112 sps:$4 sm:$0xff]  }
 0x2fa   :  { %9425 = vmatpush1.bf16.msra.mxu0 %v18986_v42 }
 0x2fb   :  { %9396 = vmatpush2.bf16.msra.mxu1 %v18977_v41  ;;  %9426 = vmatprep.subr.bf16.mxu0 %v18994_v45  ;;  %v19063_v41 = vld [vmem:[#allocation2 + $0x654] ss:$112 sps:$4 sm:$0xff]  }
 0x2fc   :  { %9397 = vmatprep.subr.bf16.mxu1 %v18985_v43  ;;  %v19049_v43 = vld [vmem:[#allocation2 + $0x1c28] ss:$112 sps:$4 sm:$0xff]  }
 0x2fe   :  { %v21236_v52 = vpop.f32.mrf.mxu1  ;;  %9427 = vmatpush1.bf16.msra.mxu0 %v18992_v48  ;;  %v19054_v48 = vld [vmem:[#allocation2 + $0x294c] ss:$112 sps:$4 sm:$0xff]  }
 0x2ff   :  { %9398 = vmatpush2.bf16.msra.mxu1 %v18983_v46  ;;  %9428 = vmatprep.subr.bf16.mxu0 %v19000_v50  ;;  %v19052_v50 = vld [vmem:[#allocation2 + $0x2948] ss:$112 sps:$4 sm:$0xff]  }
 0x300   :  { %v21238_v56 = vpop.f32.mrf.mxu1  ;;  %9399 = vmatprep.subr.bf16.mxu1 %v18991_v49 }
 0x302   :  { %v9083_v60 = vpop.f32.mrf.mxu1  ;;  %9429 = vmatpush1.bf16.msra.mxu0 %v18998_v17  ;;  %v19060_v17 = vld [vmem:[#allocation2 + $0x286c] ss:$112 sps:$4 sm:$0xff]  }
 0x303   :  { %9400 = vmatpush2.bf16.msra.mxu1 %v18989_v53  ;;  %9430 = vmatprep.subr.bf16.mxu0 %v19006_v12  ;;  %v19061_v53 = vld [vmem:[#allocation2 + $0x650] ss:$112 sps:$4 sm:$0xff]   ;;  %v19069_v12 = vld [vmem:[#allocation2 + $0x574] ss:$112 sps:$4 sm:$0xff]  }
 0x304   :  { %v9084_v63 = vpop.f32.mrf.mxu1  ;;  %9401 = vmatprep.subr.bf16.mxu1 %v18997_v57 }
 0x305   :  { %v19075_v63 = vld [vmem:[#allocation2 + $0x494] ss:$112 sps:$4 sm:$0xff]  }
 0x306   :  { %9431 = vmatpush2.bf16.msra.mxu0 %v19004_v62  ;;  %v19066_v62 = vld [vmem:[#allocation2 + $0x278c] ss:$112 sps:$4 sm:$0xff]  }
 0x307   :  { %9402 = vmatpush2.bf16.msra.mxu1 %v18995_v61  ;;  %9432 = vmatprep.subr.bf16.mxu0 %v19012_v1  ;;  %v19058_v61 = vld [vmem:[#allocation2 + $0x2868] ss:$112 sps:$4 sm:$0xff]   ;;  %v19072_v1 = vld [vmem:[#allocation2 + $0x26ac] ss:$112 sps:$4 sm:$0xff]  }
 0x308   :  { %9403 = vmatprep.subr.bf16.mxu1 %v19003_v0  ;;  %v19064_v0 = vld [vmem:[#allocation2 + $0x2788] ss:$112 sps:$4 sm:$0xff]  }
 0x30a   :  { %9433 = vmatpush2.bf16.msra.mxu0 %v19010_v4  ;;  %v19081_v4 = vld [vmem:[#allocation2 + $0x3b4] ss:$112 sps:$4 sm:$0xff]  }
 0x30b   :  { %9404 = vmatpush2.bf16.msra.mxu1 %v19001_v2  ;;  %9434 = vmatprep.subr.bf16.mxu0 %v19018_v37  ;;  %v19073_v2 = vld [vmem:[#allocation2 + $0x490] ss:$112 sps:$4 sm:$0xff]   ;;  %v19078_v37 = vld [vmem:[#allocation2 + $0x25cc] ss:$112 sps:$4 sm:$0xff]  }
 0x30c   :  { %9455 = vmatprep.subr.bf16.mxu1 %v19009_v5  ;;  %v19070_v5 = vld [vmem:[#allocation2 + $0x26a8] ss:$112 sps:$4 sm:$0xff]  }
 0x30e   :  { %9406 = vmatmul.mubr.bf16.vlgmr.msra.gmra.mxu1 %v21120_v6  ;;  %9435 = vmatpush2.bf16.msra.mxu0 %v19016_v10  ;;  %v19087_v10 = vld [vmem:[#allocation2 + $0x2d4] ss:$112 sps:$4 sm:$0xff]  }
 0x30f   :  { %9456 = vmatpush1.bf16.msra.mxu1 %v19007_v9  ;;  %9436 = vmatprep.subr.bf16.mxu0 %v19024_v44  ;;  %v19079_v9 = vld [vmem:[#allocation2 + $0x3b0] ss:$112 sps:$4 sm:$0xff]   ;;  %v19084_v44 = vld [vmem:[#allocation2 + $0x24ec] ss:$112 sps:$4 sm:$0xff]  }
 0x310   :  { %9457 = vmatprep.subr.bf16.mxu1 %v19015_v11  ;;  %9487 = vmatprep.mubr.bf16.mxu1 %v21142_v33  ;;  %v19076_v11 = vld [vmem:[#allocation2 + $0x25c8] ss:$112 sps:$4 sm:$0xff]  }
 0x312   :  { %9437 = vmatpush2.bf16.msra.mxu0 %v19022_v18  ;;  %v19093_v18 = vld [vmem:[#allocation2 + $0x1f4] ss:$112 sps:$4 sm:$0xff]  }
 0x313   :  { %9458 = vmatpush1.bf16.msra.mxu1 %v19013_v58  ;;  %9438 = vmatprep.subr.bf16.mxu0 %v19030_v20  ;;  %v19085_v58 = vld [vmem:[#allocation2 + $0x2d0] ss:$112 sps:$4 sm:$0xff]  }
 0x314   :  { %9459 = vmatprep.subr.bf16.mxu1 %v19021_v19  ;;  %v19082_v19 = vld [vmem:[#allocation2 + $0x24e8] ss:$112 sps:$4 sm:$0xff]  }
 0x316   :  { %9439 = vmatpush2.bf16.msra.mxu0 %v19028_v23 }
 0x317   :  { %9460 = vmatpush1.bf16.msra.mxu1 %v19019_v22  ;;  %9440 = vmatprep.subr.bf16.mxu0 %v19036_v25  ;;  %v19090_v22 = vld [vmem:[#allocation2 + $0x240c] ss:$112 sps:$4 sm:$0xff]   ;;  %v19099_v25 = vld [vmem:[#allocation2 + $0x114] ss:$112 sps:$4 sm:$0xff]  }
 0x318   :  { %9461 = vmatprep.subr.bf16.mxu1 %v19027_v24  ;;  %v19091_v24 = vld [vmem:[#allocation2 + $0x1f0] ss:$112 sps:$4 sm:$0xff]  }
 0x31a   :  { %9441 = vmatpush2.bf16.msra.mxu0 %v19034_v28 }
 0x31b   :  { %9462 = vmatpush1.bf16.msra.mxu1 %v19025_v27  ;;  %9442 = vmatprep.subr.bf16.mxu0 %v19042_v32 }
 0x31c   :  { %9463 = vmatprep.subr.bf16.mxu1 %v19033_v55  ;;  %v19088_v55 = vld [vmem:[#allocation2 + $0x2408] ss:$112 sps:$4 sm:$0xff]  }
 0x31e   :  { %9443 = vmatpush2.bf16.msra.mxu0 %v19040_v34  ;;  %v19097_v34 = vld [vmem:[#allocation2 + $0x110] ss:$112 sps:$4 sm:$0xff]  }
 0x31f   :  { %9464 = vmatpush1.bf16.msra.mxu1 %v19031_v14  ;;  %9444 = vmatprep.subr.bf16.mxu0 %v19048_v30  ;;  %v19096_v14 = vld [vmem:[#allocation2 + $0x232c] ss:$112 sps:$4 sm:$0xff]  }
 0x320   :  { %9465 = vmatprep.subr.bf16.mxu1 %v19039_v35  ;;  %v19102_v35 = vld [vmem:[#allocation2 + $0x34] ss:$112 sps:$4 sm:$0xff]  }
 0x322   :  { %9445 = vmatpush2.bf16.msra.mxu0 %v19046_v21 }
 0x323   :  { %9466 = vmatpush1.bf16.msra.mxu1 %v19037_v36  ;;  %9510 = vmatprep.subr.bf16.mxu0 %v19057_v39  ;;  %v19094_v36 = vld [vmem:[#allocation2 + $0x2328] ss:$112 sps:$4 sm:$0xff]  }
 0x324   :  { %9467 = vmatprep.subr.bf16.mxu1 %v19045_v38  ;;  %v19105_v38 = vld [vmem:[#allocation2 + $0x1454] ss:$112 sps:$4 sm:$0xff]  }
 0x325   :  { %v9120_v42 = vpop.f32.mrf.mxu0  ;;  %9447 = vmatmul.mubr.bf16.vlgmr.msra.gmra.mxu0 %v21122_v7 }
 0x326   :  { %v9121_v45 = vadd.f32 %v9120_v42, %v21236_v52  ;;  %9511 = vmatpush1.bf16.msra.mxu0 %v19055_v15  ;;  %9528 = vmatprep.mubr.bf16.mxu0 %v20933_v13  ;;  %v21249_v52 = vld [vmem:[%s21771_s12 + $0x18] ss:$0 sps:$4 sm:$0xff]   ;;  %v19108_v15 = vld [vmem:[#allocation2 + $0xd54] ss:$112 sps:$4 sm:$0xff]   ;;  %v19103_v42 = vld [vmem:[#allocation2 + $0x1450] ss:$112 sps:$4 sm:$0xff]  }
 0x327   :  { %9468 = vmatpush1.bf16.msra.mxu1 %v19043_v31  ;;  %v9122_v46 = vpop.f32.mrf.mxu0  ;;  %9537 = vmatprep.subr.bf16.mxu0 %v19063_v41  ;;  %v19100_v31 = vld [vmem:[#allocation2 + $0x30] ss:$112 sps:$4 sm:$0xff]  }
 0x328   :  { %9469 = vmatprep.subr.bf16.mxu1 %v19051_v40  ;;  %v9123_v49 = vadd.f32 %v9122_v46, %v21238_v56  ;;  %v19067_v56 = vld [vmem:[#allocation2 + $0x570] ss:$112 sps:$4 sm:$0xff]  }
 0x329   :  { %v9124_v57 = vpop.f32.mrf.mxu0 }
 0x32a   :  { %v19117_v57 = vld [vmem:[#allocation2 + $0x1294] ss:$112 sps:$4 sm:$0xff]  }
 0x32b   :  { %9470 = vmatpush1.bf16.msra.mxu1 %v19049_v43  ;;  %v9125_v60 = vpop.f32.mrf.mxu0 }
 0x32c   :  { %9471 = vmatprep.subr.bf16.mxu1 %v19054_v48  ;;  %v19111_v48 = vld [vmem:[#allocation2 + $0x1374] ss:$112 sps:$4 sm:$0xff]   ;;  %v19115_v60 = vld [vmem:[#allocation2 + $0x1290] ss:$112 sps:$4 sm:$0xff]  }
 0x32d   :  { %17404 = vmatmul.mubr.msk.bf16.vlgmr.msra.gmra.mxu0 %vm8549_vm0, %v21249_v52 }
 0x32e   :  { %9538 = vmatpush1.bf16.msra.mxu0 %v19061_v53  ;;  %9569 = vmatprep.mubr.bf16.mxu0 %v21111_v47  ;;  %v19109_v53 = vld [vmem:[#allocation2 + $0x1370] ss:$112 sps:$4 sm:$0xff]  }
 0x32f   :  { %9472 = vmatpush2.bf16.msra.mxu1 %v19052_v50  ;;  %9539 = vmatprep.subr.bf16.mxu0 %v19069_v12  ;;  %v19120_v12 = vld [vmem:[#allocation2 + $0xb94] ss:$112 sps:$4 sm:$0xff]  }
 0x330   :  { %9473 = vmatprep.subr.bf16.mxu1 %v19060_v17  ;;  %v19112_v17 = vld [vmem:[#allocation2 + $0xc70] ss:$112 sps:$4 sm:$0xff]  }
 0x332   :  { %9540 = vmatpush1.bf16.msra.mxu0 %v19067_v56  ;;  %v19126_v56 = vld [vmem:[#allocation2 + $0xab4] ss:$112 sps:$4 sm:$0xff]  }
 0x333   :  { %9474 = vmatpush2.bf16.msra.mxu1 %v19058_v61  ;;  %9541 = vmatprep.subr.bf16.mxu0 %v19075_v63  ;;  %v19118_v61 = vld [vmem:[#allocation2 + $0xb90] ss:$112 sps:$4 sm:$0xff]  }
 0x334   :  { %9475 = vmatprep.subr.bf16.mxu1 %v19066_v62  ;;  %v19123_v62 = vld [vmem:[#allocation2 + $0x11b4] ss:$112 sps:$4 sm:$0xff]   ;;  %v19121_v63 = vld [vmem:[#allocation2 + $0x11b0] ss:$112 sps:$4 sm:$0xff]  }
 0x336   :  { %9542 = vmatpush1.bf16.msra.mxu0 %v19073_v2  ;;  %v19132_v2 = vld [vmem:[#allocation2 + $0x9d4] ss:$112 sps:$4 sm:$0xff]  }
 0x337   :  { %9476 = vmatpush2.bf16.msra.mxu1 %v19064_v0  ;;  %9543 = vmatprep.subr.bf16.mxu0 %v19081_v4  ;;  %v19124_v0 = vld [vmem:[#allocation2 + $0xab0] ss:$112 sps:$4 sm:$0xff]  }
 0x338   :  { %9477 = vmatprep.subr.bf16.mxu1 %v19072_v1  ;;  %v19129_v1 = vld [vmem:[#allocation2 + $0x10d4] ss:$112 sps:$4 sm:$0xff]   ;;  %v19127_v4 = vld [vmem:[#allocation2 + $0x10d0] ss:$112 sps:$4 sm:$0xff]  }
 0x33a   :  { %9544 = vmatpush1.bf16.msra.mxu0 %v19079_v9  ;;  %v19138_v9 = vld [vmem:[#allocation2 + $0x8f4] ss:$112 sps:$4 sm:$0xff]  }
 0x33b   :  { %9478 = vmatpush2.bf16.msra.mxu1 %v19070_v5  ;;  %9545 = vmatprep.subr.bf16.mxu0 %v19087_v10  ;;  %v19130_v5 = vld [vmem:[#allocation2 + $0x9d0] ss:$112 sps:$4 sm:$0xff]  }
 0x33c   :  { %9479 = vmatprep.subr.bf16.mxu1 %v19078_v37  ;;  %v19135_v37 = vld [vmem:[#allocation2 + $0xff4] ss:$112 sps:$4 sm:$0xff]   ;;  %v19133_v10 = vld [vmem:[#allocation2 + $0xff0] ss:$112 sps:$4 sm:$0xff]  }
 0x33e   :  { %v9161_v20 = vpop.f32.mrf.mxu1  ;;  %9546 = vmatpush1.bf16.msra.mxu0 %v19085_v58  ;;  %v19144_v58 = vld [vmem:[#allocation2 + $0x814] ss:$112 sps:$4 sm:$0xff]  }
 0x33f   :  { %9480 = vmatpush2.bf16.msra.mxu1 %v19076_v11  ;;  %v9162_v23 = vadd.f32 %v9161_v20, %v9121_v45  ;;  %9547 = vmatprep.subr.bf16.mxu0 %v19093_v18  ;;  %v19106_v45 = vld [vmem:[#allocation2 + $0xd50] ss:$112 sps:$4 sm:$0xff]   ;;  %v19147_v20 = vld [vmem:[#allocation2 + $0xe34] ss:$112 sps:$4 sm:$0xff]  }
 0x340   :  { %v9163_v27 = vpop.f32.mrf.mxu1  ;;  %9481 = vmatprep.subr.bf16.mxu1 %v19084_v44  ;;  %v19136_v11 = vld [vmem:[#allocation2 + $0x8f0] ss:$112 sps:$4 sm:$0xff]   ;;  %v19141_v44 = vld [vmem:[#allocation2 + $0xf14] ss:$112 sps:$4 sm:$0xff]  }
 0x341   :  { %v9164_v28 = vadd.f32 %v9163_v27, %v9123_v49  ;;  %v19114_v49 = vld [vmem:[#allocation2 + $0xc74] ss:$112 sps:$4 sm:$0xff]   ;;  %v19139_v18 = vld [vmem:[#allocation2 + $0xf10] ss:$112 sps:$4 sm:$0xff]  }
 0x342   :  { %v9165_v32 = vpop.f32.mrf.mxu1  ;;  %9548 = vmatpush1.bf16.msra.mxu0 %v19091_v24  ;;  %v19145_v24 = vld [vmem:[#allocation2 + $0xe30] ss:$112 sps:$4 sm:$0xff]   ;;  %v19153_v27 = vld [vmem:[#allocation2 + $0x1b54] ss:$112 sps:$4 sm:$0xff]  }
 0x343   :  { %9482 = vmatpush2.bf16.msra.mxu1 %v19082_v19  ;;  %9549 = vmatprep.subr.bf16.mxu0 %v19099_v25  ;;  %v19142_v19 = vld [vmem:[#allocation2 + $0x810] ss:$112 sps:$4 sm:$0xff]  }
 0x344   :  { %v9166_v30 = vpop.f32.mrf.mxu1  ;;  %9483 = vmatprep.subr.bf16.mxu1 %v19090_v22  ;;  %v19150_v22 = vld [vmem:[#allocation2 + $0x734] ss:$112 sps:$4 sm:$0xff]   ;;  %v19148_v25 = vld [vmem:[#allocation2 + $0x730] ss:$112 sps:$4 sm:$0xff]  }
 0x345   :  { %v19165_v30 = vld [vmem:[#allocation2 + $0x2174] ss:$112 sps:$4 sm:$0xff]  }
 0x346   :  { %v9202_v21 = vpop.f32.mrf.mxu1  ;;  %9550 = vmatpush1.bf16.msra.mxu0 %v19097_v34  ;;  %v19157_v34 = vld [vmem:[#allocation2 + $0x2250] ss:$112 sps:$4 sm:$0xff]  }
 0x347   :  { %9484 = vmatpush2.bf16.msra.mxu1 %v19088_v55  ;;  %v21254_v39 = vadd.f32 %v9202_v21, %v9162_v23  ;;  %9551 = vmatprep.subr.bf16.mxu0 %v19102_v35  ;;  %v19156_v35 = vld [vmem:[#allocation2 + $0x1a74] ss:$112 sps:$4 sm:$0xff]   ;;  %v19154_v21 = vld [vmem:[#allocation2 + $0x1a70] ss:$112 sps:$4 sm:$0xff]  }
 0x348   :  { %v9204_v40 = vpop.f32.mrf.mxu1  ;;  %9485 = vmatprep.subr.bf16.mxu1 %v19096_v14  ;;  %v19151_v14 = vld [vmem:[#allocation2 + $0x1b50] ss:$112 sps:$4 sm:$0xff]  }
 0x349   :  { %v21256_v41 = vadd.f32 %v9204_v40, %v9164_v28  ;;  %v19159_v28 = vld [vmem:[#allocation2 + $0x2254] ss:$112 sps:$4 sm:$0xff]   ;;  %v19160_v40 = vld [vmem:[#allocation2 + $0x1990] ss:$112 sps:$4 sm:$0xff]  }
 0x34a   :  { %v9206_v43 = vpop.f32.mrf.mxu1  ;;  %9552 = vmatpush1.bf16.msra.mxu0 %v19100_v31  ;;  %v19163_v31 = vld [vmem:[#allocation2 + $0x2170] ss:$112 sps:$4 sm:$0xff]  }
 0x34b   :  { %v10849_v46 = vmax.f32 %v21180_v3, %v21256_v41  ;;  %9486 = vmatpush2.bf16.msra.mxu1 %v19094_v36  ;;  %9553 = vmatprep.subr.bf16.mxu0 %v19108_v15  ;;  %v19171_v15 = vld [vmem:[#allocation2 + $0x2094] ss:$112 sps:$4 sm:$0xff]   ;;  %v19697_v3 = vld [vmem:[#allocation2 + $0x1390] ss:$112 sps:$4 sm:$0xff]  }
 0x34c   :  { %v9207_v50 = vpop.f32.mrf.mxu1  ;;  %9578 = vmatprep.subr.bf16.mxu1 %v19105_v38  ;;  %v19162_v38 = vld [vmem:[#allocation2 + $0x1994] ss:$112 sps:$4 sm:$0xff]   ;;  %v19700_v41 = vld [vmem:[#allocation2 + $0xc90] ss:$112 sps:$4 sm:$0xff]  }
 0x34d   :  { %v19168_v43 = vld [vmem:[#allocation2 + $0x18b4] ss:$112 sps:$4 sm:$0xff]  }
 0x34e   :  { %9488 = vmatmul.mubr.bf16.vlgmr.msra.gmra.mxu1 %v21147_v16  ;;  %9554 = vmatpush2.bf16.msra.mxu0 %v19106_v45  ;;  %v19177_v45 = vld [vmem:[#allocation2 + $0x1fb4] ss:$112 sps:$4 sm:$0xff]  }
 0x34f   :  { %9579 = vmatpush1.bf16.msra.mxu1 %v19103_v42  ;;  %9555 = vmatprep.subr.bf16.mxu0 %v19114_v49  ;;  %v19169_v42 = vld [vmem:[#allocation2 + $0x2090] ss:$112 sps:$4 sm:$0xff]   ;;  %v19174_v50 = vld [vmem:[#allocation2 + $0x17d4] ss:$112 sps:$4 sm:$0xff]  }
 0x350   :  { %9580 = vmatprep.subr.bf16.mxu1 %v19111_v48  ;;  %9610 = vmatprep.mubr.bf16.mxu1 %v21116_v51  ;;  %v19166_v48 = vld [vmem:[#allocation2 + $0x18b0] ss:$112 sps:$4 sm:$0xff]  }
 0x351   :  { %v19175_v49 = vld [vmem:[#allocation2 + $0x1fb0] ss:$112 sps:$4 sm:$0xff]  }
 0x352   :  { %9556 = vmatpush2.bf16.msra.mxu0 %v19112_v17  ;;  %v19172_v17 = vld [vmem:[#allocation2 + $0x17d0] ss:$112 sps:$4 sm:$0xff]  }
 0x353   :  { %9581 = vmatpush1.bf16.msra.mxu1 %v19109_v53  ;;  %9557 = vmatprep.subr.bf16.mxu0 %v19120_v12  ;;  %v19183_v53 = vld [vmem:[#allocation2 + $0x1ed4] ss:$112 sps:$4 sm:$0xff]  }
 0x354   :  { %9582 = vmatprep.subr.bf16.mxu1 %v19117_v57  ;;  %v19181_v57 = vld [vmem:[#allocation2 + $0x1ed0] ss:$112 sps:$4 sm:$0xff]   ;;  %v19180_v12 = vld [vmem:[#allocation2 + $0x16f4] ss:$112 sps:$4 sm:$0xff]  }
 0x356   :  { %9558 = vmatpush2.bf16.msra.mxu0 %v19118_v61  ;;  %v19178_v61 = vld [vmem:[#allocation2 + $0x16f0] ss:$112 sps:$4 sm:$0xff]  }
 0x357   :  { %9583 = vmatpush1.bf16.msra.mxu1 %v19115_v60  ;;  %9559 = vmatprep.subr.bf16.mxu0 %v19126_v56  ;;  %v19189_v60 = vld [vmem:[#allocation2 + $0x1df4] ss:$112 sps:$4 sm:$0xff]  }
 0x358   :  { %9584 = vmatprep.subr.bf16.mxu1 %v19123_v62  ;;  %v19187_v62 = vld [vmem:[#allocation2 + $0x1df0] ss:$112 sps:$4 sm:$0xff]   ;;  %v19186_v56 = vld [vmem:[#allocation2 + $0x1614] ss:$112 sps:$4 sm:$0xff]  }
 0x35a   :  { %9560 = vmatpush2.bf16.msra.mxu0 %v19124_v0  ;;  %v19184_v0 = vld [vmem:[#allocation2 + $0x1610] ss:$112 sps:$4 sm:$0xff]  }
 0x35b   :  { %9585 = vmatpush1.bf16.msra.mxu1 %v19121_v63  ;;  %9561 = vmatprep.subr.bf16.mxu0 %v19132_v2  ;;  %v19195_v63 = vld [vmem:[#allocation2 + $0x1d14] ss:$112 sps:$4 sm:$0xff]  }
 0x35c   :  { %9586 = vmatprep.subr.bf16.mxu1 %v19129_v1  ;;  %v19193_v1 = vld [vmem:[#allocation2 + $0x1d10] ss:$112 sps:$4 sm:$0xff]   ;;  %v19192_v2 = vld [vmem:[#allocation2 + $0x1534] ss:$112 sps:$4 sm:$0xff]  }
 0x35e   :  { %9562 = vmatpush2.bf16.msra.mxu0 %v19130_v5 }
 0x35f   :  { %9587 = vmatpush1.bf16.msra.mxu1 %v19127_v4  ;;  %9563 = vmatprep.subr.bf16.mxu0 %v19138_v9  ;;  %v19198_v4 = vld [vmem:[#allocation2 + $0x1c34] ss:$112 sps:$4 sm:$0xff]   ;;  %v19190_v9 = vld [vmem:[#allocation2 + $0x1530] ss:$112 sps:$4 sm:$0xff]  }
 0x360   :  { %9588 = vmatprep.subr.bf16.mxu1 %v19135_v37 }
 0x362   :  { %9564 = vmatpush2.bf16.msra.mxu0 %v19136_v11 }
 0x363   :  { %9589 = vmatpush1.bf16.msra.mxu1 %v19133_v10  ;;  %9565 = vmatprep.subr.bf16.mxu0 %v19144_v58  ;;  %v19196_v10 = vld [vmem:[#allocation2 + $0x1c30] ss:$112 sps:$4 sm:$0xff]   ;;  %v19204_v58 = vld [vmem:[#allocation2 + $0x2954] ss:$112 sps:$4 sm:$0xff]  }
 0x364   :  { %9590 = vmatprep.subr.bf16.mxu1 %v19141_v44  ;;  %v19201_v44 = vld [vmem:[#allocation2 + $0x2a34] ss:$112 sps:$4 sm:$0xff]  }
 0x365   :  { %v21262_v23 = vpop.f32.mrf.mxu0 }
 0x366   :  { %9566 = vmatpush2.bf16.msra.mxu0 %v19142_v19 }
 0x367   :  { %9591 = vmatpush1.bf16.msra.mxu1 %v19139_v18  ;;  %9567 = vmatprep.subr.bf16.mxu0 %v19150_v22  ;;  %v21264_v55 = vpop.f32.mrf.mxu0  ;;  %v19202_v22 = vld [vmem:[#allocation2 + $0x2950] ss:$112 sps:$4 sm:$0xff]  }
 0x368   :  { %9592 = vmatprep.subr.bf16.mxu1 %v19147_v20  ;;  %v19199_v20 = vld [vmem:[#allocation2 + $0x2a30] ss:$112 sps:$4 sm:$0xff]  }
 0x369   :  { %v9247_v32 = vpop.f32.mrf.mxu0 }
 0x36a   :  { %9568 = vmatpush2.bf16.msra.mxu0 %v19148_v25  ;;  %v19210_v25 = vld [vmem:[#allocation2 + $0x2874] ss:$112 sps:$4 sm:$0xff]  }
 0x36b   :  { %9593 = vmatpush1.bf16.msra.mxu1 %v19145_v24  ;;  %9619 = vmatprep.subr.bf16.mxu0 %v19159_v28  ;;  %v9248_v36 = vpop.f32.mrf.mxu0 }
 0x36c   :  { %9594 = vmatprep.subr.bf16.mxu1 %v19153_v27  ;;  %v19208_v27 = vld [vmem:[#allocation2 + $0x2870] ss:$112 sps:$4 sm:$0xff]   ;;  %v19213_v36 = vld [vmem:[#allocation2 + $0x57c] ss:$112 sps:$4 sm:$0xff]  }
 0x36d   :  { %9570 = vmatmul.mubr.bf16.vlgmr.msra.gmra.mxu0 %v21120_v6 }
 0x36e   :  { %9620 = vmatpush1.bf16.msra.mxu0 %v19157_v34  ;;  %9651 = vmatprep.mubr.bf16.mxu0 %v21142_v33  ;;  %v19214_v34 = vld [vmem:[#allocation2 + $0x2790] ss:$112 sps:$4 sm:$0xff]  }
 0x36f   :  { %9595 = vmatpush2.bf16.msra.mxu1 %v19151_v14  ;;  %9621 = vmatprep.subr.bf16.mxu0 %v19165_v30  ;;  %v19205_v14 = vld [vmem:[#allocation2 + $0x658] ss:$112 sps:$4 sm:$0xff]  }
 0x370   :  { %9596 = vmatprep.subr.bf16.mxu1 %v19156_v35 }
 0x372   :  { %9622 = vmatpush1.bf16.msra.mxu0 %v19163_v31  ;;  %v19219_v31 = vld [vmem:[#allocation2 + $0x49c] ss:$112 sps:$4 sm:$0xff]  }
 0x373   :  { %9597 = vmatpush2.bf16.msra.mxu1 %v19154_v21  ;;  %9623 = vmatprep.subr.bf16.mxu0 %v19171_v15  ;;  %v19222_v21 = vld [vmem:[#allocation2 + $0x26b4] ss:$112 sps:$4 sm:$0xff]   ;;  %v19220_v15 = vld [vmem:[#allocation2 + $0x26b0] ss:$112 sps:$4 sm:$0xff]  }
 0x374   :  { %9598 = vmatprep.subr.bf16.mxu1 %v19162_v38  ;;  %v19211_v38 = vld [vmem:[#allocation2 + $0x578] ss:$112 sps:$4 sm:$0xff]  }
 0x376   :  { %9624 = vmatpush1.bf16.msra.mxu0 %v19169_v42  ;;  %v19217_v42 = vld [vmem:[#allocation2 + $0x498] ss:$112 sps:$4 sm:$0xff]  }
 0x377   :  { %9599 = vmatpush2.bf16.msra.mxu1 %v19160_v40  ;;  %9625 = vmatprep.subr.bf16.mxu0 %v19177_v45  ;;  %v19228_v40 = vld [vmem:[#allocation2 + $0x25d4] ss:$112 sps:$4 sm:$0xff]   ;;  %v19226_v45 = vld [vmem:[#allocation2 + $0x25d0] ss:$112 sps:$4 sm:$0xff]  }
 0x378   :  { %9600 = vmatprep.subr.bf16.mxu1 %v19168_v43  ;;  %v19225_v43 = vld [vmem:[#allocation2 + $0x3bc] ss:$112 sps:$4 sm:$0xff]  }
 0x37a   :  { %9626 = vmatpush1.bf16.msra.mxu0 %v19175_v49  ;;  %v19231_v49 = vld [vmem:[#allocation2 + $0x2dc] ss:$112 sps:$4 sm:$0xff]  }
 0x37b   :  { %9601 = vmatpush2.bf16.msra.mxu1 %v19166_v48  ;;  %9627 = vmatprep.subr.bf16.mxu0 %v19183_v53  ;;  %v19234_v48 = vld [vmem:[#allocation2 + $0x24f4] ss:$112 sps:$4 sm:$0xff]  }
 0x37c   :  { %9602 = vmatprep.subr.bf16.mxu1 %v19174_v50  ;;  %v19232_v50 = vld [vmem:[#allocation2 + $0x24f0] ss:$112 sps:$4 sm:$0xff]   ;;  %v19240_v53 = vld [vmem:[#allocation2 + $0x2414] ss:$112 sps:$4 sm:$0xff]  }
 0x37e   :  { %9628 = vmatpush1.bf16.msra.mxu0 %v19181_v57  ;;  %v19237_v57 = vld [vmem:[#allocation2 + $0x1fc] ss:$112 sps:$4 sm:$0xff]  }
 0x37f   :  { %9603 = vmatpush2.bf16.msra.mxu1 %v19172_v17  ;;  %9629 = vmatprep.subr.bf16.mxu0 %v19189_v60  ;;  %v19229_v17 = vld [vmem:[#allocation2 + $0x2d8] ss:$112 sps:$4 sm:$0xff]   ;;  %v19246_v60 = vld [vmem:[#allocation2 + $0x2334] ss:$112 sps:$4 sm:$0xff]  }
 0x380   :  { %9604 = vmatprep.subr.bf16.mxu1 %v19180_v12  ;;  %v19238_v12 = vld [vmem:[#allocation2 + $0x2410] ss:$112 sps:$4 sm:$0xff]  }
 0x382   :  { %9630 = vmatpush1.bf16.msra.mxu0 %v19187_v62  ;;  %v19235_v62 = vld [vmem:[#allocation2 + $0x1f8] ss:$112 sps:$4 sm:$0xff]  }
 0x383   :  { %9605 = vmatpush2.bf16.msra.mxu1 %v19178_v61  ;;  %9631 = vmatprep.subr.bf16.mxu0 %v19195_v63  ;;  %v19243_v63 = vld [vmem:[#allocation2 + $0x11c] ss:$112 sps:$4 sm:$0xff]  }
 0x384   :  { %9606 = vmatprep.subr.bf16.mxu1 %v19186_v56 }
 0x386   :  { %v9284_v5 = vpop.f32.mrf.mxu1  ;;  %9632 = vmatpush1.bf16.msra.mxu0 %v19193_v1 }
 0x387   :  { %v21269_v37 = vadd.f32 %v9284_v5, %v21262_v23  ;;  %9607 = vmatpush2.bf16.msra.mxu1 %v19184_v0  ;;  %9633 = vmatprep.subr.bf16.mxu0 %v19198_v4  ;;  %v19207_v23 = vld [vmem:[#allocation2 + $0x65c] ss:$112 sps:$4 sm:$0xff]   ;;  %v19244_v0 = vld [vmem:[#allocation2 + $0x2330] ss:$112 sps:$4 sm:$0xff]  }
 0x388   :  { %v9286_v11 = vpop.f32.mrf.mxu1  ;;  %9608 = vmatprep.subr.bf16.mxu1 %v19192_v2  ;;  %v19252_v2 = vld [vmem:[#allocation2 + $0x145c] ss:$112 sps:$4 sm:$0xff]  }
 0x389   :  { %v21272_v18 = vadd.f32 %v9286_v11, %v21264_v55  ;;  %v19216_v55 = vld [vmem:[#allocation2 + $0x2794] ss:$112 sps:$4 sm:$0xff]  }
 0x38a   :  { %v9288_v19 = vpop.f32.mrf.mxu1  ;;  %9634 = vmatpush1.bf16.msra.mxu0 %v19196_v10 }
 0x38b   :  { %9609 = vmatpush2.bf16.msra.mxu1 %v19190_v9  ;;  %9635 = vmatprep.subr.bf16.mxu0 %v19204_v58  ;;  %v19250_v58 = vld [vmem:[#allocation2 + $0x1458] ss:$112 sps:$4 sm:$0xff]   ;;  %v19258_v19 = vld [vmem:[#allocation2 + $0x137c] ss:$112 sps:$4 sm:$0xff]  }
 0x38c   :  { %v9289_v24 = vpop.f32.mrf.mxu1  ;;  %9674 = vmatprep.subr.bf16.mxu1 %v19201_v44  ;;  %v19249_v44 = vld [vmem:[#allocation2 + $0x3c] ss:$112 sps:$4 sm:$0xff]  }
 0x38d   :  { %v19255_v24 = vld [vmem:[#allocation2 + $0xd5c] ss:$112 sps:$4 sm:$0xff]  }
 0x38e   :  { %9611 = vmatmul.mubr.bf16.vlgmr.msra.gmra.mxu1 %v21122_v7  ;;  %v9366_v28 = vpop.f32.mrf.mxu1  ;;  %9636 = vmatpush2.bf16.msra.mxu0 %v19202_v22 }
 0x38f   :  { %9675 = vmatpush1.bf16.msra.mxu1 %v19199_v20  ;;  %9692 = vmatprep.mubr.bf16.mxu1 %v20933_v13 }
 0x390   :  { %v21275_v32 = vpop.f32.mrf.mxu1  ;;  %9701 = vmatprep.subr.bf16.mxu1 %v19207_v23  ;;  %9637 = vmatprep.subr.bf16.mxu0 %v19210_v25  ;;  %v19256_v23 = vld [vmem:[#allocation2 + $0x1378] ss:$112 sps:$4 sm:$0xff]   ;;  %v19264_v25 = vld [vmem:[#allocation2 + $0x129c] ss:$112 sps:$4 sm:$0xff]  }
 0x392   :  { %v9370_v35 = vpop.f32.mrf.mxu1  ;;  %9638 = vmatpush2.bf16.msra.mxu0 %v19208_v27  ;;  %v19253_v27 = vld [vmem:[#allocation2 + $0xd58] ss:$112 sps:$4 sm:$0xff]  }
 0x393   :  { %9639 = vmatprep.subr.bf16.mxu0 %v19216_v55  ;;  %v19270_v55 = vld [vmem:[#allocation2 + $0x11bc] ss:$112 sps:$4 sm:$0xff]  }
 0x394   :  { %v9371_v30 = vpop.f32.mrf.mxu1  ;;  %v19267_v35 = vld [vmem:[#allocation2 + $0xb9c] ss:$112 sps:$4 sm:$0xff]  }
 0x395   :  { %v19276_v30 = vld [vmem:[#allocation2 + $0x10dc] ss:$112 sps:$4 sm:$0xff]  }
 0x396   :  { %17405 = vmatmul.mubr.msk.bf16.vlgmr.msra.gmra.mxu1 %vm8549_vm0, %v21249_v52  ;;  %9640 = vmatpush2.bf16.msra.mxu0 %v19214_v34  ;;  %v19223_v52 = vld [vmem:[#allocation2 + $0x3b8] ss:$112 sps:$4 sm:$0xff]  }
 0x397   :  { %9702 = vmatpush1.bf16.msra.mxu1 %v19205_v14  ;;  %9641 = vmatprep.subr.bf16.mxu0 %v19222_v21  ;;  %v19259_v14 = vld [vmem:[#allocation2 + $0xc78] ss:$112 sps:$4 sm:$0xff]  }
 0x398   :  { %9703 = vmatprep.subr.bf16.mxu1 %v19213_v36  ;;  %9733 = vmatprep.mubr.bf16.mxu1 %v21111_v47  ;;  %v19268_v34 = vld [vmem:[#allocation2 + $0x11b8] ss:$112 sps:$4 sm:$0xff]  }
 0x399   :  { %v19265_v36 = vld [vmem:[#allocation2 + $0xb98] ss:$112 sps:$4 sm:$0xff]  }
 0x39a   :  { %9642 = vmatpush2.bf16.msra.mxu0 %v19220_v15  ;;  %v19274_v21 = vld [vmem:[#allocation2 + $0x10d8] ss:$112 sps:$4 sm:$0xff]  }
 0x39b   :  { %9704 = vmatpush1.bf16.msra.mxu1 %v19211_v38  ;;  %9643 = vmatprep.subr.bf16.mxu0 %v19228_v40  ;;  %v19273_v38 = vld [vmem:[#allocation2 + $0xabc] ss:$112 sps:$4 sm:$0xff]   ;;  %v19271_v15 = vld [vmem:[#allocation2 + $0xab8] ss:$112 sps:$4 sm:$0xff]  }
 0x39c   :  { %9705 = vmatprep.subr.bf16.mxu1 %v19219_v31  ;;  %v19282_v31 = vld [vmem:[#allocation2 + $0xffc] ss:$112 sps:$4 sm:$0xff]   ;;  %v19280_v40 = vld [vmem:[#allocation2 + $0xff8] ss:$112 sps:$4 sm:$0xff]  }
 0x39e   :  { %9644 = vmatpush2.bf16.msra.mxu0 %v19226_v45  ;;  %v19277_v45 = vld [vmem:[#allocation2 + $0x9d8] ss:$112 sps:$4 sm:$0xff]  }
 0x39f   :  { %9706 = vmatpush1.bf16.msra.mxu1 %v19217_v42  ;;  %9645 = vmatprep.subr.bf16.mxu0 %v19234_v48  ;;  %v19279_v42 = vld [vmem:[#allocation2 + $0x9dc] ss:$112 sps:$4 sm:$0xff]   ;;  %v19286_v48 = vld [vmem:[#allocation2 + $0xf18] ss:$112 sps:$4 sm:$0xff]  }
 0x3a0   :  { %9707 = vmatprep.subr.bf16.mxu1 %v19225_v43  ;;  %v19288_v43 = vld [vmem:[#allocation2 + $0xf1c] ss:$112 sps:$4 sm:$0xff]  }
 0x3a2   :  { %9646 = vmatpush2.bf16.msra.mxu0 %v19232_v50  ;;  %v19283_v50 = vld [vmem:[#allocation2 + $0x8f8] ss:$112 sps:$4 sm:$0xff]  }
 0x3a3   :  { %9708 = vmatpush1.bf16.msra.mxu1 %v19223_v52  ;;  %9647 = vmatprep.subr.bf16.mxu0 %v19240_v53  ;;  %v19285_v52 = vld [vmem:[#allocation2 + $0x8fc] ss:$112 sps:$4 sm:$0xff]   ;;  %v19292_v53 = vld [vmem:[#allocation2 + $0xe38] ss:$112 sps:$4 sm:$0xff]  }
 0x3a4   :  { %9709 = vmatprep.subr.bf16.mxu1 %v19231_v49  ;;  %v19294_v49 = vld [vmem:[#allocation2 + $0xe3c] ss:$112 sps:$4 sm:$0xff]  }
 0x3a5   :  { %v9325_v61 = vpop.f32.mrf.mxu0 }
 0x3a6   :  { %v9326_v56 = vadd.f32 %v9325_v61, %v21269_v37  ;;  %9648 = vmatpush2.bf16.msra.mxu0 %v19238_v12  ;;  %v19241_v37 = vld [vmem:[#allocation2 + $0x118] ss:$112 sps:$4 sm:$0xff]   ;;  %v19297_v61 = vld [vmem:[#allocation2 + $0x73c] ss:$112 sps:$4 sm:$0xff]  }
 0x3a7   :  { %9710 = vmatpush1.bf16.msra.mxu1 %v19229_v17  ;;  %v9327_v1 = vpop.f32.mrf.mxu0  ;;  %9649 = vmatprep.subr.bf16.mxu0 %v19246_v60  ;;  %v19291_v17 = vld [vmem:[#allocation2 + $0x81c] ss:$112 sps:$4 sm:$0xff]   ;;  %v19289_v12 = vld [vmem:[#allocation2 + $0x818] ss:$112 sps:$4 sm:$0xff]  }
 0x3a8   :  { %9711 = vmatprep.subr.bf16.mxu1 %v19237_v57  ;;  %v21282_v4 = vadd.f32 %v9366_v28, %v9326_v56  ;;  %v9328_v5 = vadd.f32 %v9327_v1, %v21272_v18  ;;  %v19247_v18 = vld [vmem:[#allocation2 + $0x38] ss:$112 sps:$4 sm:$0xff]   ;;  %v19261_v28 = vld [vmem:[#allocation2 + $0xc7c] ss:$112 sps:$4 sm:$0xff]  }
 0x3a9   :  { %v9329_v9 = vpop.f32.mrf.mxu0  ;;  %v19300_v57 = vld [vmem:[#allocation2 + $0x1b5c] ss:$112 sps:$4 sm:$0xff]   ;;  %v19298_v60 = vld [vmem:[#allocation2 + $0x1b58] ss:$112 sps:$4 sm:$0xff]  }
 0x3aa   :  { %v10850_v10 = vmax.f32 %v21185_v8, %v21282_v4  ;;  %v21288_v11 = vadd.f32 %v21275_v32, %v9328_v5  ;;  %9650 = vmatpush2.bf16.msra.mxu0 %v19244_v0  ;;  %v19262_v32 = vld [vmem:[#allocation2 + $0x1298] ss:$112 sps:$4 sm:$0xff]   ;;  %v19312_v5 = vld [vmem:[#allocation2 + $0x199c] ss:$112 sps:$4 sm:$0xff]   ;;  %v19711_v8 = vld [vmem:[#allocation2 + $0x11d4] ss:$112 sps:$4 sm:$0xff]  }
 0x3ab   :  { %9712 = vmatpush1.bf16.msra.mxu1 %v19235_v62  ;;  %9742 = vmatprep.subr.bf16.mxu0 %v19252_v2  ;;  %v9330_v20 = vpop.f32.mrf.mxu0  ;;  %v19306_v62 = vld [vmem:[#allocation2 + $0x1a7c] ss:$112 sps:$4 sm:$0xff]   ;;  %v19295_v56 = vld [vmem:[#allocation2 + $0x738] ss:$112 sps:$4 sm:$0xff]   ;;  %v19714_v4 = vld [vmem:[#allocation2 + $0xad4] ss:$112 sps:$4 sm:$0xff]  }
 0x3ac   :  { %9713 = vmatprep.subr.bf16.mxu1 %v19243_v63  ;;  %v10851_v22 = vmax.f32 %v21197_v54, %v21288_v11  ;;  %v19304_v63 = vld [vmem:[#allocation2 + $0x1a78] ss:$112 sps:$4 sm:$0xff]   ;;  %v19303_v2 = vld [vmem:[#allocation2 + $0x225c] ss:$112 sps:$4 sm:$0xff]  }
 0x3ad   :  { %9652 = vmatmul.mubr.bf16.vlgmr.msra.gmra.mxu0 %v21147_v16  ;;  %v19301_v9 = vld [vmem:[#allocation2 + $0x2258] ss:$112 sps:$4 sm:$0xff]   ;;  %v19318_v20 = vld [vmem:[#allocation2 + $0x18bc] ss:$112 sps:$4 sm:$0xff]  }
 0x3ae   :  { %9743 = vmatpush1.bf16.msra.mxu0 %v19250_v58  ;;  %9774 = vmatprep.mubr.bf16.mxu0 %v21116_v51  ;;  %v19309_v58 = vld [vmem:[#allocation2 + $0x217c] ss:$112 sps:$4 sm:$0xff]   ;;  %v19835_v54 = vld [vmem:[#allocation2 + $0x58] ss:$112 sps:$4 sm:$0xff]  }
 0x3af   :  { %9714 = vmatpush1.bf16.msra.mxu1 %v19241_v37  ;;  %9744 = vmatprep.subr.bf16.mxu0 %v19258_v19  ;;  %v19310_v37 = vld [vmem:[#allocation2 + $0x1998] ss:$112 sps:$4 sm:$0xff]  }
 0x3b0   :  { %9715 = vmatprep.subr.bf16.mxu1 %v19249_v44  ;;  %v19844_v11 = vld [vmem:[#allocation2 + $0x1398] ss:$112 sps:$4 sm:$0xff]  }
 0x3b2   :  { %9745 = vmatpush1.bf16.msra.mxu0 %v19256_v23  ;;  %v19315_v23 = vld [vmem:[#allocation2 + $0x209c] ss:$112 sps:$4 sm:$0xff]  }
 0x3b3   :  { %9716 = vmatpush1.bf16.msra.mxu1 %v19247_v18  ;;  %9746 = vmatprep.subr.bf16.mxu0 %v19264_v25  ;;  %v19307_v18 = vld [vmem:[#allocation2 + $0x2178] ss:$112 sps:$4 sm:$0xff]   ;;  %v19324_v25 = vld [vmem:[#allocation2 + $0x17dc] ss:$112 sps:$4 sm:$0xff]  }
 0x3b4   :  { %9717 = vmatprep.subr.bf16.mxu1 %v19255_v24  ;;  %v19316_v24 = vld [vmem:[#allocation2 + $0x18b8] ss:$112 sps:$4 sm:$0xff]  }
 0x3b6   :  { %9747 = vmatpush1.bf16.msra.mxu0 %v19262_v32  ;;  %v19321_v32 = vld [vmem:[#allocation2 + $0x1fbc] ss:$112 sps:$4 sm:$0xff]  }
 0x3b7   :  { %9718 = vmatpush2.bf16.msra.mxu1 %v19253_v27  ;;  %9748 = vmatprep.subr.bf16.mxu0 %v19270_v55  ;;  %v19313_v27 = vld [vmem:[#allocation2 + $0x2098] ss:$112 sps:$4 sm:$0xff]   ;;  %v19330_v55 = vld [vmem:[#allocation2 + $0x16fc] ss:$112 sps:$4 sm:$0xff]  }
 0x3b8   :  { %9719 = vmatprep.subr.bf16.mxu1 %v19261_v28  ;;  %v19322_v28 = vld [vmem:[#allocation2 + $0x17d8] ss:$112 sps:$4 sm:$0xff]  }
 0x3ba   :  { %9749 = vmatpush1.bf16.msra.mxu0 %v19268_v34  ;;  %v19328_v34 = vld [vmem:[#allocation2 + $0x16f8] ss:$112 sps:$4 sm:$0xff]  }
 0x3bb   :  { %9720 = vmatpush2.bf16.msra.mxu1 %v19259_v14  ;;  %9750 = vmatprep.subr.bf16.mxu0 %v19276_v30  ;;  %v19319_v14 = vld [vmem:[#allocation2 + $0x1fb8] ss:$112 sps:$4 sm:$0xff]   ;;  %v19336_v30 = vld [vmem:[#allocation2 + $0x161c] ss:$112 sps:$4 sm:$0xff]  }
 0x3bc   :  { %9721 = vmatprep.subr.bf16.mxu1 %v19267_v35  ;;  %v19327_v35 = vld [vmem:[#allocation2 + $0x1edc] ss:$112 sps:$4 sm:$0xff]  }
 0x3be   :  { %9751 = vmatpush1.bf16.msra.mxu0 %v19274_v21  ;;  %v19334_v21 = vld [vmem:[#allocation2 + $0x1618] ss:$112 sps:$4 sm:$0xff]  }
 0x3bf   :  { %9722 = vmatpush2.bf16.msra.mxu1 %v19265_v36  ;;  %9752 = vmatprep.subr.bf16.mxu0 %v19282_v31  ;;  %v19325_v36 = vld [vmem:[#allocation2 + $0x1ed8] ss:$112 sps:$4 sm:$0xff]   ;;  %v19342_v31 = vld [vmem:[#allocation2 + $0x153c] ss:$112 sps:$4 sm:$0xff]  }
 0x3c0   :  { %9723 = vmatprep.subr.bf16.mxu1 %v19273_v38  ;;  %v19333_v38 = vld [vmem:[#allocation2 + $0x1dfc] ss:$112 sps:$4 sm:$0xff]  }
 0x3c2   :  { %9753 = vmatpush1.bf16.msra.mxu0 %v19280_v40  ;;  %v19331_v40 = vld [vmem:[#allocation2 + $0x1df8] ss:$112 sps:$4 sm:$0xff]  }
 0x3c3   :  { %9724 = vmatpush2.bf16.msra.mxu1 %v19271_v15  ;;  %9754 = vmatprep.subr.bf16.mxu0 %v19288_v43  ;;  %v19340_v43 = vld [vmem:[#allocation2 + $0x1538] ss:$112 sps:$4 sm:$0xff]  }
 0x3c4   :  { %9725 = vmatprep.subr.bf16.mxu1 %v19279_v42 }
 0x3c6   :  { %9755 = vmatpush1.bf16.msra.mxu0 %v19286_v48  ;;  %v19339_v48 = vld [vmem:[#allocation2 + $0x1d1c] ss:$112 sps:$4 sm:$0xff]  }
 0x3c7   :  { %9726 = vmatpush2.bf16.msra.mxu1 %v19277_v45  ;;  %9756 = vmatprep.subr.bf16.mxu0 %v19294_v49 }
 0x3c8   :  { %9727 = vmatprep.subr.bf16.mxu1 %v19285_v52  ;;  %v19351_v52 = vld [vmem:[#allocation2 + $0x2a3c] ss:$112 sps:$4 sm:$0xff]  }
 0x3ca   :  { %9757 = vmatpush1.bf16.msra.mxu0 %v19292_v53  ;;  %v19337_v53 = vld [vmem:[#allocation2 + $0x1d18] ss:$112 sps:$4 sm:$0xff]  }
 0x3cb   :  { %9728 = vmatpush2.bf16.msra.mxu1 %v19283_v50  ;;  %9758 = vmatprep.subr.bf16.mxu0 %v19300_v57  ;;  %v19345_v57 = vld [vmem:[#allocation2 + $0x1c3c] ss:$112 sps:$4 sm:$0xff]  }
 0x3cc   :  { %9729 = vmatprep.subr.bf16.mxu1 %v19291_v17  ;;  %v19349_v17 = vld [vmem:[#allocation2 + $0x2a38] ss:$112 sps:$4 sm:$0xff]  }
 0x3ce   :  { %v9407_v0 = vpop.f32.mrf.mxu1  ;;  %9759 = vmatpush2.bf16.msra.mxu0 %v19298_v60 }
 0x3cf   :  { %9730 = vmatpush2.bf16.msra.mxu1 %v19289_v12  ;;  %9760 = vmatprep.subr.bf16.mxu0 %v19306_v62  ;;  %v19357_v12 = vld [vmem:[#allocation2 + $0x664] ss:$112 sps:$4 sm:$0xff]   ;;  %v19343_v62 = vld [vmem:[#allocation2 + $0x1c38] ss:$112 sps:$4 sm:$0xff]  }
 0x3d0   :  { %v9409_v1 = vpop.f32.mrf.mxu1  ;;  %9731 = vmatprep.subr.bf16.mxu1 %v19297_v61 }
 0x3d2   :  { %v9411_v44 = vpop.f32.mrf.mxu1  ;;  %9761 = vmatpush2.bf16.msra.mxu0 %v19304_v63 }
 0x3d3   :  { %9732 = vmatpush2.bf16.msra.mxu1 %v19295_v56  ;;  %9762 = vmatprep.subr.bf16.mxu0 %v19312_v5  ;;  %v19348_v56 = vld [vmem:[#allocation2 + $0x295c] ss:$112 sps:$4 sm:$0xff]   ;;  %v19352_v44 = vld [vmem:[#allocation2 + $0x2878] ss:$112 sps:$4 sm:$0xff]  }
 0x3d4   :  { %v9412_v19 = vpop.f32.mrf.mxu1  ;;  %9783 = vmatprep.subr.bf16.mxu1 %v19303_v2  ;;  %v19354_v2 = vld [vmem:[#allocation2 + $0x287c] ss:$112 sps:$4 sm:$0xff]  }
 0x3d5   :  { %v19360_v19 = vld [vmem:[#allocation2 + $0x279c] ss:$112 sps:$4 sm:$0xff]  }
 0x3d6   :  { %9734 = vmatmul.mubr.bf16.vlgmr.msra.gmra.mxu1 %v21120_v6  ;;  %9763 = vmatpush2.bf16.msra.mxu0 %v19310_v37 }
 0x3d7   :  { %9784 = vmatpush1.bf16.msra.mxu1 %v19301_v9  ;;  %9764 = vmatprep.subr.bf16.mxu0 %v19318_v20  ;;  %v19363_v9 = vld [vmem:[#allocation2 + $0x584] ss:$112 sps:$4 sm:$0xff]   ;;  %v19361_v20 = vld [vmem:[#allocation2 + $0x580] ss:$112 sps:$4 sm:$0xff]  }
 0x3d8   :  { %9785 = vmatprep.subr.bf16.mxu1 %v19309_v58  ;;  %9815 = vmatprep.mubr.bf16.mxu1 %v21142_v33  ;;  %v21309_v58 = vld [vmem:[%s21771_s12 + $0x18] ss:$0 sps:$4 sm:$0xff]  }
 0x3da   :  { %9765 = vmatpush2.bf16.msra.mxu0 %v19316_v24  ;;  %v19358_v24 = vld [vmem:[#allocation2 + $0x2798] ss:$112 sps:$4 sm:$0xff]  }
 0x3db   :  { %9786 = vmatpush1.bf16.msra.mxu1 %v19307_v18  ;;  %9766 = vmatprep.subr.bf16.mxu0 %v19324_v25  ;;  %v19369_v18 = vld [vmem:[#allocation2 + $0x4a4] ss:$112 sps:$4 sm:$0xff]   ;;  %v19367_v25 = vld [vmem:[#allocation2 + $0x4a0] ss:$112 sps:$4 sm:$0xff]  }
 0x3dc   :  { %9787 = vmatprep.subr.bf16.mxu1 %v19315_v23  ;;  %v19366_v23 = vld [vmem:[#allocation2 + $0x26bc] ss:$112 sps:$4 sm:$0xff]  }
 0x3de   :  { %9767 = vmatpush2.bf16.msra.mxu0 %v19322_v28  ;;  %v19364_v28 = vld [vmem:[#allocation2 + $0x26b8] ss:$112 sps:$4 sm:$0xff]  }
 0x3df   :  { %9788 = vmatpush1.bf16.msra.mxu1 %v19313_v27  ;;  %9768 = vmatprep.subr.bf16.mxu0 %v19330_v55  ;;  %v19375_v27 = vld [vmem:[#allocation2 + $0x3c4] ss:$112 sps:$4 sm:$0xff]   ;;  %v19373_v55 = vld [vmem:[#allocation2 + $0x3c0] ss:$112 sps:$4 sm:$0xff]  }
 0x3e0   :  { %9789 = vmatprep.subr.bf16.mxu1 %v19321_v32  ;;  %v19372_v32 = vld [vmem:[#allocation2 + $0x25dc] ss:$112 sps:$4 sm:$0xff]  }
 0x3e2   :  { %9769 = vmatpush2.bf16.msra.mxu0 %v19328_v34  ;;  %v19370_v34 = vld [vmem:[#allocation2 + $0x25d8] ss:$112 sps:$4 sm:$0xff]  }
 0x3e3   :  { %9790 = vmatpush1.bf16.msra.mxu1 %v19319_v14  ;;  %9770 = vmatprep.subr.bf16.mxu0 %v19336_v30  ;;  %v19381_v14 = vld [vmem:[#allocation2 + $0x2e4] ss:$112 sps:$4 sm:$0xff]   ;;  %v19379_v30 = vld [vmem:[#allocation2 + $0x2e0] ss:$112 sps:$4 sm:$0xff]  }
 0x3e4   :  { %9791 = vmatprep.subr.bf16.mxu1 %v19327_v35  ;;  %v19378_v35 = vld [vmem:[#allocation2 + $0x24fc] ss:$112 sps:$4 sm:$0xff]  }
 0x3e5   :  { %v9448_v15 = vpop.f32.mrf.mxu0 }
 0x3e6   :  { %v21296_v42 = vadd.f32 %v9448_v15, %v9407_v0  ;;  %9771 = vmatpush2.bf16.msra.mxu0 %v19334_v21  ;;  %v19346_v0 = vld [vmem:[#allocation2 + $0x2958] ss:$112 sps:$4 sm:$0xff]   ;;  %v19393_v15 = vld [vmem:[#allocation2 + $0x124] ss:$112 sps:$4 sm:$0xff]  }
 0x3e7   :  { %9792 = vmatpush1.bf16.msra.mxu1 %v19325_v36  ;;  %v9450_v45 = vpop.f32.mrf.mxu0  ;;  %9772 = vmatprep.subr.bf16.mxu0 %v19342_v31  ;;  %v19387_v36 = vld [vmem:[#allocation2 + $0x204] ss:$112 sps:$4 sm:$0xff]   ;;  %v19376_v21 = vld [vmem:[#allocation2 + $0x24f8] ss:$112 sps:$4 sm:$0xff]   ;;  %v19385_v31 = vld [vmem:[#allocation2 + $0x200] ss:$112 sps:$4 sm:$0xff]  }
 0x3e8   :  { %9793 = vmatprep.subr.bf16.mxu1 %v19333_v38  ;;  %v21298_v49 = vadd.f32 %v9450_v45, %v9409_v1  ;;  %v19355_v1 = vld [vmem:[#allocation2 + $0x660] ss:$112 sps:$4 sm:$0xff]   ;;  %v19384_v38 = vld [vmem:[#allocation2 + $0x241c] ss:$112 sps:$4 sm:$0xff]  }
 0x3e9   :  { %v9452_v50 = vpop.f32.mrf.mxu0  ;;  %v19391_v45 = vld [vmem:[#allocation2 + $0x120] ss:$112 sps:$4 sm:$0xff]  }
 0x3ea   :  { %9773 = vmatpush2.bf16.msra.mxu0 %v19340_v43  ;;  %v19390_v43 = vld [vmem:[#allocation2 + $0x233c] ss:$112 sps:$4 sm:$0xff]  }
 0x3eb   :  { %9794 = vmatpush1.bf16.msra.mxu1 %v19331_v40  ;;  %9838 = vmatprep.subr.bf16.mxu0 %v19351_v52  ;;  %v9453_v60 = vpop.f32.mrf.mxu0  ;;  %v19382_v40 = vld [vmem:[#allocation2 + $0x2418] ss:$112 sps:$4 sm:$0xff]  }
 0x3ec   :  { %9795 = vmatprep.subr.bf16.mxu1 %v19339_v48  ;;  %v19396_v48 = vld [vmem:[#allocation2 + $0x44] ss:$112 sps:$4 sm:$0xff]   ;;  %v19388_v52 = vld [vmem:[#allocation2 + $0x2338] ss:$112 sps:$4 sm:$0xff]  }
 0x3ed   :  { %9775 = vmatmul.mubr.bf16.vlgmr.msra.gmra.mxu0 %v21122_v7  ;;  %v21301_v61 = vpop.f32.mrf.mxu0 }
 0x3ee   :  { %9839 = vmatpush1.bf16.msra.mxu0 %v19349_v17  ;;  %9856 = vmatprep.mubr.bf16.mxu0 %v20933_v13 }
 0x3ef   :  { %9796 = vmatpush1.bf16.msra.mxu1 %v19337_v53  ;;  %v21304_v63 = vpop.f32.mrf.mxu0  ;;  %9865 = vmatprep.subr.bf16.mxu0 %v19357_v12  ;;  %v19399_v53 = vld [vmem:[#allocation2 + $0x1464] ss:$112 sps:$4 sm:$0xff]  }
 0x3f0   :  { %9797 = vmatprep.subr.bf16.mxu1 %v19345_v57  ;;  %v19394_v57 = vld [vmem:[#allocation2 + $0x40] ss:$112 sps:$4 sm:$0xff]   ;;  %v19402_v12 = vld [vmem:[#allocation2 + $0xd64] ss:$112 sps:$4 sm:$0xff]  }
 0x3f1   :  { %v9534_v5 = vpop.f32.mrf.mxu0 }
 0x3f3   :  { %9798 = vmatpush1.bf16.msra.mxu1 %v19343_v62  ;;  %v9535_v37 = vpop.f32.mrf.mxu0 }
 0x3f4   :  { %9799 = vmatprep.subr.bf16.mxu1 %v19348_v56  ;;  %v19408_v37 = vld [vmem:[#allocation2 + $0xc84] ss:$112 sps:$4 sm:$0xff]  }
 0x3f5   :  { %17406 = vmatmul.mubr.msk.bf16.vlgmr.msra.gmra.mxu0 %vm8549_vm0, %v21309_v58 }
 0x3f6   :  { %9866 = vmatpush1.bf16.msra.mxu0 %v19355_v1  ;;  %9897 = vmatprep.mubr.bf16.mxu0 %v21111_v47 }
 0x3f7   :  { %9800 = vmatpush2.bf16.msra.mxu1 %v19346_v0  ;;  %9867 = vmatprep.subr.bf16.mxu0 %v19363_v9  ;;  %v19397_v0 = vld [vmem:[#allocation2 + $0x1460] ss:$112 sps:$4 sm:$0xff]   ;;  %v19405_v9 = vld [vmem:[#allocation2 + $0x1384] ss:$112 sps:$4 sm:$0xff]  }
 0x3f8   :  { %9801 = vmatprep.subr.bf16.mxu1 %v19354_v2  ;;  %v19400_v2 = vld [vmem:[#allocation2 + $0xd60] ss:$112 sps:$4 sm:$0xff]  }
 0x3fa   :  { %9868 = vmatpush1.bf16.msra.mxu0 %v19361_v20  ;;  %v19414_v20 = vld [vmem:[#allocation2 + $0xba4] ss:$112 sps:$4 sm:$0xff]  }
 0x3fb   :  { %9802 = vmatpush2.bf16.msra.mxu1 %v19352_v44  ;;  %9869 = vmatprep.subr.bf16.mxu0 %v19369_v18  ;;  %v19409_v18 = vld [vmem:[#allocation2 + $0x12a0] ss:$112 sps:$4 sm:$0xff]  }
 0x3fc   :  { %9803 = vmatprep.subr.bf16.mxu1 %v19360_v19  ;;  %v19406_v19 = vld [vmem:[#allocation2 + $0xc80] ss:$112 sps:$4 sm:$0xff]  }
 0x3fe   :  { %9870 = vmatpush1.bf16.msra.mxu0 %v19367_v25  ;;  %v19420_v25 = vld [vmem:[#allocation2 + $0xac4] ss:$112 sps:$4 sm:$0xff]  }
 0x3ff   :  { %9804 = vmatpush2.bf16.msra.mxu1 %v19358_v24  ;;  %9871 = vmatprep.subr.bf16.mxu0 %v19375_v27  ;;  %v19412_v24 = vld [vmem:[#allocation2 + $0xba0] ss:$112 sps:$4 sm:$0xff]  }
 0x400   :  { %9805 = vmatprep.subr.bf16.mxu1 %v19366_v23  ;;  %v19417_v23 = vld [vmem:[#allocation2 + $0x11c4] ss:$112 sps:$4 sm:$0xff]   ;;  %v19415_v27 = vld [vmem:[#allocation2 + $0x11c0] ss:$112 sps:$4 sm:$0xff]  }
 0x402   :  { %9872 = vmatpush1.bf16.msra.mxu0 %v19373_v55  ;;  %v19426_v55 = vld [vmem:[#allocation2 + $0x9e4] ss:$112 sps:$4 sm:$0xff]  }
 0x403   :  { %9806 = vmatpush2.bf16.msra.mxu1 %v19364_v28  ;;  %9873 = vmatprep.subr.bf16.mxu0 %v19381_v14  ;;  %v19418_v28 = vld [vmem:[#allocation2 + $0xac0] ss:$112 sps:$4 sm:$0xff]  }
 0x404   :  { %9807 = vmatprep.subr.bf16.mxu1 %v19372_v32  ;;  %v19423_v32 = vld [vmem:[#allocation2 + $0x10e4] ss:$112 sps:$4 sm:$0xff]   ;;  %v19421_v14 = vld [vmem:[#allocation2 + $0x10e0] ss:$112 sps:$4 sm:$0xff]  }
 0x406   :  { %9874 = vmatpush1.bf16.msra.mxu0 %v19379_v30  ;;  %v19432_v30 = vld [vmem:[#allocation2 + $0x904] ss:$112 sps:$4 sm:$0xff]  }
 0x407   :  { %9808 = vmatpush2.bf16.msra.mxu1 %v19370_v34  ;;  %9875 = vmatprep.subr.bf16.mxu0 %v19387_v36  ;;  %v19424_v34 = vld [vmem:[#allocation2 + $0x9e0] ss:$112 sps:$4 sm:$0xff]  }
 0x408   :  { %9809 = vmatprep.subr.bf16.mxu1 %v19378_v35  ;;  %v19429_v35 = vld [vmem:[#allocation2 + $0x1004] ss:$112 sps:$4 sm:$0xff]   ;;  %v19427_v36 = vld [vmem:[#allocation2 + $0x1000] ss:$112 sps:$4 sm:$0xff]  }
 0x40a   :  { %9876 = vmatpush1.bf16.msra.mxu0 %v19385_v31  ;;  %v19438_v31 = vld [vmem:[#allocation2 + $0x824] ss:$112 sps:$4 sm:$0xff]  }
 0x40b   :  { %9810 = vmatpush2.bf16.msra.mxu1 %v19376_v21  ;;  %9877 = vmatprep.subr.bf16.mxu0 %v19393_v15  ;;  %v19430_v21 = vld [vmem:[#allocation2 + $0x900] ss:$112 sps:$4 sm:$0xff]  }
 0x40c   :  { %9811 = vmatprep.subr.bf16.mxu1 %v19384_v38  ;;  %v19435_v38 = vld [vmem:[#allocation2 + $0xf24] ss:$112 sps:$4 sm:$0xff]   ;;  %v19433_v15 = vld [vmem:[#allocation2 + $0xf20] ss:$112 sps:$4 sm:$0xff]  }
 0x40e   :  { %v9489_v50 = vpop.f32.mrf.mxu1  ;;  %9878 = vmatpush1.bf16.msra.mxu0 %v19391_v45  ;;  %v19444_v45 = vld [vmem:[#allocation2 + $0x744] ss:$112 sps:$4 sm:$0xff]  }
 0x40f   :  { %v9490_v17 = vadd.f32 %v9489_v50, %v21296_v42  ;;  %9812 = vmatpush2.bf16.msra.mxu1 %v19382_v40  ;;  %9879 = vmatprep.subr.bf16.mxu0 %v19396_v48  ;;  %v19436_v40 = vld [vmem:[#allocation2 + $0x820] ss:$112 sps:$4 sm:$0xff]  }
 0x410   :  { %v9491_v60 = vpop.f32.mrf.mxu1  ;;  %9813 = vmatprep.subr.bf16.mxu1 %v19390_v43  ;;  %v19441_v43 = vld [vmem:[#allocation2 + $0xe44] ss:$112 sps:$4 sm:$0xff]   ;;  %v19442_v50 = vld [vmem:[#allocation2 + $0x740] ss:$112 sps:$4 sm:$0xff]  }
 0x411   :  { %v21316_v62 = vadd.f32 %v21301_v61, %v9490_v17  ;;  %v9492_v56 = vadd.f32 %v9491_v60, %v21298_v49  ;;  %v19403_v49 = vld [vmem:[#allocation2 + $0x1380] ss:$112 sps:$4 sm:$0xff]   ;;  %v19453_v17 = vld [vmem:[#allocation2 + $0x2264] ss:$112 sps:$4 sm:$0xff]  }
 0x412   :  { %v9493_v1 = vpop.f32.mrf.mxu1  ;;  %9880 = vmatpush1.bf16.msra.mxu0 %v19394_v57  ;;  %v19445_v60 = vld [vmem:[#allocation2 + $0x1b60] ss:$112 sps:$4 sm:$0xff]  }
 0x413   :  { %v10852_v5 = vmax.f32 %v21199_v59, %v21316_v62  ;;  %v21322_v42 = vadd.f32 %v21304_v63, %v9492_v56  ;;  %9814 = vmatpush2.bf16.msra.mxu1 %v19388_v52  ;;  %9881 = vmatprep.subr.bf16.mxu0 %v19402_v12  ;;  %v19411_v63 = vld [vmem:[#allocation2 + $0x12a4] ss:$112 sps:$4 sm:$0xff]   ;;  %v19439_v52 = vld [vmem:[#allocation2 + $0xe40] ss:$112 sps:$4 sm:$0xff]   ;;  %v19849_v59 = vld [vmem:[#allocation2 + $0xc9c] ss:$112 sps:$4 sm:$0xff]  }
 0x414   :  { %v9494_v44 = vpop.f32.mrf.mxu1  ;;  %9906 = vmatprep.subr.bf16.mxu1 %v19399_v53  ;;  %v19447_v53 = vld [vmem:[#allocation2 + $0x1b64] ss:$112 sps:$4 sm:$0xff]   ;;  %v19451_v56 = vld [vmem:[#allocation2 + $0x2260] ss:$112 sps:$4 sm:$0xff]   ;;  %v19858_v62 = vld [vmem:[#allocation2 + $0x11dc] ss:$112 sps:$4 sm:$0xff]  }
 0x415   :  { %v10853_v61 = vmax.f32 %v21229_v26, %v21322_v42  ;;  %v19459_v1 = vld [vmem:[#allocation2 + $0x2184] ss:$112 sps:$4 sm:$0xff]   ;;  %v19457_v44 = vld [vmem:[#allocation2 + $0x2180] ss:$112 sps:$4 sm:$0xff]  }
 0x416   :  { %9816 = vmatmul.mubr.bf16.vlgmr.msra.gmra.mxu1 %v21147_v16  ;;  %9882 = vmatpush2.bf16.msra.mxu0 %v19400_v2  ;;  %v19991_v26 = vld [vmem:[#allocation2 + $0x13a0] ss:$112 sps:$4 sm:$0xff]  }
 0x417   :  { %9907 = vmatpush1.bf16.msra.mxu1 %v19397_v0  ;;  %9883 = vmatprep.subr.bf16.mxu0 %v19408_v37  ;;  %v19450_v0 = vld [vmem:[#allocation2 + $0x1a84] ss:$112 sps:$4 sm:$0xff]   ;;  %v19994_v42 = vld [vmem:[#allocation2 + $0xca0] ss:$112 sps:$4 sm:$0xff]  }
 0x418   :  { %9908 = vmatprep.subr.bf16.mxu1 %v19405_v9  ;;  %9938 = vmatprep.mubr.bf16.mxu1 %v21116_v51  ;;  %v19448_v9 = vld [vmem:[#allocation2 + $0x1a80] ss:$112 sps:$4 sm:$0xff]   ;;  %v19456_v37 = vld [vmem:[#allocation2 + $0x19a4] ss:$112 sps:$4 sm:$0xff]  }
 0x41a   :  { %9884 = vmatpush2.bf16.msra.mxu0 %v19406_v19  ;;  %v19454_v19 = vld [vmem:[#allocation2 + $0x19a0] ss:$112 sps:$4 sm:$0xff]  }
 0x41b   :  { %9909 = vmatpush1.bf16.msra.mxu1 %v19403_v49  ;;  %9885 = vmatprep.subr.bf16.mxu0 %v19414_v20  ;;  %v19465_v49 = vld [vmem:[#allocation2 + $0x20a4] ss:$112 sps:$4 sm:$0xff]  }
 0x41c   :  { %9910 = vmatprep.subr.bf16.mxu1 %v19411_v63  ;;  %v19463_v63 = vld [vmem:[#allocation2 + $0x20a0] ss:$112 sps:$4 sm:$0xff]   ;;  %v19462_v20 = vld [vmem:[#allocation2 + $0x18c4] ss:$112 sps:$4 sm:$0xff]  }
 0x41e   :  { %9886 = vmatpush2.bf16.msra.mxu0 %v19412_v24  ;;  %v19460_v24 = vld [vmem:[#allocation2 + $0x18c0] ss:$112 sps:$4 sm:$0xff]  }
 0x41f   :  { %9911 = vmatpush1.bf16.msra.mxu1 %v19409_v18  ;;  %9887 = vmatprep.subr.bf16.mxu0 %v19420_v25  ;;  %v19471_v18 = vld [vmem:[#allocation2 + $0x1fc4] ss:$112 sps:$4 sm:$0xff]  }
 0x420   :  { %9912 = vmatprep.subr.bf16.mxu1 %v19417_v23  ;;  %v19469_v23 = vld [vmem:[#allocation2 + $0x1fc0] ss:$112 sps:$4 sm:$0xff]   ;;  %v19468_v25 = vld [vmem:[#allocation2 + $0x17e4] ss:$112 sps:$4 sm:$0xff]  }
 0x422   :  { %9888 = vmatpush2.bf16.msra.mxu0 %v19418_v28  ;;  %v19466_v28 = vld [vmem:[#allocation2 + $0x17e0] ss:$112 sps:$4 sm:$0xff]  }
 0x423   :  { %9913 = vmatpush1.bf16.msra.mxu1 %v19415_v27  ;;  %9889 = vmatprep.subr.bf16.mxu0 %v19426_v55  ;;  %v19477_v27 = vld [vmem:[#allocation2 + $0x1ee4] ss:$112 sps:$4 sm:$0xff]  }
 0x424   :  { %9914 = vmatprep.subr.bf16.mxu1 %v19423_v32  ;;  %v19475_v32 = vld [vmem:[#allocation2 + $0x1ee0] ss:$112 sps:$4 sm:$0xff]   ;;  %v19474_v55 = vld [vmem:[#allocation2 + $0x1704] ss:$112 sps:$4 sm:$0xff]  }
 0x426   :  { %9890 = vmatpush2.bf16.msra.mxu0 %v19424_v34  ;;  %v19472_v34 = vld [vmem:[#allocation2 + $0x1700] ss:$112 sps:$4 sm:$0xff]  }
 0x427   :  { %9915 = vmatpush1.bf16.msra.mxu1 %v19421_v14  ;;  %9891 = vmatprep.subr.bf16.mxu0 %v19432_v30  ;;  %v19483_v14 = vld [vmem:[#allocation2 + $0x1e04] ss:$112 sps:$4 sm:$0xff]  }
 0x428   :  { %9916 = vmatprep.subr.bf16.mxu1 %v19429_v35  ;;  %v19481_v35 = vld [vmem:[#allocation2 + $0x1e00] ss:$112 sps:$4 sm:$0xff]   ;;  %v19480_v30 = vld [vmem:[#allocation2 + $0x1624] ss:$112 sps:$4 sm:$0xff]  }
 0x42a   :  { %9892 = vmatpush2.bf16.msra.mxu0 %v19430_v21  ;;  %v19478_v21 = vld [vmem:[#allocation2 + $0x1620] ss:$112 sps:$4 sm:$0xff]  }
 0x42b   :  { %9917 = vmatpush1.bf16.msra.mxu1 %v19427_v36  ;;  %9893 = vmatprep.subr.bf16.mxu0 %v19438_v31  ;;  %v19489_v36 = vld [vmem:[#allocation2 + $0x1d24] ss:$112 sps:$4 sm:$0xff]  }
 0x42c   :  { %9918 = vmatprep.subr.bf16.mxu1 %v19435_v38  ;;  %v19487_v38 = vld [vmem:[#allocation2 + $0x1d20] ss:$112 sps:$4 sm:$0xff]   ;;  %v19486_v31 = vld [vmem:[#allocation2 + $0x1544] ss:$112 sps:$4 sm:$0xff]  }
 0x42d   :  { %v21328_v48 = vpop.f32.mrf.mxu0 }
 0x42e   :  { %9894 = vmatpush2.bf16.msra.mxu0 %v19436_v40 }
 0x42f   :  { %9919 = vmatpush1.bf16.msra.mxu1 %v19433_v15  ;;  %9895 = vmatprep.subr.bf16.mxu0 %v19444_v45  ;;  %v21330_v57 = vpop.f32.mrf.mxu0  ;;  %v19492_v15 = vld [vmem:[#allocation2 + $0x1c44] ss:$112 sps:$4 sm:$0xff]   ;;  %v19484_v45 = vld [vmem:[#allocation2 + $0x1540] ss:$112 sps:$4 sm:$0xff]  }
 0x430   :  { %9920 = vmatprep.subr.bf16.mxu1 %v19441_v43 }
 0x431   :  { %v9575_v12 = vpop.f32.mrf.mxu0 }
 0x432   :  { %9896 = vmatpush2.bf16.msra.mxu0 %v19442_v50 }
 0x433   :  { %9921 = vmatpush1.bf16.msra.mxu1 %v19439_v52  ;;  %9947 = vmatprep.subr.bf16.mxu0 %v19453_v17  ;;  %v9576_v2 = vpop.f32.mrf.mxu0  ;;  %v19490_v52 = vld [vmem:[#allocation2 + $0x1c40] ss:$112 sps:$4 sm:$0xff]   ;;  %v19498_v17 = vld [vmem:[#allocation2 + $0x2964] ss:$112 sps:$4 sm:$0xff]  }
 0x434   :  { %9922 = vmatprep.subr.bf16.mxu1 %v19447_v53  ;;  %v19495_v53 = vld [vmem:[#allocation2 + $0x2a44] ss:$112 sps:$4 sm:$0xff]  }
 0x435   :  { %9898 = vmatmul.mubr.bf16.vlgmr.msra.gmra.mxu0 %v21120_v6  ;;  %v19504_v2 = vld [vmem:[#allocation2 + $0x2884] ss:$112 sps:$4 sm:$0xff]  }
 0x436   :  { %9948 = vmatpush1.bf16.msra.mxu0 %v19451_v56  ;;  %9979 = vmatprep.mubr.bf16.mxu0 %v21142_v33  ;;  %v19493_v56 = vld [vmem:[#allocation2 + $0x2a40] ss:$112 sps:$4 sm:$0xff]  }
 0x437   :  { %9923 = vmatpush2.bf16.msra.mxu1 %v19445_v60  ;;  %9949 = vmatprep.subr.bf16.mxu0 %v19459_v1 }
 0x438   :  { %9924 = vmatprep.subr.bf16.mxu1 %v19450_v0  ;;  %v19496_v0 = vld [vmem:[#allocation2 + $0x2960] ss:$112 sps:$4 sm:$0xff]  }
 0x43a   :  { %9950 = vmatpush1.bf16.msra.mxu0 %v19457_v44 }
 0x43b   :  { %9925 = vmatpush2.bf16.msra.mxu1 %v19448_v9  ;;  %9951 = vmatprep.subr.bf16.mxu0 %v19465_v49 }
 0x43c   :  { %9926 = vmatprep.subr.bf16.mxu1 %v19456_v37  ;;  %v19502_v37 = vld [vmem:[#allocation2 + $0x2880] ss:$112 sps:$4 sm:$0xff]  }
 0x43e   :  { %9952 = vmatpush1.bf16.msra.mxu0 %v19463_v63  ;;  %v19508_v63 = vld [vmem:[#allocation2 + $0x27a0] ss:$112 sps:$4 sm:$0xff]  }
 0x43f   :  { %9927 = vmatpush2.bf16.msra.mxu1 %v19454_v19  ;;  %9953 = vmatprep.subr.bf16.mxu0 %v19471_v18  ;;  %v19499_v19 = vld [vmem:[#allocation2 + $0x668] ss:$112 sps:$4 sm:$0xff]   ;;  %v19507_v18 = vld [vmem:[#allocation2 + $0x58c] ss:$112 sps:$4 sm:$0xff]  }
 0x440   :  { %9928 = vmatprep.subr.bf16.mxu1 %v19462_v20 }
 0x442   :  { %9954 = vmatpush1.bf16.msra.mxu0 %v19469_v23  ;;  %v19505_v23 = vld [vmem:[#allocation2 + $0x588] ss:$112 sps:$4 sm:$0xff]  }
 0x443   :  { %9929 = vmatpush2.bf16.msra.mxu1 %v19460_v24  ;;  %9955 = vmatprep.subr.bf16.mxu0 %v19477_v27  ;;  %v19516_v24 = vld [vmem:[#allocation2 + $0x26c4] ss:$112 sps:$4 sm:$0xff]   ;;  %v19513_v27 = vld [vmem:[#allocation2 + $0x4ac] ss:$112 sps:$4 sm:$0xff]  }
 0x444   :  { %9930 = vmatprep.subr.bf16.mxu1 %v19468_v25  ;;  %v19514_v25 = vld [vmem:[#allocation2 + $0x26c0] ss:$112 sps:$4 sm:$0xff]  }
 0x446   :  { %9956 = vmatpush1.bf16.msra.mxu0 %v19475_v32  ;;  %v19511_v32 = vld [vmem:[#allocation2 + $0x4a8] ss:$112 sps:$4 sm:$0xff]  }
 0x447   :  { %9931 = vmatpush2.bf16.msra.mxu1 %v19466_v28  ;;  %9957 = vmatprep.subr.bf16.mxu0 %v19483_v14  ;;  %v19522_v28 = vld [vmem:[#allocation2 + $0x25e4] ss:$112 sps:$4 sm:$0xff]   ;;  %v19519_v14 = vld [vmem:[#allocation2 + $0x3cc] ss:$112 sps:$4 sm:$0xff]  }
 0x448   :  { %9932 = vmatprep.subr.bf16.mxu1 %v19474_v55  ;;  %v19520_v55 = vld [vmem:[#allocation2 + $0x25e0] ss:$112 sps:$4 sm:$0xff]  }
 0x44a   :  { %9958 = vmatpush1.bf16.msra.mxu0 %v19481_v35  ;;  %v19526_v35 = vld [vmem:[#allocation2 + $0x2500] ss:$112 sps:$4 sm:$0xff]  }
 0x44b   :  { %9933 = vmatpush2.bf16.msra.mxu1 %v19472_v34  ;;  %9959 = vmatprep.subr.bf16.mxu0 %v19489_v36  ;;  %v19528_v34 = vld [vmem:[#allocation2 + $0x2504] ss:$112 sps:$4 sm:$0xff]  }
 0x44c   :  { %9934 = vmatprep.subr.bf16.mxu1 %v19480_v30  ;;  %v19525_v30 = vld [vmem:[#allocation2 + $0x2ec] ss:$112 sps:$4 sm:$0xff]   ;;  %v19534_v36 = vld [vmem:[#allocation2 + $0x2424] ss:$112 sps:$4 sm:$0xff]  }
 0x44e   :  { %v9612_v40 = vpop.f32.mrf.mxu1  ;;  %9960 = vmatpush1.bf16.msra.mxu0 %v19487_v38  ;;  %v19532_v38 = vld [vmem:[#allocation2 + $0x2420] ss:$112 sps:$4 sm:$0xff]  }
 0x44f   :  { %v21335_v43 = vadd.f32 %v9612_v40, %v21328_v48  ;;  %9935 = vmatpush2.bf16.msra.mxu1 %v19478_v21  ;;  %9961 = vmatprep.subr.bf16.mxu0 %v19492_v15  ;;  %v19501_v48 = vld [vmem:[#allocation2 + $0x66c] ss:$112 sps:$4 sm:$0xff]   ;;  %v19523_v21 = vld [vmem:[#allocation2 + $0x2e8] ss:$112 sps:$4 sm:$0xff]   ;;  %v19540_v15 = vld [vmem:[#allocation2 + $0x2344] ss:$112 sps:$4 sm:$0xff]  }
 0x450   :  { %v9614_v50 = vpop.f32.mrf.mxu1  ;;  %9936 = vmatprep.subr.bf16.mxu1 %v19486_v31  ;;  %v19531_v31 = vld [vmem:[#allocation2 + $0x20c] ss:$112 sps:$4 sm:$0xff]  }
 0x451   :  { %v21338_v12 = vadd.f32 %v9614_v50, %v21330_v57  ;;  %v19510_v57 = vld [vmem:[#allocation2 + $0x27a4] ss:$112 sps:$4 sm:$0xff]   ;;  %v19538_v50 = vld [vmem:[#allocation2 + $0x2340] ss:$112 sps:$4 sm:$0xff]  }
 0x452   :  { %v9616_v60 = vpop.f32.mrf.mxu1  ;;  %9962 = vmatpush1.bf16.msra.mxu0 %v19490_v52 }
 0x453   :  { %9937 = vmatpush2.bf16.msra.mxu1 %v19484_v45  ;;  %9963 = vmatprep.subr.bf16.mxu0 %v19498_v17  ;;  %v19529_v45 = vld [vmem:[#allocation2 + $0x208] ss:$112 sps:$4 sm:$0xff]   ;;  %v19537_v17 = vld [vmem:[#allocation2 + $0x12c] ss:$112 sps:$4 sm:$0xff]  }
 0x454   :  { %v9617_v1 = vpop.f32.mrf.mxu1  ;;  %10002 = vmatprep.subr.bf16.mxu1 %v19495_v53  ;;  %v19546_v60 = vld [vmem:[#allocation2 + $0x146c] ss:$112 sps:$4 sm:$0xff]  }
 0x456   :  { %9939 = vmatmul.mubr.bf16.vlgmr.msra.gmra.mxu1 %v21122_v7  ;;  %v9694_v9 = vpop.f32.mrf.mxu1  ;;  %9964 = vmatpush2.bf16.msra.mxu0 %v19496_v0 }
 0x457   :  { %10003 = vmatpush1.bf16.msra.mxu1 %v19493_v56  ;;  %10020 = vmatprep.mubr.bf16.mxu1 %v20933_v13 }
 0x458   :  { %v21341_v44 = vpop.f32.mrf.mxu1  ;;  %10029 = vmatprep.subr.bf16.mxu1 %v19501_v48  ;;  %9965 = vmatprep.subr.bf16.mxu0 %v19504_v2 }
 0x45a   :  { %v9698_v49 = vpop.f32.mrf.mxu1  ;;  %9966 = vmatpush2.bf16.msra.mxu0 %v19502_v37  ;;  %v19544_v37 = vld [vmem:[#allocation2 + $0x1468] ss:$112 sps:$4 sm:$0xff]  }
 0x45b   :  { %9967 = vmatprep.subr.bf16.mxu0 %v19510_v57  ;;  %v19543_v57 = vld [vmem:[#allocation2 + $0x4c] ss:$112 sps:$4 sm:$0xff]  }
 0x45c   :  { %v9699_v20 = vpop.f32.mrf.mxu1  ;;  %v19552_v49 = vld [vmem:[#allocation2 + $0x138c] ss:$112 sps:$4 sm:$0xff]  }
 0x45d   :  { %v19558_v20 = vld [vmem:[#allocation2 + $0x12ac] ss:$112 sps:$4 sm:$0xff]  }
 0x45e   :  { %17407 = vmatmul.mubr.msk.bf16.vlgmr.msra.gmra.mxu1 %vm8549_vm0, %v21309_v58  ;;  %9968 = vmatpush2.bf16.msra.mxu0 %v19508_v63  ;;  %v19517_v58 = vld [vmem:[#allocation2 + $0x3c8] ss:$112 sps:$4 sm:$0xff]  }
 0x45f   :  { %10030 = vmatpush1.bf16.msra.mxu1 %v19499_v19  ;;  %9969 = vmatprep.subr.bf16.mxu0 %v19516_v24  ;;  %v19550_v63 = vld [vmem:[#allocation2 + $0x1388] ss:$112 sps:$4 sm:$0xff]  }
 0x460   :  { %10031 = vmatprep.subr.bf16.mxu1 %v19507_v18  ;;  %10061 = vmatprep.mubr.bf16.mxu1 %v21111_v47  ;;  %v19547_v18 = vld [vmem:[#allocation2 + $0xd68] ss:$112 sps:$4 sm:$0xff]  }
 0x461   :  { %v19556_v24 = vld [vmem:[#allocation2 + $0x12a8] ss:$112 sps:$4 sm:$0xff]  }
 0x462   :  { %9970 = vmatpush2.bf16.msra.mxu0 %v19514_v25  ;;  %v19564_v25 = vld [vmem:[#allocation2 + $0x11cc] ss:$112 sps:$4 sm:$0xff]  }
 0x463   :  { %10032 = vmatpush1.bf16.msra.mxu1 %v19505_v23  ;;  %9971 = vmatprep.subr.bf16.mxu0 %v19522_v28  ;;  %v19555_v23 = vld [vmem:[#allocation2 + $0xc8c] ss:$112 sps:$4 sm:$0xff]   ;;  %v19562_v28 = vld [vmem:[#allocation2 + $0x11c8] ss:$112 sps:$4 sm:$0xff]  }
 0x464   :  { %10033 = vmatprep.subr.bf16.mxu1 %v19513_v27  ;;  %v19553_v27 = vld [vmem:[#allocation2 + $0xc88] ss:$112 sps:$4 sm:$0xff]  }
 0x466   :  { %9972 = vmatpush2.bf16.msra.mxu0 %v19520_v55  ;;  %v19570_v55 = vld [vmem:[#allocation2 + $0x10ec] ss:$112 sps:$4 sm:$0xff]  }
 0x467   :  { %10034 = vmatpush1.bf16.msra.mxu1 %v19511_v32  ;;  %9973 = vmatprep.subr.bf16.mxu0 %v19528_v34  ;;  %v19561_v32 = vld [vmem:[#allocation2 + $0xbac] ss:$112 sps:$4 sm:$0xff]   ;;  %v19568_v34 = vld [vmem:[#allocation2 + $0x10e8] ss:$112 sps:$4 sm:$0xff]  }
 0x468   :  { %10035 = vmatprep.subr.bf16.mxu1 %v19519_v14  ;;  %v19559_v14 = vld [vmem:[#allocation2 + $0xba8] ss:$112 sps:$4 sm:$0xff]  }
 0x46a   :  { %9974 = vmatpush2.bf16.msra.mxu0 %v19526_v35  ;;  %v19576_v35 = vld [vmem:[#allocation2 + $0x100c] ss:$112 sps:$4 sm:$0xff]  }
 0x46b   :  { %10036 = vmatpush1.bf16.msra.mxu1 %v19517_v58  ;;  %9975 = vmatprep.subr.bf16.mxu0 %v19534_v36  ;;  %v19567_v58 = vld [vmem:[#allocation2 + $0xacc] ss:$112 sps:$4 sm:$0xff]   ;;  %v19574_v36 = vld [vmem:[#allocation2 + $0x1008] ss:$112 sps:$4 sm:$0xff]  }
 0x46c   :  { %10037 = vmatprep.subr.bf16.mxu1 %v19525_v30  ;;  %v19565_v30 = vld [vmem:[#allocation2 + $0xac8] ss:$112 sps:$4 sm:$0xff]  }
 0x46d   :  { %v9653_v40 = vpop.f32.mrf.mxu0 }
 0x46e   :  { %v9654_v52 = vadd.f32 %v9653_v40, %v21335_v43  ;;  %9976 = vmatpush2.bf16.msra.mxu0 %v19532_v38  ;;  %v19535_v43 = vld [vmem:[#allocation2 + $0x128] ss:$112 sps:$4 sm:$0xff]   ;;  %v19582_v38 = vld [vmem:[#allocation2 + $0xf2c] ss:$112 sps:$4 sm:$0xff]  }
 0x46f   :  { %10038 = vmatpush1.bf16.msra.mxu1 %v19523_v21  ;;  %v9655_v53 = vpop.f32.mrf.mxu0  ;;  %9977 = vmatprep.subr.bf16.mxu0 %v19540_v15  ;;  %v19573_v21 = vld [vmem:[#allocation2 + $0x9ec] ss:$112 sps:$4 sm:$0xff]   ;;  %v19580_v15 = vld [vmem:[#allocation2 + $0xf28] ss:$112 sps:$4 sm:$0xff]  }
 0x470   :  { %10039 = vmatprep.subr.bf16.mxu1 %v19531_v31  ;;  %v21348_v56 = vadd.f32 %v9694_v9, %v9654_v52  ;;  %v9656_v0 = vadd.f32 %v9655_v53, %v21338_v12  ;;  %v19541_v12 = vld [vmem:[#allocation2 + $0x48] ss:$112 sps:$4 sm:$0xff]   ;;  %v19579_v40 = vld [vmem:[#allocation2 + $0x90c] ss:$112 sps:$4 sm:$0xff]  }
 0x471   :  { %v9657_v1 = vpop.f32.mrf.mxu0  ;;  %v19571_v31 = vld [vmem:[#allocation2 + $0x9e8] ss:$112 sps:$4 sm:$0xff]   ;;  %v19585_v53 = vld [vmem:[#allocation2 + $0x82c] ss:$112 sps:$4 sm:$0xff]  }
 0x472   :  { %v10854_v48 = vmax.f32 %v21234_v29, %v21348_v56  ;;  %v21354_v2 = vadd.f32 %v21341_v44, %v9656_v0  ;;  %9978 = vmatpush2.bf16.msra.mxu0 %v19538_v50  ;;  %v19549_v44 = vld [vmem:[#allocation2 + $0xd6c] ss:$112 sps:$4 sm:$0xff]   ;;  %v19577_v52 = vld [vmem:[#allocation2 + $0x908] ss:$112 sps:$4 sm:$0xff]   ;;  %v20005_v29 = vld [vmem:[#allocation2 + $0x11e4] ss:$112 sps:$4 sm:$0xff]  }
 0x473   :  { %10040 = vmatpush1.bf16.msra.mxu1 %v19529_v45  ;;  %10070 = vmatprep.subr.bf16.mxu0 %v19546_v60  ;;  %v9658_v19 = vpop.f32.mrf.mxu0  ;;  %v19588_v45 = vld [vmem:[#allocation2 + $0xe4c] ss:$112 sps:$4 sm:$0xff]   ;;  %v19586_v50 = vld [vmem:[#allocation2 + $0xe48] ss:$112 sps:$4 sm:$0xff]   ;;  %v20008_v56 = vld [vmem:[#allocation2 + $0xae4] ss:$112 sps:$4 sm:$0xff]  }
 0x474   :  { %10041 = vmatprep.subr.bf16.mxu1 %v19537_v17  ;;  %v10855_v9 = vmax.f32 %v21254_v39, %v21354_v2  ;;  %v19594_v17 = vld [vmem:[#allocation2 + $0x1b6c] ss:$112 sps:$4 sm:$0xff]   ;;  %v19583_v60 = vld [vmem:[#allocation2 + $0x828] ss:$112 sps:$4 sm:$0xff]  }
 0x475   :  { %9980 = vmatmul.mubr.bf16.vlgmr.msra.gmra.mxu0 %v21147_v16  ;;  %v19592_v0 = vld [vmem:[#allocation2 + $0x1b68] ss:$112 sps:$4 sm:$0xff]   ;;  %v19591_v1 = vld [vmem:[#allocation2 + $0x74c] ss:$112 sps:$4 sm:$0xff]  }
 0x476   :  { %10071 = vmatpush1.bf16.msra.mxu0 %v19544_v37  ;;  %10102 = vmatprep.mubr.bf16.mxu0 %v21116_v51  ;;  %v20129_v39 = vld [vmem:[#allocation2 + $0x68] ss:$112 sps:$4 sm:$0xff]  }
 0x477   :  { %10042 = vmatpush1.bf16.msra.mxu1 %v19535_v43  ;;  %10072 = vmatprep.subr.bf16.mxu0 %v19552_v49  ;;  %v19600_v43 = vld [vmem:[#allocation2 + $0x1a8c] ss:$112 sps:$4 sm:$0xff]   ;;  %v19598_v49 = vld [vmem:[#allocation2 + $0x1a88] ss:$112 sps:$4 sm:$0xff]  }
 0x478   :  { %10043 = vmatprep.subr.bf16.mxu1 %v19543_v57  ;;  %v19589_v57 = vld [vmem:[#allocation2 + $0x748] ss:$112 sps:$4 sm:$0xff]  }
 0x479   :  { %v20138_v2 = vld [vmem:[#allocation2 + $0x13a8] ss:$112 sps:$4 sm:$0xff]  }
 0x47a   :  { %10073 = vmatpush1.bf16.msra.mxu0 %v19550_v63  ;;  %v19606_v63 = vld [vmem:[#allocation2 + $0x19ac] ss:$112 sps:$4 sm:$0xff]  }
 0x47b   :  { %10044 = vmatpush1.bf16.msra.mxu1 %v19541_v12  ;;  %10074 = vmatprep.subr.bf16.mxu0 %v19558_v20  ;;  %v19597_v12 = vld [vmem:[#allocation2 + $0x226c] ss:$112 sps:$4 sm:$0xff]   ;;  %v19595_v20 = vld [vmem:[#allocation2 + $0x2268] ss:$112 sps:$4 sm:$0xff]  }
 0x47c   :  { %10045 = vmatprep.subr.bf16.mxu1 %v19549_v44 }
 0x47e   :  { %10075 = vmatpush1.bf16.msra.mxu0 %v19556_v24 }
 0x47f   :  { %10046 = vmatpush2.bf16.msra.mxu1 %v19547_v18  ;;  %10076 = vmatprep.subr.bf16.mxu0 %v19564_v25  ;;  %v19604_v18 = vld [vmem:[#allocation2 + $0x19a8] ss:$112 sps:$4 sm:$0xff]   ;;  %v19612_v25 = vld [vmem:[#allocation2 + $0x18cc] ss:$112 sps:$4 sm:$0xff]  }
 0x480   :  { %10047 = vmatprep.subr.bf16.mxu1 %v19555_v23  ;;  %v19603_v23 = vld [vmem:[#allocation2 + $0x218c] ss:$112 sps:$4 sm:$0xff]  }
 0x482   :  { %10077 = vmatpush1.bf16.msra.mxu0 %v19562_v28  ;;  %v19610_v28 = vld [vmem:[#allocation2 + $0x18c8] ss:$112 sps:$4 sm:$0xff]  }
 0x483   :  { %10048 = vmatpush2.bf16.msra.mxu1 %v19553_v27  ;;  %10078 = vmatprep.subr.bf16.mxu0 %v19570_v55  ;;  %v19601_v27 = vld [vmem:[#allocation2 + $0x2188] ss:$112 sps:$4 sm:$0xff]   ;;  %v19618_v55 = vld [vmem:[#allocation2 + $0x17ec] ss:$112 sps:$4 sm:$0xff]  }
 0x484   :  { %10049 = vmatprep.subr.bf16.mxu1 %v19561_v32  ;;  %v19609_v32 = vld [vmem:[#allocation2 + $0x20ac] ss:$112 sps:$4 sm:$0xff]  }
 0x486   :  { %10079 = vmatpush1.bf16.msra.mxu0 %v19568_v34  ;;  %v19616_v34 = vld [vmem:[#allocation2 + $0x17e8] ss:$112 sps:$4 sm:$0xff]  }
 0x487   :  { %10050 = vmatpush2.bf16.msra.mxu1 %v19559_v14  ;;  %10080 = vmatprep.subr.bf16.mxu0 %v19576_v35  ;;  %v19607_v14 = vld [vmem:[#allocation2 + $0x20a8] ss:$112 sps:$4 sm:$0xff]   ;;  %v19624_v35 = vld [vmem:[#allocation2 + $0x170c] ss:$112 sps:$4 sm:$0xff]  }
 0x488   :  { %10051 = vmatprep.subr.bf16.mxu1 %v19567_v58  ;;  %v19615_v58 = vld [vmem:[#allocation2 + $0x1fcc] ss:$112 sps:$4 sm:$0xff]  }
 0x48a   :  { %10081 = vmatpush1.bf16.msra.mxu0 %v19574_v36  ;;  %v19622_v36 = vld [vmem:[#allocation2 + $0x1708] ss:$112 sps:$4 sm:$0xff]  }
 0x48b   :  { %10052 = vmatpush2.bf16.msra.mxu1 %v19565_v30  ;;  %10082 = vmatprep.subr.bf16.mxu0 %v19582_v38  ;;  %v19613_v30 = vld [vmem:[#allocation2 + $0x1fc8] ss:$112 sps:$4 sm:$0xff]   ;;  %v19630_v38 = vld [vmem:[#allocation2 + $0x162c] ss:$112 sps:$4 sm:$0xff]  }
 0x48c   :  { %10053 = vmatprep.subr.bf16.mxu1 %v19573_v21  ;;  %v19621_v21 = vld [vmem:[#allocation2 + $0x1eec] ss:$112 sps:$4 sm:$0xff]  }
 0x48e   :  { %10083 = vmatpush1.bf16.msra.mxu0 %v19580_v15  ;;  %v19628_v15 = vld [vmem:[#allocation2 + $0x1628] ss:$112 sps:$4 sm:$0xff]  }
 0x48f   :  { %10054 = vmatpush2.bf16.msra.mxu1 %v19571_v31  ;;  %10084 = vmatprep.subr.bf16.mxu0 %v19588_v45  ;;  %v19619_v31 = vld [vmem:[#allocation2 + $0x1ee8] ss:$112 sps:$4 sm:$0xff]   ;;  %v19636_v45 = vld [vmem:[#allocation2 + $0x154c] ss:$112 sps:$4 sm:$0xff]  }
 0x490   :  { %10055 = vmatprep.subr.bf16.mxu1 %v19579_v40  ;;  %v19627_v40 = vld [vmem:[#allocation2 + $0x1e0c] ss:$112 sps:$4 sm:$0xff]  }
 0x492   :  { %10085 = vmatpush1.bf16.msra.mxu0 %v19586_v50  ;;  %v19625_v50 = vld [vmem:[#allocation2 + $0x1e08] ss:$112 sps:$4 sm:$0xff]  }
 0x493   :  { %10056 = vmatpush2.bf16.msra.mxu1 %v19577_v52  ;;  %10086 = vmatprep.subr.bf16.mxu0 %v19594_v17  ;;  %v19634_v17 = vld [vmem:[#allocation2 + $0x1548] ss:$112 sps:$4 sm:$0xff]  }
 0x494   :  { %10057 = vmatprep.subr.bf16.mxu1 %v19585_v53 }
 0x496   :  { %v9735_v37 = vpop.f32.mrf.mxu1  ;;  %10087 = vmatpush2.bf16.msra.mxu0 %v19592_v0  ;;  %v19633_v0 = vld [vmem:[#allocation2 + $0x1d2c] ss:$112 sps:$4 sm:$0xff]  }
 0x497   :  { %10058 = vmatpush2.bf16.msra.mxu1 %v19583_v60  ;;  %10088 = vmatprep.subr.bf16.mxu0 %v19600_v43 }
 0x498   :  { %v9737_v19 = vpop.f32.mrf.mxu1  ;;  %10059 = vmatprep.subr.bf16.mxu1 %v19591_v1  ;;  %v19645_v1 = vld [vmem:[#allocation2 + $0x2a4c] ss:$112 sps:$4 sm:$0xff]  }
 0x49a   :  { %v9739_v44 = vpop.f32.mrf.mxu1  ;;  %10089 = vmatpush2.bf16.msra.mxu0 %v19598_v49  ;;  %v19631_v49 = vld [vmem:[#allocation2 + $0x1d28] ss:$112 sps:$4 sm:$0xff]  }
 0x49b   :  { %10060 = vmatpush2.bf16.msra.mxu1 %v19589_v57  ;;  %10090 = vmatprep.subr.bf16.mxu0 %v19606_v63  ;;  %v19639_v63 = vld [vmem:[#allocation2 + $0x1c4c] ss:$112 sps:$4 sm:$0xff]  }
 0x49c   :  { %v9740_v24 = vpop.f32.mrf.mxu1  ;;  %10111 = vmatprep.subr.bf16.mxu1 %v19597_v12  ;;  %v19643_v12 = vld [vmem:[#allocation2 + $0x2a48] ss:$112 sps:$4 sm:$0xff]  }
 0x49e   :  { %10062 = vmatmul.mubr.bf16.vlgmr.msra.gmra.mxu1 %v21120_v6  ;;  %10091 = vmatpush2.bf16.msra.mxu0 %v19604_v18  ;;  %v19637_v18 = vld [vmem:[#allocation2 + $0x1c48] ss:$112 sps:$4 sm:$0xff]  }
 0x49f   :  { %10112 = vmatpush1.bf16.msra.mxu1 %v19595_v20  ;;  %10092 = vmatprep.subr.bf16.mxu0 %v19612_v25  ;;  %v19640_v25 = vld [vmem:[#allocation2 + $0x2968] ss:$112 sps:$4 sm:$0xff]  }
 0x4a0   :  { %10113 = vmatprep.subr.bf16.mxu1 %v19603_v23  ;;  %10143 = vmatprep.mubr.bf16.mxu1 %v21142_v33 }
 0x4a2   :  { %10093 = vmatpush2.bf16.msra.mxu0 %v19610_v28  ;;  %v19648_v28 = vld [vmem:[#allocation2 + $0x288c] ss:$112 sps:$4 sm:$0xff]  }
 0x4a3   :  { %10114 = vmatpush1.bf16.msra.mxu1 %v19601_v27  ;;  %10094 = vmatprep.subr.bf16.mxu0 %v19618_v55  ;;  %v19649_v27 = vld [vmem:[#allocation2 + $0x670] ss:$112 sps:$4 sm:$0xff]  }
 0x4a4   :  { %10115 = vmatprep.subr.bf16.mxu1 %v19609_v32  ;;  %v19657_v32 = vld [vmem:[#allocation2 + $0x594] ss:$112 sps:$4 sm:$0xff]  }
 0x4a6   :  { %10095 = vmatpush2.bf16.msra.mxu0 %v19616_v34  ;;  %v19646_v34 = vld [vmem:[#allocation2 + $0x2888] ss:$112 sps:$4 sm:$0xff]  }
 0x4a7   :  { %10116 = vmatpush1.bf16.msra.mxu1 %v19607_v14  ;;  %10096 = vmatprep.subr.bf16.mxu0 %v19624_v35  ;;  %v21375_v14 = vld [vmem:[%s21771_s12 + $0x18] ss:$0 sps:$4 sm:$0xff]   ;;  %v19654_v35 = vld [vmem:[#allocation2 + $0x27ac] ss:$112 sps:$4 sm:$0xff]  }
 0x4a8   :  { %10117 = vmatprep.subr.bf16.mxu1 %v19615_v58  ;;  %v19655_v58 = vld [vmem:[#allocation2 + $0x590] ss:$112 sps:$4 sm:$0xff]  }
 0x4aa   :  { %10097 = vmatpush2.bf16.msra.mxu0 %v19622_v36  ;;  %v19652_v36 = vld [vmem:[#allocation2 + $0x27a8] ss:$112 sps:$4 sm:$0xff]  }
 0x4ab   :  { %10118 = vmatpush1.bf16.msra.mxu1 %v19613_v30  ;;  %10098 = vmatprep.subr.bf16.mxu0 %v19630_v38  ;;  %v19663_v30 = vld [vmem:[#allocation2 + $0x4b4] ss:$112 sps:$4 sm:$0xff]   ;;  %v19660_v38 = vld [vmem:[#allocation2 + $0x26cc] ss:$112 sps:$4 sm:$0xff]  }
 0x4ac   :  { %10119 = vmatprep.subr.bf16.mxu1 %v19621_v21  ;;  %v19661_v21 = vld [vmem:[#allocation2 + $0x4b0] ss:$112 sps:$4 sm:$0xff]  }
 0x4ad   :  { %v9776_v52 = vpop.f32.mrf.mxu0 }
 0x4ae   :  { %v21362_v53 = vadd.f32 %v9776_v52, %v9735_v37  ;;  %10099 = vmatpush2.bf16.msra.mxu0 %v19628_v15  ;;  %v19651_v37 = vld [vmem:[#allocation2 + $0x674] ss:$112 sps:$4 sm:$0xff]   ;;  %v19658_v15 = vld [vmem:[#allocation2 + $0x26c8] ss:$112 sps:$4 sm:$0xff]  }
 0x4af   :  { %10120 = vmatpush1.bf16.msra.mxu1 %v19619_v31  ;;  %v9778_v60 = vpop.f32.mrf.mxu0  ;;  %10100 = vmatprep.subr.bf16.mxu0 %v19636_v45  ;;  %v19669_v31 = vld [vmem:[#allocation2 + $0x3d4] ss:$112 sps:$4 sm:$0xff]   ;;  %v19666_v45 = vld [vmem:[#allocation2 + $0x25ec] ss:$112 sps:$4 sm:$0xff]  }
 0x4b0   :  { %10121 = vmatprep.subr.bf16.mxu1 %v19627_v40  ;;  %v21364_v43 = vadd.f32 %v9778_v60, %v9737_v19  ;;  %v19642_v19 = vld [vmem:[#allocation2 + $0x296c] ss:$112 sps:$4 sm:$0xff]   ;;  %v19667_v40 = vld [vmem:[#allocation2 + $0x3d0] ss:$112 sps:$4 sm:$0xff]   ;;  %v19675_v52 = vld [vmem:[#allocation2 + $0x2f4] ss:$112 sps:$4 sm:$0xff]  }
 0x4b1   :  { %v9780_v57 = vpop.f32.mrf.mxu0  ;;  %v19672_v60 = vld [vmem:[#allocation2 + $0x250c] ss:$112 sps:$4 sm:$0xff]  }
 0x4b2   :  { %10101 = vmatpush2.bf16.msra.mxu0 %v19634_v17  ;;  %v19673_v17 = vld [vmem:[#allocation2 + $0x2f0] ss:$112 sps:$4 sm:$0xff]  }
 0x4b3   :  { %10122 = vmatpush1.bf16.msra.mxu1 %v19625_v50  ;;  %10166 = vmatprep.subr.bf16.mxu0 %v19645_v1  ;;  %v9781_v44 = vpop.f32.mrf.mxu0  ;;  %v19664_v50 = vld [vmem:[#allocation2 + $0x25e8] ss:$112 sps:$4 sm:$0xff]   ;;  %v19679_v57 = vld [vmem:[#allocation2 + $0x210] ss:$112 sps:$4 sm:$0xff]  }
 0x4b4   :  { %10123 = vmatprep.subr.bf16.mxu1 %v19633_v0  ;;  %v19681_v0 = vld [vmem:[#allocation2 + $0x214] ss:$112 sps:$4 sm:$0xff]   ;;  %v19670_v1 = vld [vmem:[#allocation2 + $0x2508] ss:$112 sps:$4 sm:$0xff]   ;;  %v19685_v44 = vld [vmem:[#allocation2 + $0x130] ss:$112 sps:$4 sm:$0xff]  }
 0x4b5   :  { %10103 = vmatmul.mubr.bf16.vlgmr.msra.gmra.mxu0 %v21122_v7  ;;  %v21367_v20 = vpop.f32.mrf.mxu0 }
 0x4b6   :  { %10167 = vmatpush1.bf16.msra.mxu0 %v19643_v12  ;;  %10184 = vmatprep.mubr.bf16.mxu0 %v20933_v13  ;;  %v19687_v12 = vld [vmem:[#allocation2 + $0x134] ss:$112 sps:$4 sm:$0xff]  }
 0x4b7   :  { %10124 = vmatpush1.bf16.msra.mxu1 %v19631_v49  ;;  %v21370_v24 = vpop.f32.mrf.mxu0  ;;  %10193 = vmatprep.subr.bf16.mxu0 %v19651_v37  ;;  %v19678_v49 = vld [vmem:[#allocation2 + $0x242c] ss:$112 sps:$4 sm:$0xff]  }
 0x4b8   :  { %10125 = vmatprep.subr.bf16.mxu1 %v19639_v63  ;;  %v19676_v63 = vld [vmem:[#allocation2 + $0x2428] ss:$112 sps:$4 sm:$0xff]   ;;  %v19684_v37 = vld [vmem:[#allocation2 + $0x234c] ss:$112 sps:$4 sm:$0xff]  }
 0x4b9   :  { %v9862_v23 = vpop.f32.mrf.mxu0 }
 0x4bb   :  { %10126 = vmatpush1.bf16.msra.mxu1 %v19637_v18  ;;  %v9863_v55 = vpop.f32.mrf.mxu0  ;;  %v19690_v18 = vld [vmem:[#allocation2 + $0x54] ss:$112 sps:$4 sm:$0xff]  }
 0x4bc   :  { %10127 = vmatprep.subr.bf16.mxu1 %v19642_v19  ;;  %v19696_v55 = vld [vmem:[#allocation2 + $0xd74] ss:$112 sps:$4 sm:$0xff]  }
 0x4bd   :  { %17408 = vmatmul.mubr.msk.bf16.vlgmr.msra.gmra.mxu0 %vm8549_vm0, %v21375_v14 }
 0x4be   :  { %10194 = vmatpush1.bf16.msra.mxu0 %v19649_v27  ;;  %10225 = vmatprep.mubr.bf16.mxu0 %v21111_v47  ;;  %v19688_v27 = vld [vmem:[#allocation2 + $0x50] ss:$112 sps:$4 sm:$0xff]  }
 0x4bf   :  { %10128 = vmatpush2.bf16.msra.mxu1 %v19640_v25  ;;  %10195 = vmatprep.subr.bf16.mxu0 %v19657_v32  ;;  %v19682_v25 = vld [vmem:[#allocation2 + $0x2348] ss:$112 sps:$4 sm:$0xff]   ;;  %v19693_v32 = vld [vmem:[#allocation2 + $0x1474] ss:$112 sps:$4 sm:$0xff]  }
 0x4c0   :  { %10129 = vmatprep.subr.bf16.mxu1 %v19648_v28 }
 0x4c2   :  { %10196 = vmatpush1.bf16.msra.mxu0 %v19655_v58 }
 0x4c3   :  { %10130 = vmatpush2.bf16.msra.mxu1 %v19646_v34  ;;  %10197 = vmatprep.subr.bf16.mxu0 %v19663_v30 }
 0x4c4   :  { %10131 = vmatprep.subr.bf16.mxu1 %v19654_v35 }
 0x4c6   :  { %10198 = vmatpush1.bf16.msra.mxu0 %v19661_v21  ;;  %v19694_v21 = vld [vmem:[#allocation2 + $0xd70] ss:$112 sps:$4 sm:$0xff]  }
 0x4c7   :  { %10132 = vmatpush2.bf16.msra.mxu1 %v19652_v36  ;;  %10199 = vmatprep.subr.bf16.mxu0 %v19669_v31  ;;  %v19691_v36 = vld [vmem:[#allocation2 + $0x1470] ss:$112 sps:$4 sm:$0xff]   ;;  %v19699_v31 = vld [vmem:[#allocation2 + $0x1394] ss:$112 sps:$4 sm:$0xff]  }
 0x4c8   :  { %10133 = vmatprep.subr.bf16.mxu1 %v19660_v38 }
 0x4ca   :  { %10200 = vmatpush1.bf16.msra.mxu0 %v19667_v40  ;;  %v19706_v40 = vld [vmem:[#allocation2 + $0xbb0] ss:$112 sps:$4 sm:$0xff]  }
 0x4cb   :  { %10134 = vmatpush2.bf16.msra.mxu1 %v19658_v15  ;;  %10201 = vmatprep.subr.bf16.mxu0 %v19675_v52  ;;  %v19702_v15 = vld [vmem:[#allocation2 + $0xc94] ss:$112 sps:$4 sm:$0xff]  }
 0x4cc   :  { %10135 = vmatprep.subr.bf16.mxu1 %v19666_v45  ;;  %v19712_v45 = vld [vmem:[#allocation2 + $0xad0] ss:$112 sps:$4 sm:$0xff]   ;;  %v19717_v52 = vld [vmem:[#allocation2 + $0x10f4] ss:$112 sps:$4 sm:$0xff]  }
 0x4ce   :  { %10202 = vmatpush1.bf16.msra.mxu0 %v19673_v17  ;;  %v19715_v17 = vld [vmem:[#allocation2 + $0x10f0] ss:$112 sps:$4 sm:$0xff]  }
 0x4cf   :  { %10136 = vmatpush2.bf16.msra.mxu1 %v19664_v50  ;;  %10203 = vmatprep.subr.bf16.mxu0 %v19681_v0  ;;  %v19720_v50 = vld [vmem:[#allocation2 + $0x9f4] ss:$112 sps:$4 sm:$0xff]  }
 0x4d0   :  { %10137 = vmatprep.subr.bf16.mxu1 %v19672_v60  ;;  %v19718_v60 = vld [vmem:[#allocation2 + $0x9f0] ss:$112 sps:$4 sm:$0xff]   ;;  %v19723_v0 = vld [vmem:[#allocation2 + $0x1014] ss:$112 sps:$4 sm:$0xff]  }
 0x4d2   :  { %10204 = vmatpush1.bf16.msra.mxu0 %v19679_v57  ;;  %v19721_v57 = vld [vmem:[#allocation2 + $0x1010] ss:$112 sps:$4 sm:$0xff]  }
 0x4d3   :  { %10138 = vmatpush2.bf16.msra.mxu1 %v19670_v1  ;;  %10205 = vmatprep.subr.bf16.mxu0 %v19687_v12  ;;  %v19726_v1 = vld [vmem:[#allocation2 + $0x914] ss:$112 sps:$4 sm:$0xff]  }
 0x4d4   :  { %10139 = vmatprep.subr.bf16.mxu1 %v19678_v49  ;;  %v19724_v49 = vld [vmem:[#allocation2 + $0x910] ss:$112 sps:$4 sm:$0xff]   ;;  %v19729_v12 = vld [vmem:[#allocation2 + $0xf34] ss:$112 sps:$4 sm:$0xff]  }
 0x4d6   :  { %v9817_v19 = vpop.f32.mrf.mxu1  ;;  %10206 = vmatpush1.bf16.msra.mxu0 %v19685_v44  ;;  %v19727_v44 = vld [vmem:[#allocation2 + $0xf30] ss:$112 sps:$4 sm:$0xff]  }
 0x4d7   :  { %v9818_v23 = vadd.f32 %v9817_v19, %v21362_v53  ;;  %10140 = vmatpush2.bf16.msra.mxu1 %v19676_v63  ;;  %10207 = vmatprep.subr.bf16.mxu0 %v19690_v18  ;;  %v19732_v63 = vld [vmem:[#allocation2 + $0x834] ss:$112 sps:$4 sm:$0xff]  }
 0x4d8   :  { %v9819_v28 = vpop.f32.mrf.mxu1  ;;  %10141 = vmatprep.subr.bf16.mxu1 %v19684_v37  ;;  %v19730_v37 = vld [vmem:[#allocation2 + $0x830] ss:$112 sps:$4 sm:$0xff]   ;;  %v19735_v18 = vld [vmem:[#allocation2 + $0xe54] ss:$112 sps:$4 sm:$0xff]  }
 0x4d9   :  { %v9859_v34 = vadd.f32 %v21367_v20, %v9818_v23  ;;  %v9820_v58 = vadd.f32 %v9819_v28, %v21364_v43  ;;  %v19708_v20 = vld [vmem:[#allocation2 + $0xbb4] ss:$112 sps:$4 sm:$0xff]  }
 0x4da   :  { %v9821_v35 = vpop.f32.mrf.mxu1  ;;  %10208 = vmatpush1.bf16.msra.mxu0 %v19688_v27  ;;  %v19738_v19 = vld [vmem:[#allocation2 + $0x754] ss:$112 sps:$4 sm:$0xff]   ;;  %v19736_v27 = vld [vmem:[#allocation2 + $0x750] ss:$112 sps:$4 sm:$0xff]  }
 0x4db   :  { %v21386_v30 = vmax.f32 %v10849_v46, %v9859_v34  ;;  %v9861_v53 = vadd.f32 %v21370_v24, %v9820_v58  ;;  %10142 = vmatpush2.bf16.msra.mxu1 %v19682_v25  ;;  %10209 = vmatprep.subr.bf16.mxu0 %v19696_v55  ;;  %v19705_v46 = vld [vmem:[#allocation2 + $0x12b4] ss:$112 sps:$4 sm:$0xff]   ;;  %v19703_v24 = vld [vmem:[#allocation2 + $0x12b0] ss:$112 sps:$4 sm:$0xff]  }
 0x4dc   :  { %v9822_v38 = vpop.f32.mrf.mxu1  ;;  %10234 = vmatprep.subr.bf16.mxu1 %v19693_v32  ;;  %v19733_v25 = vld [vmem:[#allocation2 + $0xe50] ss:$112 sps:$4 sm:$0xff]   ;;  %v19741_v28 = vld [vmem:[#allocation2 + $0x1b74] ss:$112 sps:$4 sm:$0xff]  }
 0x4dd   :  { %v21392_v43 = vmax.f32 %v10850_v10, %v9861_v53  ;;  %v19709_v10 = vld [vmem:[#allocation2 + $0x11d0] ss:$112 sps:$4 sm:$0xff]   ;;  %v19747_v32 = vld [vmem:[#allocation2 + $0x2274] ss:$112 sps:$4 sm:$0xff]  }
 0x4de   :  { %10144 = vmatmul.mubr.bf16.vlgmr.msra.gmra.mxu1 %v21147_v16  ;;  %10210 = vmatpush2.bf16.msra.mxu0 %v19694_v21  ;;  %v19739_v58 = vld [vmem:[#allocation2 + $0x1b70] ss:$112 sps:$4 sm:$0xff]   ;;  %v19744_v53 = vld [vmem:[#allocation2 + $0x1a94] ss:$112 sps:$4 sm:$0xff]  }
 0x4df   :  { %10235 = vmatpush1.bf16.msra.mxu1 %v19691_v36  ;;  %10211 = vmatprep.subr.bf16.mxu0 %v19702_v15  ;;  %v19745_v35 = vld [vmem:[#allocation2 + $0x2270] ss:$112 sps:$4 sm:$0xff]   ;;  %v19753_v36 = vld [vmem:[#allocation2 + $0x2194] ss:$112 sps:$4 sm:$0xff]  }
 0x4e0   :  { %10236 = vmatprep.subr.bf16.mxu1 %v19699_v31  ;;  %10266 = vmatprep.mubr.bf16.mxu1 %v21116_v51  ;;  %v19742_v38 = vld [vmem:[#allocation2 + $0x1a90] ss:$112 sps:$4 sm:$0xff]   ;;  %v19750_v15 = vld [vmem:[#allocation2 + $0x19b4] ss:$112 sps:$4 sm:$0xff]  }
 0x4e1   :  { %v19751_v31 = vld [vmem:[#allocation2 + $0x2190] ss:$112 sps:$4 sm:$0xff]  }
 0x4e2   :  { %10212 = vmatpush2.bf16.msra.mxu0 %v19700_v41  ;;  %v19748_v41 = vld [vmem:[#allocation2 + $0x19b0] ss:$112 sps:$4 sm:$0xff]  }
 0x4e3   :  { %10237 = vmatpush1.bf16.msra.mxu1 %v19697_v3  ;;  %10213 = vmatprep.subr.bf16.mxu0 %v19708_v20  ;;  %v19759_v3 = vld [vmem:[#allocation2 + $0x20b4] ss:$112 sps:$4 sm:$0xff]  }
 0x4e4   :  { %10238 = vmatprep.subr.bf16.mxu1 %v19705_v46  ;;  %v19757_v46 = vld [vmem:[#allocation2 + $0x20b0] ss:$112 sps:$4 sm:$0xff]   ;;  %v19756_v20 = vld [vmem:[#allocation2 + $0x18d4] ss:$112 sps:$4 sm:$0xff]  }
 0x4e6   :  { %10214 = vmatpush2.bf16.msra.mxu0 %v19706_v40  ;;  %v19754_v40 = vld [vmem:[#allocation2 + $0x18d0] ss:$112 sps:$4 sm:$0xff]  }
 0x4e7   :  { %10239 = vmatpush1.bf16.msra.mxu1 %v19703_v24  ;;  %10215 = vmatprep.subr.bf16.mxu0 %v19714_v4  ;;  %v19765_v24 = vld [vmem:[#allocation2 + $0x1fd4] ss:$112 sps:$4 sm:$0xff]  }
 0x4e8   :  { %10240 = vmatprep.subr.bf16.mxu1 %v19711_v8  ;;  %v19763_v8 = vld [vmem:[#allocation2 + $0x1fd0] ss:$112 sps:$4 sm:$0xff]   ;;  %v19762_v4 = vld [vmem:[#allocation2 + $0x17f4] ss:$112 sps:$4 sm:$0xff]  }
 0x4ea   :  { %10216 = vmatpush2.bf16.msra.mxu0 %v19712_v45  ;;  %v19760_v45 = vld [vmem:[#allocation2 + $0x17f0] ss:$112 sps:$4 sm:$0xff]  }
 0x4eb   :  { %10241 = vmatpush1.bf16.msra.mxu1 %v19709_v10  ;;  %10217 = vmatprep.subr.bf16.mxu0 %v19720_v50  ;;  %v19771_v10 = vld [vmem:[#allocation2 + $0x1ef4] ss:$112 sps:$4 sm:$0xff]  }
 0x4ec   :  { %10242 = vmatprep.subr.bf16.mxu1 %v19717_v52  ;;  %v19769_v52 = vld [vmem:[#allocation2 + $0x1ef0] ss:$112 sps:$4 sm:$0xff]   ;;  %v19768_v50 = vld [vmem:[#allocation2 + $0x1714] ss:$112 sps:$4 sm:$0xff]  }
 0x4ee   :  { %10218 = vmatpush2.bf16.msra.mxu0 %v19718_v60  ;;  %v19766_v60 = vld [vmem:[#allocation2 + $0x1710] ss:$112 sps:$4 sm:$0xff]  }
 0x4ef   :  { %10243 = vmatpush1.bf16.msra.mxu1 %v19715_v17  ;;  %10219 = vmatprep.subr.bf16.mxu0 %v19726_v1  ;;  %v19777_v17 = vld [vmem:[#allocation2 + $0x1e14] ss:$112 sps:$4 sm:$0xff]  }
 0x4f0   :  { %10244 = vmatprep.subr.bf16.mxu1 %v19723_v0  ;;  %v19775_v0 = vld [vmem:[#allocation2 + $0x1e10] ss:$112 sps:$4 sm:$0xff]   ;;  %v19774_v1 = vld [vmem:[#allocation2 + $0x1634] ss:$112 sps:$4 sm:$0xff]  }
 0x4f2   :  { %10220 = vmatpush2.bf16.msra.mxu0 %v19724_v49  ;;  %v19772_v49 = vld [vmem:[#allocation2 + $0x1630] ss:$112 sps:$4 sm:$0xff]  }
 0x4f3   :  { %10245 = vmatpush1.bf16.msra.mxu1 %v19721_v57  ;;  %10221 = vmatprep.subr.bf16.mxu0 %v19732_v63  ;;  %v19783_v57 = vld [vmem:[#allocation2 + $0x1d34] ss:$112 sps:$4 sm:$0xff]  }
 0x4f4   :  { %10246 = vmatprep.subr.bf16.mxu1 %v19729_v12  ;;  %v19781_v12 = vld [vmem:[#allocation2 + $0x1d30] ss:$112 sps:$4 sm:$0xff]   ;;  %v19780_v63 = vld [vmem:[#allocation2 + $0x1554] ss:$112 sps:$4 sm:$0xff]  }
 0x4f5   :  { %v21396_v23 = vpop.f32.mrf.mxu0 }
 0x4f6   :  { %10222 = vmatpush2.bf16.msra.mxu0 %v19730_v37 }
 0x4f7   :  { %10247 = vmatpush1.bf16.msra.mxu1 %v19727_v44  ;;  %10223 = vmatprep.subr.bf16.mxu0 %v19738_v19  ;;  %v21398_v55 = vpop.f32.mrf.mxu0  ;;  %v19786_v44 = vld [vmem:[#allocation2 + $0x1c54] ss:$112 sps:$4 sm:$0xff]   ;;  %v19778_v19 = vld [vmem:[#allocation2 + $0x1550] ss:$112 sps:$4 sm:$0xff]  }
 0x4f8   :  { %10248 = vmatprep.subr.bf16.mxu1 %v19735_v18 }
 0x4f9   :  { %v9903_v34 = vpop.f32.mrf.mxu0 }
 0x4fa   :  { %10224 = vmatpush2.bf16.msra.mxu0 %v19736_v27 }
 0x4fb   :  { %10249 = vmatpush1.bf16.msra.mxu1 %v19733_v25  ;;  %10275 = vmatprep.subr.bf16.mxu0 %v19747_v32  ;;  %v9904_v21 = vpop.f32.mrf.mxu0  ;;  %v19784_v25 = vld [vmem:[#allocation2 + $0x1c50] ss:$112 sps:$4 sm:$0xff]   ;;  %v19792_v32 = vld [vmem:[#allocation2 + $0x2974] ss:$112 sps:$4 sm:$0xff]  }
 0x4fc   :  { %10250 = vmatprep.subr.bf16.mxu1 %v19741_v28  ;;  %v19789_v28 = vld [vmem:[#allocation2 + $0x2a54] ss:$112 sps:$4 sm:$0xff]  }
 0x4fd   :  { %10226 = vmatmul.mubr.bf16.vlgmr.msra.gmra.mxu0 %v21120_v6  ;;  %v19798_v21 = vld [vmem:[#allocation2 + $0x2894] ss:$112 sps:$4 sm:$0xff]  }
 0x4fe   :  { %10276 = vmatpush1.bf16.msra.mxu0 %v19745_v35  ;;  %10307 = vmatprep.mubr.bf16.mxu0 %v21142_v33  ;;  %v19787_v35 = vld [vmem:[#allocation2 + $0x2a50] ss:$112 sps:$4 sm:$0xff]  }
 0x4ff   :  { %10251 = vmatpush2.bf16.msra.mxu1 %v19739_v58  ;;  %10277 = vmatprep.subr.bf16.mxu0 %v19753_v36 }
 0x500   :  { %10252 = vmatprep.subr.bf16.mxu1 %v19744_v53  ;;  %v19790_v53 = vld [vmem:[#allocation2 + $0x2970] ss:$112 sps:$4 sm:$0xff]  }
 0x502   :  { %10278 = vmatpush1.bf16.msra.mxu0 %v19751_v31  ;;  %v19796_v31 = vld [vmem:[#allocation2 + $0x2890] ss:$112 sps:$4 sm:$0xff]  }
 0x503   :  { %10253 = vmatpush2.bf16.msra.mxu1 %v19742_v38  ;;  %10279 = vmatprep.subr.bf16.mxu0 %v19759_v3 }
 0x504   :  { %10254 = vmatprep.subr.bf16.mxu1 %v19750_v15 }
 0x506   :  { %10280 = vmatpush1.bf16.msra.mxu0 %v19757_v46  ;;  %v19802_v46 = vld [vmem:[#allocation2 + $0x27b0] ss:$112 sps:$4 sm:$0xff]  }
 0x507   :  { %10255 = vmatpush2.bf16.msra.mxu1 %v19748_v41  ;;  %10281 = vmatprep.subr.bf16.mxu0 %v19765_v24  ;;  %v19793_v41 = vld [vmem:[#allocation2 + $0x678] ss:$112 sps:$4 sm:$0xff]   ;;  %v19801_v24 = vld [vmem:[#allocation2 + $0x59c] ss:$112 sps:$4 sm:$0xff]  }
 0x508   :  { %10256 = vmatprep.subr.bf16.mxu1 %v19756_v20 }
 0x50a   :  { %10282 = vmatpush1.bf16.msra.mxu0 %v19763_v8  ;;  %v19799_v8 = vld [vmem:[#allocation2 + $0x598] ss:$112 sps:$4 sm:$0xff]  }
 0x50b   :  { %10257 = vmatpush2.bf16.msra.mxu1 %v19754_v40  ;;  %10283 = vmatprep.subr.bf16.mxu0 %v19771_v10  ;;  %v19810_v40 = vld [vmem:[#allocation2 + $0x26d4] ss:$112 sps:$4 sm:$0xff]   ;;  %v19807_v10 = vld [vmem:[#allocation2 + $0x4bc] ss:$112 sps:$4 sm:$0xff]  }
 0x50c   :  { %10258 = vmatprep.subr.bf16.mxu1 %v19762_v4  ;;  %v19808_v4 = vld [vmem:[#allocation2 + $0x26d0] ss:$112 sps:$4 sm:$0xff]  }
 0x50e   :  { %10284 = vmatpush1.bf16.msra.mxu0 %v19769_v52  ;;  %v19805_v52 = vld [vmem:[#allocation2 + $0x4b8] ss:$112 sps:$4 sm:$0xff]  }
 0x50f   :  { %10259 = vmatpush2.bf16.msra.mxu1 %v19760_v45  ;;  %10285 = vmatprep.subr.bf16.mxu0 %v19777_v17  ;;  %v19816_v45 = vld [vmem:[#allocation2 + $0x25f4] ss:$112 sps:$4 sm:$0xff]   ;;  %v19813_v17 = vld [vmem:[#allocation2 + $0x3dc] ss:$112 sps:$4 sm:$0xff]  }
 0x510   :  { %10260 = vmatprep.subr.bf16.mxu1 %v19768_v50  ;;  %v19814_v50 = vld [vmem:[#allocation2 + $0x25f0] ss:$112 sps:$4 sm:$0xff]  }
 0x512   :  { %10286 = vmatpush1.bf16.msra.mxu0 %v19775_v0  ;;  %v19811_v0 = vld [vmem:[#allocation2 + $0x3d8] ss:$112 sps:$4 sm:$0xff]  }
 0x513   :  { %10261 = vmatpush2.bf16.msra.mxu1 %v19766_v60  ;;  %10287 = vmatprep.subr.bf16.mxu0 %v19783_v57  ;;  %v19822_v60 = vld [vmem:[#allocation2 + $0x2514] ss:$112 sps:$4 sm:$0xff]   ;;  %v19819_v57 = vld [vmem:[#allocation2 + $0x2fc] ss:$112 sps:$4 sm:$0xff]  }
 0x514   :  { %10262 = vmatprep.subr.bf16.mxu1 %v19774_v1  ;;  %v19820_v1 = vld [vmem:[#allocation2 + $0x2510] ss:$112 sps:$4 sm:$0xff]  }
 0x516   :  { %v9940_v37 = vpop.f32.mrf.mxu1  ;;  %10288 = vmatpush1.bf16.msra.mxu0 %v19781_v12  ;;  %v19817_v12 = vld [vmem:[#allocation2 + $0x2f8] ss:$112 sps:$4 sm:$0xff]  }
 0x517   :  { %v21403_v18 = vadd.f32 %v9940_v37, %v21396_v23  ;;  %10263 = vmatpush2.bf16.msra.mxu1 %v19772_v49  ;;  %10289 = vmatprep.subr.bf16.mxu0 %v19786_v44  ;;  %v19795_v23 = vld [vmem:[#allocation2 + $0x67c] ss:$112 sps:$4 sm:$0xff]   ;;  %v19828_v49 = vld [vmem:[#allocation2 + $0x2434] ss:$112 sps:$4 sm:$0xff]  }
 0x518   :  { %v9942_v27 = vpop.f32.mrf.mxu1  ;;  %10264 = vmatprep.subr.bf16.mxu1 %v19780_v63  ;;  %v19826_v63 = vld [vmem:[#allocation2 + $0x2430] ss:$112 sps:$4 sm:$0xff]   ;;  %v19825_v44 = vld [vmem:[#allocation2 + $0x21c] ss:$112 sps:$4 sm:$0xff]   ;;  %v19834_v37 = vld [vmem:[#allocation2 + $0x2354] ss:$112 sps:$4 sm:$0xff]  }
 0x519   :  { %v21406_v34 = vadd.f32 %v9942_v27, %v21398_v55  ;;  %v19804_v55 = vld [vmem:[#allocation2 + $0x27b4] ss:$112 sps:$4 sm:$0xff]  }
 0x51a   :  { %v9944_v58 = vpop.f32.mrf.mxu1  ;;  %10290 = vmatpush1.bf16.msra.mxu0 %v19784_v25  ;;  %v19823_v25 = vld [vmem:[#allocation2 + $0x218] ss:$112 sps:$4 sm:$0xff]  }
 0x51b   :  { %10265 = vmatpush2.bf16.msra.mxu1 %v19778_v19  ;;  %10291 = vmatprep.subr.bf16.mxu0 %v19792_v32  ;;  %v19831_v58 = vld [vmem:[#allocation2 + $0x13c] ss:$112 sps:$4 sm:$0xff]  }
 0x51c   :  { %v9945_v36 = vpop.f32.mrf.mxu1  ;;  %10330 = vmatprep.subr.bf16.mxu1 %v19789_v28  ;;  %v19832_v28 = vld [vmem:[#allocation2 + $0x2350] ss:$112 sps:$4 sm:$0xff]  }
 0x51e   :  { %10267 = vmatmul.mubr.bf16.vlgmr.msra.gmra.mxu1 %v21122_v7  ;;  %v10022_v38 = vpop.f32.mrf.mxu1  ;;  %10292 = vmatpush2.bf16.msra.mxu0 %v19790_v53 }
 0x51f   :  { %10331 = vmatpush1.bf16.msra.mxu1 %v19787_v35  ;;  %10348 = vmatprep.mubr.bf16.mxu1 %v20933_v13  ;;  %v19840_v35 = vld [vmem:[#allocation2 + $0x147c] ss:$112 sps:$4 sm:$0xff]  }
 0x520   :  { %v21409_v15 = vpop.f32.mrf.mxu1  ;;  %10357 = vmatprep.subr.bf16.mxu1 %v19795_v23  ;;  %10293 = vmatprep.subr.bf16.mxu0 %v19798_v21 }
 0x522   :  { %v10026_v3 = vpop.f32.mrf.mxu1  ;;  %10294 = vmatpush2.bf16.msra.mxu0 %v19796_v31 }
 0x523   :  { %10295 = vmatprep.subr.bf16.mxu0 %v19804_v55  ;;  %v19838_v55 = vld [vmem:[#allocation2 + $0x1478] ss:$112 sps:$4 sm:$0xff]   ;;  %v19837_v3 = vld [vmem:[#allocation2 + $0x5c] ss:$112 sps:$4 sm:$0xff]  }
 0x524   :  { %v10027_v20 = vpop.f32.mrf.mxu1 }
 0x525   :  { %v19850_v20 = vld [vmem:[#allocation2 + $0x12b8] ss:$112 sps:$4 sm:$0xff]  }
 0x526   :  { %17409 = vmatmul.mubr.msk.bf16.vlgmr.msra.gmra.mxu1 %vm8549_vm0, %v21375_v14  ;;  %10296 = vmatpush2.bf16.msra.mxu0 %v19802_v46 }
 0x527   :  { %10358 = vmatpush1.bf16.msra.mxu1 %v19793_v41  ;;  %10297 = vmatprep.subr.bf16.mxu0 %v19810_v40  ;;  %v19846_v41 = vld [vmem:[#allocation2 + $0x139c] ss:$112 sps:$4 sm:$0xff]  }
 0x528   :  { %10359 = vmatprep.subr.bf16.mxu1 %v19801_v24  ;;  %10389 = vmatprep.mubr.bf16.mxu1 %v21111_v47  ;;  %v19856_v24 = vld [vmem:[#allocation2 + $0x11d8] ss:$112 sps:$4 sm:$0xff]   ;;  %v19855_v40 = vld [vmem:[#allocation2 + $0xbbc] ss:$112 sps:$4 sm:$0xff]  }
 0x52a   :  { %10298 = vmatpush2.bf16.msra.mxu0 %v19808_v4  ;;  %v19853_v4 = vld [vmem:[#allocation2 + $0xbb8] ss:$112 sps:$4 sm:$0xff]  }
 0x52b   :  { %10360 = vmatpush1.bf16.msra.mxu1 %v19799_v8  ;;  %10299 = vmatprep.subr.bf16.mxu0 %v19816_v45  ;;  %v19864_v8 = vld [vmem:[#allocation2 + $0x10fc] ss:$112 sps:$4 sm:$0xff]  }
 0x52c   :  { %10361 = vmatprep.subr.bf16.mxu1 %v19807_v10  ;;  %v19862_v10 = vld [vmem:[#allocation2 + $0x10f8] ss:$112 sps:$4 sm:$0xff]   ;;  %v19861_v45 = vld [vmem:[#allocation2 + $0xadc] ss:$112 sps:$4 sm:$0xff]  }
 0x52e   :  { %10300 = vmatpush2.bf16.msra.mxu0 %v19814_v50  ;;  %v19859_v50 = vld [vmem:[#allocation2 + $0xad8] ss:$112 sps:$4 sm:$0xff]  }
 0x52f   :  { %10362 = vmatpush1.bf16.msra.mxu1 %v19805_v52  ;;  %10301 = vmatprep.subr.bf16.mxu0 %v19822_v60  ;;  %v19870_v52 = vld [vmem:[#allocation2 + $0x101c] ss:$112 sps:$4 sm:$0xff]  }
 0x530   :  { %10363 = vmatprep.subr.bf16.mxu1 %v19813_v17  ;;  %v19868_v17 = vld [vmem:[#allocation2 + $0x1018] ss:$112 sps:$4 sm:$0xff]   ;;  %v19867_v60 = vld [vmem:[#allocation2 + $0x9fc] ss:$112 sps:$4 sm:$0xff]  }
 0x532   :  { %10302 = vmatpush2.bf16.msra.mxu0 %v19820_v1  ;;  %v19865_v1 = vld [vmem:[#allocation2 + $0x9f8] ss:$112 sps:$4 sm:$0xff]  }
 0x533   :  { %10364 = vmatpush1.bf16.msra.mxu1 %v19811_v0  ;;  %10303 = vmatprep.subr.bf16.mxu0 %v19828_v49  ;;  %v19876_v0 = vld [vmem:[#allocation2 + $0xf3c] ss:$112 sps:$4 sm:$0xff]  }
 0x534   :  { %10365 = vmatprep.subr.bf16.mxu1 %v19819_v57  ;;  %v19874_v57 = vld [vmem:[#allocation2 + $0xf38] ss:$112 sps:$4 sm:$0xff]   ;;  %v19873_v49 = vld [vmem:[#allocation2 + $0x91c] ss:$112 sps:$4 sm:$0xff]  }
 0x535   :  { %v9981_v19 = vpop.f32.mrf.mxu0 }
 0x536   :  { %v9982_v27 = vadd.f32 %v9981_v19, %v21403_v18  ;;  %10304 = vmatpush2.bf16.msra.mxu0 %v19826_v63  ;;  %v19829_v18 = vld [vmem:[#allocation2 + $0x138] ss:$112 sps:$4 sm:$0xff]   ;;  %v19888_v19 = vld [vmem:[#allocation2 + $0x1b7c] ss:$112 sps:$4 sm:$0xff]  }
 0x537   :  { %10366 = vmatpush1.bf16.msra.mxu1 %v19817_v12  ;;  %v9983_v32 = vpop.f32.mrf.mxu0  ;;  %10305 = vmatprep.subr.bf16.mxu0 %v19834_v37  ;;  %v19882_v12 = vld [vmem:[#allocation2 + $0xe5c] ss:$112 sps:$4 sm:$0xff]   ;;  %v19871_v63 = vld [vmem:[#allocation2 + $0x918] ss:$112 sps:$4 sm:$0xff]  }
 0x538   :  { %10367 = vmatprep.subr.bf16.mxu1 %v19825_v44  ;;  %v10023_v53 = vadd.f32 %v10022_v38, %v9982_v27  ;;  %v9984_v36 = vadd.f32 %v9983_v32, %v21406_v34  ;;  %v19852_v38 = vld [vmem:[#allocation2 + $0x12bc] ss:$112 sps:$4 sm:$0xff]   ;;  %v19880_v44 = vld [vmem:[#allocation2 + $0xe58] ss:$112 sps:$4 sm:$0xff]  }
 0x539   :  { %v9985_v23 = vpop.f32.mrf.mxu0  ;;  %v19879_v37 = vld [vmem:[#allocation2 + $0x83c] ss:$112 sps:$4 sm:$0xff]   ;;  %v19886_v27 = vld [vmem:[#allocation2 + $0x1b78] ss:$112 sps:$4 sm:$0xff]  }
 0x53a   :  { %v21420_v21 = vmax.f32 %v10851_v22, %v10023_v53  ;;  %v10025_v31 = vadd.f32 %v21409_v15, %v9984_v36  ;;  %10306 = vmatpush2.bf16.msra.mxu0 %v19832_v28  ;;  %v19843_v22 = vld [vmem:[#allocation2 + $0xd7c] ss:$112 sps:$4 sm:$0xff]   ;;  %v19841_v15 = vld [vmem:[#allocation2 + $0xd78] ss:$112 sps:$4 sm:$0xff]  }
 0x53b   :  { %10368 = vmatpush1.bf16.msra.mxu1 %v19823_v25  ;;  %10398 = vmatprep.subr.bf16.mxu0 %v19840_v35  ;;  %v9986_v46 = vpop.f32.mrf.mxu0  ;;  %v19877_v25 = vld [vmem:[#allocation2 + $0x838] ss:$112 sps:$4 sm:$0xff]   ;;  %v19885_v28 = vld [vmem:[#allocation2 + $0x75c] ss:$112 sps:$4 sm:$0xff]  }
 0x53c   :  { %10369 = vmatprep.subr.bf16.mxu1 %v19831_v58  ;;  %v21426_v34 = vmax.f32 %v10852_v5, %v10025_v31  ;;  %v19847_v5 = vld [vmem:[#allocation2 + $0xc98] ss:$112 sps:$4 sm:$0xff]   ;;  %v19894_v32 = vld [vmem:[#allocation2 + $0x1a9c] ss:$112 sps:$4 sm:$0xff]  }
 0x53d   :  { %10308 = vmatmul.mubr.bf16.vlgmr.msra.gmra.mxu0 %v21147_v16  ;;  %v19883_v35 = vld [vmem:[#allocation2 + $0x758] ss:$112 sps:$4 sm:$0xff]   ;;  %v19891_v23 = vld [vmem:[#allocation2 + $0x227c] ss:$112 sps:$4 sm:$0xff]  }
 0x53e   :  { %10399 = vmatpush1.bf16.msra.mxu0 %v19838_v55  ;;  %10430 = vmatprep.mubr.bf16.mxu0 %v21116_v51  ;;  %v19892_v53 = vld [vmem:[#allocation2 + $0x1a98] ss:$112 sps:$4 sm:$0xff]   ;;  %v19900_v31 = vld [vmem:[#allocation2 + $0x19bc] ss:$112 sps:$4 sm:$0xff]  }
 0x53f   :  { %10370 = vmatpush1.bf16.msra.mxu1 %v19829_v18  ;;  %10400 = vmatprep.subr.bf16.mxu0 %v19846_v41  ;;  %v19889_v55 = vld [vmem:[#allocation2 + $0x2278] ss:$112 sps:$4 sm:$0xff]   ;;  %v19897_v46 = vld [vmem:[#allocation2 + $0x219c] ss:$112 sps:$4 sm:$0xff]  }
 0x540   :  { %10371 = vmatprep.subr.bf16.mxu1 %v19837_v3  ;;  %v19898_v3 = vld [vmem:[#allocation2 + $0x19b8] ss:$112 sps:$4 sm:$0xff]  }
 0x542   :  { %10401 = vmatpush1.bf16.msra.mxu0 %v19844_v11  ;;  %v19895_v11 = vld [vmem:[#allocation2 + $0x2198] ss:$112 sps:$4 sm:$0xff]  }
 0x543   :  { %10372 = vmatpush1.bf16.msra.mxu1 %v19835_v54  ;;  %10402 = vmatprep.subr.bf16.mxu0 %v19852_v38  ;;  %v19906_v54 = vld [vmem:[#allocation2 + $0x18dc] ss:$112 sps:$4 sm:$0xff]  }
 0x544   :  { %10373 = vmatprep.subr.bf16.mxu1 %v19843_v22  ;;  %v19904_v22 = vld [vmem:[#allocation2 + $0x18d8] ss:$112 sps:$4 sm:$0xff]   ;;  %v19903_v38 = vld [vmem:[#allocation2 + $0x20bc] ss:$112 sps:$4 sm:$0xff]  }
 0x546   :  { %10403 = vmatpush1.bf16.msra.mxu0 %v19850_v20  ;;  %v19901_v20 = vld [vmem:[#allocation2 + $0x20b8] ss:$112 sps:$4 sm:$0xff]  }
 0x547   :  { %10374 = vmatpush2.bf16.msra.mxu1 %v19841_v15  ;;  %10404 = vmatprep.subr.bf16.mxu0 %v19858_v62  ;;  %v19912_v15 = vld [vmem:[#allocation2 + $0x17fc] ss:$112 sps:$4 sm:$0xff]  }
 0x548   :  { %10375 = vmatprep.subr.bf16.mxu1 %v19849_v59  ;;  %v19910_v59 = vld [vmem:[#allocation2 + $0x17f8] ss:$112 sps:$4 sm:$0xff]   ;;  %v19909_v62 = vld [vmem:[#allocation2 + $0x1fdc] ss:$112 sps:$4 sm:$0xff]  }
 0x54a   :  { %10405 = vmatpush1.bf16.msra.mxu0 %v19856_v24  ;;  %v19907_v24 = vld [vmem:[#allocation2 + $0x1fd8] ss:$112 sps:$4 sm:$0xff]  }
 0x54b   :  { %10376 = vmatpush2.bf16.msra.mxu1 %v19847_v5  ;;  %10406 = vmatprep.subr.bf16.mxu0 %v19864_v8  ;;  %v19918_v5 = vld [vmem:[#allocation2 + $0x171c] ss:$112 sps:$4 sm:$0xff]  }
 0x54c   :  { %10377 = vmatprep.subr.bf16.mxu1 %v19855_v40  ;;  %v19916_v40 = vld [vmem:[#allocation2 + $0x1718] ss:$112 sps:$4 sm:$0xff]   ;;  %v19915_v8 = vld [vmem:[#allocation2 + $0x1efc] ss:$112 sps:$4 sm:$0xff]  }
 0x54e   :  { %10407 = vmatpush1.bf16.msra.mxu0 %v19862_v10  ;;  %v19913_v10 = vld [vmem:[#allocation2 + $0x1ef8] ss:$112 sps:$4 sm:$0xff]  }
 0x54f   :  { %10378 = vmatpush2.bf16.msra.mxu1 %v19853_v4  ;;  %10408 = vmatprep.subr.bf16.mxu0 %v19870_v52  ;;  %v19924_v4 = vld [vmem:[#allocation2 + $0x163c] ss:$112 sps:$4 sm:$0xff]  }
 0x550   :  { %10379 = vmatprep.subr.bf16.mxu1 %v19861_v45  ;;  %v19922_v45 = vld [vmem:[#allocation2 + $0x1638] ss:$112 sps:$4 sm:$0xff]   ;;  %v19921_v52 = vld [vmem:[#allocation2 + $0x1e1c] ss:$112 sps:$4 sm:$0xff]  }
 0x552   :  { %10409 = vmatpush1.bf16.msra.mxu0 %v19868_v17 }
 0x553   :  { %10380 = vmatpush2.bf16.msra.mxu1 %v19859_v50  ;;  %10410 = vmatprep.subr.bf16.mxu0 %v19876_v0  ;;  %v19930_v50 = vld [vmem:[#allocation2 + $0x155c] ss:$112 sps:$4 sm:$0xff]  }
 0x554   :  { %10381 = vmatprep.subr.bf16.mxu1 %v19867_v60  ;;  %v19919_v60 = vld [vmem:[#allocation2 + $0x1e18] ss:$112 sps:$4 sm:$0xff]  }
 0x556   :  { %10411 = vmatpush1.bf16.msra.mxu0 %v19874_v57 }
 0x557   :  { %10382 = vmatpush2.bf16.msra.mxu1 %v19865_v1  ;;  %10412 = vmatprep.subr.bf16.mxu0 %v19882_v12  ;;  %v19928_v1 = vld [vmem:[#allocation2 + $0x1558] ss:$112 sps:$4 sm:$0xff]   ;;  %v19939_v12 = vld [vmem:[#allocation2 + $0x2a5c] ss:$112 sps:$4 sm:$0xff]  }
 0x558   :  { %10383 = vmatprep.subr.bf16.mxu1 %v19873_v49  ;;  %v19927_v49 = vld [vmem:[#allocation2 + $0x1d3c] ss:$112 sps:$4 sm:$0xff]  }
 0x55a   :  { %10413 = vmatpush1.bf16.msra.mxu0 %v19880_v44 }
 0x55b   :  { %10384 = vmatpush2.bf16.msra.mxu1 %v19871_v63  ;;  %10414 = vmatprep.subr.bf16.mxu0 %v19888_v19  ;;  %v19937_v19 = vld [vmem:[#allocation2 + $0x2a58] ss:$112 sps:$4 sm:$0xff]  }
 0x55c   :  { %10385 = vmatprep.subr.bf16.mxu1 %v19879_v37  ;;  %v19925_v37 = vld [vmem:[#allocation2 + $0x1d38] ss:$112 sps:$4 sm:$0xff]  }
 0x55e   :  { %v10063_v58 = vpop.f32.mrf.mxu1  ;;  %10415 = vmatpush2.bf16.msra.mxu0 %v19886_v27 }
 0x55f   :  { %10386 = vmatpush2.bf16.msra.mxu1 %v19877_v25  ;;  %10416 = vmatprep.subr.bf16.mxu0 %v19894_v32  ;;  %v19933_v25 = vld [vmem:[#allocation2 + $0x1c5c] ss:$112 sps:$4 sm:$0xff]  }
 0x560   :  { %v10065_v36 = vpop.f32.mrf.mxu1  ;;  %10387 = vmatprep.subr.bf16.mxu1 %v19885_v28  ;;  %v19945_v28 = vld [vmem:[#allocation2 + $0x684] ss:$112 sps:$4 sm:$0xff]  }
 0x562   :  { %v10067_v18 = vpop.f32.mrf.mxu1  ;;  %10417 = vmatpush2.bf16.msra.mxu0 %v19892_v53 }
 0x563   :  { %10388 = vmatpush2.bf16.msra.mxu1 %v19883_v35  ;;  %10418 = vmatprep.subr.bf16.mxu0 %v19900_v31  ;;  %v19936_v35 = vld [vmem:[#allocation2 + $0x297c] ss:$112 sps:$4 sm:$0xff]   ;;  %v19943_v31 = vld [vmem:[#allocation2 + $0x680] ss:$112 sps:$4 sm:$0xff]  }
 0x564   :  { %v10068_v41 = vpop.f32.mrf.mxu1  ;;  %10439 = vmatprep.subr.bf16.mxu1 %v19891_v23  ;;  %v19934_v23 = vld [vmem:[#allocation2 + $0x2978] ss:$112 sps:$4 sm:$0xff]   ;;  %v19942_v18 = vld [vmem:[#allocation2 + $0x289c] ss:$112 sps:$4 sm:$0xff]  }
 0x565   :  { %v19940_v41 = vld [vmem:[#allocation2 + $0x2898] ss:$112 sps:$4 sm:$0xff]  }
 0x566   :  { %10390 = vmatmul.mubr.bf16.vlgmr.msra.gmra.mxu1 %v21120_v6  ;;  %10419 = vmatpush2.bf16.msra.mxu0 %v19898_v3 }
 0x567   :  { %10440 = vmatpush1.bf16.msra.mxu1 %v19889_v55  ;;  %10420 = vmatprep.subr.bf16.mxu0 %v19906_v54  ;;  %v19951_v55 = vld [vmem:[#allocation2 + $0x5a4] ss:$112 sps:$4 sm:$0xff]   ;;  %v19948_v54 = vld [vmem:[#allocation2 + $0x27bc] ss:$112 sps:$4 sm:$0xff]  }
 0x568   :  { %10441 = vmatprep.subr.bf16.mxu1 %v19897_v46  ;;  %10471 = vmatprep.mubr.bf16.mxu1 %v21142_v33  ;;  %v19949_v46 = vld [vmem:[#allocation2 + $0x5a0] ss:$112 sps:$4 sm:$0xff]  }
 0x56a   :  { %10421 = vmatpush2.bf16.msra.mxu0 %v19904_v22  ;;  %v19946_v22 = vld [vmem:[#allocation2 + $0x27b8] ss:$112 sps:$4 sm:$0xff]  }
 0x56b   :  { %10442 = vmatpush1.bf16.msra.mxu1 %v19895_v11  ;;  %10422 = vmatprep.subr.bf16.mxu0 %v19912_v15  ;;  %v19957_v11 = vld [vmem:[#allocation2 + $0x4c4] ss:$112 sps:$4 sm:$0xff]   ;;  %v19954_v15 = vld [vmem:[#allocation2 + $0x26dc] ss:$112 sps:$4 sm:$0xff]  }
 0x56c   :  { %10443 = vmatprep.subr.bf16.mxu1 %v19903_v38  ;;  %v19955_v38 = vld [vmem:[#allocation2 + $0x4c0] ss:$112 sps:$4 sm:$0xff]  }
 0x56e   :  { %10423 = vmatpush2.bf16.msra.mxu0 %v19910_v59  ;;  %v19961_v59 = vld [vmem:[#allocation2 + $0x3e0] ss:$112 sps:$4 sm:$0xff]  }
 0x56f   :  { %10444 = vmatpush1.bf16.msra.mxu1 %v19901_v20  ;;  %10424 = vmatprep.subr.bf16.mxu0 %v19918_v5  ;;  %v19963_v20 = vld [vmem:[#allocation2 + $0x3e4] ss:$112 sps:$4 sm:$0xff]  }
 0x570   :  { %10445 = vmatprep.subr.bf16.mxu1 %v19909_v62  ;;  %v19960_v62 = vld [vmem:[#allocation2 + $0x25fc] ss:$112 sps:$4 sm:$0xff]   ;;  %v19969_v5 = vld [vmem:[#allocation2 + $0x304] ss:$112 sps:$4 sm:$0xff]  }
 0x572   :  { %10425 = vmatpush2.bf16.msra.mxu0 %v19916_v40  ;;  %v19967_v40 = vld [vmem:[#allocation2 + $0x300] ss:$112 sps:$4 sm:$0xff]  }
 0x573   :  { %10446 = vmatpush1.bf16.msra.mxu1 %v19907_v24  ;;  %10426 = vmatprep.subr.bf16.mxu0 %v19924_v4  ;;  %v19958_v24 = vld [vmem:[#allocation2 + $0x25f8] ss:$112 sps:$4 sm:$0xff]   ;;  %v19975_v4 = vld [vmem:[#allocation2 + $0x224] ss:$112 sps:$4 sm:$0xff]  }
 0x574   :  { %10447 = vmatprep.subr.bf16.mxu1 %v19915_v8  ;;  %v19966_v8 = vld [vmem:[#allocation2 + $0x251c] ss:$112 sps:$4 sm:$0xff]  }
 0x575   :  { %v10104_v17 = vpop.f32.mrf.mxu0 }
 0x576   :  { %v21432_v0 = vadd.f32 %v10104_v17, %v10063_v58  ;;  %10427 = vmatpush2.bf16.msra.mxu0 %v19922_v45  ;;  %v19931_v58 = vld [vmem:[#allocation2 + $0x1c58] ss:$112 sps:$4 sm:$0xff]   ;;  %v19973_v45 = vld [vmem:[#allocation2 + $0x220] ss:$112 sps:$4 sm:$0xff]  }
 0x577   :  { %10448 = vmatpush1.bf16.msra.mxu1 %v19913_v10  ;;  %v10106_v57 = vpop.f32.mrf.mxu0  ;;  %10428 = vmatprep.subr.bf16.mxu0 %v19930_v50  ;;  %v19964_v10 = vld [vmem:[#allocation2 + $0x2518] ss:$112 sps:$4 sm:$0xff]   ;;  %v19981_v50 = vld [vmem:[#allocation2 + $0x144] ss:$112 sps:$4 sm:$0xff]  }
 0x578   :  { %10449 = vmatprep.subr.bf16.mxu1 %v19921_v52  ;;  %v21434_v63 = vadd.f32 %v10106_v57, %v10065_v36  ;;  %v19972_v52 = vld [vmem:[#allocation2 + $0x243c] ss:$112 sps:$4 sm:$0xff]   ;;  %v19970_v17 = vld [vmem:[#allocation2 + $0x2438] ss:$112 sps:$4 sm:$0xff]   ;;  %v19984_v57 = vld [vmem:[#allocation2 + $0x64] ss:$112 sps:$4 sm:$0xff]  }
 0x579   :  { %v10108_v44 = vpop.f32.mrf.mxu0 }
 0x57a   :  { %10429 = vmatpush2.bf16.msra.mxu0 %v19928_v1  ;;  %v19978_v1 = vld [vmem:[#allocation2 + $0x235c] ss:$112 sps:$4 sm:$0xff]   ;;  %v19976_v44 = vld [vmem:[#allocation2 + $0x2358] ss:$112 sps:$4 sm:$0xff]  }
 0x57b   :  { %10450 = vmatpush1.bf16.msra.mxu1 %v19919_v60  ;;  %10494 = vmatprep.subr.bf16.mxu0 %v19939_v12  ;;  %v10109_v27 = vpop.f32.mrf.mxu0  ;;  %v19979_v60 = vld [vmem:[#allocation2 + $0x140] ss:$112 sps:$4 sm:$0xff]  }
 0x57c   :  { %10451 = vmatprep.subr.bf16.mxu1 %v19927_v49  ;;  %v19990_v27 = vld [vmem:[#allocation2 + $0xd84] ss:$112 sps:$4 sm:$0xff]  }
 0x57d   :  { %10431 = vmatmul.mubr.bf16.vlgmr.msra.gmra.mxu0 %v21122_v7  ;;  %v21437_v32 = vpop.f32.mrf.mxu0 }
 0x57e   :  { %10495 = vmatpush1.bf16.msra.mxu0 %v19937_v19  ;;  %10512 = vmatprep.mubr.bf16.mxu0 %v20933_v13 }
 0x57f   :  { %10452 = vmatpush1.bf16.msra.mxu1 %v19925_v37  ;;  %v21440_v53 = vpop.f32.mrf.mxu0  ;;  %10521 = vmatprep.subr.bf16.mxu0 %v19945_v28  ;;  %v19982_v37 = vld [vmem:[#allocation2 + $0x60] ss:$112 sps:$4 sm:$0xff]  }
 0x580   :  { %10453 = vmatprep.subr.bf16.mxu1 %v19933_v25  ;;  %v19987_v25 = vld [vmem:[#allocation2 + $0x1484] ss:$112 sps:$4 sm:$0xff]  }
 0x581   :  { %v10190_v36 = vpop.f32.mrf.mxu0 }
 0x583   :  { %10454 = vmatpush1.bf16.msra.mxu1 %v19931_v58  ;;  %v10191_v3 = vpop.f32.mrf.mxu0 }
 0x584   :  { %10455 = vmatprep.subr.bf16.mxu1 %v19936_v35  ;;  %v19996_v3 = vld [vmem:[#allocation2 + $0xca4] ss:$112 sps:$4 sm:$0xff]  }
 0x585   :  { %17410 = vmatmul.mubr.msk.bf16.vlgmr.msra.gmra.mxu0 %vm8549_vm0, %v21375_v14  ;;  %v19952_v14 = vld [vmem:[#allocation2 + $0x26d8] ss:$112 sps:$4 sm:$0xff]  }
 0x586   :  { %10522 = vmatpush1.bf16.msra.mxu0 %v19943_v31  ;;  %10553 = vmatprep.mubr.bf16.mxu0 %v21111_v47  ;;  %v19988_v31 = vld [vmem:[#allocation2 + $0xd80] ss:$112 sps:$4 sm:$0xff]  }
 0x587   :  { %10456 = vmatpush2.bf16.msra.mxu1 %v19934_v23  ;;  %10523 = vmatprep.subr.bf16.mxu0 %v19951_v55  ;;  %v19985_v23 = vld [vmem:[#allocation2 + $0x1480] ss:$112 sps:$4 sm:$0xff]   ;;  %v19993_v55 = vld [vmem:[#allocation2 + $0x13a4] ss:$112 sps:$4 sm:$0xff]  }
 0x588   :  { %10457 = vmatprep.subr.bf16.mxu1 %v19942_v18 }
 0x58a   :  { %10524 = vmatpush1.bf16.msra.mxu0 %v19949_v46  ;;  %v20006_v46 = vld [vmem:[#allocation2 + $0xae0] ss:$112 sps:$4 sm:$0xff]  }
 0x58b   :  { %10458 = vmatpush2.bf16.msra.mxu1 %v19940_v41  ;;  %10525 = vmatprep.subr.bf16.mxu0 %v19957_v11  ;;  %v20000_v41 = vld [vmem:[#allocation2 + $0xbc0] ss:$112 sps:$4 sm:$0xff]   ;;  %v20014_v11 = vld [vmem:[#allocation2 + $0xa04] ss:$112 sps:$4 sm:$0xff]  }
 0x58c   :  { %10459 = vmatprep.subr.bf16.mxu1 %v19948_v54  ;;  %v20011_v54 = vld [vmem:[#allocation2 + $0x1104] ss:$112 sps:$4 sm:$0xff]  }
 0x58e   :  { %10526 = vmatpush1.bf16.msra.mxu0 %v19955_v38  ;;  %v20012_v38 = vld [vmem:[#allocation2 + $0xa00] ss:$112 sps:$4 sm:$0xff]  }
 0x58f   :  { %10460 = vmatpush2.bf16.msra.mxu1 %v19946_v22  ;;  %10527 = vmatprep.subr.bf16.mxu0 %v19963_v20  ;;  %v20009_v22 = vld [vmem:[#allocation2 + $0x1100] ss:$112 sps:$4 sm:$0xff]   ;;  %v20020_v20 = vld [vmem:[#allocation2 + $0x924] ss:$112 sps:$4 sm:$0xff]  }
 0x590   :  { %10461 = vmatprep.subr.bf16.mxu1 %v19954_v15  ;;  %v20017_v15 = vld [vmem:[#allocation2 + $0x1024] ss:$112 sps:$4 sm:$0xff]  }
 0x592   :  { %10528 = vmatpush1.bf16.msra.mxu0 %v19961_v59  ;;  %v20018_v59 = vld [vmem:[#allocation2 + $0x920] ss:$112 sps:$4 sm:$0xff]  }
 0x593   :  { %10462 = vmatpush2.bf16.msra.mxu1 %v19952_v14  ;;  %10529 = vmatprep.subr.bf16.mxu0 %v19969_v5  ;;  %v20015_v14 = vld [vmem:[#allocation2 + $0x1020] ss:$112 sps:$4 sm:$0xff]   ;;  %v20026_v5 = vld [vmem:[#allocation2 + $0x844] ss:$112 sps:$4 sm:$0xff]  }
 0x594   :  { %10463 = vmatprep.subr.bf16.mxu1 %v19960_v62  ;;  %v20023_v62 = vld [vmem:[#allocation2 + $0xf44] ss:$112 sps:$4 sm:$0xff]  }
 0x596   :  { %10530 = vmatpush1.bf16.msra.mxu0 %v19967_v40  ;;  %v20024_v40 = vld [vmem:[#allocation2 + $0x840] ss:$112 sps:$4 sm:$0xff]  }
 0x597   :  { %10464 = vmatpush2.bf16.msra.mxu1 %v19958_v24  ;;  %10531 = vmatprep.subr.bf16.mxu0 %v19975_v4  ;;  %v20021_v24 = vld [vmem:[#allocation2 + $0xf40] ss:$112 sps:$4 sm:$0xff]   ;;  %v20032_v4 = vld [vmem:[#allocation2 + $0x764] ss:$112 sps:$4 sm:$0xff]  }
 0x598   :  { %10465 = vmatprep.subr.bf16.mxu1 %v19966_v8  ;;  %v20029_v8 = vld [vmem:[#allocation2 + $0xe64] ss:$112 sps:$4 sm:$0xff]  }
 0x59a   :  { %10532 = vmatpush1.bf16.msra.mxu0 %v19973_v45  ;;  %v20027_v45 = vld [vmem:[#allocation2 + $0xe60] ss:$112 sps:$4 sm:$0xff]  }
 0x59b   :  { %10466 = vmatpush2.bf16.msra.mxu1 %v19964_v10  ;;  %10533 = vmatprep.subr.bf16.mxu0 %v19981_v50  ;;  %v20035_v50 = vld [vmem:[#allocation2 + $0x1b84] ss:$112 sps:$4 sm:$0xff]  }
 0x59c   :  { %10467 = vmatprep.subr.bf16.mxu1 %v19972_v52  ;;  %v20030_v52 = vld [vmem:[#allocation2 + $0x760] ss:$112 sps:$4 sm:$0xff]  }
 0x59e   :  { %v10145_v49 = vpop.f32.mrf.mxu1  ;;  %10534 = vmatpush1.bf16.msra.mxu0 %v19979_v60 }
 0x59f   :  { %v10146_v12 = vadd.f32 %v10145_v49, %v21432_v0  ;;  %10468 = vmatpush2.bf16.msra.mxu1 %v19970_v17  ;;  %10535 = vmatprep.subr.bf16.mxu0 %v19984_v57  ;;  %v20041_v17 = vld [vmem:[#allocation2 + $0x2284] ss:$112 sps:$4 sm:$0xff]   ;;  %v20033_v57 = vld [vmem:[#allocation2 + $0x1b80] ss:$112 sps:$4 sm:$0xff]  }
 0x5a0   :  { %v10147_v19 = vpop.f32.mrf.mxu1  ;;  %10469 = vmatprep.subr.bf16.mxu1 %v19978_v1  ;;  %v20039_v49 = vld [vmem:[#allocation2 + $0x2280] ss:$112 sps:$4 sm:$0xff]  }
 0x5a1   :  { %v10187_v28 = vadd.f32 %v21437_v32, %v10146_v12  ;;  %v10148_v58 = vadd.f32 %v10147_v19, %v21434_v63  ;;  %v20002_v32 = vld [vmem:[#allocation2 + $0xbc4] ss:$112 sps:$4 sm:$0xff]   ;;  %v20036_v19 = vld [vmem:[#allocation2 + $0x1aa0] ss:$112 sps:$4 sm:$0xff]  }
 0x5a2   :  { %v10149_v35 = vpop.f32.mrf.mxu1  ;;  %10536 = vmatpush1.bf16.msra.mxu0 %v19982_v37  ;;  %v20038_v12 = vld [vmem:[#allocation2 + $0x1aa4] ss:$112 sps:$4 sm:$0xff]  }
 0x5a3   :  { %v21451_v36 = vmax.f32 %v10853_v61, %v10187_v28  ;;  %v10189_v0 = vadd.f32 %v21440_v53, %v10148_v58  ;;  %10470 = vmatpush2.bf16.msra.mxu1 %v19976_v44  ;;  %10537 = vmatprep.subr.bf16.mxu0 %v19990_v27  ;;  %v19999_v61 = vld [vmem:[#allocation2 + $0x12c4] ss:$112 sps:$4 sm:$0xff]   ;;  %v19997_v53 = vld [vmem:[#allocation2 + $0x12c0] ss:$112 sps:$4 sm:$0xff]  }
 0x5a4   :  { %v10150_v18 = vpop.f32.mrf.mxu1  ;;  %10562 = vmatprep.subr.bf16.mxu1 %v19987_v25  ;;  %v20047_v44 = vld [vmem:[#allocation2 + $0x21a4] ss:$112 sps:$4 sm:$0xff]   ;;  %v20045_v25 = vld [vmem:[#allocation2 + $0x21a0] ss:$112 sps:$4 sm:$0xff]  }
 0x5a5   :  { %v21457_v63 = vmax.f32 %v10854_v48, %v10189_v0  ;;  %v20003_v48 = vld [vmem:[#allocation2 + $0x11e0] ss:$112 sps:$4 sm:$0xff]   ;;  %v20044_v27 = vld [vmem:[#allocation2 + $0x19c4] ss:$112 sps:$4 sm:$0xff]  }
 0x5a6   :  { %10472 = vmatmul.mubr.bf16.vlgmr.msra.gmra.mxu1 %v21147_v16  ;;  %10538 = vmatpush2.bf16.msra.mxu0 %v19988_v31  ;;  %v20053_v28 = vld [vmem:[#allocation2 + $0x20c4] ss:$112 sps:$4 sm:$0xff]   ;;  %v20042_v58 = vld [vmem:[#allocation2 + $0x19c0] ss:$112 sps:$4 sm:$0xff]  }
 0x5a7   :  { %10563 = vmatpush1.bf16.msra.mxu1 %v19985_v23  ;;  %10539 = vmatprep.subr.bf16.mxu0 %v19996_v3  ;;  %v20051_v35 = vld [vmem:[#allocation2 + $0x20c0] ss:$112 sps:$4 sm:$0xff]   ;;  %v20050_v0 = vld [vmem:[#allocation2 + $0x18e4] ss:$112 sps:$4 sm:$0xff]  }
 0x5a8   :  { %10564 = vmatprep.subr.bf16.mxu1 %v19993_v55  ;;  %10594 = vmatprep.mubr.bf16.mxu1 %v21116_v51  ;;  %v20059_v23 = vld [vmem:[#allocation2 + $0x1fe4] ss:$112 sps:$4 sm:$0xff]   ;;  %v20048_v31 = vld [vmem:[#allocation2 + $0x18e0] ss:$112 sps:$4 sm:$0xff]  }
 0x5a9   :  { %v20057_v18 = vld [vmem:[#allocation2 + $0x1fe0] ss:$112 sps:$4 sm:$0xff]   ;;  %v20056_v55 = vld [vmem:[#allocation2 + $0x1804] ss:$112 sps:$4 sm:$0xff]  }
 0x5aa   :  { %10540 = vmatpush2.bf16.msra.mxu0 %v19994_v42  ;;  %v20065_v3 = vld [vmem:[#allocation2 + $0x1f04] ss:$112 sps:$4 sm:$0xff]   ;;  %v20063_v42 = vld [vmem:[#allocation2 + $0x1f00] ss:$112 sps:$4 sm:$0xff]  }
 0x5ab   :  { %10565 = vmatpush1.bf16.msra.mxu1 %v19991_v26  ;;  %10541 = vmatprep.subr.bf16.mxu0 %v20002_v32  ;;  %v20054_v26 = vld [vmem:[#allocation2 + $0x1800] ss:$112 sps:$4 sm:$0xff]   ;;  %v20071_v32 = vld [vmem:[#allocation2 + $0x1e24] ss:$112 sps:$4 sm:$0xff]  }
 0x5ac   :  { %10566 = vmatprep.subr.bf16.mxu1 %v19999_v61  ;;  %v20062_v61 = vld [vmem:[#allocation2 + $0x1724] ss:$112 sps:$4 sm:$0xff]  }
 0x5ae   :  { %10542 = vmatpush2.bf16.msra.mxu0 %v20000_v41  ;;  %v20069_v41 = vld [vmem:[#allocation2 + $0x1e20] ss:$112 sps:$4 sm:$0xff]  }
 0x5af   :  { %10567 = vmatpush1.bf16.msra.mxu1 %v19997_v53  ;;  %10543 = vmatprep.subr.bf16.mxu0 %v20008_v56  ;;  %v20060_v53 = vld [vmem:[#allocation2 + $0x1720] ss:$112 sps:$4 sm:$0xff]   ;;  %v20077_v56 = vld [vmem:[#allocation2 + $0x1d44] ss:$112 sps:$4 sm:$0xff]  }
 0x5b0   :  { %10568 = vmatprep.subr.bf16.mxu1 %v20005_v29  ;;  %v20068_v29 = vld [vmem:[#allocation2 + $0x1644] ss:$112 sps:$4 sm:$0xff]  }
 0x5b2   :  { %10544 = vmatpush2.bf16.msra.mxu0 %v20006_v46  ;;  %v20075_v46 = vld [vmem:[#allocation2 + $0x1d40] ss:$112 sps:$4 sm:$0xff]  }
 0x5b3   :  { %10569 = vmatpush1.bf16.msra.mxu1 %v20003_v48  ;;  %10545 = vmatprep.subr.bf16.mxu0 %v20014_v11  ;;  %v20066_v48 = vld [vmem:[#allocation2 + $0x1640] ss:$112 sps:$4 sm:$0xff]   ;;  %v20080_v11 = vld [vmem:[#allocation2 + $0x1c64] ss:$112 sps:$4 sm:$0xff]  }
 0x5b4   :  { %10570 = vmatprep.subr.bf16.mxu1 %v20011_v54  ;;  %v20074_v54 = vld [vmem:[#allocation2 + $0x1564] ss:$112 sps:$4 sm:$0xff]  }
 0x5b6   :  { %10546 = vmatpush2.bf16.msra.mxu0 %v20012_v38 }
 0x5b7   :  { %10571 = vmatpush1.bf16.msra.mxu1 %v20009_v22  ;;  %10547 = vmatprep.subr.bf16.mxu0 %v20020_v20  ;;  %v20078_v20 = vld [vmem:[#allocation2 + $0x1c60] ss:$112 sps:$4 sm:$0xff]  }
 0x5b8   :  { %10572 = vmatprep.subr.bf16.mxu1 %v20017_v15  ;;  %v20072_v15 = vld [vmem:[#allocation2 + $0x1560] ss:$112 sps:$4 sm:$0xff]  }
 0x5ba   :  { %10548 = vmatpush2.bf16.msra.mxu0 %v20018_v59  ;;  %v20083_v59 = vld [vmem:[#allocation2 + $0x2a64] ss:$112 sps:$4 sm:$0xff]  }
 0x5bb   :  { %10573 = vmatpush1.bf16.msra.mxu1 %v20015_v14  ;;  %10549 = vmatprep.subr.bf16.mxu0 %v20026_v5 }
 0x5bc   :  { %10574 = vmatprep.subr.bf16.mxu1 %v20023_v62  ;;  %v20086_v62 = vld [vmem:[#allocation2 + $0x2984] ss:$112 sps:$4 sm:$0xff]  }
 0x5bd   :  { %v21461_v10 = vpop.f32.mrf.mxu0 }
 0x5be   :  { %10550 = vmatpush2.bf16.msra.mxu0 %v20024_v40  ;;  %v20081_v40 = vld [vmem:[#allocation2 + $0x2a60] ss:$112 sps:$4 sm:$0xff]  }
 0x5bf   :  { %10575 = vmatpush1.bf16.msra.mxu1 %v20021_v24  ;;  %10551 = vmatprep.subr.bf16.mxu0 %v20032_v4  ;;  %v21463_v60 = vpop.f32.mrf.mxu0 }
 0x5c0   :  { %10576 = vmatprep.subr.bf16.mxu1 %v20029_v8  ;;  %v20084_v8 = vld [vmem:[#allocation2 + $0x2980] ss:$112 sps:$4 sm:$0xff]  }
 0x5c1   :  { %v10231_v1 = vpop.f32.mrf.mxu0 }
 0x5c2   :  { %10552 = vmatpush2.bf16.msra.mxu0 %v20030_v52 }
 0x5c3   :  { %10577 = vmatpush1.bf16.msra.mxu1 %v20027_v45  ;;  %10603 = vmatprep.subr.bf16.mxu0 %v20041_v17  ;;  %v10232_v37 = vpop.f32.mrf.mxu0  ;;  %v20092_v45 = vld [vmem:[#allocation2 + $0x28a4] ss:$112 sps:$4 sm:$0xff]  }
 0x5c4   :  { %10578 = vmatprep.subr.bf16.mxu1 %v20035_v50  ;;  %v20090_v50 = vld [vmem:[#allocation2 + $0x28a0] ss:$112 sps:$4 sm:$0xff]   ;;  %v20104_v37 = vld [vmem:[#allocation2 + $0x26e4] ss:$112 sps:$4 sm:$0xff]  }
 0x5c5   :  { %10554 = vmatmul.mubr.bf16.vlgmr.msra.gmra.mxu0 %v21120_v6 }
 0x5c6   :  { %10604 = vmatpush1.bf16.msra.mxu0 %v20039_v49  ;;  %10635 = vmatprep.mubr.bf16.mxu0 %v21142_v33  ;;  %v20096_v49 = vld [vmem:[#allocation2 + $0x27c0] ss:$112 sps:$4 sm:$0xff]  }
 0x5c7   :  { %10579 = vmatpush2.bf16.msra.mxu1 %v20033_v57  ;;  %10605 = vmatprep.subr.bf16.mxu0 %v20047_v44  ;;  %v20087_v57 = vld [vmem:[#allocation2 + $0x688] ss:$112 sps:$4 sm:$0xff]   ;;  %v20095_v44 = vld [vmem:[#allocation2 + $0x5ac] ss:$112 sps:$4 sm:$0xff]  }
 0x5c8   :  { %10580 = vmatprep.subr.bf16.mxu1 %v20038_v12 }
 0x5ca   :  { %10606 = vmatpush1.bf16.msra.mxu0 %v20045_v25  ;;  %v20093_v25 = vld [vmem:[#allocation2 + $0x5a8] ss:$112 sps:$4 sm:$0xff]  }
 0x5cb   :  { %10581 = vmatpush2.bf16.msra.mxu1 %v20036_v19  ;;  %10607 = vmatprep.subr.bf16.mxu0 %v20053_v28  ;;  %v21482_v19 = vld [vmem:[%s21771_s12 + $0x18] ss:$0 sps:$4 sm:$0xff]   ;;  %v20101_v28 = vld [vmem:[#allocation2 + $0x4cc] ss:$112 sps:$4 sm:$0xff]  }
 0x5cc   :  { %10582 = vmatprep.subr.bf16.mxu1 %v20044_v27  ;;  %v20102_v27 = vld [vmem:[#allocation2 + $0x26e0] ss:$112 sps:$4 sm:$0xff]  }
 0x5ce   :  { %10608 = vmatpush1.bf16.msra.mxu0 %v20051_v35  ;;  %v20099_v35 = vld [vmem:[#allocation2 + $0x4c8] ss:$112 sps:$4 sm:$0xff]  }
 0x5cf   :  { %10583 = vmatpush2.bf16.msra.mxu1 %v20042_v58  ;;  %10609 = vmatprep.subr.bf16.mxu0 %v20059_v23  ;;  %v20110_v58 = vld [vmem:[#allocation2 + $0x2604] ss:$112 sps:$4 sm:$0xff]   ;;  %v20107_v23 = vld [vmem:[#allocation2 + $0x3ec] ss:$112 sps:$4 sm:$0xff]  }
 0x5d0   :  { %10584 = vmatprep.subr.bf16.mxu1 %v20050_v0  ;;  %v20108_v0 = vld [vmem:[#allocation2 + $0x2600] ss:$112 sps:$4 sm:$0xff]  }
 0x5d2   :  { %10610 = vmatpush1.bf16.msra.mxu0 %v20057_v18  ;;  %v20105_v18 = vld [vmem:[#allocation2 + $0x3e8] ss:$112 sps:$4 sm:$0xff]  }
 0x5d3   :  { %10585 = vmatpush2.bf16.msra.mxu1 %v20048_v31  ;;  %10611 = vmatprep.subr.bf16.mxu0 %v20065_v3  ;;  %v20116_v31 = vld [vmem:[#allocation2 + $0x2524] ss:$112 sps:$4 sm:$0xff]   ;;  %v20113_v3 = vld [vmem:[#allocation2 + $0x30c] ss:$112 sps:$4 sm:$0xff]  }
 0x5d4   :  { %10586 = vmatprep.subr.bf16.mxu1 %v20056_v55  ;;  %v20114_v55 = vld [vmem:[#allocation2 + $0x2520] ss:$112 sps:$4 sm:$0xff]  }
 0x5d6   :  { %10612 = vmatpush1.bf16.msra.mxu0 %v20063_v42  ;;  %v20111_v42 = vld [vmem:[#allocation2 + $0x308] ss:$112 sps:$4 sm:$0xff]  }
 0x5d7   :  { %10587 = vmatpush2.bf16.msra.mxu1 %v20054_v26  ;;  %10613 = vmatprep.subr.bf16.mxu0 %v20071_v32  ;;  %v20122_v26 = vld [vmem:[#allocation2 + $0x2444] ss:$112 sps:$4 sm:$0xff]  }
 0x5d8   :  { %10588 = vmatprep.subr.bf16.mxu1 %v20062_v61  ;;  %v20119_v61 = vld [vmem:[#allocation2 + $0x22c] ss:$112 sps:$4 sm:$0xff]   ;;  %v20128_v32 = vld [vmem:[#allocation2 + $0x2364] ss:$112 sps:$4 sm:$0xff]  }
 0x5da   :  { %10614 = vmatpush1.bf16.msra.mxu0 %v20069_v41  ;;  %v20117_v41 = vld [vmem:[#allocation2 + $0x228] ss:$112 sps:$4 sm:$0xff]  }
 0x5db   :  { %10589 = vmatpush2.bf16.msra.mxu1 %v20060_v53  ;;  %10615 = vmatprep.subr.bf16.mxu0 %v20077_v56  ;;  %v20126_v56 = vld [vmem:[#allocation2 + $0x2360] ss:$112 sps:$4 sm:$0xff]  }
 0x5dc   :  { %10590 = vmatprep.subr.bf16.mxu1 %v20068_v29 }
 0x5de   :  { %v10268_v22 = vpop.f32.mrf.mxu1  ;;  %10616 = vmatpush1.bf16.msra.mxu0 %v20075_v46  ;;  %v20125_v46 = vld [vmem:[#allocation2 + $0x14c] ss:$112 sps:$4 sm:$0xff]  }
 0x5df   :  { %v21468_v38 = vadd.f32 %v10268_v22, %v21461_v10  ;;  %10591 = vmatpush2.bf16.msra.mxu1 %v20066_v48  ;;  %10617 = vmatprep.subr.bf16.mxu0 %v20080_v11  ;;  %v20089_v10 = vld [vmem:[#allocation2 + $0x68c] ss:$112 sps:$4 sm:$0xff]  }
 0x5e0   :  { %v10270_v14 = vpop.f32.mrf.mxu1  ;;  %10592 = vmatprep.subr.bf16.mxu1 %v20074_v54  ;;  %v20134_v54 = vld [vmem:[#allocation2 + $0x148c] ss:$112 sps:$4 sm:$0xff]  }
 0x5e1   :  { %v21471_v5 = vadd.f32 %v10270_v14, %v21463_v60  ;;  %v20098_v60 = vld [vmem:[#allocation2 + $0x27c4] ss:$112 sps:$4 sm:$0xff]   ;;  %v20123_v14 = vld [vmem:[#allocation2 + $0x148] ss:$112 sps:$4 sm:$0xff]  }
 0x5e2   :  { %v10272_v24 = vpop.f32.mrf.mxu1  ;;  %10618 = vmatpush1.bf16.msra.mxu0 %v20078_v20 }
 0x5e3   :  { %10593 = vmatpush2.bf16.msra.mxu1 %v20072_v15  ;;  %10619 = vmatprep.subr.bf16.mxu0 %v20086_v62  ;;  %v20131_v62 = vld [vmem:[#allocation2 + $0x6c] ss:$112 sps:$4 sm:$0xff]  }
 0x5e4   :  { %v10273_v4 = vpop.f32.mrf.mxu1  ;;  %10658 = vmatprep.subr.bf16.mxu1 %v20083_v59  ;;  %v20132_v59 = vld [vmem:[#allocation2 + $0x1488] ss:$112 sps:$4 sm:$0xff]   ;;  %v20140_v24 = vld [vmem:[#allocation2 + $0x13ac] ss:$112 sps:$4 sm:$0xff]  }
 0x5e5   :  { %v20135_v4 = vld [vmem:[#allocation2 + $0xd88] ss:$112 sps:$4 sm:$0xff]  }
 0x5e6   :  { %10595 = vmatmul.mubr.bf16.vlgmr.msra.gmra.mxu1 %v21122_v7  ;;  %v21474_v52 = vpop.f32.mrf.mxu1  ;;  %10620 = vmatpush2.bf16.msra.mxu0 %v20084_v8  ;;  %v20146_v8 = vld [vmem:[#allocation2 + $0x12cc] ss:$112 sps:$4 sm:$0xff]  }
 0x5e7   :  { %10659 = vmatpush1.bf16.msra.mxu1 %v20081_v40  ;;  %10676 = vmatprep.mubr.bf16.mxu1 %v20933_v13 }
 0x5e8   :  { %v21476_v17 = vpop.f32.mrf.mxu1  ;;  %10685 = vmatprep.subr.bf16.mxu1 %v20089_v10  ;;  %10621 = vmatprep.subr.bf16.mxu0 %v20092_v45  ;;  %v20144_v10 = vld [vmem:[#allocation2 + $0x12c8] ss:$112 sps:$4 sm:$0xff]   ;;  %v20143_v45 = vld [vmem:[#allocation2 + $0xcac] ss:$112 sps:$4 sm:$0xff]  }
 0x5ea   :  { %v10354_v1 = vpop.f32.mrf.mxu1  ;;  %10622 = vmatpush2.bf16.msra.mxu0 %v20090_v50  ;;  %v20141_v50 = vld [vmem:[#allocation2 + $0xca8] ss:$112 sps:$4 sm:$0xff]  }
 0x5eb   :  { %10623 = vmatprep.subr.bf16.mxu0 %v20098_v60  ;;  %v20149_v60 = vld [vmem:[#allocation2 + $0xbcc] ss:$112 sps:$4 sm:$0xff]  }
 0x5ec   :  { %v10355_v12 = vpop.f32.mrf.mxu1  ;;  %v20158_v1 = vld [vmem:[#allocation2 + $0x110c] ss:$112 sps:$4 sm:$0xff]  }
 0x5ed   :  { %v20164_v12 = vld [vmem:[#allocation2 + $0x102c] ss:$112 sps:$4 sm:$0xff]  }
 0x5ee   :  { %17411 = vmatmul.mubr.msk.bf16.vlgmr.msra.gmra.mxu1 %vm8549_vm0, %v21482_v19  ;;  %10624 = vmatpush2.bf16.msra.mxu0 %v20096_v49  ;;  %v20155_v49 = vld [vmem:[#allocation2 + $0xaec] ss:$112 sps:$4 sm:$0xff]  }
 0x5ef   :  { %10686 = vmatpush1.bf16.msra.mxu1 %v20087_v57  ;;  %10625 = vmatprep.subr.bf16.mxu0 %v20104_v37  ;;  %v20147_v57 = vld [vmem:[#allocation2 + $0xbc8] ss:$112 sps:$4 sm:$0xff]  }
 0x5f0   :  { %10687 = vmatprep.subr.bf16.mxu1 %v20095_v44  ;;  %10717 = vmatprep.mubr.bf16.mxu1 %v21111_v47  ;;  %v20120_v47 = vld [vmem:[#allocation2 + $0x2440] ss:$112 sps:$4 sm:$0xff]   ;;  %v20153_v44 = vld [vmem:[#allocation2 + $0xae8] ss:$112 sps:$4 sm:$0xff]  }
 0x5f1   :  { %v20162_v37 = vld [vmem:[#allocation2 + $0x1028] ss:$112 sps:$4 sm:$0xff]  }
 0x5f2   :  { %10626 = vmatpush2.bf16.msra.mxu0 %v20102_v27  ;;  %v20170_v27 = vld [vmem:[#allocation2 + $0xf4c] ss:$112 sps:$4 sm:$0xff]  }
 0x5f3   :  { %10688 = vmatpush1.bf16.msra.mxu1 %v20093_v25  ;;  %10627 = vmatprep.subr.bf16.mxu0 %v20110_v58  ;;  %v20161_v25 = vld [vmem:[#allocation2 + $0xa0c] ss:$112 sps:$4 sm:$0xff]   ;;  %v20168_v58 = vld [vmem:[#allocation2 + $0xf48] ss:$112 sps:$4 sm:$0xff]  }
 0x5f4   :  { %10689 = vmatprep.subr.bf16.mxu1 %v20101_v28  ;;  %v20159_v28 = vld [vmem:[#allocation2 + $0xa08] ss:$112 sps:$4 sm:$0xff]  }
 0x5f6   :  { %10628 = vmatpush2.bf16.msra.mxu0 %v20108_v0  ;;  %v20176_v0 = vld [vmem:[#allocation2 + $0xe6c] ss:$112 sps:$4 sm:$0xff]  }
 0x5f7   :  { %10690 = vmatpush1.bf16.msra.mxu1 %v20099_v35  ;;  %10629 = vmatprep.subr.bf16.mxu0 %v20116_v31  ;;  %v20167_v35 = vld [vmem:[#allocation2 + $0x92c] ss:$112 sps:$4 sm:$0xff]   ;;  %v20174_v31 = vld [vmem:[#allocation2 + $0xe68] ss:$112 sps:$4 sm:$0xff]  }
 0x5f8   :  { %10691 = vmatprep.subr.bf16.mxu1 %v20107_v23  ;;  %v20165_v23 = vld [vmem:[#allocation2 + $0x928] ss:$112 sps:$4 sm:$0xff]  }
 0x5fa   :  { %10630 = vmatpush2.bf16.msra.mxu0 %v20114_v55  ;;  %v20182_v55 = vld [vmem:[#allocation2 + $0x1b8c] ss:$112 sps:$4 sm:$0xff]  }
 0x5fb   :  { %10692 = vmatpush1.bf16.msra.mxu1 %v20105_v18  ;;  %10631 = vmatprep.subr.bf16.mxu0 %v20122_v26  ;;  %v20173_v18 = vld [vmem:[#allocation2 + $0x84c] ss:$112 sps:$4 sm:$0xff]   ;;  %v20180_v26 = vld [vmem:[#allocation2 + $0x1b88] ss:$112 sps:$4 sm:$0xff]  }
 0x5fc   :  { %10693 = vmatprep.subr.bf16.mxu1 %v20113_v3  ;;  %v20171_v3 = vld [vmem:[#allocation2 + $0x848] ss:$112 sps:$4 sm:$0xff]  }
 0x5fd   :  { %v10309_v53 = vpop.f32.mrf.mxu0 }
 0x5fe   :  { %v10310_v29 = vadd.f32 %v10309_v53, %v21468_v38  ;;  %10632 = vmatpush2.bf16.msra.mxu0 %v20120_v47  ;;  %v20188_v47 = vld [vmem:[#allocation2 + $0x1aac] ss:$112 sps:$4 sm:$0xff]   ;;  %v20186_v53 = vld [vmem:[#allocation2 + $0x1aa8] ss:$112 sps:$4 sm:$0xff]  }
 0x5ff   :  { %10694 = vmatpush1.bf16.msra.mxu1 %v20111_v42  ;;  %v10311_v48 = vpop.f32.mrf.mxu0  ;;  %10633 = vmatprep.subr.bf16.mxu0 %v20128_v32  ;;  %v20179_v42 = vld [vmem:[#allocation2 + $0x76c] ss:$112 sps:$4 sm:$0xff]   ;;  %v20177_v32 = vld [vmem:[#allocation2 + $0x768] ss:$112 sps:$4 sm:$0xff]  }
 0x600   :  { %10695 = vmatprep.subr.bf16.mxu1 %v20119_v61  ;;  %v10351_v11 = vadd.f32 %v21474_v52, %v10310_v29  ;;  %v10312_v22 = vadd.f32 %v10311_v48, %v21471_v5  ;;  %v20152_v52 = vld [vmem:[#allocation2 + $0x11ec] ss:$112 sps:$4 sm:$0xff]  }
 0x601   :  { %v10313_v15 = vpop.f32.mrf.mxu0  ;;  %v20185_v29 = vld [vmem:[#allocation2 + $0x228c] ss:$112 sps:$4 sm:$0xff]  }
 0x602   :  { %v21493_v20 = vmax.f32 %v10855_v9, %v10351_v11  ;;  %v21496_v38 = vadd.f32 %v21476_v17, %v10312_v22  ;;  %10634 = vmatpush2.bf16.msra.mxu0 %v20126_v56  ;;  %v20137_v9 = vld [vmem:[#allocation2 + $0xd8c] ss:$112 sps:$4 sm:$0xff]   ;;  %v20150_v17 = vld [vmem:[#allocation2 + $0x11e8] ss:$112 sps:$4 sm:$0xff]  }
 0x603   :  { %10696 = vmatpush1.bf16.msra.mxu1 %v20117_v41  ;;  %10726 = vmatprep.subr.bf16.mxu0 %v20134_v54  ;;  %v10314_v40 = vpop.f32.mrf.mxu0  ;;  %v20194_v56 = vld [vmem:[#allocation2 + $0x19cc] ss:$112 sps:$4 sm:$0xff]   ;;  %v20192_v54 = vld [vmem:[#allocation2 + $0x19c8] ss:$112 sps:$4 sm:$0xff]  }
 0x604   :  { %10697 = vmatprep.subr.bf16.mxu1 %v20125_v46  ;;  %v10863_v5 = vmax.f32 %v21386_v30, %v21496_v38  ;;  %v20183_v46 = vld [vmem:[#allocation2 + $0x2288] ss:$112 sps:$4 sm:$0xff]   ;;  %v20191_v22 = vld [vmem:[#allocation2 + $0x21ac] ss:$112 sps:$4 sm:$0xff]  }
 0x605   :  { %10636 = vmatmul.mubr.bf16.vlgmr.msra.gmra.mxu0 %v21147_v16  ;;  %v20200_v15 = vld [vmem:[#allocation2 + $0x18ec] ss:$112 sps:$4 sm:$0xff]   ;;  %v20195_v40 = vld [vmem:[#allocation2 + $0x20c8] ss:$112 sps:$4 sm:$0xff]  }
 0x606   :  { %10727 = vmatpush1.bf16.msra.mxu0 %v20132_v59  ;;  %10758 = vmatprep.mubr.bf16.mxu0 %v21116_v51  ;;  %v20156_v51 = vld [vmem:[#allocation2 + $0x1108] ss:$112 sps:$4 sm:$0xff]  }
 0x607   :  { %10698 = vmatpush1.bf16.msra.mxu1 %v20123_v14  ;;  %10728 = vmatprep.subr.bf16.mxu0 %v20140_v24  ;;  %v20189_v14 = vld [vmem:[#allocation2 + $0x21a8] ss:$112 sps:$4 sm:$0xff]   ;;  %v20206_v24 = vld [vmem:[#allocation2 + $0x180c] ss:$112 sps:$4 sm:$0xff]  }
 0x608   :  { %10699 = vmatprep.subr.bf16.mxu1 %v20131_v62  ;;  %v20198_v59 = vld [vmem:[#allocation2 + $0x18e8] ss:$112 sps:$4 sm:$0xff]   ;;  %v20197_v62 = vld [vmem:[#allocation2 + $0x20cc] ss:$112 sps:$4 sm:$0xff]  }
 0x60a   :  { %10729 = vmatpush1.bf16.msra.mxu0 %v20138_v2  ;;  %v20203_v2 = vld [vmem:[#allocation2 + $0x1fec] ss:$112 sps:$4 sm:$0xff]  }
 0x60b   :  { %10700 = vmatpush1.bf16.msra.mxu1 %v20129_v39  ;;  %10730 = vmatprep.subr.bf16.mxu0 %v20146_v8  ;;  %v20204_v39 = vld [vmem:[#allocation2 + $0x1808] ss:$112 sps:$4 sm:$0xff]  }
 0x60c   :  { %10701 = vmatprep.subr.bf16.mxu1 %v20137_v9  ;;  %v20212_v9 = vld [vmem:[#allocation2 + $0x172c] ss:$112 sps:$4 sm:$0xff]   ;;  %v20210_v8 = vld [vmem:[#allocation2 + $0x1728] ss:$112 sps:$4 sm:$0xff]  }
 0x60e   :  { %10731 = vmatpush1.bf16.msra.mxu0 %v20144_v10  ;;  %v20218_v10 = vld [vmem:[#allocation2 + $0x164c] ss:$112 sps:$4 sm:$0xff]  }
 0x60f   :  { %10702 = vmatpush2.bf16.msra.mxu1 %v20135_v4  ;;  %10732 = vmatprep.subr.bf16.mxu0 %v20152_v52  ;;  %v20209_v4 = vld [vmem:[#allocation2 + $0x1f0c] ss:$112 sps:$4 sm:$0xff]  }
 0x610   :  { %10703 = vmatprep.subr.bf16.mxu1 %v20143_v45  ;;  %v20207_v45 = vld [vmem:[#allocation2 + $0x1f08] ss:$112 sps:$4 sm:$0xff]   ;;  %v20215_v52 = vld [vmem:[#allocation2 + $0x1e2c] ss:$112 sps:$4 sm:$0xff]  }
 0x612   :  { %10733 = vmatpush1.bf16.msra.mxu0 %v20150_v17 }
 0x613   :  { %10704 = vmatpush2.bf16.msra.mxu1 %v20141_v50  ;;  %10734 = vmatprep.subr.bf16.mxu0 %v20158_v1  ;;  %v20224_v50 = vld [vmem:[#allocation2 + $0x156c] ss:$112 sps:$4 sm:$0xff]   ;;  %v20222_v1 = vld [vmem:[#allocation2 + $0x1568] ss:$112 sps:$4 sm:$0xff]  }
 0x614   :  { %10705 = vmatprep.subr.bf16.mxu1 %v20149_v60  ;;  %v20213_v60 = vld [vmem:[#allocation2 + $0x1e28] ss:$112 sps:$4 sm:$0xff]  }
 0x616   :  { %10735 = vmatpush1.bf16.msra.mxu0 %v20156_v51  ;;  %v20221_v51 = vld [vmem:[#allocation2 + $0x1d4c] ss:$112 sps:$4 sm:$0xff]  }
 0x617   :  { %10706 = vmatpush2.bf16.msra.mxu1 %v20147_v57  ;;  %10736 = vmatprep.subr.bf16.mxu0 %v20164_v12 }
 0x618   :  { %10707 = vmatprep.subr.bf16.mxu1 %v20155_v49  ;;  %v20233_v49 = vld [vmem:[#allocation2 + $0x2a6c] ss:$112 sps:$4 sm:$0xff]  }
 0x61a   :  { %10737 = vmatpush1.bf16.msra.mxu0 %v20162_v37  ;;  %v10988_v37 = vld [vmem:[#allocation6 + $0x1e0] sm:$0xff] }
 0x61b   :  { %10708 = vmatpush2.bf16.msra.mxu1 %v20153_v44  ;;  %10738 = vmatprep.subr.bf16.mxu0 %v20170_v27  ;;  %v10984_v44 = vld [vmem:[#allocation6 + $0x1c0] sm:$0xff] }
 0x61c   :  { %10709 = vmatprep.subr.bf16.mxu1 %v20161_v25  ;;  %v20219_v27 = vld [vmem:[#allocation2 + $0x1d48] ss:$112 sps:$4 sm:$0xff]  }
 0x61e   :  { %10739 = vmatpush1.bf16.msra.mxu0 %v20168_v58  ;;  %v20227_v58 = vld [vmem:[#allocation2 + $0x1c6c] ss:$112 sps:$4 sm:$0xff]  }
 0x61f   :  { %10710 = vmatpush2.bf16.msra.mxu1 %v20159_v28  ;;  %10740 = vmatprep.subr.bf16.mxu0 %v20176_v0  ;;  %v20231_v28 = vld [vmem:[#allocation2 + $0x2a68] ss:$112 sps:$4 sm:$0xff]   ;;  %v17470_v0 = vcombine.high %v10984_v44, %v10988_v37 }
 0x620   :  { %10711 = vmatprep.subr.bf16.mxu1 %v20167_v35 }
 0x622   :  { %10741 = vmatpush1.bf16.msra.mxu0 %v20174_v31  ;;  %v20225_v31 = vld [vmem:[#allocation2 + $0x1c68] ss:$112 sps:$4 sm:$0xff]  }
 0x623   :  { %10712 = vmatpush2.bf16.msra.mxu1 %v20165_v23  ;;  %10742 = vmatprep.subr.bf16.mxu0 %v20182_v55 }
 0x624   :  { %10713 = vmatprep.subr.bf16.mxu1 %v20173_v18  ;;  %v20230_v18 = vld [vmem:[#allocation2 + $0x298c] ss:$112 sps:$4 sm:$0xff]  }
 0x626   :  { %v21502_v61 = vpop.f32.mrf.mxu1  ;;  %10743 = vmatpush2.bf16.msra.mxu0 %v20180_v26  ;;  %v10980_v26 = vld [vmem:[#allocation6 + $0x1a0] sm:$0xff] }
 0x627   :  { %10714 = vmatpush2.bf16.msra.mxu1 %v20171_v3  ;;  %10744 = vmatprep.subr.bf16.mxu0 %v20188_v47  ;;  %v10976_v3 = vld [vmem:[#allocation6 + $0x180] sm:$0xff] }
 0x628   :  { %v10393_v41 = vpop.f32.mrf.mxu1  ;;  %10715 = vmatprep.subr.bf16.mxu1 %v20179_v42  ;;  %v20228_v47 = vld [vmem:[#allocation2 + $0x2988] ss:$112 sps:$4 sm:$0xff]  }
 0x62a   :  { %v10395_v48 = vpop.f32.mrf.mxu1  ;;  %10745 = vmatpush2.bf16.msra.mxu0 %v20186_v53  ;;  %v17462_v53 = vcombine.high %v10976_v3, %v10980_v26 }
 0x62b   :  { %10716 = vmatpush2.bf16.msra.mxu1 %v20177_v32  ;;  %10746 = vmatprep.subr.bf16.mxu0 %v20194_v56  ;;  %v17469_v32 = vcombine.low %v10984_v44, %v10988_v37  ;;  %v10972_v56 = vld [vmem:[#allocation6 + $0x160] sm:$0xff] }
 0x62c   :  { %v10396_v11 = vpop.f32.mrf.mxu1  ;;  %10767 = vmatprep.subr.bf16.mxu1 %v20185_v29  ;;  %v10968_v29 = vld [vmem:[#allocation6 + $0x140] sm:$0xff] }
 0x62d   :  { %v20234_v48 = vld [vmem:[#allocation2 + $0x28a8] ss:$112 sps:$4 sm:$0xff]   ;;  %v17454_v11 = vcombine.high %v10968_v29, %v10972_v56 }
 0x62e   :  { %10718 = vmatmul.mubr.bf16.vlgmr.msra.gmra.mxu1 %v21120_v6  ;;  %10747 = vmatpush2.bf16.msra.mxu0 %v20192_v54  ;;  %v20201_v6 = vld [vmem:[#allocation2 + $0x1fe8] ss:$112 sps:$4 sm:$0xff]   ;;  %v20239_v54 = vld [vmem:[#allocation2 + $0x27cc] ss:$112 sps:$4 sm:$0xff]  }
 0x62f   :  { %10768 = vmatpush1.bf16.msra.mxu1 %v20183_v46  ;;  %10748 = vmatprep.subr.bf16.mxu0 %v20200_v15  ;;  %v17461_v46 = vcombine.low %v10976_v3, %v10980_v26  ;;  %v10964_v15 = vld [vmem:[#allocation6 + $0x120] sm:$0xff] }
 0x630   :  { %10769 = vmatprep.subr.bf16.mxu1 %v20191_v22  ;;  %10799 = vmatprep.mubr.bf16.mxu1 %v21142_v33  ;;  %v20216_v33 = vld [vmem:[#allocation2 + $0x1648] ss:$112 sps:$4 sm:$0xff]  }
 0x631   :  { %v10960_v22 = vld [vmem:[#allocation6 + $0x100] sm:$0xff] }
 0x632   :  { %10749 = vmatpush2.bf16.msra.mxu0 %v20198_v59  ;;  %v17453_v59 = vcombine.low %v10968_v29, %v10972_v56  ;;  %v10928_v37 = vld [vmem:[#allocation6] sm:$0xff]  ;;  %v21525_v29 = vld [vmem:[#allocation4] sm:$0xff] }
 0x633   :  { %10770 = vmatpush1.bf16.msra.mxu1 %v20189_v14  ;;  %10750 = vmatprep.subr.bf16.mxu0 %v20206_v24  ;;  %v20237_v14 = vld [vmem:[#allocation2 + $0x27c8] ss:$112 sps:$4 sm:$0xff]   ;;  %v17446_v24 = vcombine.high %v10960_v22, %v10964_v15 }
 0x634   :  { %10771 = vmatprep.subr.bf16.mxu1 %v20197_v62  ;;  %v20242_v62 = vld [vmem:[#allocation2 + $0x26ec] ss:$112 sps:$4 sm:$0xff]  }
 0x635   :  { %v11052_v26 = vld [vmem:[#allocation6 + $0x3e0] sm:$0xff] }
 0x636   :  { %10751 = vmatpush2.bf16.msra.mxu0 %v20204_v39  ;;  %v20240_v39 = vld [vmem:[#allocation2 + $0x26e8] ss:$112 sps:$4 sm:$0xff]  }
 0x637   :  { %10772 = vmatpush1.bf16.msra.mxu1 %v20195_v40  ;;  %10752 = vmatprep.subr.bf16.mxu0 %v20212_v9  ;;  %v10952_v40 = vld [vmem:[#allocation6 + $0xc0] sm:$0xff] }
 0x638   :  { %10773 = vmatprep.subr.bf16.mxu1 %v20203_v2  ;;  %v17445_v2 = vcombine.low %v10960_v22, %v10964_v15  ;;  %v20245_v9 = vld [vmem:[#allocation2 + $0x260c] ss:$112 sps:$4 sm:$0xff]  }
 0x639   :  { %v11044_v22 = vld [vmem:[#allocation6 + $0x3a0] sm:$0xff] }
 0x63a   :  { %10753 = vmatpush2.bf16.msra.mxu0 %v20210_v8  ;;  %v10944_v8 = vld [vmem:[#allocation6 + $0x80] sm:$0xff] }
 0x63b   :  { %10774 = vmatpush1.bf16.msra.mxu1 %v20201_v6  ;;  %10754 = vmatprep.subr.bf16.mxu0 %v20218_v10  ;;  %v20243_v10 = vld [vmem:[#allocation2 + $0x2608] ss:$112 sps:$4 sm:$0xff]  }
 0x63c   :  { %10775 = vmatprep.subr.bf16.mxu1 %v20209_v4  ;;  %v10948_v4 = vld [vmem:[#allocation6 + $0xa0] sm:$0xff] }
 0x63d   :  { %v21506_v17 = vpop.f32.mrf.mxu0  ;;  %v11104_v15 = vld [vmem:[#allocation6 + $0x580] sm:$0xff] }
 0x63e   :  { %10755 = vmatpush2.bf16.msra.mxu0 %v20216_v33  ;;  %v20248_v33 = vld [vmem:[#allocation2 + $0x252c] ss:$112 sps:$4 sm:$0xff]  }
 0x63f   :  { %10776 = vmatpush1.bf16.msra.mxu1 %v20207_v45  ;;  %v10434_v57 = vpop.f32.mrf.mxu0  ;;  %10756 = vmatprep.subr.bf16.mxu0 %v20224_v50  ;;  %v10936_v50 = vld [vmem:[#allocation6 + $0x40] sm:$0xff] }
 0x640   :  { %10777 = vmatprep.subr.bf16.mxu1 %v20215_v52  ;;  %v21508_v12 = vadd.f32 %v10434_v57, %v10393_v41  ;;  %v17430_v52 = vcombine.high %v10944_v8, %v10948_v4  ;;  %v20246_v57 = vld [vmem:[#allocation2 + $0x2528] ss:$112 sps:$4 sm:$0xff]  }
 0x641   :  { %v10436_v25 = vpop.f32.mrf.mxu0 }
 0x642   :  { %10757 = vmatpush2.bf16.msra.mxu0 %v20222_v1  ;;  %v10872_v1 = vlaneseq  ;;  %v10932_v25 = vld [vmem:[#allocation6 + $0x20] sm:$0xff] }
 0x643   :  { %10778 = vmatpush1.bf16.msra.mxu1 %v20213_v60  ;;  %10822 = vmatprep.subr.bf16.mxu0 %v20233_v49  ;;  %v10437_v35 = vpop.f32.mrf.mxu0  ;;  %v10940_v60 = vld [vmem:[#allocation6 + $0x60] sm:$0xff] }
 0x644   :  { %10779 = vmatprep.subr.bf16.mxu1 %v20221_v51  ;;  %v17429_v51 = vcombine.low %v10944_v8, %v10948_v4  ;;  %v20251_v49 = vld [vmem:[#allocation2 + $0x244c] ss:$112 sps:$4 sm:$0xff]   ;;  %v17422_v44 = vcombine.high %v10936_v50, %v10940_v60 }
 0x645   :  { %10759 = vmatmul.mubr.bf16.vlgmr.msra.gmra.mxu0 %v21122_v7  ;;  %v21511_v23 = vpop.f32.mrf.mxu0  ;;  %v20236_v7 = vld [vmem:[#allocation2 + $0x28ac] ss:$112 sps:$4 sm:$0xff]  }
 0x646   :  { %10823 = vmatpush1.bf16.msra.mxu0 %v20231_v28  ;;  %10840 = vmatprep.mubr.bf16.mxu0 %v20933_v13  ;;  %v20249_v28 = vld [vmem:[#allocation2 + $0x2448] ss:$112 sps:$4 sm:$0xff]   ;;  %v20254_v35 = vld [vmem:[#allocation2 + $0x236c] ss:$112 sps:$4 sm:$0xff]  }
 0x647   :  { %10780 = vmatpush1.bf16.msra.mxu1 %v20219_v27  ;;  %v21514_v55 = vpop.f32.mrf.mxu0  ;;  %13616 = vmatprep.subr.bf16.mxu0 %v17470_v0  ;;  %v21518_v27 = vshrl.u32 %v10872_v1, 7  ;;  %v17414_v0 = vcombine.high %v10928_v37, %v10932_v25  ;;  %v11036_v8 = vld [vmem:[#allocation6 + $0x360] sm:$0xff] }
 0x648   :  { %10781 = vmatprep.subr.bf16.mxu1 %v20227_v58  ;;  %v17421_v58 = vcombine.low %v10936_v50, %v10940_v60  ;;  %v11100_v4 = vld [vmem:[#allocation6 + $0x560] sm:$0xff] }
 0x649   :  { %v10518_v42 = vpop.f32.mrf.mxu0  ;;  %v21523_v3 = vsub.s32 1, %v21518_v27  ;;  %v11024_v50 = vld [vmem:[#allocation6 + $0x300] sm:$0xff] }
 0x64a   :  { %v11112_v42 = vld [vmem:[#allocation6 + $0x5c0] sm:$0xff] }
 0x64b   :  { %10782 = vmatpush1.bf16.msra.mxu1 %v20225_v31  ;;  %v10519_v41 = vpop.f32.mrf.mxu0  ;;  %v11048_v31 = vld [vmem:[#allocation6 + $0x3c0] sm:$0xff] }
 0x64c   :  { %10783 = vmatprep.subr.bf16.mxu1 %v20230_v18  ;;  %v10433_v18 = vadd.f32 %v21506_v17, %v21502_v61  ;;  %v17413_v41 = vcombine.low %v10928_v37, %v10932_v25  ;;  %v11028_v60 = vld [vmem:[#allocation6 + $0x320] sm:$0xff] }
 0x64d   :  { %17412 = vmatmul.mubr.msk.bf16.vlgmr.msra.gmra.mxu0 %vm8549_vm0, %v21482_v19  ;;  %v10956_v19 = vld [vmem:[#allocation6 + $0xe0] sm:$0xff] }
 0x64e   :  { %13617 = vmatpush1.bf16.msra.mxu0 %v17469_v32  ;;  %v17438_v6 = vcombine.high %v10952_v40, %v10956_v19  ;;  %v17437_v45 = vcombine.low %v10952_v40, %v10956_v19  ;;  %v11016_v37 = vld [vmem:[#allocation6 + $0x2c0] sm:$0xff] }
 0x64f   :  { %10784 = vmatpush2.bf16.msra.mxu1 %v20228_v47  ;;  %13618 = vmatprep.subr.bf16.mxu0 %v17462_v53  ;;  %v11116_v47 = vld [vmem:[#allocation6 + $0x5e0] sm:$0xff] }
 0x650   :  { %10785 = vmatprep.subr.bf16.mxu1 %v20236_v7  ;;  %v20252_v53 = vld [vmem:[#allocation2 + $0x2368] ss:$112 sps:$4 sm:$0xff]   ;;  %v17598_v61 = vcombine.high %v11112_v42, %v11116_v47  ;;  %v17597_v19 = vcombine.low %v11112_v42, %v11116_v47 }
 0x651   :  { %v11020_v25 = vld [vmem:[#allocation6 + $0x2e0] sm:$0xff] }
 0x652   :  { %13619 = vmatpush1.bf16.msra.mxu0 %v17461_v46  ;;  %v11040_v46 = vld [vmem:[#allocation6 + $0x380] sm:$0xff] }
 0x653   :  { %10786 = vmatpush2.bf16.msra.mxu1 %v20234_v48  ;;  %13620 = vmatprep.subr.bf16.mxu0 %v17454_v11  ;;  %v17534_v48 = vcombine.high %v11048_v31, %v11052_v26  ;;  %v11012_v42 = vld [vmem:[#allocation6 + $0x2a0] sm:$0xff] }
 0x654   :  { %10787 = vmatprep.subr.bf16.mxu1 %v20239_v54  ;;  %v10879_v54 = vrot.slane %v21525_v29, %v21523_v3 }
 0x656   :  { %13621 = vmatpush1.bf16.msra.mxu0 %v17453_v59 }
 0x657   :  { %10788 = vmatpush2.bf16.msra.mxu1 %v20237_v14  ;;  %13622 = vmatprep.subr.bf16.mxu0 %v17446_v24  ;;  %v11108_v14 = vld [vmem:[#allocation6 + $0x5a0] sm:$0xff] }
 0x658   :  { %10789 = vmatprep.subr.bf16.mxu1 %v20242_v62  ;;  %v17533_v62 = vcombine.low %v11048_v31, %v11052_v26  ;;  %v17502_v31 = vcombine.high %v11016_v37, %v11020_v25  ;;  %v11008_v26 = vld [vmem:[#allocation6 + $0x280] sm:$0xff] }
 0x65a   :  { %13623 = vmatpush1.bf16.msra.mxu0 %v17445_v2  ;;  %v17590_v2 = vcombine.high %v11104_v15, %v11108_v14 }
 0x65b   :  { %10790 = vmatpush2.bf16.msra.mxu1 %v20240_v39  ;;  %13624 = vmatprep.subr.bf16.mxu0 %v17438_v6  ;;  %v11032_v6 = vld [vmem:[#allocation6 + $0x340] sm:$0xff] }
 0x65c   :  { %10791 = vmatprep.subr.bf16.mxu1 %v20245_v9 }
 0x65e   :  { %13625 = vmatpush1.bf16.msra.mxu0 %v17437_v45  ;;  %v17518_v45 = vcombine.high %v11032_v6, %v11036_v8 }
 0x65f   :  { %10792 = vmatpush2.bf16.msra.mxu1 %v20243_v10  ;;  %13626 = vmatprep.subr.bf16.mxu0 %v17430_v52  ;;  %v17525_v10 = vcombine.low %v11040_v46, %v11044_v22 }
 0x660   :  { %10793 = vmatprep.subr.bf16.mxu1 %v20248_v33  ;;  %v17589_v33 = vcombine.low %v11104_v15, %v11108_v14 }
 0x662   :  { %13627 = vmatpush1.bf16.msra.mxu0 %v17429_v51  ;;  %v11092_v51 = vld [vmem:[#allocation6 + $0x520] sm:$0xff] }
 0x663   :  { %10794 = vmatpush2.bf16.msra.mxu1 %v20246_v57  ;;  %13628 = vmatprep.subr.bf16.mxu0 %v17422_v44  ;;  %v11088_v57 = vld [vmem:[#allocation6 + $0x500] sm:$0xff] }
 0x664   :  { %10795 = vmatprep.subr.bf16.mxu1 %v20251_v49  ;;  %v17510_v49 = vcombine.high %v11024_v50, %v11028_v60 }
 0x666   :  { %v10473_v32 = vpop.f32.mrf.mxu1  ;;  %13629 = vmatpush1.bf16.msra.mxu0 %v17421_v58  ;;  %v11080_v58 = vld [vmem:[#allocation6 + $0x4c0] sm:$0xff] }
 0x667   :  { %v10474_v7 = vadd.f32 %v10473_v32, %v10433_v18  ;;  %10796 = vmatpush2.bf16.msra.mxu1 %v20249_v28  ;;  %13630 = vmatprep.subr.bf16.mxu0 %v17414_v0  ;;  %v17574_v28 = vcombine.high %v11088_v57, %v11092_v51  ;;  %v17509_v0 = vcombine.low %v11024_v50, %v11028_v60  ;;  %v11072_v32 = vld [vmem:[#allocation6 + $0x480] sm:$0xff] }
 0x668   :  { %v10475_v56 = vpop.f32.mrf.mxu1  ;;  %10797 = vmatprep.subr.bf16.mxu1 %v20254_v35  ;;  %v11084_v35 = vld [vmem:[#allocation6 + $0x4e0] sm:$0xff]  ;;  %v17573_v18 = vcombine.low %v11088_v57, %v11092_v51 }
 0x669   :  { %v10515_v17 = vadd.f32 %v21511_v23, %v10474_v7  ;;  %v10476_v11 = vadd.f32 %v10475_v56, %v21508_v12  ;;  %v17526_v23 = vcombine.high %v11040_v46, %v11044_v22  ;;  %v17566_v47 = vcombine.high %v11080_v58, %v11084_v35  ;;  %v11076_v7 = vld [vmem:[#allocation6 + $0x4a0] sm:$0xff] }
 0x66a   :  { %v10477_v59 = vpop.f32.mrf.mxu1  ;;  %13631 = vmatpush1.bf16.msra.mxu0 %v17413_v41  ;;  %v21542_v41 = vsub.s32 0, %v21518_v27  ;;  %v17494_v56 = vcombine.high %v11008_v26, %v11012_v42  ;;  %v11000_v46 = vld [vmem:[#allocation6 + $0x240] sm:$0xff]  ;;  %v17493_v22 = vcombine.low %v11008_v26, %v11012_v42 }
 0x66b   :  { %v10864_v24 = vmax.f32 %v21392_v43, %v10515_v17  ;;  %v21533_v40 = vadd.f32 %v21514_v55, %v10476_v11  ;;  %10798 = vmatpush2.bf16.msra.mxu1 %v20252_v53  ;;  %13632 = vmatprep.subr.bf16.mxu0 %v17534_v48  ;;  %v11096_v43 = vld [vmem:[#allocation6 + $0x540] sm:$0xff]  ;;  %v17501_v53 = vcombine.low %v11016_v37, %v11020_v25 }
 0x66c   :  { %v10478_v39 = vpop.f32.mrf.mxu1  ;;  %13657 = vmatprep.subr.bf16.mxu1 %v17598_v61  ;;  %v17582_v1 = vcombine.high %v11096_v43, %v11100_v4  ;;  %v17581_v44 = vcombine.low %v11096_v43, %v11100_v4  ;;  %v17565_v48 = vcombine.low %v11080_v58, %v11084_v35  ;;  %v11004_v61 = vld [vmem:[#allocation6 + $0x260] sm:$0xff]  ;;  %v17558_v17 = vcombine.high %v11072_v32, %v11076_v7 }
 0x66d   :  { %v10908_v9 = vadd.f32 %v10879_v54, %v10864_v24  ;;  %v10865_v12 = vmax.f32 %v21420_v21, %v21533_v40  ;;  %v11064_v54 = vld [vmem:[#allocation6 + $0x440] sm:$0xff]  ;;  %v10875_v15 = vrot.slane %v21525_v29, %v21542_v41  ;;  %v17486_v14 = vcombine.high %v11000_v46, %v11004_v61 }
 0x66e   :  { %10800 = vmatmul.mubr.bf16.vlgmr.msra.gmra.mxu1 %v21147_v16  ;;  %13633 = vmatpush2.bf16.msra.mxu0 %v17533_v62  ;;  %v17517_v16 = vcombine.low %v11032_v6, %v11036_v8  ;;  %v11068_v11 = vld [vmem:[#allocation6 + $0x460] sm:$0xff]  ;;  %v17557_v59 = vcombine.low %v11072_v32, %v11076_v7 }
 0x66f   :  { %v10915_v55 = vmax.f32 %v10908_v9, 0.0  ;;  %13658 = vmatpush1.bf16.msra.mxu1 %v17597_v19  ;;  %13634 = vmatprep.subr.bf16.mxu0 %v17526_v23  ;;  %v10992_v62 = vld [vmem:[#allocation6 + $0x200] sm:$0xff]  ;;  %v17550_v19 = vcombine.high %v11064_v54, %v11068_v11  ;;  %v10907_v9 = vadd.f32 %v10875_v15, %v10863_v5  ;;  %v17549_v8 = vcombine.low %v11064_v54, %v11068_v11 }
 0x670   :  { %13659 = vmatprep.subr.bf16.mxu1 %v17590_v2  ;;  %v10996_v24 = vld [vmem:[#allocation6 + $0x220] sm:$0xff]  ;;  %v17485_v2 = vcombine.low %v11000_v46, %v11004_v61 }
 0x671   :  { %v21538_v52 = vpack.c.bf16 %v10915_v55, %v10915_v55  ;;  %v11056_v39 = vld [vmem:[#allocation6 + $0x400] sm:$0xff]  ;;  %v17478_v6 = vcombine.high %v10992_v62, %v10996_v24  ;;  %v17477_v50 = vcombine.low %v10992_v62, %v10996_v24  ;;  %v10914_v60 = vmax.f32 %v10907_v9, 0.0 }
 0x672   :  { %13635 = vmatpush2.bf16.msra.mxu0 %v17525_v10  ;;  %v11060_v23 = vld [vmem:[#allocation6 + $0x420] sm:$0xff] }
 0x673   :  { %13648 = vmatprep.mubr.bf16.mxu0 %v21538_v52  ;;  %13636 = vmatprep.subr.bf16.mxu0 %v17518_v45  ;;  %v17542_v43 = vcombine.high %v11056_v39, %v11060_v23  ;;  %v11240_v4 = vld [vmem:[#allocation6 + $0x9c0] sm:$0xff]  ;;  %v17541_v30 = vcombine.low %v11056_v39, %v11060_v23  ;;  %v21553_v25 = vpack.c.bf16 %v10914_v60, %v10914_v60 }
 0x674   :  { %13660 = vmatpush1.bf16.msra.mxu1 %v17589_v33  ;;  %v11244_v55 = vld [vmem:[#allocation6 + $0x9e0] sm:$0xff] }
 0x675   :  { %13661 = vmatprep.subr.bf16.mxu1 %v17582_v1  ;;  %v11176_v45 = vld [vmem:[#allocation6 + $0x7c0] sm:$0xff]  ;;  %v17726_v38 = vcombine.high %v11240_v4, %v11244_v55  ;;  %v17725_v37 = vcombine.low %v11240_v4, %v11244_v55 }
 0x676   :  { %13637 = vmatpush2.bf16.msra.mxu0 %v17517_v16  ;;  %v11180_v33 = vld [vmem:[#allocation6 + $0x7e0] sm:$0xff] }
 0x677   :  { %13638 = vmatprep.subr.bf16.mxu0 %v17510_v49  ;;  %v17662_v5 = vcombine.high %v11176_v45, %v11180_v33  ;;  %v11232_v57 = vld [vmem:[#allocation6 + $0x980] sm:$0xff]  ;;  %v17661_v58 = vcombine.low %v11176_v45, %v11180_v33 }
 0x678   :  { %13662 = vmatpush1.bf16.msra.mxu1 %v17581_v44  ;;  %v11236_v51 = vld [vmem:[#allocation6 + $0x9a0] sm:$0xff] }
 0x679   :  { %13663 = vmatprep.subr.bf16.mxu1 %v17574_v28  ;;  %v11168_v49 = vld [vmem:[#allocation6 + $0x780] sm:$0xff]  ;;  %v17718_v35 = vcombine.high %v11232_v57, %v11236_v51 }
 0x67a   :  { %13639 = vmatpush2.bf16.msra.mxu0 %v17509_v0  ;;  %v11172_v44 = vld [vmem:[#allocation6 + $0x7a0] sm:$0xff] }
 0x67b   :  { %13640 = vmatprep.subr.bf16.mxu0 %v17502_v31  ;;  %v17654_v0 = vcombine.high %v11168_v49, %v11172_v44  ;;  %v11224_v31 = vld [vmem:[#allocation6 + $0x940] sm:$0xff]  ;;  %v17653_v32 = vcombine.low %v11168_v49, %v11172_v44 }
 0x67c   :  { %13664 = vmatpush1.bf16.msra.mxu1 %v17573_v18  ;;  %v11228_v18 = vld [vmem:[#allocation6 + $0x960] sm:$0xff] }
 0x67d   :  { %13665 = vmatprep.subr.bf16.mxu1 %v17566_v47  ;;  %v11160_v26 = vld [vmem:[#allocation6 + $0x740] sm:$0xff]  ;;  %v17717_v47 = vcombine.low %v11232_v57, %v11236_v51  ;;  %v17710_v7 = vcombine.high %v11224_v31, %v11228_v18 }
 0x67e   :  { %13641 = vmatpush2.bf16.msra.mxu0 %v17501_v53  ;;  %v11164_v42 = vld [vmem:[#allocation6 + $0x760] sm:$0xff] }
 0x67f   :  { %13642 = vmatprep.subr.bf16.mxu0 %v17494_v56  ;;  %v17646_v53 = vcombine.high %v11160_v26, %v11164_v42  ;;  %v11216_v56 = vld [vmem:[#allocation6 + $0x900] sm:$0xff]  ;;  %v17645_v54 = vcombine.low %v11160_v26, %v11164_v42 }
 0x680   :  { %13666 = vmatpush1.bf16.msra.mxu1 %v17565_v48  ;;  %v11220_v48 = vld [vmem:[#allocation6 + $0x920] sm:$0xff] }
 0x681   :  { %13667 = vmatprep.subr.bf16.mxu1 %v17558_v17  ;;  %v11152_v46 = vld [vmem:[#allocation6 + $0x700] sm:$0xff]  ;;  %v17709_v17 = vcombine.low %v11224_v31, %v11228_v18  ;;  %v17702_v11 = vcombine.high %v11216_v56, %v11220_v48  ;;  %v17701_v24 = vcombine.low %v11216_v56, %v11220_v48 }
 0x682   :  { %13643 = vmatpush2.bf16.msra.mxu0 %v17493_v22  ;;  %v11156_v61 = vld [vmem:[#allocation6 + $0x720] sm:$0xff] }
 0x683   :  { %13644 = vmatprep.subr.bf16.mxu0 %v17486_v14  ;;  %v17638_v22 = vcombine.high %v11152_v46, %v11156_v61  ;;  %v11208_v15 = vld [vmem:[#allocation6 + $0x8c0] sm:$0xff] }
 0x684   :  { %13668 = vmatpush1.bf16.msra.mxu1 %v17557_v59  ;;  %v11212_v14 = vld [vmem:[#allocation6 + $0x8e0] sm:$0xff] }
 0x685   :  { %13669 = vmatprep.subr.bf16.mxu1 %v17550_v19  ;;  %v21549_v10 = vpop.f32.mrf.mxu0  ;;  %v11144_v59 = vld [vmem:[#allocation6 + $0x6c0] sm:$0xff]  ;;  %v17637_v19 = vcombine.low %v11152_v46, %v11156_v61  ;;  %v17694_v39 = vcombine.high %v11208_v15, %v11212_v14 }
 0x686   :  { %13645 = vmatpush2.bf16.msra.mxu0 %v17485_v2  ;;  %v11148_v62 = vld [vmem:[#allocation6 + $0x6e0] sm:$0xff] }
 0x687   :  { %13646 = vmatprep.subr.bf16.mxu0 %v17478_v6  ;;  %v21551_v1 = vpop.f32.mrf.mxu0  ;;  %v17630_v23 = vcombine.high %v11144_v59, %v11148_v62  ;;  %v11200_v2 = vld [vmem:[#allocation6 + $0x880] sm:$0xff]  ;;  %v17629_v4 = vcombine.low %v11144_v59, %v11148_v62 }
 0x688   :  { %13670 = vmatpush1.bf16.msra.mxu1 %v17549_v8  ;;  %v11204_v9 = vld [vmem:[#allocation6 + $0x8a0] sm:$0xff] }
 0x689   :  { %13671 = vmatprep.subr.bf16.mxu1 %v17542_v43  ;;  %v10559_v16 = vpop.f32.mrf.mxu0  ;;  %v11136_v6 = vld [vmem:[#allocation6 + $0x680] sm:$0xff]  ;;  %v17693_v43 = vcombine.low %v11208_v15, %v11212_v14  ;;  %v17686_v55 = vcombine.high %v11200_v2, %v11204_v9 }
 0x68a   :  { %13647 = vmatpush2.bf16.msra.mxu0 %v17477_v50  ;;  %v11140_v8 = vld [vmem:[#allocation6 + $0x6a0] sm:$0xff] }
 0x68b   :  { %v10560_v28 = vpop.f32.mrf.mxu0  ;;  %13698 = vmatprep.subr.bf16.mxu0 %v17726_v38  ;;  %v17622_v45 = vcombine.high %v11136_v6, %v11140_v8  ;;  %v11192_v33 = vld [vmem:[#allocation6 + $0x840] sm:$0xff]  ;;  %v17685_v38 = vcombine.low %v11200_v2, %v11204_v9 }
 0x68c   :  { %13672 = vmatpush1.bf16.msra.mxu1 %v17541_v30  ;;  %v11196_v50 = vld [vmem:[#allocation6 + $0x860] sm:$0xff] }
 0x68d   :  { %13673 = vmatprep.subr.bf16.mxu1 %v17662_v5  ;;  %13649 = vmatmul.mubr.bf16.vlgmr.msra.gmra.mxu0 %v21553_v25  ;;  %v11128_v60 = vld [vmem:[#allocation6 + $0x640] sm:$0xff]  ;;  %v17621_v5 = vcombine.low %v11136_v6, %v11140_v8  ;;  %v17678_v57 = vcombine.high %v11192_v33, %v11196_v50  ;;  %v17677_v28 = vcombine.low %v11192_v33, %v11196_v50  ;;  %v21567_v50 = vld [vmem:[#allocation6 + $0x5c8] sm:$0xff] }
 0x68e   :  { %13699 = vmatpush1.bf16.msra.mxu0 %v17725_v37  ;;  %v11132_v30 = vld [vmem:[#allocation6 + $0x660] sm:$0xff] }
 0x68f   :  { %13700 = vmatprep.subr.bf16.mxu0 %v17718_v35  ;;  %v17614_v51 = vcombine.high %v11128_v60, %v11132_v30  ;;  %v11184_v16 = vld [vmem:[#allocation6 + $0x800] sm:$0xff] }
 0x690   :  { %13674 = vmatpush2.bf16.msra.mxu1 %v17661_v58  ;;  %v11188_v49 = vld [vmem:[#allocation6 + $0x820] sm:$0xff]  ;;  %v17613_v58 = vcombine.low %v11128_v60, %v11132_v30  ;;  %v21569_v60 = vld [vmem:[#allocation6 + $0x5e8] sm:$0xff] }
 0x691   :  { %13675 = vmatprep.subr.bf16.mxu1 %v17654_v0  ;;  %v11120_v44 = vld [vmem:[#allocation6 + $0x600] sm:$0xff]  ;;  %v17670_v35 = vcombine.high %v11184_v16, %v11188_v49 }
 0x692   :  { %13701 = vmatpush1.bf16.msra.mxu0 %v17717_v47  ;;  %v11124_v37 = vld [vmem:[#allocation6 + $0x620] sm:$0xff] }
 0x693   :  { %13702 = vmatprep.subr.bf16.mxu0 %v17710_v7  ;;  %v17606_v0 = vcombine.high %v11120_v44, %v11124_v37  ;;  %v11304_v31 = vld [vmem:[#allocation6 + $0xbc0] sm:$0xff] }
 0x694   :  { %13676 = vmatpush2.bf16.msra.mxu1 %v17653_v32  ;;  %v11308_v18 = vld [vmem:[#allocation6 + $0xbe0] sm:$0xff]  ;;  %v17669_v32 = vcombine.low %v11184_v16, %v11188_v49 }
 0x695   :  { %13677 = vmatprep.subr.bf16.mxu1 %v17646_v53  ;;  %v21558_v42 = vld [vmem:[#allocation6 + $0xdc0] sm:$0xff]  ;;  %v17605_v53 = vcombine.low %v11120_v44, %v11124_v37  ;;  %v17790_v56 = vcombine.high %v11304_v31, %v11308_v18 }
 0x696   :  { %13703 = vmatpush1.bf16.msra.mxu0 %v17709_v17  ;;  %v21560_v47 = vld [vmem:[#allocation6 + $0xde0] sm:$0xff] }
 0x697   :  { %13704 = vmatprep.subr.bf16.mxu0 %v17702_v11  ;;  %v17854_v46 = vcombine.high %v21558_v42, %v21560_v47  ;;  %v11296_v61 = vld [vmem:[#allocation6 + $0xb80] sm:$0xff]  ;;  %v17789_v11 = vcombine.low %v11304_v31, %v11308_v18  ;;  %v10882_v31 = vsub.s32 2, %v21518_v27  ;;  %v17853_v21 = vcombine.low %v21558_v42, %v21560_v47 }
 0x698   :  { %13678 = vmatpush2.bf16.msra.mxu1 %v17645_v54  ;;  %v11300_v17 = vld [vmem:[#allocation6 + $0xba0] sm:$0xff] }
 0x699   :  { %13679 = vmatprep.subr.bf16.mxu1 %v17638_v22  ;;  %v17782_v15 = vcombine.high %v11296_v61, %v11300_v17  ;;  %v11288_v14 = vld [vmem:[#allocation6 + $0xb40] sm:$0xff] }
 0x69a   :  { %13705 = vmatpush1.bf16.msra.mxu0 %v17701_v24  ;;  %v11292_v59 = vld [vmem:[#allocation6 + $0xb60] sm:$0xff] }
 0x69b   :  { %13706 = vmatprep.subr.bf16.mxu0 %v17694_v39  ;;  %v11280_v39 = vld [vmem:[#allocation6 + $0xb00] sm:$0xff]  ;;  %v17773_v9 = vcombine.low %v11288_v14, %v11292_v59 }
 0x69c   :  { %13680 = vmatpush2.bf16.msra.mxu1 %v17637_v19  ;;  %v17774_v19 = vcombine.high %v11288_v14, %v11292_v59  ;;  %v11264_v33 = vld [vmem:[#allocation6 + $0xa80] sm:$0xff] }
 0x69d   :  { %13681 = vmatprep.subr.bf16.mxu1 %v17630_v23  ;;  %v11284_v23 = vld [vmem:[#allocation6 + $0xb20] sm:$0xff] }
 0x69e   :  { %13707 = vmatpush1.bf16.msra.mxu0 %v17693_v43  ;;  %v17766_v8 = vcombine.high %v11280_v39, %v11284_v23  ;;  %v11272_v43 = vld [vmem:[#allocation6 + $0xac0] sm:$0xff] }
 0x69f   :  { %13708 = vmatprep.subr.bf16.mxu0 %v17686_v55  ;;  %v17765_v55 = vcombine.low %v11280_v39, %v11284_v23  ;;  %v11268_v30 = vld [vmem:[#allocation6 + $0xaa0] sm:$0xff] }
 0x6a0   :  { %13682 = vmatpush2.bf16.msra.mxu1 %v17629_v4  ;;  %v11276_v4 = vld [vmem:[#allocation6 + $0xae0] sm:$0xff]  ;;  %v17750_v49 = vcombine.high %v11264_v33, %v11268_v30 }
 0x6a1   :  { %13683 = vmatprep.subr.bf16.mxu1 %v17622_v45  ;;  %v17758_v45 = vcombine.high %v11272_v43, %v11276_v4  ;;  %v11256_v44 = vld [vmem:[#allocation6 + $0xa40] sm:$0xff] }
 0x6a2   :  { %13709 = vmatpush1.bf16.msra.mxu0 %v17685_v38  ;;  %v21571_v38 = vld [vmem:[#allocation6 + $0x1c8] sm:$0xff]  ;;  %v11260_v37 = vld [vmem:[#allocation6 + $0xa60] sm:$0xff] }
 0x6a3   :  { %13710 = vmatprep.subr.bf16.mxu0 %v17678_v57  ;;  %v17599_v57 = vcombine.low %v21567_v50, %v21569_v60  ;;  %v17741_v18 = vcombine.low %v11256_v44, %v11260_v37  ;;  %v11336_v47 = vld [vmem:[#allocation6 + $0xcc0] sm:$0xff] }
 0x6a4   :  { %13684 = vmatpush2.bf16.msra.mxu1 %v17621_v5  ;;  %v21573_v5 = vld [vmem:[#allocation6 + $0x1e8] sm:$0xff] }
 0x6a5   :  { %13685 = vmatprep.subr.bf16.mxu1 %v17614_v51  ;;  %v17757_v51 = vcombine.low %v11272_v43, %v11276_v4  ;;  %v17471_v16 = vcombine.low %v21571_v38, %v21573_v5  ;;  %v11344_v4 = vld [vmem:[#allocation6 + $0xd00] sm:$0xff] }
 0x6a6   :  { %v21556_v26 = vpop.f32.mrf.mxu1  ;;  %13711 = vmatpush1.bf16.msra.mxu0 %v17677_v28  ;;  %v17749_v28 = vcombine.low %v11264_v33, %v11268_v30  ;;  %v11340_v33 = vld [vmem:[#allocation6 + $0xce0] sm:$0xff] }
 0x6a7   :  { %13712 = vmatprep.subr.bf16.mxu0 %v17670_v35  ;;  %v11248_v35 = vld [vmem:[#allocation6 + $0xa00] sm:$0xff] }
 0x6a8   :  { %v10598_v7 = vpop.f32.mrf.mxu1  ;;  %13686 = vmatpush2.bf16.msra.mxu1 %v17613_v58  ;;  %v17742_v58 = vcombine.high %v11256_v44, %v11260_v37  ;;  %v11332_v44 = vld [vmem:[#allocation6 + $0xca0] sm:$0xff]  ;;  %v17821_v37 = vcombine.low %v11336_v47, %v11340_v33 }
 0x6a9   :  { %v21563_v48 = vadd.f32 %v10598_v7, %v21551_v1  ;;  %13687 = vmatprep.subr.bf16.mxu1 %v17606_v0  ;;  %v17781_v1 = vcombine.low %v11296_v61, %v11300_v17  ;;  %v11252_v0 = vld [vmem:[#allocation6 + $0xa20] sm:$0xff]  ;;  %v10597_v7 = vadd.f32 %v21556_v26, %v21549_v10 }
 0x6aa   :  { %v10600_v54 = vpop.f32.mrf.mxu1  ;;  %13713 = vmatpush1.bf16.msra.mxu0 %v17669_v32  ;;  %v17734_v32 = vcombine.high %v11248_v35, %v11252_v0  ;;  %v17733_v17 = vcombine.low %v11248_v35, %v11252_v0  ;;  %v11324_v35 = vld [vmem:[#allocation6 + $0xc60] sm:$0xff] }
 0x6ab   :  { %13714 = vmatprep.subr.bf16.mxu0 %v17790_v56  ;;  %v10883_v56 = vrot.slane %v21525_v29, %v10882_v31 }
 0x6ac   :  { %v10601_v22 = vpop.f32.mrf.mxu1  ;;  %13688 = vmatpush2.bf16.msra.mxu1 %v17605_v53  ;;  %v10886_v53 = vsub.s32 3, %v21518_v27 }
 0x6ad   :  { %13739 = vmatprep.subr.bf16.mxu1 %v17854_v46 }
 0x6ae   :  { %v10678_v62 = vpop.f32.mrf.mxu1  ;;  %13715 = vmatpush2.bf16.msra.mxu0 %v17789_v11  ;;  %v17600_v11 = vcombine.high %v21567_v50, %v21569_v60  ;;  %v10887_v10 = vrot.slane %v21525_v29, %v10886_v53  ;;  %v10961_v50 = vld [vmem:[#allocation6 + $0x108] sm:$0xff] }
 0x6af   :  { %13716 = vmatprep.subr.bf16.mxu0 %v17782_v15  ;;  %v10909_v15 = vadd.f32 %v10883_v56, %v10865_v12  ;;  %v11352_v12 = vld [vmem:[#allocation6 + $0xd40] sm:$0xff]  ;;  %v10965_v60 = vld [vmem:[#allocation6 + $0x128] sm:$0xff] }
 0x6b0   :  { %v10680_v24 = vpop.f32.mrf.mxu1 }
 0x6b1   :  { %v10916_v23 = vmax.f32 %v10909_v15, 0.0 }
 0x6b2   :  { %v10682_v2 = vpop.f32.mrf.mxu1  ;;  %13717 = vmatpush2.bf16.msra.mxu0 %v17781_v1 }
 0x6b3   :  { %13718 = vmatprep.subr.bf16.mxu0 %v17774_v19  ;;  %v21604_v40 = vpack.c.bf16 %v10916_v23, %v10916_v23 }
 0x6b4   :  { %v10683_v6 = vpop.f32.mrf.mxu1 }
 0x6b6   :  { %13719 = vmatpush2.bf16.msra.mxu0 %v17773_v9  ;;  %v11360_v9 = vld [vmem:[#allocation6 + $0xd80] sm:$0xff] }
 0x6b7   :  { %13720 = vmatprep.subr.bf16.mxu0 %v17766_v8 }
 0x6ba   :  { %13721 = vmatpush2.bf16.msra.mxu0 %v17765_v55  ;;  %v11348_v55 = vld [vmem:[#allocation6 + $0xd20] sm:$0xff] }
 0x6bb   :  { %13722 = vmatprep.subr.bf16.mxu0 %v17758_v45  ;;  %v17830_v42 = vcombine.high %v11344_v4, %v11348_v55  ;;  %v17829_v30 = vcombine.low %v11344_v4, %v11348_v55 }
 0x6be   :  { %13723 = vmatpush2.bf16.msra.mxu0 %v17757_v51  ;;  %v17822_v51 = vcombine.high %v11336_v47, %v11340_v33 }
 0x6bf   :  { %13724 = vmatprep.subr.bf16.mxu0 %v17750_v49  ;;  %v11328_v49 = vld [vmem:[#allocation6 + $0xc80] sm:$0xff] }
 0x6c0   :  { %v17813_v0 = vcombine.low %v11328_v49, %v11332_v44 }
 0x6c2   :  { %13725 = vmatpush2.bf16.msra.mxu0 %v17749_v28  ;;  %v17814_v28 = vcombine.high %v11328_v49, %v11332_v44 }
 0x6c3   :  { %13726 = vmatprep.subr.bf16.mxu0 %v17742_v58  ;;  %v11320_v58 = vld [vmem:[#allocation6 + $0xc40] sm:$0xff] }
 0x6c4   :  { %v17805_v56 = vcombine.low %v11320_v58, %v11324_v35 }
 0x6c5   :  { %v10637_v46 = vpop.f32.mrf.mxu0 }
 0x6c6   :  { %v10638_v61 = vadd.f32 %v10637_v46, %v10597_v7  ;;  %13727 = vmatpush2.bf16.msra.mxu0 %v17741_v18  ;;  %v17806_v18 = vcombine.high %v11320_v58, %v11324_v35  ;;  %v11316_v7 = vld [vmem:[#allocation6 + $0xc20] sm:$0xff] }
 0x6c7   :  { %v10639_v54 = vpop.f32.mrf.mxu0  ;;  %13728 = vmatprep.subr.bf16.mxu0 %v17734_v32  ;;  %v11312_v32 = vld [vmem:[#allocation6 + $0xc00] sm:$0xff] }
 0x6c8   :  { %v10679_v22 = vadd.f32 %v10678_v62, %v10638_v61  ;;  %v10640_v26 = vadd.f32 %v10639_v54, %v21563_v48  ;;  %v11364_v48 = vld [vmem:[#allocation6 + $0xda0] sm:$0xff]  ;;  %v17798_v46 = vcombine.high %v11312_v32, %v11316_v7  ;;  %v17797_v61 = vcombine.low %v11312_v32, %v11316_v7  ;;  %v11109_v32 = vld [vmem:[#allocation6 + $0x5a8] sm:$0xff] }
 0x6c9   :  { %v10641_v14 = vpop.f32.mrf.mxu0  ;;  %v17845_v8 = vcombine.low %v11360_v9, %v11364_v48  ;;  %v17472_v54 = vcombine.high %v21571_v38, %v21573_v5  ;;  %v17448_v5 = vcombine.high %v10961_v50, %v10965_v60 }
 0x6ca   :  { %v10866_v59 = vmax.f32 %v21426_v34, %v10679_v22  ;;  %v21596_v1 = vadd.f32 %v10680_v24, %v10640_v26  ;;  %13729 = vmatpush2.bf16.msra.mxu0 %v17733_v17  ;;  %v17846_v34 = vcombine.high %v11360_v9, %v11364_v48  ;;  %v11356_v24 = vld [vmem:[#allocation6 + $0xd60] sm:$0xff]  ;;  %v10890_v9 = vsub.s32 4, %v21518_v27 }
 0x6cb   :  { %v10642_v19 = vpop.f32.mrf.mxu0  ;;  %13821 = vmatprep.subr.bf16.mxu0 %v17600_v11  ;;  %v17838_v43 = vcombine.high %v11352_v12, %v11356_v24  ;;  %v17837_v45 = vcombine.low %v11352_v12, %v11356_v24 }
 0x6cc   :  { %v10910_v39 = vadd.f32 %v10887_v10, %v10866_v59  ;;  %v10867_v62 = vmax.f32 %v21451_v36, %v21596_v1  ;;  %v10977_v36 = vld [vmem:[#allocation6 + $0x188] sm:$0xff] }
 0x6cd   :  { %v10981_v1 = vld [vmem:[#allocation6 + $0x1a8] sm:$0xff] }
 0x6ce   :  { %v10917_v2 = vmax.f32 %v10910_v39, 0.0 }
 0x6d0   :  { %v21600_v6 = vpack.c.bf16 %v10917_v2, %v10917_v2 }
 0x6d2   :  { %13689 = vmatprep.mubr.bf16.mxu1 %v21600_v6 }
 0x6d3   :  { %13690 = vmatmul.mubr.bf16.vlgmr.msra.gmra.mxu1 %v21604_v40 }
 0x6d4   :  { %13740 = vmatpush1.bf16.msra.mxu1 %v17853_v21  ;;  %13771 = vmatprep.mubr.bf16.mxu1 %v20933_v13  ;;  %v10894_v21 = vsub.s32 5, %v21518_v27 }
 0x6d5   :  { %13741 = vmatprep.subr.bf16.mxu1 %v17846_v34  ;;  %v10891_v34 = vrot.slane %v21525_v29, %v10890_v9  ;;  %v17447_v9 = vcombine.low %v10961_v50, %v10965_v60  ;;  %v11173_v50 = vld [vmem:[#allocation6 + $0x7a8] sm:$0xff] }
 0x6d6   :  { %v11041_v60 = vld [vmem:[#allocation6 + $0x388] sm:$0xff] }
 0x6d7   :  { %v10911_v47 = vadd.f32 %v10891_v34, %v10867_v62  ;;  %v11073_v34 = vld [vmem:[#allocation6 + $0x488] sm:$0xff] }
 0x6d8   :  { %13742 = vmatpush1.bf16.msra.mxu1 %v17845_v8 }
 0x6d9   :  { %13743 = vmatprep.subr.bf16.mxu1 %v17838_v43  ;;  %v10898_v43 = vsub.s32 6, %v21518_v27  ;;  %v10918_v58 = vmax.f32 %v10911_v47, 0.0  ;;  %v11069_v47 = vld [vmem:[#allocation6 + $0x468] sm:$0xff] }
 0x6da   :  { %v20488_v27 = vld [vmem:[#allocation21 + $0x38] sm:$0xff]  }
 0x6db   :  { %v10899_v49 = vrot.slane %v21525_v29, %v10898_v43  ;;  %v21624_v62 = vpack.c.bf16 %v10918_v58, %v10918_v58  ;;  %v11057_v58 = vld [vmem:[#allocation6 + $0x408] sm:$0xff] }
 0x6dc   :  { %13744 = vmatpush1.bf16.msra.mxu1 %v17837_v45  ;;  %v10895_v45 = vrot.slane %v21525_v29, %v10894_v21 }
 0x6dd   :  { %13745 = vmatprep.subr.bf16.mxu1 %v17830_v42 }
 0x6e0   :  { %13746 = vmatpush1.bf16.msra.mxu1 %v17829_v30 }
 0x6e1   :  { %13747 = vmatprep.subr.bf16.mxu1 %v17822_v51 }
 0x6e4   :  { %13748 = vmatpush1.bf16.msra.mxu1 %v17821_v37 }
 0x6e5   :  { %13749 = vmatprep.subr.bf16.mxu1 %v17814_v28 }
 0x6e8   :  { %13750 = vmatpush1.bf16.msra.mxu1 %v17813_v0 }
 0x6e9   :  { %13751 = vmatprep.subr.bf16.mxu1 %v17806_v18  ;;  %v11105_v18 = vld [vmem:[#allocation6 + $0x588] sm:$0xff] }
 0x6ea   :  { %v17592_v29 = vcombine.high %v11105_v18, %v11109_v32 }
 0x6ec   :  { %13752 = vmatpush1.bf16.msra.mxu1 %v17805_v56 }
 0x6ed   :  { %13753 = vmatprep.subr.bf16.mxu1 %v17798_v46  ;;  %v11097_v46 = vld [vmem:[#allocation6 + $0x548] sm:$0xff] }
 0x6ee   :  { %v10719_v17 = vpop.f32.mrf.mxu1 }
 0x6f0   :  { %v10721_v11 = vpop.f32.mrf.mxu1  ;;  %13754 = vmatpush1.bf16.msra.mxu1 %v17797_v61  ;;  %v11101_v61 = vld [vmem:[#allocation6 + $0x568] sm:$0xff] }
 0x6f1   :  { %13780 = vmatprep.subr.bf16.mxu1 %v17472_v54  ;;  %v10973_v54 = vld [vmem:[#allocation6 + $0x168] sm:$0xff] }
 0x6f2   :  { %v10723_v22 = vpop.f32.mrf.mxu1 }
 0x6f3   :  { %v17463_v22 = vcombine.low %v10977_v36, %v10981_v1 }
 0x6f4   :  { %v10724_v10 = vpop.f32.mrf.mxu1 }
 0x6f5   :  { %v17584_v10 = vcombine.high %v11097_v46, %v11101_v61 }
 0x705   :  { %v10760_v26 = vpop.f32.mrf.mxu0 }
 0x706   :  { %v10761_v48 = vadd.f32 %v10760_v26, %v10719_v17  ;;  %v10969_v17 = vld [vmem:[#allocation6 + $0x148] sm:$0xff] }
 0x707   :  { %v10762_v15 = vpop.f32.mrf.mxu0  ;;  %v17456_v26 = vcombine.high %v10969_v17, %v10973_v54 }
 0x708   :  { %v10763_v24 = vadd.f32 %v10762_v15, %v10721_v11  ;;  %v17591_v11 = vcombine.low %v11105_v18, %v11109_v32  ;;  %v11089_v15 = vld [vmem:[#allocation6 + $0x508] sm:$0xff] }
 0x709   :  { %v10764_v14 = vpop.f32.mrf.mxu0  ;;  %v10929_v18 = vld [vmem:[#allocation6 + $0x8] sm:$0xff] }
 0x70a   :  { %v11093_v14 = vld [vmem:[#allocation6 + $0x528] sm:$0xff] }
 0x70b   :  { %v10765_v59 = vpop.f32.mrf.mxu0  ;;  %v17576_v38 = vcombine.high %v11089_v15, %v11093_v14  ;;  %v10933_v32 = vld [vmem:[#allocation6 + $0x28] sm:$0xff] }
 0x70c   :  { %v17455_v59 = vcombine.low %v10969_v17, %v10973_v54  ;;  %v11049_v54 = vld [vmem:[#allocation6 + $0x3c8] sm:$0xff] }
 0x70d   :  { %v10842_v19 = vpop.f32.mrf.mxu0 }
 0x70f   :  { %v10844_v39 = vpop.f32.mrf.mxu0 }
 0x711   :  { %v10846_v23 = vpop.f32.mrf.mxu0 }
 0x712   :  { %v10957_v23 = vld [vmem:[#allocation6 + $0xe8] sm:$0xff] }
 0x713   :  { %v10847_v2 = vpop.f32.mrf.mxu0 }
 0x714   :  { %v17575_v2 = vcombine.low %v11089_v15, %v11093_v14  ;;  %v11169_v14 = vld [vmem:[#allocation6 + $0x788] sm:$0xff] }
 0x72e   :  { %v10801_v12 = vpop.f32.mrf.mxu1 }
 0x72f   :  { %v10802_v8 = vadd.f32 %v10801_v12, %v10761_v48  ;;  %v11077_v12 = vld [vmem:[#allocation6 + $0x4a8] sm:$0xff] }
 0x730   :  { %v10803_v4 = vpop.f32.mrf.mxu1 }
 0x731   :  { %v10843_v55 = vadd.f32 %v10842_v19, %v10802_v8  ;;  %v10804_v42 = vadd.f32 %v10803_v4, %v10763_v24  ;;  %v11085_v19 = vld [vmem:[#allocation6 + $0x4e8] sm:$0xff] }
 0x732   :  { %v10805_v33 = vpop.f32.mrf.mxu1  ;;  %v10945_v24 = vld [vmem:[#allocation6 + $0x88] sm:$0xff] }
 0x733   :  { %v10868_v30 = vmax.f32 %v21457_v63, %v10843_v55  ;;  %v10845_v51 = vadd.f32 %v10844_v39, %v10804_v42  ;;  %v10953_v39 = vld [vmem:[#allocation6 + $0xc8] sm:$0xff]  ;;  %v17560_v55 = vcombine.high %v11073_v34, %v11077_v12 }
 0x734   :  { %v10806_v44 = vpop.f32.mrf.mxu1  ;;  %v17440_v21 = vcombine.high %v10953_v39, %v10957_v23  ;;  %v10949_v8 = vld [vmem:[#allocation6 + $0xa8] sm:$0xff]  ;;  %v17439_v4 = vcombine.low %v10953_v39, %v10957_v23 }
 0x735   :  { %v10912_v37 = vadd.f32 %v10895_v45, %v10868_v30  ;;  %v10869_v28 = vmax.f32 %v21493_v20, %v10845_v51  ;;  %v17464_v20 = vcombine.high %v10977_v36, %v10981_v1  ;;  %v17432_v45 = vcombine.high %v10945_v24, %v10949_v8  ;;  %v11065_v42 = vld [vmem:[#allocation6 + $0x448] sm:$0xff] }
 0x736   :  { %v10937_v33 = vld [vmem:[#allocation6 + $0x48] sm:$0xff]  ;;  %v17559_v51 = vcombine.low %v11073_v34, %v11077_v12 }
 0x737   :  { %v10919_v35 = vmax.f32 %v10912_v37, 0.0  ;;  %v10913_v0 = vadd.f32 %v10899_v49, %v10869_v28  ;;  %v10941_v30 = vld [vmem:[#allocation6 + $0x68] sm:$0xff]  ;;  %v17431_v49 = vcombine.low %v10945_v24, %v10949_v8  ;;  %v17552_v37 = vcombine.high %v11065_v42, %v11069_v47 }
 0x738   :  { %v17424_v28 = vcombine.high %v10937_v33, %v10941_v30  ;;  %v17423_v36 = vcombine.low %v10937_v33, %v10941_v30  ;;  %v11165_v39 = vld [vmem:[#allocation6 + $0x768] sm:$0xff] }
 0x739   :  { %v10920_v7 = vmax.f32 %v10913_v0, 0.0  ;;  %v21622_v56 = vpack.c.bf16 %v10919_v35, %v10919_v35  ;;  %v11061_v35 = vld [vmem:[#allocation6 + $0x428] sm:$0xff] }
 0x73a   :  { %v11033_v23 = vld [vmem:[#allocation6 + $0x348] sm:$0xff] }
 0x73b   :  { %v21626_v63 = vpack.c.bf16 %v10920_v7, %v10920_v7  ;;  %13730 = vmatprep.mubr.bf16.mxu0 %v21622_v56  ;;  %v17551_v7 = vcombine.low %v11065_v42, %v11069_v47  ;;  %v11153_v12 = vld [vmem:[#allocation6 + $0x708] sm:$0xff] }
 0x73c   :  { %13731 = vmatmul.mubr.bf16.vlgmr.msra.gmra.mxu0 %v21624_v62  ;;  %v11157_v24 = vld [vmem:[#allocation6 + $0x728] sm:$0xff] }
 0x73d   :  { %13822 = vmatpush1.bf16.msra.mxu0 %v17599_v57  ;;  %13772 = vmatmul.mubr.bf16.vlgmr.msra.gmra.mxu1 %v21626_v63  ;;  %v17583_v57 = vcombine.low %v11097_v46, %v11101_v61  ;;  %v17416_v46 = vcombine.high %v10929_v18, %v10933_v32  ;;  %v11177_v61 = vld [vmem:[#allocation6 + $0x7c8] sm:$0xff] }
 0x73e   :  { %13781 = vmatpush1.bf16.msra.mxu1 %v17471_v16  ;;  %13853 = vmatprep.mubr.bf16.mxu0 %v21600_v6  ;;  %v11081_v16 = vld [vmem:[#allocation6 + $0x4c8] sm:$0xff] }
 0x73f   :  { %13812 = vmatprep.mubr.bf16.mxu1 %v21538_v52  ;;  %13823 = vmatprep.subr.bf16.mxu0 %v17592_v29  ;;  %v17568_v48 = vcombine.high %v11081_v16, %v11085_v19  ;;  %v17567_v43 = vcombine.low %v11081_v16, %v11085_v19  ;;  %v17544_v29 = vcombine.high %v11057_v58, %v11061_v35  ;;  %v11161_v19 = vld [vmem:[#allocation6 + $0x748] sm:$0xff] }
 0x740   :  { %13782 = vmatprep.subr.bf16.mxu1 %v17464_v20  ;;  %v11181_v20 = vld [vmem:[#allocation6 + $0x7e8] sm:$0xff] }
 0x741   :  { %13824 = vmatpush1.bf16.msra.mxu0 %v17591_v11  ;;  %v11053_v11 = vld [vmem:[#allocation6 + $0x3e8] sm:$0xff] }
 0x742   :  { %13783 = vmatpush1.bf16.msra.mxu1 %v17463_v22  ;;  %13825 = vmatprep.subr.bf16.mxu0 %v17584_v10  ;;  %v17543_v22 = vcombine.low %v11057_v58, %v11061_v35  ;;  %v17415_v10 = vcombine.low %v10929_v18, %v10933_v32  ;;  %v17536_v15 = vcombine.high %v11049_v54, %v11053_v11  ;;  %v11025_v8 = vld [vmem:[#allocation6 + $0x308] sm:$0xff] }
 0x743   :  { %13784 = vmatprep.subr.bf16.mxu1 %v17456_v26  ;;  %v17664_v26 = vcombine.high %v11177_v61, %v11181_v20  ;;  %v11145_v47 = vld [vmem:[#allocation6 + $0x6c8] sm:$0xff] }
 0x744   :  { %v11149_v33 = vld [vmem:[#allocation6 + $0x6e8] sm:$0xff] }
 0x745   :  { %13826 = vmatpush1.bf16.msra.mxu0 %v17583_v57  ;;  %v11045_v57 = vld [vmem:[#allocation6 + $0x3a8] sm:$0xff] }
 0x746   :  { %13785 = vmatpush1.bf16.msra.mxu1 %v17455_v59  ;;  %13827 = vmatprep.subr.bf16.mxu0 %v17576_v38  ;;  %v17663_v59 = vcombine.low %v11177_v61, %v11181_v20  ;;  %v17535_v38 = vcombine.low %v11049_v54, %v11053_v11  ;;  %v17528_v16 = vcombine.high %v11041_v60, %v11045_v57  ;;  %v11017_v30 = vld [vmem:[#allocation6 + $0x2c8] sm:$0xff] }
 0x747   :  { %13786 = vmatprep.subr.bf16.mxu1 %v17448_v5  ;;  %v17656_v5 = vcombine.high %v11169_v14, %v11173_v50  ;;  %v11137_v35 = vld [vmem:[#allocation6 + $0x688] sm:$0xff] }
 0x748   :  { %v11141_v18 = vld [vmem:[#allocation6 + $0x6a8] sm:$0xff] }
 0x749   :  { %13828 = vmatpush1.bf16.msra.mxu0 %v17575_v2  ;;  %v11037_v2 = vld [vmem:[#allocation6 + $0x368] sm:$0xff]  ;;  %v17623_v11 = vcombine.low %v11137_v35, %v11141_v18 }
 0x74a   :  { %13787 = vmatpush1.bf16.msra.mxu1 %v17447_v9  ;;  %13829 = vmatprep.subr.bf16.mxu0 %v17568_v48  ;;  %v17655_v9 = vcombine.low %v11169_v14, %v11173_v50  ;;  %v17527_v48 = vcombine.low %v11041_v60, %v11045_v57  ;;  %v17520_v34 = vcombine.high %v11033_v23, %v11037_v2  ;;  %v11009_v32 = vld [vmem:[#allocation6 + $0x288] sm:$0xff] }
 0x74b   :  { %13788 = vmatprep.subr.bf16.mxu1 %v17440_v21  ;;  %v17648_v21 = vcombine.high %v11161_v19, %v11165_v39  ;;  %v11129_v61 = vld [vmem:[#allocation6 + $0x648] sm:$0xff] }
 0x74c   :  { %v11133_v20 = vld [vmem:[#allocation6 + $0x668] sm:$0xff] }
 0x74d   :  { %13830 = vmatpush1.bf16.msra.mxu0 %v17567_v43  ;;  %v21639_v44 = vpop.f32.mrf.mxu0  ;;  %v11029_v43 = vld [vmem:[#allocation6 + $0x328] sm:$0xff]  ;;  %v17615_v57 = vcombine.low %v11129_v61, %v11133_v20 }
 0x74e   :  { %13789 = vmatpush1.bf16.msra.mxu1 %v17439_v4  ;;  %13831 = vmatprep.subr.bf16.mxu0 %v17560_v55  ;;  %v17647_v4 = vcombine.low %v11161_v19, %v11165_v39  ;;  %v17519_v55 = vcombine.low %v11033_v23, %v11037_v2  ;;  %v17512_v42 = vcombine.high %v11025_v8, %v11029_v43  ;;  %v11005_v54 = vld [vmem:[#allocation6 + $0x268] sm:$0xff] }
 0x74f   :  { %13790 = vmatprep.subr.bf16.mxu1 %v17432_v45  ;;  %v21641_v0 = vpop.f32.mrf.mxu0  ;;  %v17640_v45 = vcombine.high %v11153_v12, %v11157_v24  ;;  %v11125_v14 = vld [vmem:[#allocation6 + $0x628] sm:$0xff] }
 0x750   :  { %v10993_v50 = vld [vmem:[#allocation6 + $0x208] sm:$0xff] }
 0x751   :  { %13832 = vmatpush1.bf16.msra.mxu0 %v17559_v51  ;;  %v13654_v1 = vpop.f32.mrf.mxu0  ;;  %v11021_v51 = vld [vmem:[#allocation6 + $0x2e8] sm:$0xff] }
 0x752   :  { %13791 = vmatpush1.bf16.msra.mxu1 %v17431_v49  ;;  %13833 = vmatprep.subr.bf16.mxu0 %v17552_v37  ;;  %v17639_v49 = vcombine.low %v11153_v12, %v11157_v24  ;;  %v17511_v37 = vcombine.low %v11025_v8, %v11029_v43  ;;  %v17504_v58 = vcombine.high %v11017_v30, %v11021_v51  ;;  %v10997_v60 = vld [vmem:[#allocation6 + $0x228] sm:$0xff] }
 0x753   :  { %13792 = vmatprep.subr.bf16.mxu1 %v17424_v28  ;;  %v13655_v17 = vpop.f32.mrf.mxu0  ;;  %v17632_v28 = vcombine.high %v11145_v47, %v11149_v33  ;;  %v17503_v1 = vcombine.low %v11017_v30, %v11021_v51  ;;  %v11373_v19 = vld [vmem:[#allocation6 + $0xde8] sm:$0xff] }
 0x754   :  { %v11001_v17 = vld [vmem:[#allocation6 + $0x248] sm:$0xff] }
 0x755   :  { %13834 = vmatpush1.bf16.msra.mxu0 %v17551_v7  ;;  %v11013_v7 = vld [vmem:[#allocation6 + $0x2a8] sm:$0xff] }
 0x756   :  { %13793 = vmatpush1.bf16.msra.mxu1 %v17423_v36  ;;  %13835 = vmatprep.subr.bf16.mxu0 %v17544_v29  ;;  %v17631_v36 = vcombine.low %v11145_v47, %v11149_v33  ;;  %v17624_v29 = vcombine.high %v11137_v35, %v11141_v18  ;;  %v11241_v39 = vld [vmem:[#allocation6 + $0x9c8] sm:$0xff] }
 0x757   :  { %13794 = vmatprep.subr.bf16.mxu1 %v17416_v46  ;;  %v17496_v46 = vcombine.high %v11009_v32, %v11013_v7  ;;  %v11245_v23 = vld [vmem:[#allocation6 + $0x9e8] sm:$0xff] }
 0x758   :  { %v11365_v12 = vld [vmem:[#allocation6 + $0xda8] sm:$0xff] }
 0x759   :  { %13836 = vmatpush1.bf16.msra.mxu0 %v17543_v22  ;;  %v17495_v22 = vcombine.low %v11009_v32, %v11013_v7  ;;  %v11233_v24 = vld [vmem:[#allocation6 + $0x988] sm:$0xff] }
 0x75a   :  { %13795 = vmatpush1.bf16.msra.mxu1 %v17415_v10  ;;  %13837 = vmatprep.subr.bf16.mxu0 %v17664_v26  ;;  %v17616_v10 = vcombine.high %v11129_v61, %v11133_v20  ;;  %v17488_v26 = vcombine.high %v11001_v17, %v11005_v54  ;;  %v11237_v8 = vld [vmem:[#allocation6 + $0x9a8] sm:$0xff] }
 0x75b   :  { %13796 = vmatprep.subr.bf16.mxu1 %v17536_v15  ;;  %v11121_v15 = vld [vmem:[#allocation6 + $0x608] sm:$0xff] }
 0x75c   :  { %v17607_v2 = vcombine.low %v11121_v15, %v11125_v14  ;;  %v11357_v47 = vld [vmem:[#allocation6 + $0xd68] sm:$0xff] }
 0x75d   :  { %13838 = vmatpush2.bf16.msra.mxu0 %v17663_v59  ;;  %v17487_v59 = vcombine.low %v11001_v17, %v11005_v54  ;;  %v11225_v33 = vld [vmem:[#allocation6 + $0x948] sm:$0xff] }
 0x75e   :  { %13797 = vmatpush2.bf16.msra.mxu1 %v17535_v38  ;;  %13839 = vmatprep.subr.bf16.mxu0 %v17656_v5  ;;  %v17608_v38 = vcombine.high %v11121_v15, %v11125_v14  ;;  %v17480_v5 = vcombine.high %v10993_v50, %v10997_v60  ;;  %v11229_v30 = vld [vmem:[#allocation6 + $0x968] sm:$0xff] }
 0x75f   :  { %13798 = vmatprep.subr.bf16.mxu1 %v17528_v16  ;;  %v11369_v16 = vld [vmem:[#allocation6 + $0xdc8] sm:$0xff] }
 0x760   :  { %v17855_v43 = vcombine.low %v11369_v16, %v11373_v19  ;;  %v11349_v35 = vld [vmem:[#allocation6 + $0xd28] sm:$0xff] }
 0x761   :  { %13840 = vmatpush2.bf16.msra.mxu0 %v17655_v9  ;;  %v17479_v9 = vcombine.low %v10993_v50, %v10997_v60  ;;  %v11217_v18 = vld [vmem:[#allocation6 + $0x908] sm:$0xff] }
 0x762   :  { %13799 = vmatpush2.bf16.msra.mxu1 %v17527_v48  ;;  %13841 = vmatprep.subr.bf16.mxu0 %v17648_v21  ;;  %v17856_v48 = vcombine.high %v11369_v16, %v11373_v19  ;;  %v17728_v21 = vcombine.high %v11241_v39, %v11245_v23  ;;  %v11221_v32 = vld [vmem:[#allocation6 + $0x928] sm:$0xff] }
 0x763   :  { %13800 = vmatprep.subr.bf16.mxu1 %v17520_v34  ;;  %v11361_v34 = vld [vmem:[#allocation6 + $0xd88] sm:$0xff] }
 0x764   :  { %v17847_v51 = vcombine.low %v11361_v34, %v11365_v12  ;;  %v11341_v61 = vld [vmem:[#allocation6 + $0xce8] sm:$0xff] }
 0x765   :  { %13842 = vmatpush2.bf16.msra.mxu0 %v17647_v4  ;;  %v17727_v4 = vcombine.low %v11241_v39, %v11245_v23  ;;  %v11209_v20 = vld [vmem:[#allocation6 + $0x8c8] sm:$0xff] }
 0x766   :  { %13801 = vmatpush2.bf16.msra.mxu1 %v17519_v55  ;;  %13843 = vmatprep.subr.bf16.mxu0 %v17640_v45  ;;  %v17848_v55 = vcombine.high %v11361_v34, %v11365_v12  ;;  %v17720_v45 = vcombine.high %v11233_v24, %v11237_v8  ;;  %v11213_v17 = vld [vmem:[#allocation6 + $0x8e8] sm:$0xff] }
 0x767   :  { %13802 = vmatprep.subr.bf16.mxu1 %v17512_v42  ;;  %v11353_v42 = vld [vmem:[#allocation6 + $0xd48] sm:$0xff] }
 0x768   :  { %v17839_v7 = vcombine.low %v11353_v42, %v11357_v47  ;;  %v11333_v15 = vld [vmem:[#allocation6 + $0xca8] sm:$0xff] }
 0x769   :  { %13844 = vmatpush2.bf16.msra.mxu0 %v17639_v49  ;;  %v17719_v49 = vcombine.low %v11233_v24, %v11237_v8  ;;  %v11201_v14 = vld [vmem:[#allocation6 + $0x888] sm:$0xff] }
 0x76a   :  { %13803 = vmatpush2.bf16.msra.mxu1 %v17511_v37  ;;  %13845 = vmatprep.subr.bf16.mxu0 %v17632_v28  ;;  %v17840_v37 = vcombine.high %v11353_v42, %v11357_v47  ;;  %v17712_v28 = vcombine.high %v11225_v33, %v11229_v30  ;;  %v11205_v50 = vld [vmem:[#allocation6 + $0x8a8] sm:$0xff]  ;;  %v10990_v42 = vld [vmem:[#allocation6 + $0x1f0] sm:$0xff] }
 0x76b   :  { %13804 = vmatprep.subr.bf16.mxu1 %v17504_v58  ;;  %v11345_v58 = vld [vmem:[#allocation6 + $0xd08] sm:$0xff] }
 0x76c   :  { %v17831_v54 = vcombine.low %v11345_v58, %v11349_v35  ;;  %v11325_v16 = vld [vmem:[#allocation6 + $0xc68] sm:$0xff] }
 0x76d   :  { %13846 = vmatpush2.bf16.msra.mxu0 %v17631_v36  ;;  %v17711_v36 = vcombine.low %v11225_v33, %v11229_v30  ;;  %v11193_v19 = vld [vmem:[#allocation6 + $0x848] sm:$0xff] }
 0x76e   :  { %13805 = vmatpush2.bf16.msra.mxu1 %v17503_v1  ;;  %13847 = vmatprep.subr.bf16.mxu0 %v17624_v29  ;;  %v17832_v1 = vcombine.high %v11345_v58, %v11349_v35  ;;  %v17704_v29 = vcombine.high %v11217_v18, %v11221_v32  ;;  %v11197_v39 = vld [vmem:[#allocation6 + $0x868] sm:$0xff]  ;;  %v10978_v35 = vld [vmem:[#allocation6 + $0x190] sm:$0xff] }
 0x76f   :  { %13806 = vmatprep.subr.bf16.mxu1 %v17496_v46  ;;  %v11337_v46 = vld [vmem:[#allocation6 + $0xcc8] sm:$0xff] }
 0x770   :  { %v17823_v60 = vcombine.low %v11337_v46, %v11341_v61  ;;  %v11317_v34 = vld [vmem:[#allocation6 + $0xc28] sm:$0xff] }
 0x771   :  { %13848 = vmatpush2.bf16.msra.mxu0 %v17623_v11  ;;  %v17703_v11 = vcombine.low %v11217_v18, %v11221_v32  ;;  %v11185_v12 = vld [vmem:[#allocation6 + $0x808] sm:$0xff]  ;;  %v10982_v18 = vld [vmem:[#allocation6 + $0x1b0] sm:$0xff] }
 0x772   :  { %13807 = vmatpush2.bf16.msra.mxu1 %v17495_v22  ;;  %13849 = vmatprep.subr.bf16.mxu0 %v17616_v10  ;;  %v17824_v22 = vcombine.high %v11337_v46, %v11341_v61  ;;  %v17696_v10 = vcombine.high %v11209_v20, %v11213_v17  ;;  %v11189_v24 = vld [vmem:[#allocation6 + $0x828] sm:$0xff]  ;;  %v17466_v61 = vcombine.high %v10978_v35, %v10982_v18 }
 0x773   :  { %13808 = vmatprep.subr.bf16.mxu1 %v17488_v26  ;;  %v11329_v26 = vld [vmem:[#allocation6 + $0xc88] sm:$0xff] }
 0x774   :  { %v17815_v23 = vcombine.low %v11329_v26, %v11333_v15  ;;  %v11305_v33 = vld [vmem:[#allocation6 + $0xbc8] sm:$0xff] }
 0x775   :  { %13850 = vmatpush2.bf16.msra.mxu0 %v17615_v57  ;;  %v17695_v57 = vcombine.low %v11209_v20, %v11213_v17  ;;  %v11309_v30 = vld [vmem:[#allocation6 + $0xbe8] sm:$0xff]  ;;  %v10970_v17 = vld [vmem:[#allocation6 + $0x150] sm:$0xff] }
 0x776   :  { %13809 = vmatpush2.bf16.msra.mxu1 %v17487_v59  ;;  %13851 = vmatprep.subr.bf16.mxu0 %v17608_v38  ;;  %v17816_v59 = vcombine.high %v11329_v26, %v11333_v15  ;;  %v17688_v38 = vcombine.high %v11201_v14, %v11205_v50  ;;  %v17792_v58 = vcombine.high %v11305_v33, %v11309_v30 }
 0x777   :  { %13810 = vmatprep.subr.bf16.mxu1 %v17480_v5  ;;  %v11321_v5 = vld [vmem:[#allocation6 + $0xc48] sm:$0xff] }
 0x778   :  { %v17807_v8 = vcombine.low %v11321_v5, %v11325_v16 }
 0x779   :  { %13852 = vmatpush2.bf16.msra.mxu0 %v17607_v2  ;;  %v17687_v2 = vcombine.low %v11201_v14, %v11205_v50  ;;  %v10962_v50 = vld [vmem:[#allocation6 + $0x110] sm:$0xff] }
 0x77a   :  { %13811 = vmatpush2.bf16.msra.mxu1 %v17479_v9  ;;  %13903 = vmatprep.subr.bf16.mxu0 %v17856_v48  ;;  %v17808_v9 = vcombine.high %v11321_v5, %v11325_v16  ;;  %v17680_v48 = vcombine.high %v11193_v19, %v11197_v39 }
 0x77b   :  { %13862 = vmatprep.subr.bf16.mxu1 %v17728_v21  ;;  %v11313_v21 = vld [vmem:[#allocation6 + $0xc08] sm:$0xff] }
 0x77c   :  { %13854 = vmatmul.mubr.bf16.vlgmr.msra.gmra.mxu0 %v21604_v40 }
 0x77d   :  { %13813 = vmatmul.mubr.bf16.vlgmr.msra.gmra.mxu1 %v21553_v25  ;;  %13904 = vmatpush1.bf16.msra.mxu0 %v17855_v43  ;;  %v17679_v43 = vcombine.low %v11193_v19, %v11197_v39  ;;  %v10954_v39 = vld [vmem:[#allocation6 + $0xd0] sm:$0xff] }
 0x77e   :  { %13863 = vmatpush1.bf16.msra.mxu1 %v17727_v4  ;;  %13894 = vmatprep.mubr.bf16.mxu1 %v21622_v56  ;;  %v17800_v4 = vcombine.high %v11313_v21, %v11317_v34 }
 0x77f   :  { %13905 = vmatprep.subr.bf16.mxu0 %v17848_v55  ;;  %13864 = vmatprep.subr.bf16.mxu1 %v17720_v45  ;;  %v17672_v55 = vcombine.high %v11185_v12, %v11189_v24  ;;  %v10986_v45 = vld [vmem:[#allocation6 + $0x1d0] sm:$0xff] }
 0x780   :  { %13935 = vmatprep.mubr.bf16.mxu0 %v20933_v13 }
 0x781   :  { %13906 = vmatpush1.bf16.msra.mxu0 %v17847_v51  ;;  %v17799_v51 = vcombine.low %v11313_v21, %v11317_v34 }
 0x782   :  { %13865 = vmatpush1.bf16.msra.mxu1 %v17719_v49  ;;  %13907 = vmatprep.subr.bf16.mxu0 %v17840_v37  ;;  %v17671_v49 = vcombine.low %v11185_v12, %v11189_v24  ;;  %v10946_v24 = vld [vmem:[#allocation6 + $0x90] sm:$0xff] }
 0x783   :  { %13866 = vmatprep.subr.bf16.mxu1 %v17712_v28  ;;  %v17474_v28 = vcombine.high %v10986_v45, %v10990_v42 }
 0x785   :  { %13908 = vmatpush1.bf16.msra.mxu0 %v17839_v7  ;;  %v11297_v7 = vld [vmem:[#allocation6 + $0xb88] sm:$0xff] }
 0x786   :  { %13867 = vmatpush1.bf16.msra.mxu1 %v17711_v36  ;;  %13909 = vmatprep.subr.bf16.mxu0 %v17832_v1  ;;  %v11301_v36 = vld [vmem:[#allocation6 + $0xba8] sm:$0xff]  ;;  %v17473_v1 = vcombine.low %v10986_v45, %v10990_v42 }
 0x787   :  { %13868 = vmatprep.subr.bf16.mxu1 %v17704_v29  ;;  %v17791_v29 = vcombine.low %v11305_v33, %v11309_v30  ;;  %v17784_v20 = vcombine.high %v11297_v7, %v11301_v36  ;;  %v17783_v26 = vcombine.low %v11297_v7, %v11301_v36  ;;  %v10938_v30 = vld [vmem:[#allocation6 + $0x50] sm:$0xff] }
 0x788   :  { %v10930_v7 = vld [vmem:[#allocation6 + $0x10] sm:$0xff] }
 0x789   :  { %13910 = vmatpush1.bf16.msra.mxu0 %v17831_v54  ;;  %v10974_v54 = vld [vmem:[#allocation6 + $0x170] sm:$0xff] }
 0x78a   :  { %13869 = vmatpush1.bf16.msra.mxu1 %v17703_v11  ;;  %13911 = vmatprep.subr.bf16.mxu0 %v17824_v22  ;;  %v11289_v11 = vld [vmem:[#allocation6 + $0xb48] sm:$0xff]  ;;  %v17458_v15 = vcombine.high %v10970_v17, %v10974_v54  ;;  %v10934_v36 = vld [vmem:[#allocation6 + $0x30] sm:$0xff] }
 0x78b   :  { %13870 = vmatprep.subr.bf16.mxu1 %v17696_v10  ;;  %v11293_v22 = vld [vmem:[#allocation6 + $0xb68] sm:$0xff]  ;;  %v17465_v10 = vcombine.low %v10978_v35, %v10982_v18 }
 0x78c   :  { %v17776_v14 = vcombine.high %v11289_v11, %v11293_v22  ;;  %v17775_v5 = vcombine.low %v11289_v11, %v11293_v22  ;;  %v11054_v11 = vld [vmem:[#allocation6 + $0x3f0] sm:$0xff] }
 0x78d   :  { %13912 = vmatpush1.bf16.msra.mxu0 %v17823_v60  ;;  %v10966_v60 = vld [vmem:[#allocation6 + $0x130] sm:$0xff] }
 0x78e   :  { %13871 = vmatpush1.bf16.msra.mxu1 %v17695_v57  ;;  %13913 = vmatprep.subr.bf16.mxu0 %v17816_v59  ;;  %v11281_v57 = vld [vmem:[#allocation6 + $0xb08] sm:$0xff]  ;;  %v17450_v16 = vcombine.high %v10962_v50, %v10966_v60  ;;  %v11114_v22 = vld [vmem:[#allocation6 + $0x5d0] sm:$0xff] }
 0x78f   :  { %13872 = vmatprep.subr.bf16.mxu1 %v17688_v38  ;;  %v11285_v59 = vld [vmem:[#allocation6 + $0xb28] sm:$0xff]  ;;  %v17457_v38 = vcombine.low %v10970_v17, %v10974_v54  ;;  %v11050_v54 = vld [vmem:[#allocation6 + $0x3d0] sm:$0xff] }
 0x790   :  { %v17768_v19 = vcombine.high %v11281_v57, %v11285_v59  ;;  %v17767_v21 = vcombine.low %v11281_v57, %v11285_v59  ;;  %v11046_v57 = vld [vmem:[#allocation6 + $0x3b0] sm:$0xff] }
 0x791   :  { %13914 = vmatpush1.bf16.msra.mxu0 %v17815_v23  ;;  %v10958_v23 = vld [vmem:[#allocation6 + $0xf0] sm:$0xff] }
 0x792   :  { %13873 = vmatpush1.bf16.msra.mxu1 %v17687_v2  ;;  %13915 = vmatprep.subr.bf16.mxu0 %v17808_v9  ;;  %v11273_v2 = vld [vmem:[#allocation6 + $0xac8] sm:$0xff]  ;;  %v17442_v34 = vcombine.high %v10954_v39, %v10958_v23  ;;  %v11106_v59 = vld [vmem:[#allocation6 + $0x590] sm:$0xff] }
 0x793   :  { %13874 = vmatprep.subr.bf16.mxu1 %v17680_v48  ;;  %v21647_v47 = vpop.f32.mrf.mxu1  ;;  %v11277_v9 = vld [vmem:[#allocation6 + $0xae8] sm:$0xff]  ;;  %v17449_v48 = vcombine.low %v10962_v50, %v10966_v60  ;;  %v11042_v60 = vld [vmem:[#allocation6 + $0x390] sm:$0xff] }
 0x794   :  { %v17760_v12 = vcombine.high %v11273_v2, %v11277_v9  ;;  %v17759_v45 = vcombine.low %v11273_v2, %v11277_v9  ;;  %v11038_v2 = vld [vmem:[#allocation6 + $0x370] sm:$0xff] }
 0x795   :  { %13916 = vmatpush1.bf16.msra.mxu0 %v17807_v8  ;;  %v21649_v37 = vpop.f32.mrf.mxu1  ;;  %v10950_v8 = vld [vmem:[#allocation6 + $0xb0] sm:$0xff] }
 0x796   :  { %13875 = vmatpush1.bf16.msra.mxu1 %v17679_v43  ;;  %13917 = vmatprep.subr.bf16.mxu0 %v17800_v4  ;;  %v11265_v43 = vld [vmem:[#allocation6 + $0xa88] sm:$0xff]  ;;  %v17434_v42 = vcombine.high %v10946_v24, %v10950_v8  ;;  %v11098_v9 = vld [vmem:[#allocation6 + $0x550] sm:$0xff] }
 0x797   :  { %13876 = vmatprep.subr.bf16.mxu1 %v17672_v55  ;;  %v13695_v32 = vpop.f32.mrf.mxu1  ;;  %v11269_v4 = vld [vmem:[#allocation6 + $0xaa8] sm:$0xff]  ;;  %v17441_v55 = vcombine.low %v10954_v39, %v10958_v23  ;;  %v11034_v23 = vld [vmem:[#allocation6 + $0x350] sm:$0xff] }
 0x798   :  { %v17752_v33 = vcombine.high %v11265_v43, %v11269_v4  ;;  %v17751_v35 = vcombine.low %v11265_v43, %v11269_v4  ;;  %v11030_v43 = vld [vmem:[#allocation6 + $0x330] sm:$0xff] }
 0x799   :  { %13918 = vmatpush1.bf16.msra.mxu0 %v17799_v51  ;;  %v13696_v46 = vpop.f32.mrf.mxu1  ;;  %v10942_v51 = vld [vmem:[#allocation6 + $0x70] sm:$0xff] }
 0x79a   :  { %13877 = vmatpush1.bf16.msra.mxu1 %v17671_v49  ;;  %13944 = vmatprep.subr.bf16.mxu0 %v17474_v28  ;;  %v11257_v49 = vld [vmem:[#allocation6 + $0xa48] sm:$0xff]  ;;  %v17426_v18 = vcombine.high %v10938_v30, %v10942_v51  ;;  %v17425_v46 = vcombine.low %v10938_v30, %v10942_v51  ;;  %v11090_v4 = vld [vmem:[#allocation6 + $0x510] sm:$0xff] }
 0x79b   :  { %13878 = vmatprep.subr.bf16.mxu1 %v17792_v58  ;;  %v11261_v28 = vld [vmem:[#allocation6 + $0xa68] sm:$0xff]  ;;  %v17433_v58 = vcombine.low %v10946_v24, %v10950_v8  ;;  %v11026_v8 = vld [vmem:[#allocation6 + $0x310] sm:$0xff] }
 0x79c   :  { %13936 = vmatmul.mubr.bf16.vlgmr.msra.gmra.mxu0 %v21626_v63  ;;  %v17744_v32 = vcombine.high %v11257_v49, %v11261_v28  ;;  %v11018_v51 = vld [vmem:[#allocation6 + $0x2d0] sm:$0xff] }
 0x79d   :  { %13945 = vmatpush1.bf16.msra.mxu0 %v17473_v1  ;;  %13976 = vmatprep.mubr.bf16.mxu0 %v21538_v52  ;;  %v11249_v1 = vld [vmem:[#allocation6 + $0xa08] sm:$0xff] }
 0x79e   :  { %13879 = vmatpush2.bf16.msra.mxu1 %v17791_v29  ;;  %13946 = vmatprep.subr.bf16.mxu0 %v17466_v61  ;;  %v11253_v29 = vld [vmem:[#allocation6 + $0xa28] sm:$0xff]  ;;  %v17743_v61 = vcombine.low %v11257_v49, %v11261_v28  ;;  %v11022_v49 = vld [vmem:[#allocation6 + $0x2f0] sm:$0xff] }
 0x79f   :  { %13880 = vmatprep.subr.bf16.mxu1 %v17784_v20  ;;  %v17418_v20 = vcombine.high %v10930_v7, %v10934_v36  ;;  %v17736_v17 = vcombine.high %v11249_v1, %v11253_v29  ;;  %v11082_v28 = vld [vmem:[#allocation6 + $0x4d0] sm:$0xff] }
 0x7a1   :  { %13947 = vmatpush1.bf16.msra.mxu0 %v17465_v10  ;;  %v11118_v10 = vld [vmem:[#allocation6 + $0x5f0] sm:$0xff] }
 0x7a2   :  { %13881 = vmatpush2.bf16.msra.mxu1 %v17783_v26  ;;  %13948 = vmatprep.subr.bf16.mxu0 %v17458_v15  ;;  %v17417_v26 = vcombine.low %v10930_v7, %v10934_v36  ;;  %v17735_v15 = vcombine.low %v11249_v1, %v11253_v29  ;;  %v17602_v50 = vcombine.high %v11114_v22, %v11118_v10  ;;  %v11010_v36 = vld [vmem:[#allocation6 + $0x290] sm:$0xff] }
 0x7a3   :  { %13882 = vmatprep.subr.bf16.mxu1 %v17776_v14  ;;  %v17538_v14 = vcombine.high %v11050_v54, %v11054_v11  ;;  %v11014_v1 = vld [vmem:[#allocation6 + $0x2b0] sm:$0xff] }
 0x7a4   :  { %v11074_v29 = vld [vmem:[#allocation6 + $0x490] sm:$0xff] }
 0x7a5   :  { %13949 = vmatpush1.bf16.msra.mxu0 %v17457_v38  ;;  %v11110_v38 = vld [vmem:[#allocation6 + $0x5b0] sm:$0xff] }
 0x7a6   :  { %13883 = vmatpush2.bf16.msra.mxu1 %v17775_v5  ;;  %13950 = vmatprep.subr.bf16.mxu0 %v17450_v16  ;;  %v17537_v5 = vcombine.low %v11050_v54, %v11054_v11  ;;  %v17601_v16 = vcombine.low %v11114_v22, %v11118_v10  ;;  %v17594_v39 = vcombine.high %v11106_v59, %v11110_v38  ;;  %v11002_v11 = vld [vmem:[#allocation6 + $0x250] sm:$0xff] }
 0x7a7   :  { %13884 = vmatprep.subr.bf16.mxu1 %v17768_v19  ;;  %v17530_v19 = vcombine.high %v11042_v60, %v11046_v57  ;;  %v11006_v22 = vld [vmem:[#allocation6 + $0x270] sm:$0xff] }
 0x7a8   :  { %v11066_v10 = vld [vmem:[#allocation6 + $0x450] sm:$0xff] }
 0x7a9   :  { %13951 = vmatpush1.bf16.msra.mxu0 %v17449_v48  ;;  %v11102_v48 = vld [vmem:[#allocation6 + $0x570] sm:$0xff] }
 0x7aa   :  { %13885 = vmatpush2.bf16.msra.mxu1 %v17767_v21  ;;  %13952 = vmatprep.subr.bf16.mxu0 %v17442_v34  ;;  %v17529_v21 = vcombine.low %v11042_v60, %v11046_v57  ;;  %v17593_v34 = vcombine.low %v11106_v59, %v11110_v38  ;;  %v17586_v24 = vcombine.high %v11098_v9, %v11102_v48  ;;  %v10994_v57 = vld [vmem:[#allocation6 + $0x210] sm:$0xff] }
 0x7ab   :  { %13886 = vmatprep.subr.bf16.mxu1 %v17760_v12  ;;  %v17522_v12 = vcombine.high %v11034_v23, %v11038_v2  ;;  %v10998_v59 = vld [vmem:[#allocation6 + $0x230] sm:$0xff] }
 0x7ac   :  { %v11058_v38 = vld [vmem:[#allocation6 + $0x410] sm:$0xff] }
 0x7ad   :  { %13953 = vmatpush1.bf16.msra.mxu0 %v17441_v55  ;;  %v11094_v55 = vld [vmem:[#allocation6 + $0x530] sm:$0xff] }
 0x7ae   :  { %13887 = vmatpush2.bf16.msra.mxu1 %v17759_v45  ;;  %13954 = vmatprep.subr.bf16.mxu0 %v17434_v42  ;;  %v17521_v45 = vcombine.low %v11034_v23, %v11038_v2  ;;  %v17585_v42 = vcombine.low %v11098_v9, %v11102_v48  ;;  %v17578_v30 = vcombine.high %v11090_v4, %v11094_v55  ;;  %v11242_v2 = vld [vmem:[#allocation6 + $0x9d0] sm:$0xff] }
 0x7af   :  { %13888 = vmatprep.subr.bf16.mxu1 %v17752_v33  ;;  %v17514_v33 = vcombine.high %v11026_v8, %v11030_v43  ;;  %v11246_v9 = vld [vmem:[#allocation6 + $0x9f0] sm:$0xff] }
 0x7b0   :  { %v11178_v48 = vld [vmem:[#allocation6 + $0x7d0] sm:$0xff] }
 0x7b1   :  { %13955 = vmatpush1.bf16.msra.mxu0 %v17433_v58  ;;  %v11086_v58 = vld [vmem:[#allocation6 + $0x4f0] sm:$0xff] }
 0x7b2   :  { %13889 = vmatpush2.bf16.msra.mxu1 %v17751_v35  ;;  %13956 = vmatprep.subr.bf16.mxu0 %v17426_v18  ;;  %v17513_v35 = vcombine.low %v11026_v8, %v11030_v43  ;;  %v17577_v18 = vcombine.low %v11090_v4, %v11094_v55  ;;  %v17570_v7 = vcombine.high %v11082_v28, %v11086_v58  ;;  %v11234_v43 = vld [vmem:[#allocation6 + $0x990] sm:$0xff] }
 0x7b3   :  { %13890 = vmatprep.subr.bf16.mxu1 %v17744_v32  ;;  %v17506_v32 = vcombine.high %v11018_v51, %v11022_v49  ;;  %v11238_v4 = vld [vmem:[#allocation6 + $0x9b0] sm:$0xff] }
 0x7b4   :  { %v11170_v55 = vld [vmem:[#allocation6 + $0x790] sm:$0xff] }
 0x7b5   :  { %13957 = vmatpush1.bf16.msra.mxu0 %v17425_v46  ;;  %v11078_v46 = vld [vmem:[#allocation6 + $0x4b0] sm:$0xff] }
 0x7b6   :  { %13891 = vmatpush2.bf16.msra.mxu1 %v17743_v61  ;;  %13958 = vmatprep.subr.bf16.mxu0 %v17418_v20  ;;  %v17505_v61 = vcombine.low %v11018_v51, %v11022_v49  ;;  %v17569_v20 = vcombine.low %v11082_v28, %v11086_v58  ;;  %v17562_v54 = vcombine.high %v11074_v29, %v11078_v46  ;;  %v11226_v49 = vld [vmem:[#allocation6 + $0x950] sm:$0xff] }
 0x7b7   :  { %13892 = vmatprep.subr.bf16.mxu1 %v17736_v17  ;;  %v17498_v17 = vcombine.high %v11010_v36, %v11014_v1  ;;  %v11230_v28 = vld [vmem:[#allocation6 + $0x970] sm:$0xff] }
 0x7b8   :  { %v11162_v58 = vld [vmem:[#allocation6 + $0x750] sm:$0xff] }
 0x7b9   :  { %13959 = vmatpush1.bf16.msra.mxu0 %v17417_v26  ;;  %v11070_v26 = vld [vmem:[#allocation6 + $0x470] sm:$0xff] }
 0x7ba   :  { %13893 = vmatpush2.bf16.msra.mxu1 %v17735_v15  ;;  %13960 = vmatprep.subr.bf16.mxu0 %v17538_v14  ;;  %v17497_v15 = vcombine.low %v11010_v36, %v11014_v1  ;;  %v17561_v14 = vcombine.low %v11074_v29, %v11078_v46  ;;  %v17554_v60 = vcombine.high %v11066_v10, %v11070_v26  ;;  %v11218_v1 = vld [vmem:[#allocation6 + $0x910] sm:$0xff] }
 0x7bb   :  { %13985 = vmatprep.subr.bf16.mxu1 %v17602_v50  ;;  %v17490_v50 = vcombine.high %v11002_v11, %v11006_v22  ;;  %v11222_v29 = vld [vmem:[#allocation6 + $0x930] sm:$0xff] }
 0x7bc   :  { %v11154_v46 = vld [vmem:[#allocation6 + $0x710] sm:$0xff] }
 0x7bd   :  { %13895 = vmatmul.mubr.bf16.vlgmr.msra.gmra.mxu1 %v21624_v62  ;;  %13961 = vmatpush2.bf16.msra.mxu0 %v17537_v5  ;;  %v11062_v5 = vld [vmem:[#allocation6 + $0x430] sm:$0xff] }
 0x7be   :  { %13986 = vmatpush1.bf16.msra.mxu1 %v17601_v16  ;;  %14017 = vmatprep.mubr.bf16.mxu1 %v21600_v6  ;;  %v17489_v16 = vcombine.low %v11002_v11, %v11006_v22  ;;  %v17546_v23 = vcombine.high %v11058_v38, %v11062_v5  ;;  %v11210_v22 = vld [vmem:[#allocation6 + $0x8d0] sm:$0xff] }
 0x7bf   :  { %13962 = vmatprep.subr.bf16.mxu0 %v17530_v19  ;;  %13987 = vmatprep.subr.bf16.mxu1 %v17594_v39  ;;  %v17553_v19 = vcombine.low %v11066_v10, %v11070_v26  ;;  %v17482_v39 = vcombine.high %v10994_v57, %v10998_v59  ;;  %v11214_v10 = vld [vmem:[#allocation6 + $0x8f0] sm:$0xff] }
 0x7c0   :  { %v11146_v26 = vld [vmem:[#allocation6 + $0x6d0] sm:$0xff] }
 0x7c1   :  { %13963 = vmatpush2.bf16.msra.mxu0 %v17529_v21  ;;  %v11182_v21 = vld [vmem:[#allocation6 + $0x7f0] sm:$0xff] }
 0x7c2   :  { %13988 = vmatpush1.bf16.msra.mxu1 %v17593_v34  ;;  %13964 = vmatprep.subr.bf16.mxu0 %v17522_v12  ;;  %v17481_v34 = vcombine.low %v10994_v57, %v10998_v59  ;;  %v17545_v12 = vcombine.low %v11058_v38, %v11062_v5  ;;  %v17666_v8 = vcombine.high %v11178_v48, %v11182_v21  ;;  %v11202_v59 = vld [vmem:[#allocation6 + $0x890] sm:$0xff] }
 0x7c3   :  { %13989 = vmatprep.subr.bf16.mxu1 %v17586_v24  ;;  %v17730_v24 = vcombine.high %v11242_v2, %v11246_v9  ;;  %v11206_v38 = vld [vmem:[#allocation6 + $0x8b0] sm:$0xff] }
 0x7c4   :  { %v11138_v5 = vld [vmem:[#allocation6 + $0x690] sm:$0xff] }
 0x7c5   :  { %13965 = vmatpush2.bf16.msra.mxu0 %v17521_v45  ;;  %v11174_v45 = vld [vmem:[#allocation6 + $0x7b0] sm:$0xff] }
 0x7c6   :  { %13990 = vmatpush1.bf16.msra.mxu1 %v17585_v42  ;;  %13966 = vmatprep.subr.bf16.mxu0 %v17514_v33  ;;  %v17729_v42 = vcombine.low %v11242_v2, %v11246_v9  ;;  %v17665_v33 = vcombine.low %v11178_v48, %v11182_v21  ;;  %v17658_v51 = vcombine.high %v11170_v55, %v11174_v45  ;;  %v11194_v9 = vld [vmem:[#allocation6 + $0x850] sm:$0xff] }
 0x7c7   :  { %13991 = vmatprep.subr.bf16.mxu1 %v17578_v30  ;;  %v17722_v30 = vcombine.high %v11234_v43, %v11238_v4  ;;  %v11198_v48 = vld [vmem:[#allocation6 + $0x870] sm:$0xff] }
 0x7c8   :  { %v11130_v21 = vld [vmem:[#allocation6 + $0x650] sm:$0xff] }
 0x7c9   :  { %13967 = vmatpush2.bf16.msra.mxu0 %v17513_v35  ;;  %v11166_v35 = vld [vmem:[#allocation6 + $0x770] sm:$0xff] }
 0x7ca   :  { %13992 = vmatpush1.bf16.msra.mxu1 %v17577_v18  ;;  %13968 = vmatprep.subr.bf16.mxu0 %v17506_v32  ;;  %v17721_v18 = vcombine.low %v11234_v43, %v11238_v4  ;;  %v17657_v32 = vcombine.low %v11170_v55, %v11174_v45  ;;  %v17650_v36 = vcombine.high %v11162_v58, %v11166_v35  ;;  %v11186_v4 = vld [vmem:[#allocation6 + $0x810] sm:$0xff] }
 0x7cb   :  { %13993 = vmatprep.subr.bf16.mxu1 %v17570_v7  ;;  %v17714_v7 = vcombine.high %v11226_v49, %v11230_v28  ;;  %v11190_v55 = vld [vmem:[#allocation6 + $0x830] sm:$0xff] }
 0x7cc   :  { %v11122_v45 = vld [vmem:[#allocation6 + $0x610] sm:$0xff] }
 0x7cd   :  { %13969 = vmatpush2.bf16.msra.mxu0 %v17505_v61  ;;  %v11158_v61 = vld [vmem:[#allocation6 + $0x730] sm:$0xff] }
 0x7ce   :  { %13994 = vmatpush1.bf16.msra.mxu1 %v17569_v20  ;;  %13970 = vmatprep.subr.bf16.mxu0 %v17498_v17  ;;  %v17713_v20 = vcombine.low %v11226_v49, %v11230_v28  ;;  %v17649_v17 = vcombine.low %v11162_v58, %v11166_v35  ;;  %v17642_v11 = vcombine.high %v11154_v46, %v11158_v61  ;;  %v11306_v28 = vld [vmem:[#allocation6 + $0xbd0] sm:$0xff] }
 0x7cf   :  { %13995 = vmatprep.subr.bf16.mxu1 %v17562_v54  ;;  %v17706_v54 = vcombine.high %v11218_v1, %v11222_v29  ;;  %v11310_v58 = vld [vmem:[#allocation6 + $0xbf0] sm:$0xff] }
 0x7d0   :  { %v11370_v35 = vld [vmem:[#allocation6 + $0xdd0] sm:$0xff] }
 0x7d1   :  { %13971 = vmatpush2.bf16.msra.mxu0 %v17497_v15  ;;  %v11150_v15 = vld [vmem:[#allocation6 + $0x6f0] sm:$0xff] }
 0x7d2   :  { %13996 = vmatpush1.bf16.msra.mxu1 %v17561_v14  ;;  %13972 = vmatprep.subr.bf16.mxu0 %v17490_v50  ;;  %v17705_v14 = vcombine.low %v11218_v1, %v11222_v29  ;;  %v17641_v50 = vcombine.low %v11154_v46, %v11158_v61  ;;  %v17634_v57 = vcombine.high %v11146_v26, %v11150_v15  ;;  %v11298_v29 = vld [vmem:[#allocation6 + $0xb90] sm:$0xff] }
 0x7d3   :  { %13997 = vmatprep.subr.bf16.mxu1 %v17554_v60  ;;  %v17698_v60 = vcombine.high %v11210_v22, %v11214_v10  ;;  %v11302_v46 = vld [vmem:[#allocation6 + $0xbb0] sm:$0xff] }
 0x7d4   :  { %v11362_v61 = vld [vmem:[#allocation6 + $0xd90] sm:$0xff] }
 0x7d5   :  { %13973 = vmatpush2.bf16.msra.mxu0 %v17489_v16  ;;  %v11142_v16 = vld [vmem:[#allocation6 + $0x6b0] sm:$0xff] }
 0x7d6   :  { %13998 = vmatpush1.bf16.msra.mxu1 %v17553_v19  ;;  %13974 = vmatprep.subr.bf16.mxu0 %v17482_v39  ;;  %v17697_v19 = vcombine.low %v11210_v22, %v11214_v10  ;;  %v17633_v39 = vcombine.low %v11146_v26, %v11150_v15  ;;  %v17626_v2 = vcombine.high %v11138_v5, %v11142_v16  ;;  %v11290_v26 = vld [vmem:[#allocation6 + $0xb50] sm:$0xff] }
 0x7d7   :  { %13999 = vmatprep.subr.bf16.mxu1 %v17546_v23  ;;  %v17690_v23 = vcombine.high %v11202_v59, %v11206_v38  ;;  %v13692_v22 = vadd.f32 %v21647_v47, %v21639_v44  ;;  %v11294_v15 = vld [vmem:[#allocation6 + $0xb70] sm:$0xff] }
 0x7d8   :  { %v17778_v47 = vcombine.high %v11290_v26, %v11294_v15 }
 0x7d9   :  { %13975 = vmatpush2.bf16.msra.mxu0 %v17481_v34  ;;  %v11134_v34 = vld [vmem:[#allocation6 + $0x670] sm:$0xff] }
 0x7da   :  { %14000 = vmatpush1.bf16.msra.mxu1 %v17545_v12  ;;  %14026 = vmatprep.subr.bf16.mxu0 %v17730_v24  ;;  %v17689_v12 = vcombine.low %v11202_v59, %v11206_v38  ;;  %v17625_v24 = vcombine.low %v11138_v5, %v11142_v16  ;;  %v17618_v43 = vcombine.high %v11130_v21, %v11134_v34 }
 0x7db   :  { %14001 = vmatprep.subr.bf16.mxu1 %v17666_v8  ;;  %v17682_v8 = vcombine.high %v11194_v9, %v11198_v48  ;;  %v17785_v5 = vcombine.low %v11298_v29, %v11302_v46 }
 0x7dc   :  { %13977 = vmatmul.mubr.bf16.vlgmr.msra.gmra.mxu0 %v21553_v25 }
 0x7dd   :  { %14027 = vmatpush1.bf16.msra.mxu0 %v17729_v42  ;;  %14058 = vmatprep.mubr.bf16.mxu0 %v21622_v56  ;;  %v11126_v42 = vld [vmem:[#allocation6 + $0x630] sm:$0xff] }
 0x7de   :  { %14002 = vmatpush2.bf16.msra.mxu1 %v17665_v33  ;;  %14028 = vmatprep.subr.bf16.mxu0 %v17722_v30  ;;  %v17681_v33 = vcombine.low %v11194_v9, %v11198_v48  ;;  %v17617_v30 = vcombine.low %v11130_v21, %v11134_v34  ;;  %v17610_v49 = vcombine.high %v11122_v45, %v11126_v42  ;;  %v11282_v9 = vld [vmem:[#allocation6 + $0xb10] sm:$0xff] }
 0x7df   :  { %14003 = vmatprep.subr.bf16.mxu1 %v17658_v51  ;;  %v17674_v51 = vcombine.high %v11186_v4, %v11190_v55  ;;  %v11286_v48 = vld [vmem:[#allocation6 + $0xb30] sm:$0xff] }
 0x7e0   :  { %v11350_v21 = vld [vmem:[#allocation6 + $0xd30] sm:$0xff] }
 0x7e1   :  { %14029 = vmatpush1.bf16.msra.mxu0 %v17721_v18  ;;  %v11374_v18 = vld [vmem:[#allocation6 + $0xdf0] sm:$0xff] }
 0x7e2   :  { %14004 = vmatpush2.bf16.msra.mxu1 %v17657_v32  ;;  %14030 = vmatprep.subr.bf16.mxu0 %v17714_v7  ;;  %v17673_v32 = vcombine.low %v11186_v4, %v11190_v55  ;;  %v17609_v7 = vcombine.low %v11122_v45, %v11126_v42  ;;  %v17858_v1 = vcombine.high %v11370_v35, %v11374_v18  ;;  %v11274_v42 = vld [vmem:[#allocation6 + $0xad0] sm:$0xff] }
 0x7e3   :  { %14005 = vmatprep.subr.bf16.mxu1 %v17650_v36  ;;  %v17794_v36 = vcombine.high %v11306_v28, %v11310_v58  ;;  %v17770_v4 = vcombine.high %v11282_v9, %v11286_v48 }
 0x7e5   :  { %14031 = vmatpush1.bf16.msra.mxu0 %v17713_v20  ;;  %v11366_v20 = vld [vmem:[#allocation6 + $0xdb0] sm:$0xff] }
 0x7e6   :  { %14006 = vmatpush2.bf16.msra.mxu1 %v17649_v17  ;;  %14032 = vmatprep.subr.bf16.mxu0 %v17706_v54  ;;  %v17793_v17 = vcombine.low %v11306_v28, %v11310_v58  ;;  %v17857_v54 = vcombine.low %v11370_v35, %v11374_v18  ;;  %v17850_v10 = vcombine.high %v11362_v61, %v11366_v20  ;;  %v11266_v18 = vld [vmem:[#allocation6 + $0xa90] sm:$0xff] }
 0x7e7   :  { %14007 = vmatprep.subr.bf16.mxu1 %v17642_v11  ;;  %v17786_v11 = vcombine.high %v11298_v29, %v11302_v46  ;;  %v17849_v44 = vcombine.low %v11362_v61, %v11366_v20  ;;  %v11258_v20 = vld [vmem:[#allocation6 + $0xa50] sm:$0xff] }
 0x7e9   :  { %14033 = vmatpush1.bf16.msra.mxu0 %v17705_v14 }
 0x7ea   :  { %14008 = vmatpush2.bf16.msra.mxu1 %v17641_v50  ;;  %14034 = vmatprep.subr.bf16.mxu0 %v17698_v60  ;;  %v11354_v50 = vld [vmem:[#allocation6 + $0xd50] sm:$0xff] }
 0x7eb   :  { %14009 = vmatprep.subr.bf16.mxu1 %v17634_v57  ;;  %v11358_v60 = vld [vmem:[#allocation6 + $0xd70] sm:$0xff]  ;;  %v13694_v57 = vadd.f32 %v21649_v37, %v21641_v0 }
 0x7ec   :  { %v11346_v37 = vld [vmem:[#allocation6 + $0xd10] sm:$0xff] }
 0x7ed   :  { %14035 = vmatpush1.bf16.msra.mxu0 %v17697_v19  ;;  %v17834_v45 = vcombine.high %v11346_v37, %v11350_v21  ;;  %v17833_v28 = vcombine.low %v11346_v37, %v11350_v21  ;;  %v11107_v37 = vld [vmem:[#allocation6 + $0x598] sm:$0xff] }
 0x7ee   :  { %14010 = vmatpush2.bf16.msra.mxu1 %v17633_v39  ;;  %14036 = vmatprep.subr.bf16.mxu0 %v17690_v23  ;;  %v11111_v21 = vld [vmem:[#allocation6 + $0x5b8] sm:$0xff] }
 0x7ef   :  { %14011 = vmatprep.subr.bf16.mxu1 %v17626_v2  ;;  %v17842_v2 = vcombine.high %v11354_v50, %v11358_v60 }
 0x7f1   :  { %14037 = vmatpush1.bf16.msra.mxu0 %v17689_v12 }
 0x7f2   :  { %14012 = vmatpush2.bf16.msra.mxu1 %v17625_v24  ;;  %14038 = vmatprep.subr.bf16.mxu0 %v17682_v8  ;;  %v17777_v24 = vcombine.low %v11290_v26, %v11294_v15 }
 0x7f3   :  { %14013 = vmatprep.subr.bf16.mxu1 %v17618_v43  ;;  %v17841_v43 = vcombine.low %v11354_v50, %v11358_v60  ;;  %v11254_v50 = vld [vmem:[#allocation6 + $0xa30] sm:$0xff] }
 0x7f4   :  { %v11314_v60 = vld [vmem:[#allocation6 + $0xc10] sm:$0xff] }
 0x7f5   :  { %14039 = vmatpush1.bf16.msra.mxu0 %v17681_v33  ;;  %v11278_v33 = vld [vmem:[#allocation6 + $0xaf0] sm:$0xff] }
 0x7f6   :  { %14014 = vmatpush2.bf16.msra.mxu1 %v17617_v30  ;;  %14040 = vmatprep.subr.bf16.mxu0 %v17674_v51  ;;  %v11338_v30 = vld [vmem:[#allocation6 + $0xcd0] sm:$0xff]  ;;  %v17762_v58 = vcombine.high %v11274_v42, %v11278_v33 }
 0x7f7   :  { %14015 = vmatprep.subr.bf16.mxu1 %v17610_v49  ;;  %v11342_v51 = vld [vmem:[#allocation6 + $0xcf0] sm:$0xff]  ;;  %v17769_v49 = vcombine.low %v11282_v9, %v11286_v48 }
 0x7f8   :  { %v17826_v35 = vcombine.high %v11338_v30, %v11342_v51  ;;  %v17825_v29 = vcombine.low %v11338_v30, %v11342_v51  ;;  %v10975_v30 = vld [vmem:[#allocation6 + $0x178] sm:$0xff]  ;;  %v17595_v51 = vcombine.low %v11107_v37, %v11111_v21 }
 0x7f9   :  { %14041 = vmatpush1.bf16.msra.mxu0 %v17673_v32  ;;  %v11270_v32 = vld [vmem:[#allocation6 + $0xab0] sm:$0xff] }
 0x7fa   :  { %14016 = vmatpush2.bf16.msra.mxu1 %v17609_v7  ;;  %14042 = vmatprep.subr.bf16.mxu0 %v17794_v36  ;;  %v11330_v7 = vld [vmem:[#allocation6 + $0xc90] sm:$0xff]  ;;  %v17754_v46 = vcombine.high %v11266_v18, %v11270_v32 }
 0x7fb   :  { %14067 = vmatprep.subr.bf16.mxu1 %v17858_v1  ;;  %v11334_v36 = vld [vmem:[#allocation6 + $0xcb0] sm:$0xff]  ;;  %v17761_v1 = vcombine.low %v11274_v42, %v11278_v33  ;;  %v10971_v33 = vld [vmem:[#allocation6 + $0x158] sm:$0xff] }
 0x7fc   :  { %v13732_v14 = vpop.f32.mrf.mxu0  ;;  %v17818_v61 = vcombine.high %v11330_v7, %v11334_v36 }
 0x7fd   :  { %v13733_v59 = vadd.f32 %v13732_v14, %v13692_v22  ;;  %14018 = vmatmul.mubr.bf16.vlgmr.msra.gmra.mxu1 %v21604_v40  ;;  %14043 = vmatpush2.bf16.msra.mxu0 %v17793_v17  ;;  %v13773_v38 = vpop.f32.mrf.mxu1  ;;  %v11262_v17 = vld [vmem:[#allocation6 + $0xa70] sm:$0xff]  ;;  %v17753_v22 = vcombine.low %v11266_v18, %v11270_v32  ;;  %v11095_v18 = vld [vmem:[#allocation6 + $0x538] sm:$0xff] }
 0x7fe   :  { %14068 = vmatpush1.bf16.msra.mxu1 %v17857_v54  ;;  %v13734_v16 = vpop.f32.mrf.mxu0  ;;  %14044 = vmatprep.subr.bf16.mxu0 %v17786_v11  ;;  %v11322_v54 = vld [vmem:[#allocation6 + $0xc50] sm:$0xff]  ;;  %v17746_v26 = vcombine.high %v11258_v20, %v11262_v17  ;;  %v10963_v32 = vld [vmem:[#allocation6 + $0x118] sm:$0xff] }
 0x7ff   :  { %v21662_v19 = vadd.f32 %v13773_v38, %v13733_v59  ;;  %v13735_v39 = vadd.f32 %v13734_v16, %v13694_v57  ;;  %v13775_v23 = vpop.f32.mrf.mxu1  ;;  %14069 = vmatprep.subr.bf16.mxu1 %v17850_v10  ;;  %14099 = vmatprep.mubr.bf16.mxu1 %v20933_v13  ;;  %v11326_v11 = vld [vmem:[#allocation6 + $0xc70] sm:$0xff]  ;;  %v17817_v10 = vcombine.low %v11330_v7, %v11334_v36  ;;  %v10967_v7 = vld [vmem:[#allocation6 + $0x138] sm:$0xff] }
 0x800   :  { %v13736_v0 = vpop.f32.mrf.mxu0  ;;  %v17810_v15 = vcombine.high %v11322_v54, %v11326_v11  ;;  %v11250_v14 = vld [vmem:[#allocation6 + $0xa10] sm:$0xff]  ;;  %v17745_v59 = vcombine.low %v11258_v20, %v11262_v17  ;;  %v17809_v38 = vcombine.low %v11322_v54, %v11326_v11  ;;  %v10955_v20 = vld [vmem:[#allocation6 + $0xd8] sm:$0xff]  ;;  %v17451_v54 = vcombine.low %v10963_v32, %v10967_v7 }
 0x801   :  { %v21665_v34 = vadd.f32 %v13775_v23, %v13735_v39  ;;  %14045 = vmatpush2.bf16.msra.mxu0 %v17785_v5  ;;  %v13777_v12 = vpop.f32.mrf.mxu1  ;;  %v11318_v57 = vld [vmem:[#allocation6 + $0xc30] sm:$0xff]  ;;  %v17738_v5 = vcombine.high %v11250_v14, %v11254_v50  ;;  %v10987_v39 = vld [vmem:[#allocation6 + $0x1d8] sm:$0xff] }
 0x802   :  { %14070 = vmatpush1.bf16.msra.mxu1 %v17849_v44  ;;  %v13737_v8 = vpop.f32.mrf.mxu0  ;;  %14046 = vmatprep.subr.bf16.mxu0 %v17778_v47  ;;  %v17802_v16 = vcombine.high %v11314_v60, %v11318_v57  ;;  %v11115_v44 = vld [vmem:[#allocation6 + $0x5d8] sm:$0xff]  ;;  %v17801_v9 = vcombine.low %v11314_v60, %v11318_v57 }
 0x803   :  { %v13778_v55 = vpop.f32.mrf.mxu1  ;;  %14071 = vmatprep.subr.bf16.mxu1 %v17842_v2  ;;  %v11119_v47 = vld [vmem:[#allocation6 + $0x5f8] sm:$0xff]  ;;  %v17737_v2 = vcombine.low %v11250_v14, %v11254_v50 }
 0x804   :  { %v10991_v23 = vld [vmem:[#allocation6 + $0x1f8] sm:$0xff]  ;;  %v17604_v48 = vcombine.high %v11115_v44, %v11119_v47  ;;  %v17603_v12 = vcombine.low %v11115_v44, %v11119_v47 }
 0x805   :  { %14047 = vmatpush2.bf16.msra.mxu0 %v17777_v24  ;;  %v17476_v0 = vcombine.high %v10987_v39, %v10991_v23  ;;  %v10979_v24 = vld [vmem:[#allocation6 + $0x198] sm:$0xff] }
 0x806   :  { %14072 = vmatpush1.bf16.msra.mxu1 %v17841_v43  ;;  %14048 = vmatprep.subr.bf16.mxu0 %v17770_v4  ;;  %v10983_v8 = vld [vmem:[#allocation6 + $0x1b8] sm:$0xff]  ;;  %v17475_v43 = vcombine.low %v10987_v39, %v10991_v23  ;;  %v17596_v4 = vcombine.high %v11107_v37, %v11111_v21 }
 0x807   :  { %14073 = vmatprep.subr.bf16.mxu1 %v17834_v45  ;;  %v11099_v55 = vld [vmem:[#allocation6 + $0x558] sm:$0xff]  ;;  %v17468_v42 = vcombine.high %v10979_v24, %v10983_v8 }
 0x808   :  { %v11103_v45 = vld [vmem:[#allocation6 + $0x578] sm:$0xff] }
 0x809   :  { %14049 = vmatpush2.bf16.msra.mxu0 %v17769_v49  ;;  %v17467_v49 = vcombine.low %v10979_v24, %v10983_v8  ;;  %v17587_v36 = vcombine.low %v11099_v55, %v11103_v45  ;;  %v10959_v17 = vld [vmem:[#allocation6 + $0xf8] sm:$0xff] }
 0x80a   :  { %14074 = vmatpush1.bf16.msra.mxu1 %v17833_v28  ;;  %14050 = vmatprep.subr.bf16.mxu0 %v17762_v58  ;;  %v17588_v28 = vcombine.high %v11099_v55, %v11103_v45  ;;  %v17460_v58 = vcombine.high %v10971_v33, %v10975_v30  ;;  %v10951_v14 = vld [vmem:[#allocation6 + $0xb8] sm:$0xff]  ;;  %v17443_v60 = vcombine.low %v10955_v20, %v10959_v17 }
 0x80b   :  { %14075 = vmatprep.subr.bf16.mxu1 %v17826_v35  ;;  %v11091_v35 = vld [vmem:[#allocation6 + $0x518] sm:$0xff] }
 0x80c   :  { %v10943_v44 = vld [vmem:[#allocation6 + $0x78] sm:$0xff] }
 0x80d   :  { %14051 = vmatpush2.bf16.msra.mxu0 %v17761_v1  ;;  %v17459_v1 = vcombine.low %v10971_v33, %v10975_v30  ;;  %v10935_v37 = vld [vmem:[#allocation6 + $0x38] sm:$0xff] }
 0x80e   :  { %14076 = vmatpush1.bf16.msra.mxu1 %v17825_v29  ;;  %14052 = vmatprep.subr.bf16.mxu0 %v17754_v46  ;;  %v17580_v29 = vcombine.high %v11091_v35, %v11095_v18  ;;  %v11083_v46 = vld [vmem:[#allocation6 + $0x4d8] sm:$0xff] }
 0x80f   :  { %14077 = vmatprep.subr.bf16.mxu1 %v17818_v61  ;;  %v11087_v61 = vld [vmem:[#allocation6 + $0x4f8] sm:$0xff] }
 0x810   :  { %v17572_v11 = vcombine.high %v11083_v46, %v11087_v61  ;;  %v17571_v50 = vcombine.low %v11083_v46, %v11087_v61  ;;  %v11051_v55 = vld [vmem:[#allocation6 + $0x3d8] sm:$0xff] }
 0x811   :  { %14053 = vmatpush2.bf16.msra.mxu0 %v17753_v22  ;;  %v17444_v22 = vcombine.high %v10955_v20, %v10959_v17  ;;  %v11055_v45 = vld [vmem:[#allocation6 + $0x3f8] sm:$0xff] }
 0x812   :  { %14078 = vmatpush1.bf16.msra.mxu1 %v17817_v10  ;;  %14054 = vmatprep.subr.bf16.mxu0 %v17746_v26  ;;  %v11075_v10 = vld [vmem:[#allocation6 + $0x498] sm:$0xff] }
 0x813   :  { %14079 = vmatprep.subr.bf16.mxu1 %v17810_v15  ;;  %v11079_v26 = vld [vmem:[#allocation6 + $0x4b8] sm:$0xff] }
 0x814   :  { %v10947_v15 = vld [vmem:[#allocation6 + $0x98] sm:$0xff]  ;;  %v17564_v57 = vcombine.high %v11075_v10, %v11079_v26  ;;  %v17563_v47 = vcombine.low %v11075_v10, %v11079_v26 }
 0x815   :  { %14055 = vmatpush2.bf16.msra.mxu0 %v17745_v59  ;;  %v17436_v59 = vcombine.high %v10947_v15, %v10951_v14  ;;  %v17435_v39 = vcombine.low %v10947_v15, %v10951_v14  ;;  %v11035_v46 = vld [vmem:[#allocation6 + $0x358] sm:$0xff] }
 0x816   :  { %14080 = vmatpush1.bf16.msra.mxu1 %v17809_v38  ;;  %14056 = vmatprep.subr.bf16.mxu0 %v17738_v5  ;;  %v11067_v38 = vld [vmem:[#allocation6 + $0x458] sm:$0xff] }
 0x817   :  { %14081 = vmatprep.subr.bf16.mxu1 %v17802_v16  ;;  %v11071_v5 = vld [vmem:[#allocation6 + $0x478] sm:$0xff] }
 0x818   :  { %v10939_v16 = vld [vmem:[#allocation6 + $0x58] sm:$0xff]  ;;  %v17556_v23 = vcombine.high %v11067_v38, %v11071_v5  ;;  %v17555_v21 = vcombine.low %v11067_v38, %v11071_v5 }
 0x819   :  { %14057 = vmatpush2.bf16.msra.mxu0 %v17737_v2  ;;  %v17428_v2 = vcombine.high %v10939_v16, %v10943_v44  ;;  %v11039_v61 = vld [vmem:[#allocation6 + $0x378] sm:$0xff] }
 0x81a   :  { %14082 = vmatpush1.bf16.msra.mxu1 %v17801_v9  ;;  %14149 = vmatprep.subr.bf16.mxu0 %v17604_v48  ;;  %v11059_v9 = vld [vmem:[#allocation6 + $0x418] sm:$0xff]  ;;  %v17524_v26 = vcombine.high %v11035_v46, %v11039_v61 }
 0x81b   :  { %14108 = vmatprep.subr.bf16.mxu1 %v17476_v0  ;;  %v11063_v48 = vld [vmem:[#allocation6 + $0x438] sm:$0xff] }
 0x81c   :  { %14059 = vmatmul.mubr.bf16.vlgmr.msra.gmra.mxu0 %v21624_v62  ;;  %v10931_v0 = vld [vmem:[#allocation6 + $0x18] sm:$0xff]  ;;  %v17548_v24 = vcombine.high %v11059_v9, %v11063_v48 }
 0x81d   :  { %14100 = vmatmul.mubr.bf16.vlgmr.msra.gmra.mxu1 %v21626_v63  ;;  %14150 = vmatpush1.bf16.msra.mxu0 %v17603_v12  ;;  %v17427_v12 = vcombine.low %v10939_v16, %v10943_v44  ;;  %v17420_v8 = vcombine.high %v10931_v0, %v10935_v37  ;;  %v17419_v33 = vcombine.low %v10931_v0, %v10935_v37  ;;  %v11155_v15 = vld [vmem:[#allocation6 + $0x718] sm:$0xff] }
 0x81e   :  { %14181 = vmatprep.mubr.bf16.mxu0 %v21600_v6  ;;  %14109 = vmatpush1.bf16.msra.mxu1 %v17475_v43  ;;  %v17452_v6 = vcombine.high %v10963_v32, %v10967_v7  ;;  %v11179_v43 = vld [vmem:[#allocation6 + $0x7d8] sm:$0xff]  ;;  %v17539_v32 = vcombine.low %v11051_v55, %v11055_v45  ;;  %v17523_v44 = vcombine.low %v11035_v46, %v11039_v61 }
 0x81f   :  { %14140 = vmatprep.mubr.bf16.mxu1 %v21538_v52  ;;  %14151 = vmatprep.subr.bf16.mxu0 %v17596_v4  ;;  %v17579_v52 = vcombine.low %v11091_v35, %v11095_v18  ;;  %v11183_v4 = vld [vmem:[#allocation6 + $0x7f8] sm:$0xff] }
 0x820   :  { %14110 = vmatprep.subr.bf16.mxu1 %v17468_v42  ;;  %v17547_v42 = vcombine.low %v11059_v9, %v11063_v48  ;;  %v17668_v30 = vcombine.high %v11179_v43, %v11183_v4  ;;  %v11047_v35 = vld [vmem:[#allocation6 + $0x3b8] sm:$0xff]  ;;  %v17667_v18 = vcombine.low %v11179_v43, %v11183_v4 }
 0x821   :  { %14152 = vmatpush1.bf16.msra.mxu0 %v17595_v51  ;;  %v17540_v51 = vcombine.high %v11051_v55, %v11055_v45  ;;  %v11159_v14 = vld [vmem:[#allocation6 + $0x738] sm:$0xff] }
 0x822   :  { %14111 = vmatpush1.bf16.msra.mxu1 %v17467_v49  ;;  %14153 = vmatprep.subr.bf16.mxu0 %v17588_v28  ;;  %v11171_v49 = vld [vmem:[#allocation6 + $0x798] sm:$0xff]  ;;  %v17643_v37 = vcombine.low %v11155_v15, %v11159_v14 }
 0x823   :  { %14112 = vmatprep.subr.bf16.mxu1 %v17460_v58  ;;  %v11175_v28 = vld [vmem:[#allocation6 + $0x7b8] sm:$0xff] }
 0x824   :  { %v11043_v58 = vld [vmem:[#allocation6 + $0x398] sm:$0xff]  ;;  %v17660_v7 = vcombine.high %v11171_v49, %v11175_v28  ;;  %v17659_v17 = vcombine.low %v11171_v49, %v11175_v28 }
 0x825   :  { %14154 = vmatpush1.bf16.msra.mxu0 %v17587_v36  ;;  %v17532_v36 = vcombine.high %v11043_v58, %v11047_v35  ;;  %v11151_v9 = vld [vmem:[#allocation6 + $0x6f8] sm:$0xff] }
 0x826   :  { %14113 = vmatpush1.bf16.msra.mxu1 %v17459_v1  ;;  %14155 = vmatprep.subr.bf16.mxu0 %v17580_v29  ;;  %v11163_v1 = vld [vmem:[#allocation6 + $0x758] sm:$0xff] }
 0x827   :  { %14114 = vmatprep.subr.bf16.mxu1 %v17452_v6  ;;  %v11167_v29 = vld [vmem:[#allocation6 + $0x778] sm:$0xff] }
 0x828   :  { %v17651_v5 = vcombine.low %v11163_v1, %v11167_v29  ;;  %v11019_v48 = vld [vmem:[#allocation6 + $0x2d8] sm:$0xff] }
 0x829   :  { %14156 = vmatpush1.bf16.msra.mxu0 %v17579_v52  ;;  %v11023_v0 = vld [vmem:[#allocation6 + $0x2f8] sm:$0xff] }
 0x82a   :  { %14115 = vmatpush1.bf16.msra.mxu1 %v17451_v54  ;;  %14157 = vmatprep.subr.bf16.mxu0 %v17572_v11  ;;  %v17531_v11 = vcombine.low %v11043_v58, %v11047_v35  ;;  %v11143_v43 = vld [vmem:[#allocation6 + $0x6b8] sm:$0xff] }
 0x82b   :  { %14116 = vmatprep.subr.bf16.mxu1 %v17444_v22  ;;  %v17652_v22 = vcombine.high %v11163_v1, %v11167_v29  ;;  %v11011_v4 = vld [vmem:[#allocation6 + $0x298] sm:$0xff] }
 0x82c   :  { %v11015_v55 = vld [vmem:[#allocation6 + $0x2b8] sm:$0xff] }
 0x82d   :  { %14158 = vmatpush1.bf16.msra.mxu0 %v17571_v50  ;;  %v11135_v49 = vld [vmem:[#allocation6 + $0x678] sm:$0xff] }
 0x82e   :  { %14117 = vmatpush1.bf16.msra.mxu1 %v17443_v60  ;;  %14159 = vmatprep.subr.bf16.mxu0 %v17564_v57  ;;  %v11027_v57 = vld [vmem:[#allocation6 + $0x318] sm:$0xff] }
 0x82f   :  { %14118 = vmatprep.subr.bf16.mxu1 %v17436_v59  ;;  %v11031_v59 = vld [vmem:[#allocation6 + $0x338] sm:$0xff] }
 0x830   :  { %v11003_v28 = vld [vmem:[#allocation6 + $0x258] sm:$0xff] }
 0x831   :  { %14160 = vmatpush1.bf16.msra.mxu0 %v17563_v47  ;;  %v17644_v47 = vcombine.high %v11155_v15, %v11159_v14  ;;  %v11007_v58 = vld [vmem:[#allocation6 + $0x278] sm:$0xff] }
 0x832   :  { %14119 = vmatpush1.bf16.msra.mxu1 %v17435_v39  ;;  %14161 = vmatprep.subr.bf16.mxu0 %v17556_v23  ;;  %v17516_v23 = vcombine.high %v11027_v57, %v11031_v59  ;;  %v11127_v1 = vld [vmem:[#allocation6 + $0x638] sm:$0xff]  ;;  %v17491_v61 = vcombine.low %v11003_v28, %v11007_v58 }
 0x833   :  { %14120 = vmatprep.subr.bf16.mxu1 %v17428_v2  ;;  %v11147_v2 = vld [vmem:[#allocation6 + $0x6d8] sm:$0xff] }
 0x834   :  { %v17635_v45 = vcombine.low %v11147_v2, %v11151_v9  ;;  %v10995_v29 = vld [vmem:[#allocation6 + $0x218] sm:$0xff] }
 0x835   :  { %14162 = vmatpush1.bf16.msra.mxu0 %v17555_v21  ;;  %v17515_v21 = vcombine.low %v11027_v57, %v11031_v59  ;;  %v11363_v57 = vld [vmem:[#allocation6 + $0xd98] sm:$0xff] }
 0x836   :  { %14121 = vmatpush1.bf16.msra.mxu1 %v17427_v12  ;;  %14163 = vmatprep.subr.bf16.mxu0 %v17548_v24  ;;  %v17636_v12 = vcombine.high %v11147_v2, %v11151_v9  ;;  %v17508_v24 = vcombine.high %v11019_v48, %v11023_v0  ;;  %v11367_v59 = vld [vmem:[#allocation6 + $0xdb8] sm:$0xff] }
 0x837   :  { %14122 = vmatprep.subr.bf16.mxu1 %v17420_v8  ;;  %v11139_v8 = vld [vmem:[#allocation6 + $0x698] sm:$0xff] }
 0x838   :  { %v17627_v35 = vcombine.low %v11139_v8, %v11143_v43  ;;  %v11359_v2 = vld [vmem:[#allocation6 + $0xd78] sm:$0xff] }
 0x839   :  { %14164 = vmatpush1.bf16.msra.mxu0 %v17547_v42  ;;  %v17507_v42 = vcombine.low %v11019_v48, %v11023_v0  ;;  %v11227_v48 = vld [vmem:[#allocation6 + $0x958] sm:$0xff] }
 0x83a   :  { %14123 = vmatpush1.bf16.msra.mxu1 %v17419_v33  ;;  %14165 = vmatprep.subr.bf16.mxu0 %v17668_v30  ;;  %v17628_v33 = vcombine.high %v11139_v8, %v11143_v43  ;;  %v17500_v30 = vcombine.high %v11011_v4, %v11015_v55  ;;  %v11231_v0 = vld [vmem:[#allocation6 + $0x978] sm:$0xff] }
 0x83b   :  { %14124 = vmatprep.subr.bf16.mxu1 %v17540_v51  ;;  %v11131_v51 = vld [vmem:[#allocation6 + $0x658] sm:$0xff]  ;;  %v17716_v8 = vcombine.high %v11227_v48, %v11231_v0 }
 0x83c   :  { %v13855_v6 = vpop.f32.mrf.mxu0  ;;  %v17619_v46 = vcombine.low %v11131_v51, %v11135_v49  ;;  %v11347_v43 = vld [vmem:[#allocation6 + $0xd18] sm:$0xff] }
 0x83d   :  { %v13814_v20 = vpop.f32.mrf.mxu1  ;;  %14166 = vmatpush2.bf16.msra.mxu0 %v17667_v18  ;;  %v17499_v18 = vcombine.low %v11011_v4, %v11015_v55  ;;  %v11351_v4 = vld [vmem:[#allocation6 + $0xd38] sm:$0xff] }
 0x83e   :  { %v21671_v52 = vadd.f32 %v13855_v6, %v13814_v20  ;;  %v13857_v54 = vpop.f32.mrf.mxu0  ;;  %14125 = vmatpush2.bf16.msra.mxu1 %v17539_v32  ;;  %14167 = vmatprep.subr.bf16.mxu0 %v17660_v7  ;;  %v17620_v32 = vcombine.high %v11131_v51, %v11135_v49  ;;  %v17492_v7 = vcombine.high %v11003_v28, %v11007_v58  ;;  %v10999_v6 = vld [vmem:[#allocation6 + $0x238] sm:$0xff] }
 0x83f   :  { %v13816_v10 = vpop.f32.mrf.mxu1  ;;  %14126 = vmatprep.subr.bf16.mxu1 %v17532_v36  ;;  %v11123_v36 = vld [vmem:[#allocation6 + $0x618] sm:$0xff]  ;;  %v17483_v15 = vcombine.low %v10995_v29, %v10999_v6 }
 0x840   :  { %v21673_v50 = vadd.f32 %v13857_v54, %v13816_v10  ;;  %v13859_v60 = vpop.f32.mrf.mxu0  ;;  %v17612_v20 = vcombine.high %v11123_v36, %v11127_v1  ;;  %v11371_v54 = vld [vmem:[#allocation6 + $0xdd8] sm:$0xff] }
 0x841   :  { %v13818_v38 = vpop.f32.mrf.mxu1  ;;  %14168 = vmatpush2.bf16.msra.mxu0 %v17659_v17  ;;  %v17484_v17 = vcombine.high %v10995_v29, %v10999_v6  ;;  %v11247_v10 = vld [vmem:[#allocation6 + $0x9f8] sm:$0xff] }
 0x842   :  { %v13860_v16 = vpop.f32.mrf.mxu0  ;;  %14127 = vmatpush2.bf16.msra.mxu1 %v17531_v11  ;;  %14169 = vmatprep.subr.bf16.mxu0 %v17652_v22  ;;  %v11375_v11 = vld [vmem:[#allocation6 + $0xdf8] sm:$0xff] }
 0x843   :  { %v13819_v39 = vpop.f32.mrf.mxu1  ;;  %14128 = vmatprep.subr.bf16.mxu1 %v17524_v26  ;;  %v11243_v22 = vld [vmem:[#allocation6 + $0x9d8] sm:$0xff]  ;;  %v17611_v26 = vcombine.low %v11123_v36, %v11127_v1  ;;  %v17860_v14 = vcombine.high %v11371_v54, %v11375_v11  ;;  %v17859_v16 = vcombine.low %v11371_v54, %v11375_v11 }
 0x844   :  { %v17732_v60 = vcombine.high %v11243_v22, %v11247_v10  ;;  %v11235_v38 = vld [vmem:[#allocation6 + $0x998] sm:$0xff] }
 0x845   :  { %14170 = vmatpush2.bf16.msra.mxu0 %v17651_v5  ;;  %v11239_v5 = vld [vmem:[#allocation6 + $0x9b8] sm:$0xff] }
 0x846   :  { %14129 = vmatpush2.bf16.msra.mxu1 %v17523_v44  ;;  %14171 = vmatprep.subr.bf16.mxu0 %v17644_v47  ;;  %v17731_v44 = vcombine.low %v11243_v22, %v11247_v10  ;;  %v17852_v47 = vcombine.high %v11363_v57, %v11367_v59  ;;  %v17724_v39 = vcombine.high %v11235_v38, %v11239_v5  ;;  %v11339_v51 = vld [vmem:[#allocation6 + $0xcd8] sm:$0xff] }
 0x847   :  { %14130 = vmatprep.subr.bf16.mxu1 %v17516_v23  ;;  %v11355_v23 = vld [vmem:[#allocation6 + $0xd58] sm:$0xff] }
 0x848   :  { %v11343_v49 = vld [vmem:[#allocation6 + $0xcf8] sm:$0xff] }
 0x849   :  { %14172 = vmatpush2.bf16.msra.mxu0 %v17643_v37  ;;  %v17851_v37 = vcombine.low %v11363_v57, %v11367_v59  ;;  %v11211_v28 = vld [vmem:[#allocation6 + $0x8d8] sm:$0xff] }
 0x84a   :  { %14131 = vmatpush2.bf16.msra.mxu1 %v17515_v21  ;;  %14173 = vmatprep.subr.bf16.mxu0 %v17636_v12  ;;  %v17723_v12 = vcombine.low %v11235_v38, %v11239_v5  ;;  %v11215_v58 = vld [vmem:[#allocation6 + $0x8f8] sm:$0xff] }
 0x84b   :  { %14132 = vmatprep.subr.bf16.mxu1 %v17508_v24  ;;  %v17844_v24 = vcombine.high %v11355_v23, %v11359_v2  ;;  %v11331_v36 = vld [vmem:[#allocation6 + $0xc98] sm:$0xff] }
 0x84c   :  { %v11335_v1 = vld [vmem:[#allocation6 + $0xcb8] sm:$0xff] }
 0x84d   :  { %14174 = vmatpush2.bf16.msra.mxu0 %v17635_v45  ;;  %v11223_v45 = vld [vmem:[#allocation6 + $0x938] sm:$0xff] }
 0x84e   :  { %14133 = vmatpush2.bf16.msra.mxu1 %v17507_v42  ;;  %14175 = vmatprep.subr.bf16.mxu0 %v17628_v33  ;;  %v17715_v33 = vcombine.low %v11227_v48, %v11231_v0  ;;  %v11203_v29 = vld [vmem:[#allocation6 + $0x898] sm:$0xff] }
 0x84f   :  { %14134 = vmatprep.subr.bf16.mxu1 %v17500_v30  ;;  %v17836_v30 = vcombine.high %v11347_v43, %v11351_v4  ;;  %v11207_v6 = vld [vmem:[#allocation6 + $0x8b8] sm:$0xff] }
 0x850   :  { %v11323_v54 = vld [vmem:[#allocation6 + $0xc58] sm:$0xff] }
 0x851   :  { %14176 = vmatpush2.bf16.msra.mxu0 %v17627_v35  ;;  %v17835_v35 = vcombine.low %v11347_v43, %v11351_v4  ;;  %v11327_v11 = vld [vmem:[#allocation6 + $0xc78] sm:$0xff] }
 0x852   :  { %14135 = vmatpush2.bf16.msra.mxu1 %v17499_v18  ;;  %14177 = vmatprep.subr.bf16.mxu0 %v17620_v32  ;;  %v17828_v32 = vcombine.high %v11339_v51, %v11343_v49  ;;  %v11195_v22 = vld [vmem:[#allocation6 + $0x858] sm:$0xff] }
 0x853   :  { %14136 = vmatprep.subr.bf16.mxu1 %v17492_v7  ;;  %v17700_v7 = vcombine.high %v11211_v28, %v11215_v58  ;;  %v11199_v10 = vld [vmem:[#allocation6 + $0x878] sm:$0xff] }
 0x854   :  { %v11315_v57 = vld [vmem:[#allocation6 + $0xc18] sm:$0xff] }
 0x855   :  { %14178 = vmatpush2.bf16.msra.mxu0 %v17619_v46  ;;  %v17827_v46 = vcombine.low %v11339_v51, %v11343_v49  ;;  %v11319_v59 = vld [vmem:[#allocation6 + $0xc38] sm:$0xff] }
 0x856   :  { %14137 = vmatpush2.bf16.msra.mxu1 %v17491_v61  ;;  %14179 = vmatprep.subr.bf16.mxu0 %v17612_v20  ;;  %v17699_v61 = vcombine.low %v11211_v28, %v11215_v58  ;;  %v17820_v20 = vcombine.high %v11331_v36, %v11335_v1  ;;  %v11187_v38 = vld [vmem:[#allocation6 + $0x818] sm:$0xff]  ;;  %v17803_v48 = vcombine.low %v11315_v57, %v11319_v59 }
 0x857   :  { %14138 = vmatprep.subr.bf16.mxu1 %v17484_v17  ;;  %v17692_v17 = vcombine.high %v11203_v29, %v11207_v6  ;;  %v11191_v5 = vld [vmem:[#allocation6 + $0x838] sm:$0xff] }
 0x858   :  { %v17675_v0 = vcombine.low %v11187_v38, %v11191_v5  ;;  %v11291_v4 = vld [vmem:[#allocation6 + $0xb58] sm:$0xff] }
 0x859   :  { %14180 = vmatpush2.bf16.msra.mxu0 %v17611_v26  ;;  %v17819_v26 = vcombine.low %v11331_v36, %v11335_v1  ;;  %v11283_v51 = vld [vmem:[#allocation6 + $0xb18] sm:$0xff] }
 0x85a   :  { %14139 = vmatpush2.bf16.msra.mxu1 %v17483_v15  ;;  %14231 = vmatprep.subr.bf16.mxu0 %v17860_v14  ;;  %v17691_v15 = vcombine.low %v11203_v29, %v11207_v6  ;;  %v17812_v14 = vcombine.high %v11323_v54, %v11327_v11  ;;  %v11287_v49 = vld [vmem:[#allocation6 + $0xb38] sm:$0xff] }
 0x85b   :  { %14190 = vmatprep.subr.bf16.mxu1 %v17732_v60  ;;  %v17684_v60 = vcombine.high %v11195_v22, %v11199_v10  ;;  %v11267_v1 = vld [vmem:[#allocation6 + $0xa98] sm:$0xff] }
 0x85c   :  { %v21675_v9 = vpop.f32.mrf.mxu0  ;;  %14182 = vmatmul.mubr.bf16.vlgmr.msra.gmra.mxu0 %v21604_v40  ;;  %v11219_v40 = vld [vmem:[#allocation6 + $0x918] sm:$0xff] }
 0x85d   :  { %14141 = vmatmul.mubr.bf16.vlgmr.msra.gmra.mxu1 %v21553_v25  ;;  %14232 = vmatpush1.bf16.msra.mxu0 %v17859_v16  ;;  %v17843_v25 = vcombine.low %v11355_v23, %v11359_v2  ;;  %v17707_v18 = vcombine.low %v11219_v40, %v11223_v45  ;;  %v17811_v16 = vcombine.low %v11323_v54, %v11327_v11  ;;  %v11307_v23 = vld [vmem:[#allocation6 + $0xbd8] sm:$0xff] }
 0x85e   :  { %v21679_v21 = vpop.f32.mrf.mxu0  ;;  %14191 = vmatpush1.bf16.msra.mxu1 %v17731_v44  ;;  %14222 = vmatprep.mubr.bf16.mxu1 %v21622_v56  ;;  %v17708_v56 = vcombine.high %v11219_v40, %v11223_v45  ;;  %v17683_v44 = vcombine.low %v11195_v22, %v11199_v10  ;;  %v11311_v2 = vld [vmem:[#allocation6 + $0xbf8] sm:$0xff] }
 0x85f   :  { %14233 = vmatprep.subr.bf16.mxu0 %v17852_v47  ;;  %14192 = vmatprep.subr.bf16.mxu1 %v17724_v39  ;;  %v17804_v47 = vcombine.high %v11315_v57, %v11319_v59  ;;  %v17676_v39 = vcombine.high %v11187_v38, %v11191_v5  ;;  %v11251_v54 = vld [vmem:[#allocation6 + $0xa18] sm:$0xff] }
 0x860   :  { %v13941_v55 = vpop.f32.mrf.mxu0  ;;  %14263 = vmatprep.mubr.bf16.mxu0 %v20933_v13  ;;  %v11255_v11 = vld [vmem:[#allocation6 + $0xa38] sm:$0xff] }
 0x861   :  { %14234 = vmatpush1.bf16.msra.mxu0 %v17851_v37  ;;  %v17796_v37 = vcombine.high %v11307_v23, %v11311_v2  ;;  %v11295_v55 = vld [vmem:[#allocation6 + $0xb78] sm:$0xff]  ;;  %v17740_v10 = vcombine.high %v11251_v54, %v11255_v11 }
 0x862   :  { %v13942_v42 = vpop.f32.mrf.mxu0  ;;  %14193 = vmatpush1.bf16.msra.mxu1 %v17723_v12  ;;  %14235 = vmatprep.subr.bf16.mxu0 %v17844_v24  ;;  %v11299_v12 = vld [vmem:[#allocation6 + $0xb98] sm:$0xff]  ;;  %v17779_v58 = vcombine.low %v11291_v4, %v11295_v55 }
 0x863   :  { %14194 = vmatprep.subr.bf16.mxu1 %v17716_v8  ;;  %v11303_v24 = vld [vmem:[#allocation6 + $0xbb8] sm:$0xff]  ;;  %v17795_v8 = vcombine.low %v11307_v23, %v11311_v2 }
 0x864   :  { %v17788_v43 = vcombine.high %v11299_v12, %v11303_v24  ;;  %v20257_v23 = vld [vmem:[#allocation9 + $0x70] sm:$0xff]  }
 0x865   :  { %14236 = vmatpush1.bf16.msra.mxu0 %v17843_v25  ;;  %v17787_v25 = vcombine.low %v11299_v12, %v11303_v24  ;;  %v20263_v24 = vld [vmem:[#allocation9 + $0x58] sm:$0xff]  }
 0x866   :  { %14195 = vmatpush1.bf16.msra.mxu1 %v17715_v33  ;;  %14237 = vmatprep.subr.bf16.mxu0 %v17836_v30  ;;  %v17780_v33 = vcombine.high %v11291_v4, %v11295_v55  ;;  %v20264_v4 = vld [vmem:[#allocation9 + $0x18] sm:$0xff]  }
 0x867   :  { %14196 = vmatprep.subr.bf16.mxu1 %v17708_v56 }
 0x869   :  { %14238 = vmatpush1.bf16.msra.mxu0 %v17835_v35 }
 0x86a   :  { %14197 = vmatpush1.bf16.msra.mxu1 %v17707_v18  ;;  %14239 = vmatprep.subr.bf16.mxu0 %v17828_v32  ;;  %v17772_v18 = vcombine.high %v11283_v51, %v11287_v49  ;;  %v11275_v32 = vld [vmem:[#allocation6 + $0xad8] sm:$0xff] }
 0x86b   :  { %14198 = vmatprep.subr.bf16.mxu1 %v17700_v7  ;;  %v11279_v7 = vld [vmem:[#allocation6 + $0xaf8] sm:$0xff] }
 0x86c   :  { %v17764_v36 = vcombine.high %v11275_v32, %v11279_v7  ;;  %v17763_v29 = vcombine.low %v11275_v32, %v11279_v7  ;;  %v20267_v32 = vld [vmem:[#allocation9 + $0x48] sm:$0xff]  }
 0x86d   :  { %14240 = vmatpush1.bf16.msra.mxu0 %v17827_v46  ;;  %v11259_v46 = vld [vmem:[#allocation6 + $0xa58] sm:$0xff]  ;;  %v20268_v7 = vld [vmem:[#allocation9 + $0x8] sm:$0xff]  }
 0x86e   :  { %14199 = vmatpush1.bf16.msra.mxu1 %v17699_v61  ;;  %14241 = vmatprep.subr.bf16.mxu0 %v17820_v20  ;;  %v11263_v61 = vld [vmem:[#allocation6 + $0xa78] sm:$0xff] }
 0x86f   :  { %14200 = vmatprep.subr.bf16.mxu1 %v17692_v17  ;;  %v17748_v17 = vcombine.high %v11259_v46, %v11263_v61  ;;  %v17747_v22 = vcombine.low %v11259_v46, %v11263_v61  ;;  %v20288_v46 = vld [vmem:[#allocation12 + $0x24] ss:$8 sps:$4 sm:$0xff]   ;;  %v20286_v61 = vld [vmem:[#allocation12 + $0x20] ss:$8 sps:$4 sm:$0xff]  }
 0x871   :  { %14242 = vmatpush1.bf16.msra.mxu0 %v17819_v26  ;;  %v17739_v26 = vcombine.low %v11251_v54, %v11255_v11 }
 0x872   :  { %14201 = vmatpush1.bf16.msra.mxu1 %v17691_v15  ;;  %14243 = vmatprep.subr.bf16.mxu0 %v17812_v14 }
 0x873   :  { %14202 = vmatprep.subr.bf16.mxu1 %v17684_v60 }
 0x875   :  { %14244 = vmatpush1.bf16.msra.mxu0 %v17811_v16 }
 0x876   :  { %14203 = vmatpush1.bf16.msra.mxu1 %v17683_v44  ;;  %14245 = vmatprep.subr.bf16.mxu0 %v17804_v47  ;;  %v20255_v47 = vld [vmem:[#allocation9 + $0x78] sm:$0xff]  }
 0x877   :  { %14204 = vmatprep.subr.bf16.mxu1 %v17676_v39  ;;  %v20256_v39 = vld [vmem:[#allocation9 + $0x38] sm:$0xff]  }
 0x879   :  { %14246 = vmatpush1.bf16.msra.mxu0 %v17803_v48  ;;  %v20258_v48 = vld [vmem:[#allocation9 + $0x30] sm:$0xff]  }
 0x87a   :  { %14205 = vmatpush1.bf16.msra.mxu1 %v17675_v0  ;;  %18057 = vmatprep.subr.bf16.mxu0 %v20255_v47  ;;  %v20259_v0 = vld [vmem:[#allocation9 + $0x68] sm:$0xff]  }
 0x87b   :  { %14206 = vmatprep.subr.bf16.mxu1 %v17796_v37  ;;  %v20262_v37 = vld [vmem:[#allocation9 + $0x20] sm:$0xff]  }
 0x87c   :  { %14264 = vmatmul.mubr.bf16.vlgmr.msra.gmra.mxu0 %v21626_v63 }
 0x87d   :  { %v13896_v40 = vpop.f32.mrf.mxu1  ;;  %18058 = vmatpush3.bf16.msra.mxu0 %v20256_v39 }
 0x87e   :  { %v13897_v45 = vadd.f32 %v13896_v40, %v21671_v52  ;;  %14207 = vmatpush2.bf16.msra.mxu1 %v17795_v8  ;;  %18059 = vmatprep.subr.bf16.mxu0 %v20257_v23 }
 0x87f   :  { %v13898_v42 = vpop.f32.mrf.mxu1  ;;  %14208 = vmatprep.subr.bf16.mxu1 %v17788_v43 }
 0x880   :  { %v21686_v30 = vadd.f32 %v21675_v9, %v13897_v45  ;;  %v13899_v56 = vadd.f32 %v13898_v42, %v21673_v50  ;;  %v17771_v50 = vcombine.low %v11283_v51, %v11287_v49 }
 0x881   :  { %v13900_v28 = vpop.f32.mrf.mxu1  ;;  %18060 = vmatpush3.bf16.msra.mxu0 %v20258_v48 }
 0x882   :  { %v21690_v63 = vadd.f32 %v21679_v21, %v13899_v56  ;;  %14209 = vmatpush2.bf16.msra.mxu1 %v17787_v25  ;;  %v14272_v52 = vmax.f32 %v21662_v19, %v21686_v30  ;;  %v11271_v21 = vld [vmem:[#allocation6 + $0xab8] sm:$0xff]  ;;  %18061 = vmatprep.subr.bf16.mxu0 %v20259_v0  ;;  %v20270_v19 = vld [vmem:[#allocation9] sm:$0xff]  }
 0x883   :  { %v13901_v35 = vpop.f32.mrf.mxu1  ;;  %14210 = vmatprep.subr.bf16.mxu1 %v17780_v33  ;;  %v17756_v6 = vcombine.high %v11267_v1, %v11271_v21  ;;  %v17755_v20 = vcombine.low %v11267_v1, %v11271_v21  ;;  %v20265_v33 = vld [vmem:[#allocation9 + $0x50] sm:$0xff]   ;;  %v20274_v1 = vld [vmem:[#allocation12 + $0x60] ss:$8 sps:$4 sm:$0xff]  }
 0x884   :  { %v14273_v9 = vmax.f32 %v21665_v34, %v21690_v63  ;;  %v20266_v28 = vld [vmem:[#allocation9 + $0x10] sm:$0xff]   ;;  %v20280_v21 = vld [vmem:[#allocation12 + $0x40] ss:$8 sps:$4 sm:$0xff]  }
 0x885   :  { %v20271_v30 = vld [vmem:[#allocation12 + $0x70] ss:$8 sps:$4 sm:$0xff]   ;;  %v20279_v34 = vld [vmem:[#allocation12 + $0x54] ss:$8 sps:$4 sm:$0xff]  }
 0x886   :  { %14211 = vmatpush2.bf16.msra.mxu1 %v17779_v58  ;;  %v20277_v63 = vld [vmem:[#allocation12 + $0x50] ss:$8 sps:$4 sm:$0xff]  }
 0x887   :  { %14212 = vmatprep.subr.bf16.mxu1 %v17772_v18 }
 0x88a   :  { %14213 = vmatpush2.bf16.msra.mxu1 %v17771_v50  ;;  %v20269_v50 = vld [vmem:[#allocation9 + $0x40] sm:$0xff]  }
 0x88b   :  { %14214 = vmatprep.subr.bf16.mxu1 %v17764_v36  ;;  %v20276_v36 = vld [vmem:[#allocation12 + $0x64] ss:$8 sps:$4 sm:$0xff]  }
 0x88e   :  { %14215 = vmatpush2.bf16.msra.mxu1 %v17763_v29  ;;  %v20285_v29 = vld [vmem:[#allocation12 + $0x34] ss:$8 sps:$4 sm:$0xff]  }
 0x88f   :  { %14216 = vmatprep.subr.bf16.mxu1 %v17756_v6  ;;  %v20283_v6 = vld [vmem:[#allocation12 + $0x30] ss:$8 sps:$4 sm:$0xff]  }
 0x892   :  { %14217 = vmatpush2.bf16.msra.mxu1 %v17755_v20 }
 0x893   :  { %14218 = vmatprep.subr.bf16.mxu1 %v17748_v17 }
 0x896   :  { %14219 = vmatpush2.bf16.msra.mxu1 %v17747_v22 }
 0x897   :  { %14220 = vmatprep.subr.bf16.mxu1 %v17740_v10 }
 0x89a   :  { %14221 = vmatpush2.bf16.msra.mxu1 %v17739_v26 }
 0x89c   :  { %v13978_v15 = vpop.f32.mrf.mxu0 }
 0x89d   :  { %14223 = vmatmul.mubr.bf16.vlgmr.msra.gmra.mxu1 %v21624_v62  ;;  %v20260_v62 = vld [vmem:[#allocation9 + $0x28] sm:$0xff]  }
 0x89e   :  { %v13980_v14 = vpop.f32.mrf.mxu0  ;;  %14613 = vmatprep.mubr.bf16.mxu1 %v20933_v13  ;;  %v20261_v13 = vld [vmem:[#allocation9 + $0x60] sm:$0xff]   ;;  %18062 = vmatpush3.bf16.msra.mxu0 %v20260_v62 }
 0x89f   :  { %18063 = vmatprep.subr.bf16.mxu0 %v20261_v13 }
 0x8a0   :  { %v13982_v60 = vpop.f32.mrf.mxu0 }
 0x8a2   :  { %v13983_v57 = vpop.f32.mrf.mxu0  ;;  %18064 = vmatpush3.bf16.msra.mxu0 %v20262_v37 }
 0x8a3   :  { %18065 = vmatprep.subr.bf16.mxu0 %v20263_v24 }
 0x8a6   :  { %18066 = vmatpush3.bf16.msra.mxu0 %v20264_v4 }
 0x8a7   :  { %18067 = vmatprep.subr.bf16.mxu0 %v20265_v33  ;;  %v20294_v33 = vld [vmem:[#allocation12 + $0x4] ss:$8 sps:$4 sm:$0xff]  }
 0x8aa   :  { %18068 = vmatpush3.bf16.msra.mxu0 %v20266_v28  ;;  %v20300_v28 = vld [vmem:[#allocation15 + $0xec] ss:$16 sps:$4 sm:$0xff]  }
 0x8ab   :  { %18069 = vmatprep.subr.bf16.mxu0 %v20267_v32  ;;  %v20307_v32 = vld [vmem:[#allocation15 + $0xa0] ss:$16 sps:$4 sm:$0xff]  }
 0x8ae   :  { %18070 = vmatpush3.bf16.msra.mxu0 %v20268_v7  ;;  %v20315_v7 = vld [vmem:[#allocation15 + $0x84] ss:$16 sps:$4 sm:$0xff]  }
 0x8af   :  { %18071 = vmatprep.subr.bf16.mxu0 %v20269_v50  ;;  %v20313_v50 = vld [vmem:[#allocation15 + $0x80] ss:$16 sps:$4 sm:$0xff]  }
 0x8b2   :  { %18072 = vmatpush3.bf16.msra.mxu0 %v20270_v19  ;;  %v20321_v19 = vld [vmem:[#allocation15 + $0x64] ss:$16 sps:$4 sm:$0xff]  }
 0x8bd   :  { %v14019_v59 = vpop.f32.mrf.mxu1 }
 0x8be   :  { %v14020_v38 = vadd.f32 %v14019_v59, %v13978_v15 }
 0x8bf   :  { %v14021_v5 = vpop.f32.mrf.mxu1 }
 0x8c0   :  { %v14022_v16 = vadd.f32 %v14021_v5, %v13980_v14 }
 0x8c1   :  { %v14023_v44 = vpop.f32.mrf.mxu1 }
 0x8c3   :  { %v14024_v2 = vpop.f32.mrf.mxu1 }
 0x8dc   :  { %v14060_v12 = vpop.f32.mrf.mxu0 }
 0x8dd   :  { %v14061_v8 = vadd.f32 %v14060_v12, %v14020_v38  ;;  %v14101_v43 = vpop.f32.mrf.mxu1 }
 0x8de   :  { %v14062_v55 = vpop.f32.mrf.mxu0 }
 0x8df   :  { %v14102_v40 = vadd.f32 %v14101_v43, %v14061_v8  ;;  %v14063_v45 = vadd.f32 %v14062_v55, %v14022_v16  ;;  %v14103_v25 = vpop.f32.mrf.mxu1  ;;  %v14278_v16 = vld [vmem:[#allocation7] sm:$0x3] }
 0x8e0   :  { %v14064_v42 = vpop.f32.mrf.mxu0  ;;  %v14283_v2 = vrot.slane %v14278_v16, %v21542_v41  ;;  %v14287_v37 = vrot.slane %v14278_v16, %v21523_v3 }
 0x8e1   :  { %v21701_v56 = vmax.f32 %v14272_v52, %v14102_v40  ;;  %v14104_v51 = vadd.f32 %v14103_v25, %v14063_v45  ;;  %v14105_v49 = vpop.f32.mrf.mxu1  ;;  %v20273_v52 = vld [vmem:[#allocation12 + $0x74] ss:$8 sps:$4 sm:$0xff]   ;;  %v20289_v42 = vld [vmem:[#allocation12 + $0x10] ss:$8 sps:$4 sm:$0xff]  }
 0x8e2   :  { %v14065_v58 = vpop.f32.mrf.mxu0  ;;  %14581 = vmatprep.subr.bf16.mxu1 %v20273_v52  ;;  %v20291_v25 = vld [vmem:[#allocation12 + $0x14] ss:$8 sps:$4 sm:$0xff]  }
 0x8e3   :  { %v21706_v35 = vmax.f32 %v14273_v9, %v14104_v51  ;;  %v14106_v18 = vpop.f32.mrf.mxu1  ;;  %14582 = vmatpush1.bf16.msra.mxu1 %v20271_v30  ;;  %v20282_v9 = vld [vmem:[#allocation12 + $0x44] ss:$8 sps:$4 sm:$0xff]  }
 0x8e4   :  { %14583 = vmatprep.subr.bf16.mxu1 %v20276_v36  ;;  %v20295_v51 = vld [vmem:[#allocation15 + $0xe0] ss:$16 sps:$4 sm:$0xff]   ;;  %v20297_v49 = vld [vmem:[#allocation15 + $0xe4] ss:$16 sps:$4 sm:$0xff]  }
 0x8e5   :  { %v20303_v58 = vld [vmem:[#allocation15 + $0xc4] ss:$16 sps:$4 sm:$0xff]   ;;  %15032 = vmatprep.subr.bf16.mxu0 %v20297_v49  ;;  %v20319_v30 = vld [vmem:[#allocation15 + $0x60] ss:$16 sps:$4 sm:$0xff]   ;;  %v20364_v49 = vld [vmem:[#allocation15 + $0x188] ss:$16 sps:$4 sm:$0xff]  }
 0x8e6   :  { %v20309_v18 = vld [vmem:[#allocation15 + $0xa4] ss:$16 sps:$4 sm:$0xff]   ;;  %v20325_v36 = vld [vmem:[#allocation15 + $0x40] ss:$16 sps:$4 sm:$0xff]  }
 0x8e7   :  { %14584 = vmatpush1.bf16.msra.mxu1 %v20274_v1  ;;  %v20327_v52 = vld [vmem:[#allocation15 + $0x44] ss:$16 sps:$4 sm:$0xff]  }
 0x8e8   :  { %14585 = vmatprep.subr.bf16.mxu1 %v20279_v34  ;;  %v20333_v1 = vld [vmem:[#allocation15 + $0x24] ss:$16 sps:$4 sm:$0xff]   ;;  %v20331_v34 = vld [vmem:[#allocation15 + $0x20] ss:$16 sps:$4 sm:$0xff]  }
 0x8eb   :  { %14586 = vmatpush1.bf16.msra.mxu1 %v20277_v63  ;;  %v20339_v63 = vld [vmem:[#allocation15 + $0x4] ss:$16 sps:$4 sm:$0xff]  }
 0x8ec   :  { %14587 = vmatprep.subr.bf16.mxu1 %v20282_v9  ;;  %v20337_v9 = vld [vmem:[#allocation15] ss:$16 sps:$4 sm:$0xff]  }
 0x8ef   :  { %14588 = vmatpush1.bf16.msra.mxu1 %v20280_v21  ;;  %v20345_v21 = vld [vmem:[#allocation15 + $0x1e4] ss:$16 sps:$4 sm:$0xff]  }
 0x8f0   :  { %14589 = vmatprep.subr.bf16.mxu1 %v20285_v29  ;;  %v20343_v29 = vld [vmem:[#allocation15 + $0x1e0] ss:$16 sps:$4 sm:$0xff]  }
 0x8f3   :  { %14590 = vmatpush1.bf16.msra.mxu1 %v20283_v6  ;;  %v20351_v6 = vld [vmem:[#allocation15 + $0x1c4] ss:$16 sps:$4 sm:$0xff]  }
 0x8f4   :  { %14591 = vmatprep.subr.bf16.mxu1 %v20288_v46  ;;  %v20349_v46 = vld [vmem:[#allocation15 + $0x1c0] ss:$16 sps:$4 sm:$0xff]  }
 0x8f7   :  { %14592 = vmatpush1.bf16.msra.mxu1 %v20286_v61  ;;  %v20357_v61 = vld [vmem:[#allocation15 + $0x1a4] ss:$16 sps:$4 sm:$0xff]  }
 0x8f8   :  { %14593 = vmatprep.subr.bf16.mxu1 %v20291_v25  ;;  %v20354_v25 = vld [vmem:[#allocation15 + $0x1cc] ss:$16 sps:$4 sm:$0xff]  }
 0x8fb   :  { %14594 = vmatpush1.bf16.msra.mxu1 %v20289_v42  ;;  %v20352_v42 = vld [vmem:[#allocation15 + $0x1c8] ss:$16 sps:$4 sm:$0xff]  }
 0x8fc   :  { %14595 = vmatprep.subr.bf16.mxu1 %v20294_v33  ;;  %v20360_v33 = vld [vmem:[#allocation15 + $0x1ac] ss:$16 sps:$4 sm:$0xff]  }
 0x91c   :  { %v14183_v20 = vpop.f32.mrf.mxu0 }
 0x91d   :  { %v14142_v17 = vpop.f32.mrf.mxu1 }
 0x91e   :  { %v14184_v54 = vadd.f32 %v14183_v20, %v14142_v17  ;;  %v14185_v11 = vpop.f32.mrf.mxu0  ;;  %v20355_v20 = vld [vmem:[#allocation15 + $0x1a0] ss:$16 sps:$4 sm:$0xff]   ;;  %v20363_v17 = vld [vmem:[#allocation15 + $0x184] ss:$16 sps:$4 sm:$0xff]  }
 0x91f   :  { %v14144_v22 = vpop.f32.mrf.mxu1 }
 0x920   :  { %v14187_v10 = vpop.f32.mrf.mxu0  ;;  %v14186_v44 = vadd.f32 %v14185_v11, %v14144_v22  ;;  %v20369_v11 = vld [vmem:[#allocation15 + $0x164] ss:$16 sps:$4 sm:$0xff]   ;;  %v20367_v22 = vld [vmem:[#allocation15 + $0x160] ss:$16 sps:$4 sm:$0xff]  }
 0x921   :  { %v14146_v26 = vpop.f32.mrf.mxu1  ;;  %v20375_v10 = vld [vmem:[#allocation15 + $0x144] ss:$16 sps:$4 sm:$0xff]  }
 0x922   :  { %v14188_v15 = vpop.f32.mrf.mxu0  ;;  %v20373_v26 = vld [vmem:[#allocation15 + $0x140] ss:$16 sps:$4 sm:$0xff]  }
 0x923   :  { %v14147_v14 = vpop.f32.mrf.mxu1 }
 0x924   :  { %v17861_v14 = vld [vmem:[#allocation10] ss:$0 sm:$0xff] }
 0x93c   :  { %v14265_v60 = vpop.f32.mrf.mxu0 }
 0x93e   :  { %v14267_v57 = vpop.f32.mrf.mxu0 }
 0x940   :  { %v14269_v59 = vpop.f32.mrf.mxu0 }
 0x942   :  { %v14270_v38 = vpop.f32.mrf.mxu0 }
 0x95d   :  { %v14224_v5 = vpop.f32.mrf.mxu1 }
 0x95e   :  { %v14225_v47 = vadd.f32 %v14224_v5, %v14184_v54  ;;  %v20361_v54 = vld [vmem:[#allocation15 + $0x180] ss:$16 sps:$4 sm:$0xff]  }
 0x95f   :  { %v14226_v39 = vpop.f32.mrf.mxu1 }
 0x960   :  { %v14266_v23 = vadd.f32 %v14265_v60, %v14225_v47  ;;  %v14227_v48 = vadd.f32 %v14226_v39, %v14186_v44  ;;  %v20298_v44 = vld [vmem:[#allocation15 + $0xe8] ss:$16 sps:$4 sm:$0xff]   ;;  %v20306_v39 = vld [vmem:[#allocation15 + $0xcc] ss:$16 sps:$4 sm:$0xff]  }
 0x961   :  { %v14228_v0 = vpop.f32.mrf.mxu1 }
 0x962   :  { %v14276_v62 = vmax.f32 %v21701_v56, %v14266_v23  ;;  %v14268_v13 = vadd.f32 %v14267_v57, %v14227_v48  ;;  %v20292_v56 = vld [vmem:[#allocation12] ss:$8 sps:$4 sm:$0xff]  }
 0x963   :  { %v14229_v12 = vpop.f32.mrf.mxu1  ;;  %14596 = vmatpush1.bf16.msra.mxu1 %v20292_v56  ;;  %v20304_v23 = vld [vmem:[#allocation15 + $0xc8] ss:$16 sps:$4 sm:$0xff]   ;;  %v20318_v0 = vld [vmem:[#allocation15 + $0x8c] ss:$16 sps:$4 sm:$0xff]  }
 0x964   :  { %v14290_v24 = vadd.f32 %v14283_v2, %v14276_v62  ;;  %v14277_v8 = vmax.f32 %v21706_v35, %v14268_v13  ;;  %15073 = vmatprep.subr.bf16.mxu1 %v20300_v28  ;;  %v20301_v35 = vld [vmem:[#allocation15 + $0xc0] ss:$16 sps:$4 sm:$0xff]   ;;  %v20312_v2 = vld [vmem:[#allocation15 + $0xac] ss:$16 sps:$4 sm:$0xff]   ;;  %v20310_v48 = vld [vmem:[#allocation15 + $0xa8] ss:$16 sps:$4 sm:$0xff]  }
 0x965   :  { %v20316_v62 = vld [vmem:[#allocation15 + $0x88] ss:$16 sps:$4 sm:$0xff]   ;;  %v20324_v13 = vld [vmem:[#allocation15 + $0x6c] ss:$16 sps:$4 sm:$0xff]  }
 0x966   :  { %v14291_v43 = vadd.f32 %v14287_v37, %v14277_v8  ;;  %v14292_v4 = vmax.f32 %v14290_v24, 0.0  ;;  %v20322_v37 = vld [vmem:[#allocation15 + $0x68] ss:$16 sps:$4 sm:$0xff]   ;;  %v20330_v12 = vld [vmem:[#allocation15 + $0x4c] ss:$16 sps:$4 sm:$0xff]  }
 0x967   :  { %v20328_v24 = vld [vmem:[#allocation15 + $0x48] ss:$16 sps:$4 sm:$0xff]   ;;  %v20336_v8 = vld [vmem:[#allocation15 + $0x2c] ss:$16 sps:$4 sm:$0xff]  }
 0x968   :  { %v14293_v55 = vmax.f32 %v14291_v43, 0.0  ;;  %v14327_v45 = vpack.c.bf16 %v14292_v4, %v14292_v4  ;;  %v20334_v43 = vld [vmem:[#allocation15 + $0x28] ss:$16 sps:$4 sm:$0xff]   ;;  %v20342_v4 = vld [vmem:[#allocation15 + $0xc] ss:$16 sps:$4 sm:$0xff]  }
 0x969   :  { %v20358_v56 = vld [vmem:[#allocation15 + $0x1a8] ss:$16 sps:$4 sm:$0xff]   ;;  %v20372_v28 = vld [vmem:[#allocation15 + $0x16c] ss:$16 sps:$4 sm:$0xff]  }
 0x96a   :  { %v14328_v40 = vpack.c.bf16 %v14293_v55, %v14293_v55  ;;  %v20340_v55 = vld [vmem:[#allocation15 + $0x8] ss:$16 sps:$4 sm:$0xff]  }
 0x96c   :  { %14463 = vmatprep.mubr.bf16.mxu0 %v14328_v40  ;;  %v20348_v40 = vld [vmem:[#allocation15 + $0x1ec] ss:$16 sps:$4 sm:$0xff]  }
 0x96d   :  { %14464 = vmatmul.mubr.bf16.vlgmr.msra.gmra.mxu0 %v14327_v45  ;;  %v20346_v45 = vld [vmem:[#allocation15 + $0x1e8] ss:$16 sps:$4 sm:$0xff]  }
 0x96e   :  { %15033 = vmatpush1.bf16.msra.mxu0 %v20295_v51  ;;  %v20366_v51 = vld [vmem:[#allocation15 + $0x18c] ss:$16 sps:$4 sm:$0xff]  }
 0x96f   :  { %15034 = vmatprep.subr.bf16.mxu0 %v20303_v58  ;;  %v20370_v58 = vld [vmem:[#allocation15 + $0x168] ss:$16 sps:$4 sm:$0xff]  }
 0x972   :  { %15035 = vmatpush1.bf16.msra.mxu0 %v20301_v35  ;;  %v20378_v35 = vld [vmem:[#allocation15 + $0x14c] ss:$16 sps:$4 sm:$0xff]  }
 0x973   :  { %15036 = vmatprep.subr.bf16.mxu0 %v20309_v18  ;;  %v20376_v18 = vld [vmem:[#allocation15 + $0x148] ss:$16 sps:$4 sm:$0xff]  }
 0x976   :  { %15037 = vmatpush1.bf16.msra.mxu0 %v20307_v32  ;;  %v20381_v32 = vld [vmem:[#allocation15 + $0x124] ss:$16 sps:$4 sm:$0xff]  }
 0x977   :  { %15038 = vmatprep.subr.bf16.mxu0 %v20315_v7  ;;  %v20384_v7 = vld [vmem:[#allocation15 + $0x12c] ss:$16 sps:$4 sm:$0xff]  }
 0x97a   :  { %15039 = vmatpush1.bf16.msra.mxu0 %v20313_v50  ;;  %v20379_v50 = vld [vmem:[#allocation15 + $0x120] ss:$16 sps:$4 sm:$0xff]  }
 0x97b   :  { %15040 = vmatprep.subr.bf16.mxu0 %v20321_v19  ;;  %v20382_v19 = vld [vmem:[#allocation15 + $0x128] ss:$16 sps:$4 sm:$0xff]  }
 0x97e   :  { %15041 = vmatpush1.bf16.msra.mxu0 %v20319_v30  ;;  %v20387_v30 = vld [vmem:[#allocation15 + $0x104] ss:$16 sps:$4 sm:$0xff]  }
 0x97f   :  { %15042 = vmatprep.subr.bf16.mxu0 %v20327_v52  ;;  %v20390_v52 = vld [vmem:[#allocation15 + $0x10c] ss:$16 sps:$4 sm:$0xff]  }
 0x982   :  { %15043 = vmatpush1.bf16.msra.mxu0 %v20325_v36  ;;  %v20385_v36 = vld [vmem:[#allocation15 + $0x100] ss:$16 sps:$4 sm:$0xff]  }
 0x983   :  { %15044 = vmatprep.subr.bf16.mxu0 %v20333_v1  ;;  %v20388_v1 = vld [vmem:[#allocation15 + $0x108] ss:$16 sps:$4 sm:$0xff]  }
 0x986   :  { %15045 = vmatpush1.bf16.msra.mxu0 %v20331_v34  ;;  %v20393_v34 = vld [vmem:[#allocation18 + $0x74] ss:$8 sps:$4 sm:$0xff]  }
 0x987   :  { %15046 = vmatprep.subr.bf16.mxu0 %v20339_v63  ;;  %v20396_v63 = vld [vmem:[#allocation18 + $0x174] ss:$8 sps:$4 sm:$0xff]  }
 0x98a   :  { %15047 = vmatpush1.bf16.msra.mxu0 %v20337_v9  ;;  %v14488_v9 = vld [vmem:[#allocation13] sm:$0x3] }
 0x98b   :  { %15048 = vmatprep.subr.bf16.mxu0 %v20345_v21  ;;  %v14494_v21 = vrot.slane %v14488_v9, %v21542_v41 }
 0x98e   :  { %15049 = vmatpush2.bf16.msra.mxu0 %v20343_v29  ;;  %v14498_v29 = vrot.slane %v14488_v9, %v21523_v3  ;;  %v20465_v9 = vld [vmem:[#allocation18 + $0xb4] ss:$8 sps:$4 sm:$0xff]  }
 0x98f   :  { %15050 = vmatprep.subr.bf16.mxu0 %v20351_v6 }
 0x992   :  { %15051 = vmatpush2.bf16.msra.mxu0 %v20349_v46 }
 0x993   :  { %15052 = vmatprep.subr.bf16.mxu0 %v20357_v61 }
 0x996   :  { %15053 = vmatpush2.bf16.msra.mxu0 %v20355_v20 }
 0x997   :  { %15054 = vmatprep.subr.bf16.mxu0 %v20363_v17 }
 0x99a   :  { %15055 = vmatpush2.bf16.msra.mxu0 %v20361_v54 }
 0x99b   :  { %15056 = vmatprep.subr.bf16.mxu0 %v20369_v11 }
 0x99e   :  { %15057 = vmatpush2.bf16.msra.mxu0 %v20367_v22 }
 0x99f   :  { %15058 = vmatprep.subr.bf16.mxu0 %v20375_v10 }
 0x9a2   :  { %15059 = vmatpush2.bf16.msra.mxu0 %v20373_v26  ;;  %v20391_v26 = vld [vmem:[#allocation18 + $0x70] ss:$8 sps:$4 sm:$0xff]  }
 0x9a3   :  { %15060 = vmatprep.subr.bf16.mxu0 %v20381_v32  ;;  %v20445_v32 = vld [vmem:[#allocation18 + $0xe0] ss:$8 sps:$4 sm:$0xff]  }
 0x9a6   :  { %15061 = vmatpush2.bf16.msra.mxu0 %v20379_v50  ;;  %v20453_v50 = vld [vmem:[#allocation18 + $0xd4] ss:$8 sps:$4 sm:$0xff]  }
 0x9a7   :  { %15062 = vmatprep.subr.bf16.mxu0 %v20387_v30  ;;  %v20451_v30 = vld [vmem:[#allocation18 + $0xd0] ss:$8 sps:$4 sm:$0xff]  }
 0x9aa   :  { %15063 = vmatpush2.bf16.msra.mxu0 %v20385_v36  ;;  %v20459_v36 = vld [vmem:[#allocation18 + $0xc4] ss:$8 sps:$4 sm:$0xff]  }
 0x9ab   :  { %15518 = vmatprep.subr.bf16.mxu0 %v20393_v34  ;;  %v20457_v34 = vld [vmem:[#allocation18 + $0xc0] ss:$8 sps:$4 sm:$0xff]  }
 0xa2d   :  { %v18073_v15 = vpop.f32.mrf.mxu0 }
 0xa2f   :  { %v18074_v60 = vpop.f32.mrf.mxu0 }
 0xa30   :  { %v18075_v57 = vadd.f32 %v18074_v60, %v18073_v15  ;;  %v20394_v15 = vld [vmem:[#allocation18 + $0x170] ss:$8 sps:$4 sm:$0xff]   ;;  %v20399_v60 = vld [vmem:[#allocation18 + $0x64] ss:$8 sps:$4 sm:$0xff]  }
 0xa31   :  { %v18076_v59 = vpop.f32.mrf.mxu0 }
 0xa32   :  { %v14466_v38 = vadd.f32 %v18075_v57, %v17861_v14  ;;  %v20402_v57 = vld [vmem:[#allocation18 + $0x164] ss:$8 sps:$4 sm:$0xff]   ;;  %v20397_v59 = vld [vmem:[#allocation18 + $0x60] ss:$8 sps:$4 sm:$0xff]  }
 0xa33   :  { %v18077_v5 = vpop.f32.mrf.mxu0 }
 0xa34   :  { %v14471_v16 = vmax.f32 %v14466_v38, 0.0  ;;  %v20400_v38 = vld [vmem:[#allocation18 + $0x160] ss:$8 sps:$4 sm:$0xff]   ;;  %v20405_v5 = vld [vmem:[#allocation18 + $0x54] ss:$8 sps:$4 sm:$0xff]  }
 0xa36   :  { %v14489_v47 = vpack.c.bf16 %v14471_v16, %v14471_v16  ;;  %v20408_v16 = vld [vmem:[#allocation18 + $0x154] ss:$8 sps:$4 sm:$0xff]  }
 0xa38   :  { %14614 = vmatmul.mubr.bf16.vlgmr.msra.gmra.mxu1 %v14489_v47  ;;  %v20406_v47 = vld [vmem:[#allocation18 + $0x150] ss:$8 sps:$4 sm:$0xff]  }
 0xa39   :  { %15074 = vmatpush1.bf16.msra.mxu1 %v20298_v44  ;;  %v20403_v44 = vld [vmem:[#allocation18 + $0x50] ss:$8 sps:$4 sm:$0xff]  }
 0xa3a   :  { %15075 = vmatprep.subr.bf16.mxu1 %v20306_v39  ;;  %v20411_v39 = vld [vmem:[#allocation18 + $0x44] ss:$8 sps:$4 sm:$0xff]  }
 0xa3d   :  { %15076 = vmatpush1.bf16.msra.mxu1 %v20304_v23  ;;  %v20414_v23 = vld [vmem:[#allocation18 + $0x144] ss:$8 sps:$4 sm:$0xff]  }
 0xa3e   :  { %15077 = vmatprep.subr.bf16.mxu1 %v20312_v2  ;;  %v20409_v2 = vld [vmem:[#allocation18 + $0x40] ss:$8 sps:$4 sm:$0xff]  }
 0xa41   :  { %15078 = vmatpush1.bf16.msra.mxu1 %v20310_v48  ;;  %v20412_v48 = vld [vmem:[#allocation18 + $0x140] ss:$8 sps:$4 sm:$0xff]  }
 0xa42   :  { %15079 = vmatprep.subr.bf16.mxu1 %v20318_v0  ;;  %v20417_v0 = vld [vmem:[#allocation18 + $0x34] ss:$8 sps:$4 sm:$0xff]  }
 0xa45   :  { %15080 = vmatpush1.bf16.msra.mxu1 %v20316_v62  ;;  %v20420_v62 = vld [vmem:[#allocation18 + $0x134] ss:$8 sps:$4 sm:$0xff]  }
 0xa46   :  { %15081 = vmatprep.subr.bf16.mxu1 %v20324_v13  ;;  %v20415_v13 = vld [vmem:[#allocation18 + $0x30] ss:$8 sps:$4 sm:$0xff]  }
 0xa49   :  { %15082 = vmatpush1.bf16.msra.mxu1 %v20322_v37  ;;  %v20418_v37 = vld [vmem:[#allocation18 + $0x130] ss:$8 sps:$4 sm:$0xff]  }
 0xa4a   :  { %15083 = vmatprep.subr.bf16.mxu1 %v20330_v12  ;;  %v20423_v12 = vld [vmem:[#allocation18 + $0x24] ss:$8 sps:$4 sm:$0xff]  }
 0xa4d   :  { %15084 = vmatpush1.bf16.msra.mxu1 %v20328_v24  ;;  %v20426_v24 = vld [vmem:[#allocation18 + $0x124] ss:$8 sps:$4 sm:$0xff]  }
 0xa4e   :  { %15085 = vmatprep.subr.bf16.mxu1 %v20336_v8  ;;  %v20421_v8 = vld [vmem:[#allocation18 + $0x20] ss:$8 sps:$4 sm:$0xff]  }
 0xa51   :  { %15086 = vmatpush1.bf16.msra.mxu1 %v20334_v43  ;;  %v20424_v43 = vld [vmem:[#allocation18 + $0x120] ss:$8 sps:$4 sm:$0xff]  }
 0xa52   :  { %15087 = vmatprep.subr.bf16.mxu1 %v20342_v4  ;;  %v20429_v4 = vld [vmem:[#allocation18 + $0x14] ss:$8 sps:$4 sm:$0xff]  }
 0xa55   :  { %15088 = vmatpush1.bf16.msra.mxu1 %v20340_v55  ;;  %v20432_v55 = vld [vmem:[#allocation18 + $0x114] ss:$8 sps:$4 sm:$0xff]  }
 0xa56   :  { %15089 = vmatprep.subr.bf16.mxu1 %v20348_v40  ;;  %v20427_v40 = vld [vmem:[#allocation18 + $0x10] ss:$8 sps:$4 sm:$0xff]  }
 0xa59   :  { %15090 = vmatpush2.bf16.msra.mxu1 %v20346_v45  ;;  %v20430_v45 = vld [vmem:[#allocation18 + $0x110] ss:$8 sps:$4 sm:$0xff]  }
 0xa5a   :  { %15091 = vmatprep.subr.bf16.mxu1 %v20354_v25  ;;  %v20435_v25 = vld [vmem:[#allocation18 + $0x4] ss:$8 sps:$4 sm:$0xff]  }
 0xa5d   :  { %15092 = vmatpush2.bf16.msra.mxu1 %v20352_v42  ;;  %v20438_v42 = vld [vmem:[#allocation18 + $0x104] ss:$8 sps:$4 sm:$0xff]  }
 0xa5e   :  { %15093 = vmatprep.subr.bf16.mxu1 %v20360_v33  ;;  %v20433_v33 = vld [vmem:[#allocation18] ss:$8 sps:$4 sm:$0xff]  }
 0xa61   :  { %15094 = vmatpush2.bf16.msra.mxu1 %v20358_v56  ;;  %v20436_v56 = vld [vmem:[#allocation18 + $0x100] ss:$8 sps:$4 sm:$0xff]  }
 0xa62   :  { %15095 = vmatprep.subr.bf16.mxu1 %v20366_v51  ;;  %v20441_v51 = vld [vmem:[#allocation18 + $0xf4] ss:$8 sps:$4 sm:$0xff]  }
 0xa65   :  { %15096 = vmatpush2.bf16.msra.mxu1 %v20364_v49  ;;  %v20444_v49 = vld [vmem:[#allocation18 + $0x1f4] ss:$8 sps:$4 sm:$0xff]  }
 0xa66   :  { %15097 = vmatprep.subr.bf16.mxu1 %v20372_v28  ;;  %v20439_v28 = vld [vmem:[#allocation18 + $0xf0] ss:$8 sps:$4 sm:$0xff]  }
 0xa69   :  { %15098 = vmatpush2.bf16.msra.mxu1 %v20370_v58  ;;  %v20442_v58 = vld [vmem:[#allocation18 + $0x1f0] ss:$8 sps:$4 sm:$0xff]  }
 0xa6a   :  { %15099 = vmatprep.subr.bf16.mxu1 %v20378_v35  ;;  %v20447_v35 = vld [vmem:[#allocation18 + $0xe4] ss:$8 sps:$4 sm:$0xff]  }
 0xa6d   :  { %15100 = vmatpush2.bf16.msra.mxu1 %v20376_v18  ;;  %v20450_v18 = vld [vmem:[#allocation18 + $0x1e4] ss:$8 sps:$4 sm:$0xff]  }
 0xa6e   :  { %15101 = vmatprep.subr.bf16.mxu1 %v20384_v7  ;;  %v20448_v7 = vld [vmem:[#allocation18 + $0x1e0] ss:$8 sps:$4 sm:$0xff]  }
 0xa71   :  { %15102 = vmatpush2.bf16.msra.mxu1 %v20382_v19  ;;  %v20456_v19 = vld [vmem:[#allocation18 + $0x1d4] ss:$8 sps:$4 sm:$0xff]  }
 0xa72   :  { %15103 = vmatprep.subr.bf16.mxu1 %v20390_v52  ;;  %v20454_v52 = vld [vmem:[#allocation18 + $0x1d0] ss:$8 sps:$4 sm:$0xff]  }
 0xa75   :  { %15104 = vmatpush2.bf16.msra.mxu1 %v20388_v1  ;;  %v20462_v1 = vld [vmem:[#allocation18 + $0x1c4] ss:$8 sps:$4 sm:$0xff]  }
 0xa76   :  { %15559 = vmatprep.subr.bf16.mxu1 %v20396_v63  ;;  %v20460_v63 = vld [vmem:[#allocation18 + $0x1c0] ss:$8 sps:$4 sm:$0xff]  }
 0xaf8   :  { %v14615_v6 = vpop.f32.mrf.mxu1 }
 0xaf9   :  { %v14616_v46 = vadd.f32 %v14615_v6, %v14494_v21  ;;  %v20468_v21 = vld [vmem:[#allocation18 + $0x1b4] ss:$8 sps:$4 sm:$0xff]   ;;  %v20466_v6 = vld [vmem:[#allocation18 + $0x1b0] ss:$8 sps:$4 sm:$0xff]  }
 0xafa   :  { %v14617_v61 = vpop.f32.mrf.mxu1 }
 0xafb   :  { %v14618_v20 = vadd.f32 %v14617_v61, %v14498_v29  ;;  %v14622_v17 = vmax.f32 %v14616_v46, 0.0  ;;  %v20463_v29 = vld [vmem:[#allocation18 + $0xb0] ss:$8 sps:$4 sm:$0xff]   ;;  %v20471_v46 = vld [vmem:[#allocation18 + $0xa4] ss:$8 sps:$4 sm:$0xff]  }
 0xafc   :  { %v14619_v54 = vpop.f32.mrf.mxu1  ;;  %v20474_v61 = vld [vmem:[#allocation18 + $0x1a4] ss:$8 sps:$4 sm:$0xff]  }
 0xafd   :  { %v14623_v11 = vmax.f32 %v14618_v20, 0.0  ;;  %v14689_v14 = vpack.c.bf16 %v14622_v17, %v14622_v17  ;;  %v20469_v20 = vld [vmem:[#allocation18 + $0xa0] ss:$8 sps:$4 sm:$0xff]   ;;  %v20477_v54 = vld [vmem:[#allocation18 + $0x94] ss:$8 sps:$4 sm:$0xff]  }
 0xafe   :  { %v14620_v22 = vpop.f32.mrf.mxu1  ;;  %v20472_v17 = vld [vmem:[#allocation18 + $0x1a0] ss:$8 sps:$4 sm:$0xff]  }
 0xaff   :  { %v14690_v10 = vpack.c.bf16 %v14623_v11, %v14623_v11  ;;  %v20480_v11 = vld [vmem:[#allocation18 + $0x194] ss:$8 sps:$4 sm:$0xff]   ;;  %v20475_v22 = vld [vmem:[#allocation18 + $0x90] ss:$8 sps:$4 sm:$0xff]  }
 0xb01   :  { %15064 = vmatprep.mubr.bf16.mxu0 %v14690_v10  ;;  %15105 = vmatprep.mubr.bf16.mxu1 %v14690_v10  ;;  %v20478_v10 = vld [vmem:[#allocation18 + $0x190] ss:$8 sps:$4 sm:$0xff]  }
 0xb02   :  { %15065 = vmatmul.mubr.bf16.vlgmr.msra.gmra.mxu0 %v14689_v14  ;;  %15106 = vmatmul.mubr.bf16.vlgmr.msra.gmra.mxu1 %v14689_v14  ;;  %v20481_v14 = vld [vmem:[#allocation18 + $0x80] ss:$8 sps:$4 sm:$0xff]  }
 0xb03   :  { %15519 = vmatpush1.bf16.msra.mxu0 %v20391_v26  ;;  %15560 = vmatpush1.bf16.msra.mxu1 %v20394_v15  ;;  %v20483_v26 = vld [vmem:[#allocation18 + $0x84] ss:$8 sps:$4 sm:$0xff]  }
 0xb04   :  { %15520 = vmatprep.subr.bf16.mxu0 %v20399_v60  ;;  %15561 = vmatprep.subr.bf16.mxu1 %v20402_v57  ;;  %v20486_v15 = vld [vmem:[#allocation18 + $0x184] ss:$8 sps:$4 sm:$0xff]   ;;  %v20484_v60 = vld [vmem:[#allocation18 + $0x180] ss:$8 sps:$4 sm:$0xff]  }
 0xb05   :  { %v20487_v57 = vld [vmem:[#allocation21 + $0x78] sm:$0xff]  }
 0xb07   :  { %15521 = vmatpush1.bf16.msra.mxu0 %v20397_v59  ;;  %15562 = vmatpush1.bf16.msra.mxu1 %v20400_v38  ;;  %v14688_v59 = vld [vmem:[#allocation16] sm:$0xf] }
 0xb08   :  { %15522 = vmatprep.subr.bf16.mxu0 %v20405_v5  ;;  %15563 = vmatprep.subr.bf16.mxu1 %v20408_v16  ;;  %v14695_v38 = vrot.slane %v14688_v59, %v21542_v41  ;;  %v14703_v5 = vrot.slane %v14688_v59, %v10882_v31  ;;  %v14699_v16 = vrot.slane %v14688_v59, %v21523_v3 }
 0xb0b   :  { %15523 = vmatpush1.bf16.msra.mxu0 %v20403_v44  ;;  %15564 = vmatpush1.bf16.msra.mxu1 %v20406_v47  ;;  %v14707_v44 = vrot.slane %v14688_v59, %v10886_v53 }
 0xb0c   :  { %15524 = vmatprep.subr.bf16.mxu0 %v20411_v39  ;;  %15565 = vmatprep.subr.bf16.mxu1 %v20414_v23 }
 0xb0f   :  { %15525 = vmatpush1.bf16.msra.mxu0 %v20409_v2  ;;  %15566 = vmatpush1.bf16.msra.mxu1 %v20412_v48 }
 0xb10   :  { %15526 = vmatprep.subr.bf16.mxu0 %v20417_v0  ;;  %15567 = vmatprep.subr.bf16.mxu1 %v20420_v62 }
 0xb13   :  { %15527 = vmatpush1.bf16.msra.mxu0 %v20415_v13  ;;  %15568 = vmatpush1.bf16.msra.mxu1 %v20418_v37 }
 0xb14   :  { %15528 = vmatprep.subr.bf16.mxu0 %v20423_v12  ;;  %15569 = vmatprep.subr.bf16.mxu1 %v20426_v24 }
 0xb17   :  { %15529 = vmatpush1.bf16.msra.mxu0 %v20421_v8  ;;  %15570 = vmatpush1.bf16.msra.mxu1 %v20424_v43 }
 0xb18   :  { %15530 = vmatprep.subr.bf16.mxu0 %v20429_v4  ;;  %15571 = vmatprep.subr.bf16.mxu1 %v20432_v55 }
 0xb1b   :  { %15531 = vmatpush1.bf16.msra.mxu0 %v20427_v40  ;;  %15572 = vmatpush1.bf16.msra.mxu1 %v20430_v45 }
 0xb1c   :  { %15532 = vmatprep.subr.bf16.mxu0 %v20435_v25  ;;  %15573 = vmatprep.subr.bf16.mxu1 %v20438_v42  ;;  %v20489_v42 = vld [vmem:[#allocation21 + $0x70] sm:$0xff]  }
 0xb1f   :  { %15533 = vmatpush1.bf16.msra.mxu0 %v20433_v33  ;;  %15574 = vmatpush1.bf16.msra.mxu1 %v20436_v56  ;;  %v20490_v33 = vld [vmem:[#allocation21 + $0x30] sm:$0xff]   ;;  %v20491_v56 = vld [vmem:[#allocation21 + $0x68] sm:$0xff]  }
 0xb20   :  { %15534 = vmatprep.subr.bf16.mxu0 %v20441_v51  ;;  %15575 = vmatprep.subr.bf16.mxu1 %v20444_v49  ;;  %v20492_v51 = vld [vmem:[#allocation21 + $0x28] sm:$0xff]   ;;  %v20493_v49 = vld [vmem:[#allocation21 + $0x60] sm:$0xff]  }
 0xb23   :  { %15535 = vmatpush2.bf16.msra.mxu0 %v20439_v28  ;;  %15576 = vmatpush2.bf16.msra.mxu1 %v20442_v58  ;;  %v20494_v28 = vld [vmem:[#allocation21 + $0x20] sm:$0xff]   ;;  %v20495_v58 = vld [vmem:[#allocation21 + $0x58] sm:$0xff]  }
 0xb24   :  { %15536 = vmatprep.subr.bf16.mxu0 %v20447_v35  ;;  %15577 = vmatprep.subr.bf16.mxu1 %v20450_v18  ;;  %v20496_v35 = vld [vmem:[#allocation21 + $0x18] sm:$0xff]   ;;  %v20497_v18 = vld [vmem:[#allocation21 + $0x50] sm:$0xff]  }
 0xb27   :  { %15537 = vmatpush2.bf16.msra.mxu0 %v20445_v32  ;;  %15578 = vmatpush2.bf16.msra.mxu1 %v20448_v7  ;;  %v20498_v32 = vld [vmem:[#allocation21 + $0x10] sm:$0xff]   ;;  %v20499_v7 = vld [vmem:[#allocation21 + $0x48] sm:$0xff]  }
 0xb28   :  { %15538 = vmatprep.subr.bf16.mxu0 %v20453_v50  ;;  %15579 = vmatprep.subr.bf16.mxu1 %v20456_v19  ;;  %v20500_v50 = vld [vmem:[#allocation21 + $0x8] sm:$0xff]   ;;  %v20501_v19 = vld [vmem:[#allocation21 + $0x40] sm:$0xff]  }
 0xb2b   :  { %15539 = vmatpush2.bf16.msra.mxu0 %v20451_v30  ;;  %15580 = vmatpush2.bf16.msra.mxu1 %v20454_v52  ;;  %v20502_v30 = vld [vmem:[#allocation21] sm:$0xff]  }
 0xb2c   :  { %15540 = vmatprep.subr.bf16.mxu0 %v20459_v36  ;;  %15581 = vmatprep.subr.bf16.mxu1 %v20462_v1  ;;  %v20503_v52 = vld [vmem:[#allocation24 + $0x38] sm:$0xff]   ;;  %v20934_v36 = vmov 0.0   ;;  %v20504_v1 = vld [vmem:[#allocation24 + $0x30] sm:$0xff]  }
 0xb2f   :  { %15541 = vmatpush2.bf16.msra.mxu0 %v20457_v34  ;;  %15582 = vmatpush2.bf16.msra.mxu1 %v20460_v63  ;;  %v20505_v34 = vld [vmem:[#allocation24 + $0x28] sm:$0xff]   ;;  %v20506_v63 = vld [vmem:[#allocation24 + $0x20] sm:$0xff]  }
 0xb30   :  { %15542 = vmatprep.subr.bf16.mxu0 %v20465_v9  ;;  %15583 = vmatprep.subr.bf16.mxu1 %v20468_v21  ;;  %v20507_v9 = vld [vmem:[#allocation24 + $0x18] sm:$0xff]  }
 0xb31   :  { %v15182_v21 = vld [vmem:[#allocation19] sm:$0x3] }
 0xb33   :  { %15543 = vmatpush2.bf16.msra.mxu0 %v20463_v29  ;;  %15584 = vmatpush2.bf16.msra.mxu1 %v20466_v6  ;;  %v15191_v29 = vrot.slane %v15182_v21, %v21542_v41  ;;  %v15195_v6 = vrot.slane %v15182_v21, %v21523_v3  ;;  %v20508_v41 = vld [vmem:[#allocation24 + $0x10] sm:$0xff]   ;;  %v20509_v3 = vld [vmem:[#allocation24 + $0x8] sm:$0xff]  }
 0xb34   :  { %15544 = vmatprep.subr.bf16.mxu0 %v20471_v46  ;;  %15585 = vmatprep.subr.bf16.mxu1 %v20474_v61 }
 0xb37   :  { %15545 = vmatpush2.bf16.msra.mxu0 %v20469_v20  ;;  %15586 = vmatpush2.bf16.msra.mxu1 %v20472_v17 }
 0xb38   :  { %15546 = vmatprep.subr.bf16.mxu0 %v20477_v54  ;;  %15587 = vmatprep.subr.bf16.mxu1 %v20480_v11 }
 0xb3b   :  { %15547 = vmatpush2.bf16.msra.mxu0 %v20475_v22  ;;  %15588 = vmatpush2.bf16.msra.mxu1 %v20478_v10 }
 0xb3c   :  { %15548 = vmatprep.subr.bf16.mxu0 %v20483_v26  ;;  %15589 = vmatprep.subr.bf16.mxu1 %v20486_v15 }
 0xb3f   :  { %15549 = vmatpush2.bf16.msra.mxu0 %v20481_v14  ;;  %15590 = vmatpush2.bf16.msra.mxu1 %v20484_v60 }
 0xb40   :  { %18079 = vmatprep.subr.bf16.mxu0 %v20487_v57  ;;  %18119 = vmatprep.subr.bf16.mxu1 %v20934_v36 }
 0xbc2   :  { %v15066_v47 = vpop.f32.mrf.mxu0  ;;  %v15107_v39 = vpop.f32.mrf.mxu1 }
 0xbc3   :  { %v15067_v23 = vadd.f32 %v15066_v47, %v14695_v38  ;;  %v15108_v2 = vadd.f32 %v15107_v39, %v14703_v5  ;;  %v20512_v47 = vld [vmem:[#allocation27 + $0x30] sm:$0xff]   ;;  %v20513_v39 = vld [vmem:[#allocation27 + $0x28] sm:$0xff]  }
 0xbc4   :  { %v15068_v48 = vpop.f32.mrf.mxu0  ;;  %v15109_v0 = vpop.f32.mrf.mxu1 }
 0xbc5   :  { %v15069_v62 = vadd.f32 %v15068_v48, %v14699_v16  ;;  %v15110_v13 = vadd.f32 %v15109_v0, %v14707_v44  ;;  %v15114_v37 = vmax.f32 %v15067_v23, 0.0  ;;  %v15116_v12 = vmax.f32 %v15108_v2, 0.0  ;;  %v20510_v16 = vld [vmem:[#allocation24] sm:$0xff]   ;;  %v20516_v48 = vld [vmem:[#allocation27 + $0x10] sm:$0xff]  }
 0xbc6   :  { %v15070_v24 = vpop.f32.mrf.mxu0  ;;  %v15111_v8 = vpop.f32.mrf.mxu1  ;;  %v20511_v44 = vld [vmem:[#allocation27 + $0x38] sm:$0xff]   ;;  %v20514_v23 = vld [vmem:[#allocation27 + $0x20] sm:$0xff]  }
 0xbc7   :  { %v15115_v43 = vmax.f32 %v15069_v62, 0.0  ;;  %v15117_v4 = vmax.f32 %v15110_v13, 0.0  ;;  %v15183_v53 = vpack.c.bf16 %v15114_v37, %v15114_v37  ;;  %v15185_v25 = vpack.c.bf16 %v15116_v12, %v15116_v12  ;;  %v20515_v2 = vld [vmem:[#allocation27 + $0x18] sm:$0xff]  }
 0xbc8   :  { %v15071_v31 = vpop.f32.mrf.mxu0  ;;  %v15112_v55 = vpop.f32.mrf.mxu1  ;;  %v18022_v62 = vld [vmem:[#allocation22] ss:$0 sm:$0xff] }
 0xbc9   :  { %v15184_v40 = vpack.c.bf16 %v15115_v43, %v15115_v43  ;;  %v15186_v45 = vpack.c.bf16 %v15117_v4, %v15117_v4  ;;  %v20517_v31 = vld [vmem:[#allocation27 + $0x8] sm:$0xff]   ;;  %v20518_v55 = vld [vmem:[#allocation27] sm:$0xff]  }
 0xbcb   :  { %15550 = vmatprep.mubr.bf16.mxu0 %v15184_v40  ;;  %15591 = vmatprep.mubr.bf16.mxu1 %v15186_v45  ;;  %v18039_v40 = vld [vmem:[#allocation25] ss:$0 sm:$0xff] }
 0xbcc   :  { %15551 = vmatmul.mubr.bf16.vlgmr.msra.gmra.mxu0 %v15183_v53  ;;  %15592 = vmatmul.mubr.bf16.vlgmr.msra.gmra.mxu1 %v15185_v25 }
 0xbcd   :  { %18080 = vmatpush3.bf16.msra.mxu0 %v20488_v27  ;;  %18120 = vmatpush3.bf16.msra.mxu1 %v20503_v52 }
 0xbce   :  { %18081 = vmatprep.subr.bf16.mxu0 %v20489_v42  ;;  %18121 = vmatprep.subr.bf16.mxu1 %v20934_v36 }
 0xbcf   :  { %18135 = vmatprep.mubr.msk.bf16.mxu1 %vm20935_vm1, %v20934_v36 }
 0xbd1   :  { %18082 = vmatpush3.bf16.msra.mxu0 %v20490_v33  ;;  %18122 = vmatpush3.bf16.msra.mxu1 %v20504_v1 }
 0xbd2   :  { %18083 = vmatprep.subr.bf16.mxu0 %v20491_v56  ;;  %18123 = vmatprep.subr.bf16.mxu1 %v20934_v36 }
 0xbd5   :  { %18084 = vmatpush3.bf16.msra.mxu0 %v20492_v51  ;;  %18124 = vmatpush3.bf16.msra.mxu1 %v20505_v34  ;;  %v18048_v51 = vld [vmem:[#allocation28] ss:$0 sm:$0xff] }
 0xbd6   :  { %18085 = vmatprep.subr.bf16.mxu0 %v20493_v49  ;;  %18125 = vmatprep.subr.bf16.mxu1 %v20934_v36 }
 0xbd9   :  { %18086 = vmatpush3.bf16.msra.mxu0 %v20494_v28  ;;  %18126 = vmatpush3.bf16.msra.mxu1 %v20506_v63 }
 0xbda   :  { %18087 = vmatprep.subr.bf16.mxu0 %v20495_v58  ;;  %18127 = vmatprep.subr.bf16.mxu1 %v20934_v36 }
 0xbdd   :  { %18088 = vmatpush3.bf16.msra.mxu0 %v20496_v35  ;;  %18128 = vmatpush3.bf16.msra.mxu1 %v20507_v9 }
 0xbde   :  { %18089 = vmatprep.subr.bf16.mxu0 %v20497_v18  ;;  %18129 = vmatprep.subr.bf16.mxu1 %v20934_v36 }
 0xbe1   :  { %18090 = vmatpush3.bf16.msra.mxu0 %v20498_v32  ;;  %18130 = vmatpush3.bf16.msra.mxu1 %v20508_v41 }
 0xbe2   :  { %18091 = vmatprep.subr.bf16.mxu0 %v20499_v7  ;;  %18131 = vmatprep.subr.bf16.mxu1 %v20934_v36 }
 0xbe5   :  { %18092 = vmatpush3.bf16.msra.mxu0 %v20500_v50  ;;  %18132 = vmatpush3.bf16.msra.mxu1 %v20509_v3 }
 0xbe6   :  { %18093 = vmatprep.subr.bf16.mxu0 %v20501_v19  ;;  %18133 = vmatprep.subr.bf16.mxu1 %v20934_v36 }
 0xbe9   :  { %18094 = vmatpush3.bf16.msra.mxu0 %v20502_v30  ;;  %18134 = vmatpush3.bf16.msra.mxu1 %v20510_v16 }
 0xbea   :  { %18139 = vmatprep.subr.bf16.mxu0 %v20934_v36 }
 0xc8c   :  { %v15552_v46 = vpop.f32.mrf.mxu0  ;;  %v15593_v61 = vpop.f32.mrf.mxu1 }
 0xc8d   :  { %v15553_v20 = vadd.f32 %v15552_v46, %v15191_v29 }
 0xc8e   :  { %v15554_v17 = vpop.f32.mrf.mxu0  ;;  %v15595_v54 = vpop.f32.mrf.mxu1 }
 0xc8f   :  { %v15594_v11 = vadd.f32 %v15593_v61, %v15553_v20  ;;  %v15555_v22 = vadd.f32 %v15554_v17, %v15195_v6 }
 0xc90   :  { %v15556_v10 = vpop.f32.mrf.mxu0  ;;  %v15597_v26 = vpop.f32.mrf.mxu1 }
 0xc91   :  { %v15596_v15 = vadd.f32 %v15595_v54, %v15555_v22  ;;  %v15600_v14 = vmax.f32 %v15594_v11, 0.0 }
 0xc92   :  { %v15557_v60 = vpop.f32.mrf.mxu0  ;;  %v15598_v57 = vpop.f32.mrf.mxu1 }
 0xc93   :  { %v15601_v59 = vmax.f32 %v15596_v15, 0.0  ;;  %v15635_v5 = vpack.c.bf16 %v15600_v14, %v15600_v14 }
 0xc95   :  { %v15636_v38 = vpack.c.bf16 %v15601_v59, %v15601_v59 }
 0xc97   :  { %15771 = vmatprep.mubr.bf16.mxu0 %v15636_v38 }
 0xc98   :  { %15772 = vmatmul.mubr.bf16.vlgmr.msra.gmra.mxu0 %v15635_v5 }
 0xc99   :  { %18155 = vmatprep.mubr.msk.bf16.mxu0 %vm20935_vm1, %v20934_v36  ;;  %18140 = vmatpush3.bf16.msra.mxu0 %v20511_v44 }
 0xc9a   :  { %18141 = vmatprep.subr.bf16.mxu0 %v20934_v36 }
 0xc9d   :  { %18142 = vmatpush3.bf16.msra.mxu0 %v20512_v47 }
 0xc9e   :  { %18143 = vmatprep.subr.bf16.mxu0 %v20934_v36 }
 0xca1   :  { %18144 = vmatpush3.bf16.msra.mxu0 %v20513_v39 }
 0xca2   :  { %18145 = vmatprep.subr.bf16.mxu0 %v20934_v36 }
 0xca5   :  { %18146 = vmatpush3.bf16.msra.mxu0 %v20514_v23 }
 0xca6   :  { %18147 = vmatprep.subr.bf16.mxu0 %v20934_v36 }
 0xca9   :  { %18148 = vmatpush3.bf16.msra.mxu0 %v20515_v2 }
 0xcaa   :  { %18149 = vmatprep.subr.bf16.mxu0 %v20934_v36 }
 0xcad   :  { %18150 = vmatpush3.bf16.msra.mxu0 %v20516_v48 }
 0xcae   :  { %18151 = vmatprep.subr.bf16.mxu0 %v20934_v36 }
 0xcb1   :  { %18152 = vmatpush3.bf16.msra.mxu0 %v20517_v31 }
 0xcb2   :  { %18153 = vmatprep.subr.bf16.mxu0 %v20934_v36 }
 0xcb5   :  { %18154 = vmatpush3.bf16.msra.mxu0 %v20518_v55 }
 0xd58   :  { %v18095_v0 = vpop.f32.mrf.mxu0 }
 0xd5a   :  { %v18096_v13 = vpop.f32.mrf.mxu0 }
 0xd5b   :  { %v18097_v37 = vadd.f32 %v18096_v13, %v18095_v0 }
 0xd5c   :  { %v18098_v12 = vpop.f32.mrf.mxu0 }
 0xd5d   :  { %v15774_v24 = vadd.f32 %v18097_v37, %v18022_v62 }
 0xd5e   :  { %v18099_v8 = vpop.f32.mrf.mxu0 }
 0xd5f   :  { %v15779_v43 = vmax.f32 %v15774_v24, 0.0 }
 0xd61   :  { %v15797_v4 = vpack.c.bf16 %v15779_v43, %v15779_v43 }
 0xd63   :  { %18136 = vmatmul.mubr.bf16.vlgmr.msra.gmra.mxu1 %v15797_v4 }
 0xe23   :  { %v15886_v45 = vpop.f32.mrf.mxu1 }
 0xe24   :  { %v15887_v27 = vadd.f32 %v18039_v40, %v15886_v45 }
 0xe25   :  { %v18137_v53 = vpop.f32.mrf.mxu1 }
 0xe26   :  { %v15892_v25 = vmax.f32 %v15887_v27, 0.0 }
 0xe27   :  { %v15889_v42 = vpop.f32.mrf.mxu1 }
 0xe28   :  { %v15910_v33 = vpack.c.bf16 %v15892_v25, %v15892_v25 }
 0xe29   :  { %v18138_v56 = vpop.f32.mrf.mxu1 }
 0xe2a   :  { %18156 = vmatmul.mubr.bf16.vlgmr.msra.gmra.mxu0 %v15910_v33 }
 0xeea   :  { %v15999_v49 = vpop.f32.mrf.mxu0 }
 0xeeb   :  { %v16000_v28 = vadd.f32 %v18048_v51, %v15999_v49 }
 0xeec   :  { %v18157_v58 = vpop.f32.mrf.mxu0 }
 0xeed   :  { %16005 = vst [vmem:[%s21762_s19] sm:$0xff] %v16000_v28 }
 0xeee   :  { %v16002_v35 = vpop.f32.mrf.mxu0 }
 0xef0   :  { %v18158_v18 = vpop.f32.mrf.mxu0 }
 0xef1   :  { %16010 = vsyncpa [#allocation3], 1 }
 0xef2   :  { %16011 = vsyncpa [#allocation5], 1 }
 0xef3   :  { %16012 = vsyncpa [#allocation8], 1 }
 0xef4   :  { %16013 = vsyncpa [#allocation11], 1 }
 0xef5   :  { %16014 = vsyncpa [#allocation14], 1 }
 0xef6   :  { %16015 = vsyncpa [#allocation17], 1 }
 0xef7   :  { %16016 = vsyncpa [#allocation20], 1 }
 0xef8   :  { %16017 = vsyncpa [#allocation23], 1 }
 0xef9   :  { %16018 = vsyncpa [#allocation26], 1 }
 0xefa   :  { %16019 = vsyncpa [#allocation29], 1 }

</bundles_post_ra>
